<compile_context>
chip_gen: v6e
topology: v6e:2x2x1
jax: 0.10.0
libtpu: 0.0.40
codegen_flags: <defaults>
</compile_context>

<pallas_src>
import functools

import jax
import jax.numpy as jnp
from jax.experimental import pallas as pl
from jax.experimental.pallas import tpu as pltpu

EXPANSION = 4
EPS = 1e-5
LANE = 128
HALO_OFF = 8  # sublane-aligned offset of the conv2 interior inside the halo scratch


# ------------------------------ small helpers ------------------------------ #

def _round_up(x, n):
    return (x + n - 1) // n * n


def _row_tile(m):
    """Largest row tile (<=512) that divides m, else m (full block)."""
    for t in (512, 256, 128, 64, 32, 16, 8):
        if m % t == 0:
            return t
    return m  # TODO(synk): pad M to a tile multiple to avoid this perf cliff.


def _pad2(a, rows, cols):
    return jnp.pad(a, ((0, rows - a.shape[0]), (0, cols - a.shape[1])))


def _pad_vec(v, n):
    return jnp.pad(v, (0, n - v.shape[0]))


def _reduce_stats(p):
    """(grid, 1, C) per-tile partial sums -> (1, C)."""
    return jnp.sum(p, axis=0)


def _bn_scale_shift(s, q, gamma, beta, m_rows):
    """Fold batch stats into per-channel scale/shift: y*scale+shift == bn(y)."""
    mean = s / m_rows
    var = jnp.maximum(q / m_rows - mean * mean, 0.0)
    inv = jax.lax.rsqrt(var + EPS)
    scale = gamma.reshape(1, -1) * inv
    shift = beta.reshape(1, -1) - mean * scale
    return scale.astype(jnp.float32), shift.astype(jnp.float32)


# ----------------------------- Pallas kernels ------------------------------ #

def _matmul_stats_kernel(x_ref, w_ref, y_ref, s_ref, q_ref):
    # y = X @ W : cast to bf16 on the VPU, f32 MXU accumulation.
    y = jnp.dot(x_ref[...].astype(jnp.bfloat16), w_ref[...],
                preferred_element_type=jnp.float32)
    y_ref[...] = y.astype(y_ref.dtype)                    # bf16 to HBM
    s_ref[...] = jnp.sum(y, axis=0, keepdims=True)        # f32 partial stats
    q_ref[...] = jnp.sum(y * y, axis=0, keepdims=True)


def matmul_stats(x, w):
    """x: (M, K) f32, w: (K, C) bf16 -> (y bf16 (M,C), s (G,1,C), q (G,1,C))."""
    M, K = x.shape
    _, C = w.shape
    tm = _row_tile(M)
    G = M // tm
    return pl.pallas_call(
        _matmul_stats_kernel,
        out_shape=(
            jax.ShapeDtypeStruct((M, C), jnp.bfloat16),
            jax.ShapeDtypeStruct((G, 1, C), jnp.float32),
            jax.ShapeDtypeStruct((G, 1, C), jnp.float32),
        ),
        grid=(G,),
        in_specs=[
            pl.BlockSpec((tm, K), lambda i: (i, 0)),
            pl.BlockSpec((K, C), lambda i: (0, 0)),
        ],
        out_specs=(
            pl.BlockSpec((tm, C), lambda i: (i, 0)),
            pl.BlockSpec((None, 1, C), lambda i: (i, 0, 0)),
            pl.BlockSpec((None, 1, C), lambda i: (i, 0, 0)),
        ),
        compiler_params=pltpu.CompilerParams(dimension_semantics=("parallel",)),
    )(x, w)


def _matmul2_stats_kernel(x_ref, wa_ref, wb_ref,
                          ya_ref, yb_ref, sa_ref, qa_ref, sb_ref, qb_ref):
    # Fused conv1 + projection-shortcut 1x1 conv: x is read once, two MXU dots.
    xb = x_ref[...].astype(jnp.bfloat16)
    ya = jnp.dot(xb, wa_ref[...], preferred_element_type=jnp.float32)
    yb = jnp.dot(xb, wb_ref[...], preferred_element_type=jnp.float32)
    ya_ref[...] = ya.astype(ya_ref.dtype)
    yb_ref[...] = yb.astype(yb_ref.dtype)
    sa_ref[...] = jnp.sum(ya, axis=0, keepdims=True)
    qa_ref[...] = jnp.sum(ya * ya, axis=0, keepdims=True)
    sb_ref[...] = jnp.sum(yb, axis=0, keepdims=True)
    qb_ref[...] = jnp.sum(yb * yb, axis=0, keepdims=True)


def matmul2_stats(x, wa, wb):
    M, K = x.shape
    Ca, Cb = wa.shape[1], wb.shape[1]
    tm = _row_tile(M)
    G = M // tm
    return pl.pallas_call(
        _matmul2_stats_kernel,
        out_shape=(
            jax.ShapeDtypeStruct((M, Ca), jnp.bfloat16),
            jax.ShapeDtypeStruct((M, Cb), jnp.bfloat16),
            jax.ShapeDtypeStruct((G, 1, Ca), jnp.float32),
            jax.ShapeDtypeStruct((G, 1, Ca), jnp.float32),
            jax.ShapeDtypeStruct((G, 1, Cb), jnp.float32),
            jax.ShapeDtypeStruct((G, 1, Cb), jnp.float32),
        ),
        grid=(G,),
        in_specs=[
            pl.BlockSpec((tm, K), lambda i: (i, 0)),
            pl.BlockSpec((K, Ca), lambda i: (0, 0)),
            pl.BlockSpec((K, Cb), lambda i: (0, 0)),
        ],
        out_specs=(
            pl.BlockSpec((tm, Ca), lambda i: (i, 0)),
            pl.BlockSpec((tm, Cb), lambda i: (i, 0)),
            pl.BlockSpec((None, 1, Ca), lambda i: (i, 0, 0)),
            pl.BlockSpec((None, 1, Ca), lambda i: (i, 0, 0)),
            pl.BlockSpec((None, 1, Cb), lambda i: (i, 0, 0)),
            pl.BlockSpec((None, 1, Cb), lambda i: (i, 0, 0)),
        ),
        compiler_params=pltpu.CompilerParams(dimension_semantics=("parallel",)),
    )(x, wa, wb)


def _bn_relu_conv3x3_kernel(x_ref, sc_ref, sh_ref, w_ref, y_ref, s_ref, q_ref,
                            xpad_ref, acc_ref, *, H, W, Ho, Wo, stride):
    Cin = x_ref.shape[-1]
    # bn1 + ReLU in f32, written into a zeroed VMEM halo buffer. The interior
    # sits at sublane offset HALO_OFF so the store stays (8,128)-aligned; the
    # 1-pixel zero halo never touches HBM.
    xpad_ref[...] = jnp.zeros_like(xpad_ref)
    sc = sc_ref[...].reshape(1, 1, -1)
    sh = sh_ref[...].reshape(1, 1, -1)
    a = jnp.maximum(x_ref[...].astype(jnp.float32) * sc + sh, 0.0)
    xpad_ref[1:H + 1, HALO_OFF:HALO_OFF + W, :] = a

    # 9 shifted MXU taps accumulated directly into a VMEM f32 scratch.
    for kh in range(3):
        for kw in range(3):
            col0 = HALO_OFF - 1 + kw
            if stride == 1:
                patch = xpad_ref[kh:kh + Ho, col0:col0 + Wo, :]
            else:
                patch = xpad_ref[pl.ds(kh, Ho, stride),
                                 pl.ds(col0, Wo, stride), :]
            d = jnp.dot(patch.reshape(Ho * Wo, Cin).astype(jnp.bfloat16),
                        w_ref[kh, kw], preferred_element_type=jnp.float32)
            if kh == 0 and kw == 0:
                acc_ref[...] = d
            else:
                acc_ref[...] += d

    acc = acc_ref[...]
    y_ref[...] = acc.astype(y_ref.dtype)                   # bf16 to HBM
    s_ref[...] = jnp.sum(acc, axis=0, keepdims=True)       # f32 partial stats
    q_ref[...] = jnp.sum(acc * acc, axis=0, keepdims=True)


def bn_relu_conv3x3_stats(y1_img, sc1, sh1, w, Ho, Wo, stride):
    """y1_img: (N, H, W, Cin) raw conv1 output (bf16); bn1+ReLU fused in-kernel.
    Returns (y bf16 (N, Ho*Wo, Cout), s (N,1,Cout), q (N,1,Cout))."""
    N, H, W, Cin = y1_img.shape
    Cout = w.shape[-1]
    # TODO(synk): tile over output-row halo bands for large H*W*C so the
    # per-step working set stays under v7x's 32 MiB scoped VMEM default.
    kern = functools.partial(_bn_relu_conv3x3_kernel,
                             H=H, W=W, Ho=Ho, Wo=Wo, stride=stride)
    return pl.pallas_call(
        kern,
        out_shape=(
            jax.ShapeDtypeStruct((N, Ho * Wo, Cout), jnp.bfloat16),
            jax.ShapeDtypeStruct((N, 1, Cout), jnp.float32),
            jax.ShapeDtypeStruct((N, 1, Cout), jnp.float32),
        ),
        grid=(N,),
        in_specs=[
            pl.BlockSpec((None, H, W, Cin), lambda n: (n, 0, 0, 0)),
            pl.BlockSpec((1, Cin), lambda n: (0, 0)),
            pl.BlockSpec((1, Cin), lambda n: (0, 0)),
            pl.BlockSpec((3, 3, Cin, Cout), lambda n: (0, 0, 0, 0)),
        ],
        out_specs=(
            pl.BlockSpec((None, Ho * Wo, Cout), lambda n: (n, 0, 0)),
            pl.BlockSpec((None, 1, Cout), lambda n: (n, 0, 0)),
            pl.BlockSpec((None, 1, Cout), lambda n: (n, 0, 0)),
        ),
        scratch_shapes=[
            pltpu.VMEM((H + 2, W + 2 * HALO_OFF, Cin), jnp.float32),
            pltpu.VMEM((Ho * Wo, Cout), jnp.float32),
        ],
        compiler_params=pltpu.CompilerParams(dimension_semantics=("parallel",)),
    )(y1_img, sc1, sh1, w)


def _bn_relu_matmul_stats_kernel(x_ref, sc_ref, sh_ref, w_ref, y_ref, s_ref, q_ref):
    # bn2 + ReLU folded into conv3's matmul (input side) + bn3 partial stats.
    a = jnp.maximum(x_ref[...].astype(jnp.float32) * sc_ref[...] + sh_ref[...], 0.0)
    y = jnp.dot(a.astype(jnp.bfloat16), w_ref[...],
                preferred_element_type=jnp.float32)
    y_ref[...] = y.astype(y_ref.dtype)
    s_ref[...] = jnp.sum(y, axis=0, keepdims=True)
    q_ref[...] = jnp.sum(y * y, axis=0, keepdims=True)


def bn_relu_matmul_stats(x, scale, shift, w):
    M, K = x.shape
    _, C = w.shape
    tm = _row_tile(M)
    G = M // tm
    return pl.pallas_call(
        _bn_relu_matmul_stats_kernel,
        out_shape=(
            jax.ShapeDtypeStruct((M, C), jnp.bfloat16),
            jax.ShapeDtypeStruct((G, 1, C), jnp.float32),
            jax.ShapeDtypeStruct((G, 1, C), jnp.float32),
        ),
        grid=(G,),
        in_specs=[
            pl.BlockSpec((tm, K), lambda i: (i, 0)),
            pl.BlockSpec((1, K), lambda i: (0, 0)),
            pl.BlockSpec((1, K), lambda i: (0, 0)),
            pl.BlockSpec((K, C), lambda i: (0, 0)),
        ],
        out_specs=(
            pl.BlockSpec((tm, C), lambda i: (i, 0)),
            pl.BlockSpec((None, 1, C), lambda i: (i, 0, 0)),
            pl.BlockSpec((None, 1, C), lambda i: (i, 0, 0)),
        ),
        compiler_params=pltpu.CompilerParams(dimension_semantics=("parallel",)),
    )(x, scale, shift, w)


def _bn_add_relu_kernel(a_ref, sa_ref, ba_ref, b_ref, sb_ref, bb_ref,
                        o_ref, *pre_refs, out_c):
    pre = (a_ref[...].astype(jnp.float32) * sa_ref[...] + ba_ref[...]
           + b_ref[...].astype(jnp.float32) * sb_ref[...] + bb_ref[...])
    pre = pre[:, :out_c]                 # drop lane padding at the final store
    o_ref[...] = jnp.maximum(pre, 0.0)
    for p in pre_refs:                   # only present when is_last=True
        p[...] = pre


def bn_add_relu(a, sa, ba, b, sb, bb, *, out_c, with_preact):
    """Fused bn3(a) + bn_shortcut(b) + residual add + ReLU (+ optional preact).
    Writes the unpadded channel width `out_c` directly (no post-slice pass)."""
    M, C = a.shape
    tm = _row_tile(M)
    kern = functools.partial(_bn_add_relu_kernel, out_c=out_c)
    out_shape = [jax.ShapeDtypeStruct((M, out_c), jnp.float32)]
    out_specs = [pl.BlockSpec((tm, out_c), lambda i: (i, 0))]
    if with_preact:
        out_shape.append(jax.ShapeDtypeStruct((M, out_c), jnp.float32))
        out_specs.append(pl.BlockSpec((tm, out_c), lambda i: (i, 0)))
    res = pl.pallas_call(
        kern,
        out_shape=tuple(out_shape),
        grid=(M // tm,),
        in_specs=[
            pl.BlockSpec((tm, C), lambda i: (i, 0)),
            pl.BlockSpec((1, C), lambda i: (0, 0)),
            pl.BlockSpec((1, C), lambda i: (0, 0)),
            pl.BlockSpec((tm, C), lambda i: (i, 0)),
            pl.BlockSpec((1, C), lambda i: (0, 0)),
            pl.BlockSpec((1, C), lambda i: (0, 0)),
        ],
        out_specs=tuple(out_specs),
        compiler_params=pltpu.CompilerParams(dimension_semantics=("parallel",)),
    )(a, sa, ba, b, sb, bb)
    return res if with_preact else res[0]


# --------------------------------- params ---------------------------------- #

def init_bottleneck_params(key, in_planes, planes, stride):
    out_planes = EXPANSION * planes
    ks = jax.random.split(key, 4)

    def conv_w(k, fan_in, shape):
        std = (2.0 / fan_in) ** 0.5
        return (std * jax.random.normal(k, shape)).astype(jnp.float32)

    params = {
        # conv1: 1x1, in_planes -> planes
        "w1": conv_w(ks[0], in_planes, (in_planes, planes)),
        "g1": jnp.ones((planes,), jnp.float32), "b1": jnp.zeros((planes,), jnp.float32),
        # conv2: 3x3 HWIO, planes -> planes
        "w2": conv_w(ks[1], 9 * planes, (3, 3, planes, planes)),
        "g2": jnp.ones((planes,), jnp.float32), "b2": jnp.zeros((planes,), jnp.float32),
        # conv3: 1x1, planes -> 4*planes
        "w3": conv_w(ks[2], planes, (planes, out_planes)),
        "g3": jnp.ones((out_planes,), jnp.float32), "b3": jnp.zeros((out_planes,), jnp.float32),
    }
    if stride != 1 or in_planes != out_planes:
        params["ws"] = conv_w(ks[3], in_planes, (in_planes, out_planes))
        params["gs"] = jnp.ones((out_planes,), jnp.float32)
        params["bs"] = jnp.zeros((out_planes,), jnp.float32)
    return params


# ------------------------------ forward pass -------------------------------- #

def bottleneck_forward(params, x, *, stride, is_last):
    """x: (N, H, W, Cin) NHWC f32. Returns NHWC output (and preact if is_last)."""
    N, H, W, Cin = x.shape
    planes = params["w1"].shape[1]
    out_planes = EXPANSION * planes

    Cin_p = _round_up(Cin, LANE)
    Cmid_p = _round_up(planes, LANE)
    Cout_p = _round_up(out_planes, LANE)

    Ho = (H + 2 - 3) // stride + 1
    Wo = (W + 2 - 3) // stride + 1
    M1 = N * H * W
    M2 = N * Ho * Wo

    # Lane-dense bf16 weights / f32 BN params (padded channels stay exactly 0).
    w1 = _pad2(params["w1"], Cin_p, Cmid_p).astype(jnp.bfloat16)
    w2 = jnp.pad(params["w2"],
                 ((0, 0), (0, 0), (0, Cmid_p - planes), (0, Cmid_p - planes))
                 ).astype(jnp.bfloat16)
    w3 = _pad2(params["w3"], Cmid_p, Cout_p).astype(jnp.bfloat16)
    g1, b1 = _pad_vec(params["g1"], Cmid_p), _pad_vec(params["b1"], Cmid_p)
    g2, b2 = _pad_vec(params["g2"], Cmid_p), _pad_vec(params["b2"], Cmid_p)
    g3, b3 = _pad_vec(params["g3"], Cout_p), _pad_vec(params["b3"], Cout_p)

    x2d_p = jnp.pad(x.reshape(M1, Cin), ((0, 0), (0, Cin_p - Cin)))  # f32

    has_proj = "ws" in params
    if has_proj:
        ws = _pad2(params["ws"], Cin_p, Cout_p).astype(jnp.bfloat16)
        gs, bs = _pad_vec(params["gs"], Cout_p), _pad_vec(params["bs"], Cout_p)

    # conv1 (and, when stride==1, the projection shortcut fused with it)
    if has_proj and stride == 1:
        y1, ysc, s1p, q1p, ssp, qsp = matmul2_stats(x2d_p, w1, ws)
        ss, qs = _reduce_stats(ssp), _reduce_stats(qsp)
    else:
        y1, s1p, q1p = matmul_stats(x2d_p, w1)
    sc1, sh1 = _bn_scale_shift(_reduce_stats(s1p), _reduce_stats(q1p), g1, b1, M1)

    # conv2 (3x3, stride, pad=1): bn1+ReLU fused in, halo built in VMEM.
    y2, s2p, q2p = bn_relu_conv3x3_stats(
        y1.reshape(N, H, W, Cmid_p), sc1, sh1, w2, Ho, Wo, stride)
    y2 = y2.reshape(M2, Cmid_p)
    sc2, sh2 = _bn_scale_shift(_reduce_stats(s2p), _reduce_stats(q2p), g2, b2, M2)

    # conv3 (1x1) with bn2+ReLU fused on the input side + bn3 stats.
    y3, s3p, q3p = bn_relu_matmul_stats(y2, sc2, sh2, w3)
    sc3, sh3 = _bn_scale_shift(_reduce_stats(s3p), _reduce_stats(q3p), g3, b3, M2)

    # shortcut branch
    if has_proj:
        if stride != 1:
            xs = x[:, ::stride, ::stride, :].reshape(M2, Cin)
            xs_p = jnp.pad(xs, ((0, 0), (0, Cin_p - Cin)))
            ysc, ssp, qsp = matmul_stats(xs_p, ws)
            ss, qs = _reduce_stats(ssp), _reduce_stats(qsp)
        scs, shs = _bn_scale_shift(ss, qs, gs, bs, M2)
        b_in = ysc
    else:
        # identity shortcut (stride==1 and Cin==4*planes  =>  Cin_p == Cout_p)
        b_in = x2d_p
        scs = jnp.ones((1, Cout_p), jnp.float32)
        shs = jnp.zeros((1, Cout_p), jnp.float32)

    # fused bn3 + bn_shortcut + add + ReLU, unpadded width written directly.
    res = bn_add_relu(y3, sc3, sh3, b_in, scs, shs,
                      out_c=out_planes, with_preact=is_last)
    if is_last:
        out2d, pre2d = res
        return (out2d.reshape(N, Ho, Wo, out_planes),
                pre2d.reshape(N, Ho, Wo, out_planes))
    return res.reshape(N, Ho, Wo, out_planes)


# --------------------------- pure-JAX reference ----------------------------- #

def ref_forward(params, x, *, stride, is_last):
    """Mirrors the kernel numerics: bf16 MXU inputs, f32 accumulation/stats,
    and bf16 quantization of intermediates at the HBM boundary."""
    N, H, W, Cin = x.shape
    planes = params["w1"].shape[1]
    out_planes = EXPANSION * planes

    def mm(a, w):
        return jnp.dot(a.astype(jnp.bfloat16), w.astype(jnp.bfloat16),
                       preferred_element_type=jnp.float32)

    def bn_fold(y, g, b):
        m = y.shape[0]
        mean = jnp.sum(y, 0) / m
        var = jnp.maximum(jnp.sum(y * y, 0) / m - mean * mean, 0.0)
        scale = g * jax.lax.rsqrt(var + EPS)
        shift = b - mean * scale
        return scale, shift

    def q16(y):  # bf16 HBM round-trip of the BN-pending intermediate
        return y.astype(jnp.bfloat16).astype(jnp.float32)

    x2d = x.reshape(N * H * W, Cin)
    y1 = mm(x2d, params["w1"])
    sc1, sh1 = bn_fold(y1, params["g1"], params["b1"])
    o1 = jnp.maximum(q16(y1) * sc1 + sh1, 0.0)

    xp = jnp.pad(o1.reshape(N, H, W, planes), ((0, 0), (1, 1), (1, 1), (0, 0)))
    Ho = (H + 2 - 3) // stride + 1
    Wo = (W + 2 - 3) // stride + 1
    cols = [xp[:, kh:kh + stride * Ho:stride, kw:kw + stride * Wo:stride, :]
            for kh in range(3) for kw in range(3)]
    patches = jnp.concatenate(cols, axis=-1).reshape(N * Ho * Wo, 9 * planes)
    y2 = mm(patches, params["w2"].reshape(9 * planes, planes))
    sc2, sh2 = bn_fold(y2, params["g2"], params["b2"])
    o2 = jnp.maximum(q16(y2) * sc2 + sh2, 0.0)

    y3 = mm(o2, params["w3"])
    sc3, sh3 = bn_fold(y3, params["g3"], params["b3"])

    if "ws" in params:
        xs = x[:, ::stride, ::stride, :].reshape(N * Ho * Wo, Cin)
        ysc = mm(xs, params["ws"])
        scs, shs = bn_fold(ysc, params["gs"], params["bs"])
        sc_branch = q16(ysc) * scs + shs
    else:
        sc_branch = x2d

    pre = (q16(y3) * sc3 + sh3 + sc_branch).reshape(N, Ho, Wo, out_planes)
    out = jnp.maximum(pre, 0.0)
    return (out, pre) if is_last else out


# --------------------------------- main ------------------------------------ #

if __name__ == "__main__":
    N, H, W = 2, 16, 16
    in_planes, planes, stride, is_last = 8, 4, 1, True

    key = jax.random.PRNGKey(0)
    kx, kp = jax.random.split(key)
    # NHWC input (PyTorch NCHW equivalent: (2, 8, 16, 16))
    x = jax.random.normal(kx, (N, H, W, in_planes), jnp.float32)
    params = init_bottleneck_params(kp, in_planes, planes, stride)

    fwd = jax.jit(bottleneck_forward, static_argnames=("stride", "is_last"))
    out, preact = fwd(params, x, stride=stride, is_last=is_last)
    out = jax.block_until_ready(out)
    preact = jax.block_until_ready(preact)

    ref_out, ref_pre = ref_forward(params, x, stride=stride, is_last=is_last)
    assert out.shape == (N, H, W, EXPANSION * planes)
    assert jnp.allclose(out, ref_out, atol=1e-2, rtol=1e-2), \
        float(jnp.max(jnp.abs(out - ref_out)))
    assert jnp.allclose(preact, ref_pre, atol=1e-2, rtol=1e-2), \
        float(jnp.max(jnp.abs(preact - ref_pre)))

    print("KERNEL_OK")
</pallas_src>

<mosaic_0001>
module attributes {stable_mosaic.version = 11 : i64} {
  func.func @_bn_relu_conv3x3_kernel(%arg0: i32, %arg1: memref<1x16x16x128xbf16, #tpu.memory_space<vmem>>, %arg2: memref<1x128xf32, #tpu.memory_space<vmem>>, %arg3: memref<1x128xf32, #tpu.memory_space<vmem>>, %arg4: memref<3x3x128x128xbf16, #tpu.memory_space<vmem>>, %arg5: memref<1x256x128xbf16, #tpu.memory_space<vmem>>, %arg6: memref<1x1x128xf32, #tpu.memory_space<vmem>>, %arg7: memref<1x1x128xf32, #tpu.memory_space<vmem>>, %arg8: memref<18x32x128xf32, #tpu.memory_space<vmem>>, %arg9: memref<256x128xf32, #tpu.memory_space<vmem>>) attributes {dimension_semantics = [#tpu.dimension_semantics<parallel>], iteration_bounds = array<i64: 2>, scalar_prefetch = 0 : i64, scratch_operands = 2 : i64, tpu.core_type = #tpu.core_type<tc>, window_params = [{transform_indices = @transform_0, window_bounds = array<i64: 1, 16, 16, 128>}, {pipeline_mode = #tpu.pipeline_mode<synchronous>, transform_indices = @transform_1, window_bounds = array<i64: 1, 128>}, {pipeline_mode = #tpu.pipeline_mode<synchronous>, transform_indices = @transform_2, window_bounds = array<i64: 1, 128>}, {pipeline_mode = #tpu.pipeline_mode<synchronous>, transform_indices = @transform_3, window_bounds = array<i64: 3, 3, 128, 128>}, {transform_indices = @transform_4, window_bounds = array<i64: 1, 256, 128>}, {transform_indices = @transform_5, window_bounds = array<i64: 1, 1, 128>}, {transform_indices = @transform_6, window_bounds = array<i64: 1, 1, 128>}]} {
    %cst = arith.constant 0.000000e+00 : f32
    %0 = vector.broadcast %cst : f32 to vector<18x32x128xf32>
    %c0 = arith.constant 0 : index
    %c0_0 = arith.constant 0 : index
    %c0_1 = arith.constant 0 : index
    %1 = vector.load %arg8[%c0, %c0_0, %c0_1] : memref<18x32x128xf32, #tpu.memory_space<vmem>>, vector<18x32x128xf32>
    tpu.vector_store %arg8[%c0, %c0_0, %c0_1], %0 {strides = array<i32>} : memref<18x32x128xf32, #tpu.memory_space<vmem>>, vector<18x32x128xf32>,
    %c0_2 = arith.constant 0 : index
    %c0_3 = arith.constant 0 : index
    %2 = vector.load %arg2[%c0_2, %c0_3] : memref<1x128xf32, #tpu.memory_space<vmem>>, vector<1x128xf32>
    %3 = vector.shape_cast %2 : vector<1x128xf32> to vector<1x1x128xf32>
    %c0_4 = arith.constant 0 : index
    %c0_5 = arith.constant 0 : index
    %4 = vector.load %arg3[%c0_4, %c0_5] : memref<1x128xf32, #tpu.memory_space<vmem>>, vector<1x128xf32>
    %5 = vector.shape_cast %4 : vector<1x128xf32> to vector<1x1x128xf32>
    %c0_6 = arith.constant 0 : index
    %c0_7 = arith.constant 0 : index
    %c0_8 = arith.constant 0 : index
    %c0_9 = arith.constant 0 : index
    %6 = vector.load %arg1[%c0_6, %c0_7, %c0_8, %c0_9] : memref<1x16x16x128xbf16, #tpu.memory_space<vmem>>, vector<1x16x16x128xbf16>
    %7 = vector.shape_cast %6 : vector<1x16x16x128xbf16> to vector<16x16x128xbf16>
    %8 = arith.extf %7 : vector<16x16x128xbf16> to vector<16x16x128xf32>
    %9 = vector.broadcast %3 : vector<1x1x128xf32> to vector<16x16x128xf32>
    %10 = arith.mulf %8, %9 : vector<16x16x128xf32>
    %11 = vector.broadcast %5 : vector<1x1x128xf32> to vector<16x16x128xf32>
    %12 = arith.addf %10, %11 : vector<16x16x128xf32>
    %cst_10 = arith.constant 0.000000e+00 : f32
    %13 = vector.broadcast %cst_10 : f32 to vector<16x16x128xf32>
    %14 = arith.maximumf %12, %13 : vector<16x16x128xf32>
    %c1 = arith.constant 1 : index
    %c8 = arith.constant 8 : index
    %c0_11 = arith.constant 0 : index
    %15 = vector.load %arg8[%c1, %c8, %c0_11] : memref<18x32x128xf32, #tpu.memory_space<vmem>>, vector<16x16x128xf32>
    tpu.vector_store %arg8[%c1, %c8, %c0_11], %14 {strides = array<i32>} : memref<18x32x128xf32, #tpu.memory_space<vmem>>, vector<16x16x128xf32>,
    %c0_12 = arith.constant 0 : index
    %c7 = arith.constant 7 : index
    %c0_13 = arith.constant 0 : index
    %16 = vector.load %arg8[%c0_12, %c7, %c0_13] : memref<18x32x128xf32, #tpu.memory_space<vmem>>, vector<16x16x128xf32>
    %17 = vector.shape_cast %16 : vector<16x16x128xf32> to vector<256x128xf32>
    %18 = arith.truncf %17 : vector<256x128xf32> to vector<256x128xbf16>
    %c0_14 = arith.constant 0 : index
    %c0_15 = arith.constant 0 : index
    %c0_16 = arith.constant 0 : index
    %c0_17 = arith.constant 0 : index
    %19 = vector.load %arg4[%c0_14, %c0_15, %c0_16, %c0_17] : memref<3x3x128x128xbf16, #tpu.memory_space<vmem>>, vector<1x1x128x128xbf16>
    %20 = vector.shape_cast %19 : vector<1x1x128x128xbf16> to vector<128x128xbf16>
    %cst_18 = arith.constant dense<0.000000e+00> : vector<256x128xf32>
    %21 = tpu.matmul %18, %20, %cst_18 {dimension_numbers = #tpu.dot_dimension_numbers<[1], [0], [0], [1], [0, 0, 1, 1], [], []>} : vector<256x128xbf16>, vector<128x128xbf16>, vector<256x128xf32> -> vector<256x128xf32>
    %c0_19 = arith.constant 0 : index
    %c0_20 = arith.constant 0 : index
    %22 = vector.load %arg9[%c0_19, %c0_20] : memref<256x128xf32, #tpu.memory_space<vmem>>, vector<256x128xf32>
    tpu.vector_store %arg9[%c0_19, %c0_20], %21 {strides = array<i32>} : memref<256x128xf32, #tpu.memory_space<vmem>>, vector<256x128xf32>,
    %c0_21 = arith.constant 0 : index
    %c8_22 = arith.constant 8 : index
    %c0_23 = arith.constant 0 : index
    %23 = vector.load %arg8[%c0_21, %c8_22, %c0_23] : memref<18x32x128xf32, #tpu.memory_space<vmem>>, vector<16x16x128xf32>
    %24 = vector.shape_cast %23 : vector<16x16x128xf32> to vector<256x128xf32>
    %25 = arith.truncf %24 : vector<256x128xf32> to vector<256x128xbf16>
    %c0_24 = arith.constant 0 : index
    %c1_25 = arith.constant 1 : index
    %c0_26 = arith.constant 0 : index
    %c0_27 = arith.constant 0 : index
    %26 = vector.load %arg4[%c0_24, %c1_25, %c0_26, %c0_27] : memref<3x3x128x128xbf16, #tpu.memory_space<vmem>>, vector<1x1x128x128xbf16>
    %27 = vector.shape_cast %26 : vector<1x1x128x128xbf16> to vector<128x128xbf16>
    %cst_28 = arith.constant dense<0.000000e+00> : vector<256x128xf32>
    %28 = tpu.matmul %25, %27, %cst_28 {dimension_numbers = #tpu.dot_dimension_numbers<[1], [0], [0], [1], [0, 0, 1, 1], [], []>} : vector<256x128xbf16>, vector<128x128xbf16>, vector<256x128xf32> -> vector<256x128xf32>
    %c0_29 = arith.constant 0 : index
    %c0_30 = arith.constant 0 : index
    %29 = vector.load %arg9[%c0_29, %c0_30] : memref<256x128xf32, #tpu.memory_space<vmem>>, vector<256x128xf32>
    %30 = arith.addf %29, %28 : vector<256x128xf32>
    %c0_31 = arith.constant 0 : index
    %c0_32 = arith.constant 0 : index
    %31 = vector.load %arg9[%c0_31, %c0_32] : memref<256x128xf32, #tpu.memory_space<vmem>>, vector<256x128xf32>
    tpu.vector_store %arg9[%c0_31, %c0_32], %30 {strides = array<i32>} : memref<256x128xf32, #tpu.memory_space<vmem>>, vector<256x128xf32>,
    %c0_33 = arith.constant 0 : index
    %c9 = arith.constant 9 : index
    %c0_34 = arith.constant 0 : index
    %32 = vector.load %arg8[%c0_33, %c9, %c0_34] : memref<18x32x128xf32, #tpu.memory_space<vmem>>, vector<16x16x128xf32>
    %33 = vector.shape_cast %32 : vector<16x16x128xf32> to vector<256x128xf32>
    %34 = arith.truncf %33 : vector<256x128xf32> to vector<256x128xbf16>
    %c0_35 = arith.constant 0 : index
    %c2 = arith.constant 2 : index
    %c0_36 = arith.constant 0 : index
    %c0_37 = arith.constant 0 : index
    %35 = vector.load %arg4[%c0_35, %c2, %c0_36, %c0_37] : memref<3x3x128x128xbf16, #tpu.memory_space<vmem>>, vector<1x1x128x128xbf16>
    %36 = vector.shape_cast %35 : vector<1x1x128x128xbf16> to vector<128x128xbf16>
    %cst_38 = arith.constant dense<0.000000e+00> : vector<256x128xf32>
    %37 = tpu.matmul %34, %36, %cst_38 {dimension_numbers = #tpu.dot_dimension_numbers<[1], [0], [0], [1], [0, 0, 1, 1], [], []>} : vector<256x128xbf16>, vector<128x128xbf16>, vector<256x128xf32> -> vector<256x128xf32>
    %c0_39 = arith.constant 0 : index
    %c0_40 = arith.constant 0 : index
    %38 = vector.load %arg9[%c0_39, %c0_40] : memref<256x128xf32, #tpu.memory_space<vmem>>, vector<256x128xf32>
    %39 = arith.addf %38, %37 : vector<256x128xf32>
    %c0_41 = arith.constant 0 : index
    %c0_42 = arith.constant 0 : index
    %40 = vector.load %arg9[%c0_41, %c0_42] : memref<256x128xf32, #tpu.memory_space<vmem>>, vector<256x128xf32>
    tpu.vector_store %arg9[%c0_41, %c0_42], %39 {strides = array<i32>} : memref<256x128xf32, #tpu.memory_space<vmem>>, vector<256x128xf32>,
    %c1_43 = arith.constant 1 : index
    %c7_44 = arith.constant 7 : index
    %c0_45 = arith.constant 0 : index
    %41 = vector.load %arg8[%c1_43, %c7_44, %c0_45] : memref<18x32x128xf32, #tpu.memory_space<vmem>>, vector<16x16x128xf32>
    %42 = vector.shape_cast %41 : vector<16x16x128xf32> to vector<256x128xf32>
    %43 = arith.truncf %42 : vector<256x128xf32> to vector<256x128xbf16>
    %c1_46 = arith.constant 1 : index
    %c0_47 = arith.constant 0 : index
    %c0_48 = arith.constant 0 : index
    %c0_49 = arith.constant 0 : index
    %44 = vector.load %arg4[%c1_46, %c0_47, %c0_48, %c0_49] : memref<3x3x128x128xbf16, #tpu.memory_space<vmem>>, vector<1x1x128x128xbf16>
    %45 = vector.shape_cast %44 : vector<1x1x128x128xbf16> to vector<128x128xbf16>
    %cst_50 = arith.constant dense<0.000000e+00> : vector<256x128xf32>
    %46 = tpu.matmul %43, %45, %cst_50 {dimension_numbers = #tpu.dot_dimension_numbers<[1], [0], [0], [1], [0, 0, 1, 1], [], []>} : vector<256x128xbf16>, vector<128x128xbf16>, vector<256x128xf32> -> vector<256x128xf32>
    %c0_51 = arith.constant 0 : index
    %c0_52 = arith.constant 0 : index
    %47 = vector.load %arg9[%c0_51, %c0_52] : memref<256x128xf32, #tpu.memory_space<vmem>>, vector<256x128xf32>
    %48 = arith.addf %47, %46 : vector<256x128xf32>
    %c0_53 = arith.constant 0 : index
    %c0_54 = arith.constant 0 : index
    %49 = vector.load %arg9[%c0_53, %c0_54] : memref<256x128xf32, #tpu.memory_space<vmem>>, vector<256x128xf32>
    tpu.vector_store %arg9[%c0_53, %c0_54], %48 {strides = array<i32>} : memref<256x128xf32, #tpu.memory_space<vmem>>, vector<256x128xf32>,
    %c1_55 = arith.constant 1 : index
    %c8_56 = arith.constant 8 : index
    %c0_57 = arith.constant 0 : index
    %50 = vector.load %arg8[%c1_55, %c8_56, %c0_57] : memref<18x32x128xf32, #tpu.memory_space<vmem>>, vector<16x16x128xf32>
    %51 = vector.shape_cast %50 : vector<16x16x128xf32> to vector<256x128xf32>
    %52 = arith.truncf %51 : vector<256x128xf32> to vector<256x128xbf16>
    %c1_58 = arith.constant 1 : index
    %c1_59 = arith.constant 1 : index
    %c0_60 = arith.constant 0 : index
    %c0_61 = arith.constant 0 : index
    %53 = vector.load %arg4[%c1_58, %c1_59, %c0_60, %c0_61] : memref<3x3x128x128xbf16, #tpu.memory_space<vmem>>, vector<1x1x128x128xbf16>
    %54 = vector.shape_cast %53 : vector<1x1x128x128xbf16> to vector<128x128xbf16>
    %cst_62 = arith.constant dense<0.000000e+00> : vector<256x128xf32>
    %55 = tpu.matmul %52, %54, %cst_62 {dimension_numbers = #tpu.dot_dimension_numbers<[1], [0], [0], [1], [0, 0, 1, 1], [], []>} : vector<256x128xbf16>, vector<128x128xbf16>, vector<256x128xf32> -> vector<256x128xf32>
    %c0_63 = arith.constant 0 : index
    %c0_64 = arith.constant 0 : index
    %56 = vector.load %arg9[%c0_63, %c0_64] : memref<256x128xf32, #tpu.memory_space<vmem>>, vector<256x128xf32>
    %57 = arith.addf %56, %55 : vector<256x128xf32>
    %c0_65 = arith.constant 0 : index
    %c0_66 = arith.constant 0 : index
    %58 = vector.load %arg9[%c0_65, %c0_66] : memref<256x128xf32, #tpu.memory_space<vmem>>, vector<256x128xf32>
    tpu.vector_store %arg9[%c0_65, %c0_66], %57 {strides = array<i32>} : memref<256x128xf32, #tpu.memory_space<vmem>>, vector<256x128xf32>,
    %c1_67 = arith.constant 1 : index
    %c9_68 = arith.constant 9 : index
    %c0_69 = arith.constant 0 : index
    %59 = vector.load %arg8[%c1_67, %c9_68, %c0_69] : memref<18x32x128xf32, #tpu.memory_space<vmem>>, vector<16x16x128xf32>
    %60 = vector.shape_cast %59 : vector<16x16x128xf32> to vector<256x128xf32>
    %61 = arith.truncf %60 : vector<256x128xf32> to vector<256x128xbf16>
    %c1_70 = arith.constant 1 : index
    %c2_71 = arith.constant 2 : index
    %c0_72 = arith.constant 0 : index
    %c0_73 = arith.constant 0 : index
    %62 = vector.load %arg4[%c1_70, %c2_71, %c0_72, %c0_73] : memref<3x3x128x128xbf16, #tpu.memory_space<vmem>>, vector<1x1x128x128xbf16>
    %63 = vector.shape_cast %62 : vector<1x1x128x128xbf16> to vector<128x128xbf16>
    %cst_74 = arith.constant dense<0.000000e+00> : vector<256x128xf32>
    %64 = tpu.matmul %61, %63, %cst_74 {dimension_numbers = #tpu.dot_dimension_numbers<[1], [0], [0], [1], [0, 0, 1, 1], [], []>} : vector<256x128xbf16>, vector<128x128xbf16>, vector<256x128xf32> -> vector<256x128xf32>
    %c0_75 = arith.constant 0 : index
    %c0_76 = arith.constant 0 : index
    %65 = vector.load %arg9[%c0_75, %c0_76] : memref<256x128xf32, #tpu.memory_space<vmem>>, vector<256x128xf32>
    %66 = arith.addf %65, %64 : vector<256x128xf32>
    %c0_77 = arith.constant 0 : index
    %c0_78 = arith.constant 0 : index
    %67 = vector.load %arg9[%c0_77, %c0_78] : memref<256x128xf32, #tpu.memory_space<vmem>>, vector<256x128xf32>
    tpu.vector_store %arg9[%c0_77, %c0_78], %66 {strides = array<i32>} : memref<256x128xf32, #tpu.memory_space<vmem>>, vector<256x128xf32>,
    %c2_79 = arith.constant 2 : index
    %c7_80 = arith.constant 7 : index
    %c0_81 = arith.constant 0 : index
    %68 = vector.load %arg8[%c2_79, %c7_80, %c0_81] : memref<18x32x128xf32, #tpu.memory_space<vmem>>, vector<16x16x128xf32>
    %69 = vector.shape_cast %68 : vector<16x16x128xf32> to vector<256x128xf32>
    %70 = arith.truncf %69 : vector<256x128xf32> to vector<256x128xbf16>
    %c2_82 = arith.constant 2 : index
    %c0_83 = arith.constant 0 : index
    %c0_84 = arith.constant 0 : index
    %c0_85 = arith.constant 0 : index
    %71 = vector.load %arg4[%c2_82, %c0_83, %c0_84, %c0_85] : memref<3x3x128x128xbf16, #tpu.memory_space<vmem>>, vector<1x1x128x128xbf16>
    %72 = vector.shape_cast %71 : vector<1x1x128x128xbf16> to vector<128x128xbf16>
    %cst_86 = arith.constant dense<0.000000e+00> : vector<256x128xf32>
    %73 = tpu.matmul %70, %72, %cst_86 {dimension_numbers = #tpu.dot_dimension_numbers<[1], [0], [0], [1], [0, 0, 1, 1], [], []>} : vector<256x128xbf16>, vector<128x128xbf16>, vector<256x128xf32> -> vector<256x128xf32>
    %c0_87 = arith.constant 0 : index
    %c0_88 = arith.constant 0 : index
    %74 = vector.load %arg9[%c0_87, %c0_88] : memref<256x128xf32, #tpu.memory_space<vmem>>, vector<256x128xf32>
    %75 = arith.addf %74, %73 : vector<256x128xf32>
    %c0_89 = arith.constant 0 : index
    %c0_90 = arith.constant 0 : index
    %76 = vector.load %arg9[%c0_89, %c0_90] : memref<256x128xf32, #tpu.memory_space<vmem>>, vector<256x128xf32>
    tpu.vector_store %arg9[%c0_89, %c0_90], %75 {strides = array<i32>} : memref<256x128xf32, #tpu.memory_space<vmem>>, vector<256x128xf32>,
    %c2_91 = arith.constant 2 : index
    %c8_92 = arith.constant 8 : index
    %c0_93 = arith.constant 0 : index
    %77 = vector.load %arg8[%c2_91, %c8_92, %c0_93] : memref<18x32x128xf32, #tpu.memory_space<vmem>>, vector<16x16x128xf32>
    %78 = vector.shape_cast %77 : vector<16x16x128xf32> to vector<256x128xf32>
    %79 = arith.truncf %78 : vector<256x128xf32> to vector<256x128xbf16>
    %c2_94 = arith.constant 2 : index
    %c1_95 = arith.constant 1 : index
    %c0_96 = arith.constant 0 : index
    %c0_97 = arith.constant 0 : index
    %80 = vector.load %arg4[%c2_94, %c1_95, %c0_96, %c0_97] : memref<3x3x128x128xbf16, #tpu.memory_space<vmem>>, vector<1x1x128x128xbf16>
    %81 = vector.shape_cast %80 : vector<1x1x128x128xbf16> to vector<128x128xbf16>
    %cst_98 = arith.constant dense<0.000000e+00> : vector<256x128xf32>
    %82 = tpu.matmul %79, %81, %cst_98 {dimension_numbers = #tpu.dot_dimension_numbers<[1], [0], [0], [1], [0, 0, 1, 1], [], []>} : vector<256x128xbf16>, vector<128x128xbf16>, vector<256x128xf32> -> vector<256x128xf32>
    %c0_99 = arith.constant 0 : index
    %c0_100 = arith.constant 0 : index
    %83 = vector.load %arg9[%c0_99, %c0_100] : memref<256x128xf32, #tpu.memory_space<vmem>>, vector<256x128xf32>
    %84 = arith.addf %83, %82 : vector<256x128xf32>
    %c0_101 = arith.constant 0 : index
    %c0_102 = arith.constant 0 : index
    %85 = vector.load %arg9[%c0_101, %c0_102] : memref<256x128xf32, #tpu.memory_space<vmem>>, vector<256x128xf32>
    tpu.vector_store %arg9[%c0_101, %c0_102], %84 {strides = array<i32>} : memref<256x128xf32, #tpu.memory_space<vmem>>, vector<256x128xf32>,
    %c2_103 = arith.constant 2 : index
    %c9_104 = arith.constant 9 : index
    %c0_105 = arith.constant 0 : index
    %86 = vector.load %arg8[%c2_103, %c9_104, %c0_105] : memref<18x32x128xf32, #tpu.memory_space<vmem>>, vector<16x16x128xf32>
    %87 = vector.shape_cast %86 : vector<16x16x128xf32> to vector<256x128xf32>
    %88 = arith.truncf %87 : vector<256x128xf32> to vector<256x128xbf16>
    %c2_106 = arith.constant 2 : index
    %c2_107 = arith.constant 2 : index
    %c0_108 = arith.constant 0 : index
    %c0_109 = arith.constant 0 : index
    %89 = vector.load %arg4[%c2_106, %c2_107, %c0_108, %c0_109] : memref<3x3x128x128xbf16, #tpu.memory_space<vmem>>, vector<1x1x128x128xbf16>
    %90 = vector.shape_cast %89 : vector<1x1x128x128xbf16> to vector<128x128xbf16>
    %cst_110 = arith.constant dense<0.000000e+00> : vector<256x128xf32>
    %91 = tpu.matmul %88, %90, %cst_110 {dimension_numbers = #tpu.dot_dimension_numbers<[1], [0], [0], [1], [0, 0, 1, 1], [], []>} : vector<256x128xbf16>, vector<128x128xbf16>, vector<256x128xf32> -> vector<256x128xf32>
    %c0_111 = arith.constant 0 : index
    %c0_112 = arith.constant 0 : index
    %92 = vector.load %arg9[%c0_111, %c0_112] : memref<256x128xf32, #tpu.memory_space<vmem>>, vector<256x128xf32>
    %93 = arith.addf %92, %91 : vector<256x128xf32>
    %c0_113 = arith.constant 0 : index
    %c0_114 = arith.constant 0 : index
    %94 = vector.load %arg9[%c0_113, %c0_114] : memref<256x128xf32, #tpu.memory_space<vmem>>, vector<256x128xf32>
    tpu.vector_store %arg9[%c0_113, %c0_114], %93 {strides = array<i32>} : memref<256x128xf32, #tpu.memory_space<vmem>>, vector<256x128xf32>,
    %c0_115 = arith.constant 0 : index
    %c0_116 = arith.constant 0 : index
    %95 = vector.load %arg9[%c0_115, %c0_116] : memref<256x128xf32, #tpu.memory_space<vmem>>, vector<256x128xf32>
    %96 = arith.truncf %95 : vector<256x128xf32> to vector<256x128xbf16>
    %c0_117 = arith.constant 0 : index
    %c0_118 = arith.constant 0 : index
    %c0_119 = arith.constant 0 : index
    %97 = vector.load %arg5[%c0_117, %c0_118, %c0_119] : memref<1x256x128xbf16, #tpu.memory_space<vmem>>, vector<1x256x128xbf16>
    %98 = vector.shape_cast %97 : vector<1x256x128xbf16> to vector<256x128xbf16>
    %99 = vector.shape_cast %96 : vector<256x128xbf16> to vector<1x256x128xbf16>
    tpu.vector_store %arg5[%c0_117, %c0_118, %c0_119], %99 {strides = array<i32>} : memref<1x256x128xbf16, #tpu.memory_space<vmem>>, vector<1x256x128xbf16>,
    %cst_120 = arith.constant dense<0.000000e+00> : vector<128xf32>
    %100 = vector.multi_reduction <add>, %95, %cst_120 [0] : vector<256x128xf32> to vector<128xf32>
    %101 = vector.shape_cast %100 : vector<128xf32> to vector<1x128xf32>
    %c0_121 = arith.constant 0 : index
    %c0_122 = arith.constant 0 : index
    %c0_123 = arith.constant 0 : index
    %102 = vector.load %arg6[%c0_121, %c0_122, %c0_123] : memref<1x1x128xf32, #tpu.memory_space<vmem>>, vector<1x1x128xf32>
    %103 = vector.shape_cast %102 : vector<1x1x128xf32> to vector<1x128xf32>
    %104 = vector.shape_cast %101 : vector<1x128xf32> to vector<1x1x128xf32>
    tpu.vector_store %arg6[%c0_121, %c0_122, %c0_123], %104 {strides = array<i32>} : memref<1x1x128xf32, #tpu.memory_space<vmem>>, vector<1x1x128xf32>,
    %105 = arith.mulf %95, %95 : vector<256x128xf32>
    %cst_124 = arith.constant dense<0.000000e+00> : vector<128xf32>
    %106 = vector.multi_reduction <add>, %105, %cst_124 [0] : vector<256x128xf32> to vector<128xf32>
    %107 = vector.shape_cast %106 : vector<128xf32> to vector<1x128xf32>
    %c0_125 = arith.constant 0 : index
    %c0_126 = arith.constant 0 : index
    %c0_127 = arith.constant 0 : index
    %108 = vector.load %arg7[%c0_125, %c0_126, %c0_127] : memref<1x1x128xf32, #tpu.memory_space<vmem>>, vector<1x1x128xf32>
    %109 = vector.shape_cast %108 : vector<1x1x128xf32> to vector<1x128xf32>
    %110 = vector.shape_cast %107 : vector<1x128xf32> to vector<1x1x128xf32>
    tpu.vector_store %arg7[%c0_125, %c0_126, %c0_127], %110 {strides = array<i32>} : memref<1x1x128xf32, #tpu.memory_space<vmem>>, vector<1x1x128xf32>,
    return
  }
  func.func @transform_0(%arg0: i32) -> (i32, i32, i32, i32) {
    %c0_i32 = arith.constant 0 : i32
    %c0_i32_0 = arith.constant 0 : i32
    %c0_i32_1 = arith.constant 0 : i32
    %c0_i32_2 = arith.constant 0 : i32
    return %arg0, %c0_i32, %c0_i32_0, %c0_i32_1 : i32, i32, i32, i32
  }
  func.func @transform_1(%arg0: i32) -> (i32, i32) {
    %c0_i32 = arith.constant 0 : i32
    %c0_i32_0 = arith.constant 0 : i32
    %c0_i32_1 = arith.constant 0 : i32
    return %c0_i32, %c0_i32_0 : i32, i32
  }
  func.func @transform_2(%arg0: i32) -> (i32, i32) {
    %c0_i32 = arith.constant 0 : i32
    %c0_i32_0 = arith.constant 0 : i32
    %c0_i32_1 = arith.constant 0 : i32
    return %c0_i32, %c0_i32_0 : i32, i32
  }
  func.func @transform_3(%arg0: i32) -> (i32, i32, i32, i32) {
    %c0_i32 = arith.constant 0 : i32
    %c0_i32_0 = arith.constant 0 : i32
    %c0_i32_1 = arith.constant 0 : i32
    %c0_i32_2 = arith.constant 0 : i32
    %c0_i32_3 = arith.constant 0 : i32
    return %c0_i32, %c0_i32_0, %c0_i32_1, %c0_i32_2 : i32, i32, i32, i32
  }
  func.func @transform_4(%arg0: i32) -> (i32, i32, i32) {
    %c0_i32 = arith.constant 0 : i32
    %c0_i32_0 = arith.constant 0 : i32
    %c0_i32_1 = arith.constant 0 : i32
    return %arg0, %c0_i32, %c0_i32_0 : i32, i32, i32
  }
  func.func @transform_5(%arg0: i32) -> (i32, i32, i32) {
    %c0_i32 = arith.constant 0 : i32
    %c0_i32_0 = arith.constant 0 : i32
    %c0_i32_1 = arith.constant 0 : i32
    return %arg0, %c0_i32, %c0_i32_0 : i32, i32, i32
  }
  func.func @transform_6(%arg0: i32) -> (i32, i32, i32) {
    %c0_i32 = arith.constant 0 : i32
    %c0_i32_0 = arith.constant 0 : i32
    %c0_i32_1 = arith.constant 0 : i32
    return %arg0, %c0_i32, %c0_i32_0 : i32, i32, i32
  }
}

module attributes {stable_mosaic.version = 11 : i64} {
  func.func @_matmul2_stats_kernel(%arg0: i32, %arg1: memref<512x128xf32, #tpu.memory_space<vmem>>, %arg2: memref<128x128xbf16, #tpu.memory_space<vmem>>, %arg3: memref<128x128xbf16, #tpu.memory_space<vmem>>, %arg4: memref<512x128xbf16, #tpu.memory_space<vmem>>, %arg5: memref<512x128xbf16, #tpu.memory_space<vmem>>, %arg6: memref<1x1x128xf32, #tpu.memory_space<vmem>>, %arg7: memref<1x1x128xf32, #tpu.memory_space<vmem>>, %arg8: memref<1x1x128xf32, #tpu.memory_space<vmem>>, %arg9: memref<1x1x128xf32, #tpu.memory_space<vmem>>) attributes {dimension_semantics = [#tpu.dimension_semantics<parallel>], iteration_bounds = array<i64: 1>, scalar_prefetch = 0 : i64, scratch_operands = 0 : i64, tpu.core_type = #tpu.core_type<tc>, window_params = [{transform_indices = @transform_0, window_bounds = array<i64: 512, 128>}, {pipeline_mode = #tpu.pipeline_mode<synchronous>, transform_indices = @transform_1, window_bounds = array<i64: 128, 128>}, {pipeline_mode = #tpu.pipeline_mode<synchronous>, transform_indices = @transform_2, window_bounds = array<i64: 128, 128>}, {transform_indices = @transform_3, window_bounds = array<i64: 512, 128>}, {transform_indices = @transform_4, window_bounds = array<i64: 512, 128>}, {transform_indices = @transform_5, window_bounds = array<i64: 1, 1, 128>}, {transform_indices = @transform_6, window_bounds = array<i64: 1, 1, 128>}, {transform_indices = @transform_7, window_bounds = array<i64: 1, 1, 128>}, {transform_indices = @transform_8, window_bounds = array<i64: 1, 1, 128>}]} {
    %c0 = arith.constant 0 : index
    %c0_0 = arith.constant 0 : index
    %0 = vector.load %arg1[%c0, %c0_0] : memref<512x128xf32, #tpu.memory_space<vmem>>, vector<512x128xf32>
    %1 = arith.truncf %0 : vector<512x128xf32> to vector<512x128xbf16>
    %c0_1 = arith.constant 0 : index
    %c0_2 = arith.constant 0 : index
    %2 = vector.load %arg2[%c0_1, %c0_2] : memref<128x128xbf16, #tpu.memory_space<vmem>>, vector<128x128xbf16>
    %cst = arith.constant dense<0.000000e+00> : vector<512x128xf32>
    %3 = tpu.matmul %1, %2, %cst {dimension_numbers = #tpu.dot_dimension_numbers<[1], [0], [0], [1], [0, 0, 1, 1], [], []>} : vector<512x128xbf16>, vector<128x128xbf16>, vector<512x128xf32> -> vector<512x128xf32>
    %c0_3 = arith.constant 0 : index
    %c0_4 = arith.constant 0 : index
    %4 = vector.load %arg3[%c0_3, %c0_4] : memref<128x128xbf16, #tpu.memory_space<vmem>>, vector<128x128xbf16>
    %cst_5 = arith.constant dense<0.000000e+00> : vector<512x128xf32>
    %5 = tpu.matmul %1, %4, %cst_5 {dimension_numbers = #tpu.dot_dimension_numbers<[1], [0], [0], [1], [0, 0, 1, 1], [], []>} : vector<512x128xbf16>, vector<128x128xbf16>, vector<512x128xf32> -> vector<512x128xf32>
    %6 = arith.truncf %3 : vector<512x128xf32> to vector<512x128xbf16>
    %c0_6 = arith.constant 0 : index
    %c0_7 = arith.constant 0 : index
    %7 = vector.load %arg4[%c0_6, %c0_7] : memref<512x128xbf16, #tpu.memory_space<vmem>>, vector<512x128xbf16>
    tpu.vector_store %arg4[%c0_6, %c0_7], %6 {strides = array<i32>} : memref<512x128xbf16, #tpu.memory_space<vmem>>, vector<512x128xbf16>,
    %8 = arith.truncf %5 : vector<512x128xf32> to vector<512x128xbf16>
    %c0_8 = arith.constant 0 : index
    %c0_9 = arith.constant 0 : index
    %9 = vector.load %arg5[%c0_8, %c0_9] : memref<512x128xbf16, #tpu.memory_space<vmem>>, vector<512x128xbf16>
    tpu.vector_store %arg5[%c0_8, %c0_9], %8 {strides = array<i32>} : memref<512x128xbf16, #tpu.memory_space<vmem>>, vector<512x128xbf16>,
    %cst_10 = arith.constant dense<0.000000e+00> : vector<128xf32>
    %10 = vector.multi_reduction <add>, %3, %cst_10 [0] : vector<512x128xf32> to vector<128xf32>
    %11 = vector.shape_cast %10 : vector<128xf32> to vector<1x128xf32>
    %c0_11 = arith.constant 0 : index
    %c0_12 = arith.constant 0 : index
    %c0_13 = arith.constant 0 : index
    %12 = vector.load %arg6[%c0_11, %c0_12, %c0_13] : memref<1x1x128xf32, #tpu.memory_space<vmem>>, vector<1x1x128xf32>
    %13 = vector.shape_cast %12 : vector<1x1x128xf32> to vector<1x128xf32>
    %14 = vector.shape_cast %11 : vector<1x128xf32> to vector<1x1x128xf32>
    tpu.vector_store %arg6[%c0_11, %c0_12, %c0_13], %14 {strides = array<i32>} : memref<1x1x128xf32, #tpu.memory_space<vmem>>, vector<1x1x128xf32>,
    %15 = arith.mulf %3, %3 : vector<512x128xf32>
    %cst_14 = arith.constant dense<0.000000e+00> : vector<128xf32>
    %16 = vector.multi_reduction <add>, %15, %cst_14 [0] : vector<512x128xf32> to vector<128xf32>
    %17 = vector.shape_cast %16 : vector<128xf32> to vector<1x128xf32>
    %c0_15 = arith.constant 0 : index
    %c0_16 = arith.constant 0 : index
    %c0_17 = arith.constant 0 : index
    %18 = vector.load %arg7[%c0_15, %c0_16, %c0_17] : memref<1x1x128xf32, #tpu.memory_space<vmem>>, vector<1x1x128xf32>
    %19 = vector.shape_cast %18 : vector<1x1x128xf32> to vector<1x128xf32>
    %20 = vector.shape_cast %17 : vector<1x128xf32> to vector<1x1x128xf32>
    tpu.vector_store %arg7[%c0_15, %c0_16, %c0_17], %20 {strides = array<i32>} : memref<1x1x128xf32, #tpu.memory_space<vmem>>, vector<1x1x128xf32>,
    %cst_18 = arith.constant dense<0.000000e+00> : vector<128xf32>
    %21 = vector.multi_reduction <add>, %5, %cst_18 [0] : vector<512x128xf32> to vector<128xf32>
    %22 = vector.shape_cast %21 : vector<128xf32> to vector<1x128xf32>
    %c0_19 = arith.constant 0 : index
    %c0_20 = arith.constant 0 : index
    %c0_21 = arith.constant 0 : index
    %23 = vector.load %arg8[%c0_19, %c0_20, %c0_21] : memref<1x1x128xf32, #tpu.memory_space<vmem>>, vector<1x1x128xf32>
    %24 = vector.shape_cast %23 : vector<1x1x128xf32> to vector<1x128xf32>
    %25 = vector.shape_cast %22 : vector<1x128xf32> to vector<1x1x128xf32>
    tpu.vector_store %arg8[%c0_19, %c0_20, %c0_21], %25 {strides = array<i32>} : memref<1x1x128xf32, #tpu.memory_space<vmem>>, vector<1x1x128xf32>,
    %26 = arith.mulf %5, %5 : vector<512x128xf32>
    %cst_22 = arith.constant dense<0.000000e+00> : vector<128xf32>
    %27 = vector.multi_reduction <add>, %26, %cst_22 [0] : vector<512x128xf32> to vector<128xf32>
    %28 = vector.shape_cast %27 : vector<128xf32> to vector<1x128xf32>
    %c0_23 = arith.constant 0 : index
    %c0_24 = arith.constant 0 : index
    %c0_25 = arith.constant 0 : index
    %29 = vector.load %arg9[%c0_23, %c0_24, %c0_25] : memref<1x1x128xf32, #tpu.memory_space<vmem>>, vector<1x1x128xf32>
    %30 = vector.shape_cast %29 : vector<1x1x128xf32> to vector<1x128xf32>
    %31 = vector.shape_cast %28 : vector<1x128xf32> to vector<1x1x128xf32>
    tpu.vector_store %arg9[%c0_23, %c0_24, %c0_25], %31 {strides = array<i32>} : memref<1x1x128xf32, #tpu.memory_space<vmem>>, vector<1x1x128xf32>,
    return
  }
  func.func @transform_0(%arg0: i32) -> (i32, i32) {
    %c0_i32 = arith.constant 0 : i32
    %c0_i32_0 = arith.constant 0 : i32
    return %arg0, %c0_i32 : i32, i32
  }
  func.func @transform_1(%arg0: i32) -> (i32, i32) {
    %c0_i32 = arith.constant 0 : i32
    %c0_i32_0 = arith.constant 0 : i32
    %c0_i32_1 = arith.constant 0 : i32
    return %c0_i32, %c0_i32_0 : i32, i32
  }
  func.func @transform_2(%arg0: i32) -> (i32, i32) {
    %c0_i32 = arith.constant 0 : i32
    %c0_i32_0 = arith.constant 0 : i32
    %c0_i32_1 = arith.constant 0 : i32
    return %c0_i32, %c0_i32_0 : i32, i32
  }
  func.func @transform_3(%arg0: i32) -> (i32, i32) {
    %c0_i32 = arith.constant 0 : i32
    %c0_i32_0 = arith.constant 0 : i32
    return %arg0, %c0_i32 : i32, i32
  }
  func.func @transform_4(%arg0: i32) -> (i32, i32) {
    %c0_i32 = arith.constant 0 : i32
    %c0_i32_0 = arith.constant 0 : i32
    return %arg0, %c0_i32 : i32, i32
  }
  func.func @transform_5(%arg0: i32) -> (i32, i32, i32) {
    %c0_i32 = arith.constant 0 : i32
    %c0_i32_0 = arith.constant 0 : i32
    %c0_i32_1 = arith.constant 0 : i32
    return %arg0, %c0_i32, %c0_i32_0 : i32, i32, i32
  }
  func.func @transform_6(%arg0: i32) -> (i32, i32, i32) {
    %c0_i32 = arith.constant 0 : i32
    %c0_i32_0 = arith.constant 0 : i32
    %c0_i32_1 = arith.constant 0 : i32
    return %arg0, %c0_i32, %c0_i32_0 : i32, i32, i32
  }
  func.func @transform_7(%arg0: i32) -> (i32, i32, i32) {
    %c0_i32 = arith.constant 0 : i32
    %c0_i32_0 = arith.constant 0 : i32
    %c0_i32_1 = arith.constant 0 : i32
    return %arg0, %c0_i32, %c0_i32_0 : i32, i32, i32
  }
  func.func @transform_8(%arg0: i32) -> (i32, i32, i32) {
    %c0_i32 = arith.constant 0 : i32
    %c0_i32_0 = arith.constant 0 : i32
    %c0_i32_1 = arith.constant 0 : i32
    return %arg0, %c0_i32, %c0_i32_0 : i32, i32, i32
  }
}

module attributes {stable_mosaic.version = 11 : i64} {
  func.func @_bn_relu_matmul_stats_kernel(%arg0: i32, %arg1: memref<512x128xbf16, #tpu.memory_space<vmem>>, %arg2: memref<1x128xf32, #tpu.memory_space<vmem>>, %arg3: memref<1x128xf32, #tpu.memory_space<vmem>>, %arg4: memref<128x128xbf16, #tpu.memory_space<vmem>>, %arg5: memref<512x128xbf16, #tpu.memory_space<vmem>>, %arg6: memref<1x1x128xf32, #tpu.memory_space<vmem>>, %arg7: memref<1x1x128xf32, #tpu.memory_space<vmem>>) attributes {dimension_semantics = [#tpu.dimension_semantics<parallel>], iteration_bounds = array<i64: 1>, scalar_prefetch = 0 : i64, scratch_operands = 0 : i64, tpu.core_type = #tpu.core_type<tc>, window_params = [{transform_indices = @transform_0, window_bounds = array<i64: 512, 128>}, {pipeline_mode = #tpu.pipeline_mode<synchronous>, transform_indices = @transform_1, window_bounds = array<i64: 1, 128>}, {pipeline_mode = #tpu.pipeline_mode<synchronous>, transform_indices = @transform_2, window_bounds = array<i64: 1, 128>}, {pipeline_mode = #tpu.pipeline_mode<synchronous>, transform_indices = @transform_3, window_bounds = array<i64: 128, 128>}, {transform_indices = @transform_4, window_bounds = array<i64: 512, 128>}, {transform_indices = @transform_5, window_bounds = array<i64: 1, 1, 128>}, {transform_indices = @transform_6, window_bounds = array<i64: 1, 1, 128>}]} {
    %c0 = arith.constant 0 : index
    %c0_0 = arith.constant 0 : index
    %0 = vector.load %arg1[%c0, %c0_0] : memref<512x128xbf16, #tpu.memory_space<vmem>>, vector<512x128xbf16>
    %1 = arith.extf %0 : vector<512x128xbf16> to vector<512x128xf32>
    %c0_1 = arith.constant 0 : index
    %c0_2 = arith.constant 0 : index
    %2 = vector.load %arg2[%c0_1, %c0_2] : memref<1x128xf32, #tpu.memory_space<vmem>>, vector<1x128xf32>
    %3 = vector.broadcast %2 : vector<1x128xf32> to vector<512x128xf32>
    %4 = arith.mulf %1, %3 : vector<512x128xf32>
    %c0_3 = arith.constant 0 : index
    %c0_4 = arith.constant 0 : index
    %5 = vector.load %arg3[%c0_3, %c0_4] : memref<1x128xf32, #tpu.memory_space<vmem>>, vector<1x128xf32>
    %6 = vector.broadcast %5 : vector<1x128xf32> to vector<512x128xf32>
    %7 = arith.addf %4, %6 : vector<512x128xf32>
    %cst = arith.constant 0.000000e+00 : f32
    %8 = vector.broadcast %cst : f32 to vector<512x128xf32>
    %9 = arith.maximumf %7, %8 : vector<512x128xf32>
    %10 = arith.truncf %9 : vector<512x128xf32> to vector<512x128xbf16>
    %c0_5 = arith.constant 0 : index
    %c0_6 = arith.constant 0 : index
    %11 = vector.load %arg4[%c0_5, %c0_6] : memref<128x128xbf16, #tpu.memory_space<vmem>>, vector<128x128xbf16>
    %cst_7 = arith.constant dense<0.000000e+00> : vector<512x128xf32>
    %12 = tpu.matmul %10, %11, %cst_7 {dimension_numbers = #tpu.dot_dimension_numbers<[1], [0], [0], [1], [0, 0, 1, 1], [], []>} : vector<512x128xbf16>, vector<128x128xbf16>, vector<512x128xf32> -> vector<512x128xf32>
    %13 = arith.truncf %12 : vector<512x128xf32> to vector<512x128xbf16>
    %c0_8 = arith.constant 0 : index
    %c0_9 = arith.constant 0 : index
    %14 = vector.load %arg5[%c0_8, %c0_9] : memref<512x128xbf16, #tpu.memory_space<vmem>>, vector<512x128xbf16>
    tpu.vector_store %arg5[%c0_8, %c0_9], %13 {strides = array<i32>} : memref<512x128xbf16, #tpu.memory_space<vmem>>, vector<512x128xbf16>,
    %cst_10 = arith.constant dense<0.000000e+00> : vector<128xf32>
    %15 = vector.multi_reduction <add>, %12, %cst_10 [0] : vector<512x128xf32> to vector<128xf32>
    %16 = vector.shape_cast %15 : vector<128xf32> to vector<1x128xf32>
    %c0_11 = arith.constant 0 : index
    %c0_12 = arith.constant 0 : index
    %c0_13 = arith.constant 0 : index
    %17 = vector.load %arg6[%c0_11, %c0_12, %c0_13] : memref<1x1x128xf32, #tpu.memory_space<vmem>>, vector<1x1x128xf32>
    %18 = vector.shape_cast %17 : vector<1x1x128xf32> to vector<1x128xf32>
    %19 = vector.shape_cast %16 : vector<1x128xf32> to vector<1x1x128xf32>
    tpu.vector_store %arg6[%c0_11, %c0_12, %c0_13], %19 {strides = array<i32>} : memref<1x1x128xf32, #tpu.memory_space<vmem>>, vector<1x1x128xf32>,
    %20 = arith.mulf %12, %12 : vector<512x128xf32>
    %cst_14 = arith.constant dense<0.000000e+00> : vector<128xf32>
    %21 = vector.multi_reduction <add>, %20, %cst_14 [0] : vector<512x128xf32> to vector<128xf32>
    %22 = vector.shape_cast %21 : vector<128xf32> to vector<1x128xf32>
    %c0_15 = arith.constant 0 : index
    %c0_16 = arith.constant 0 : index
    %c0_17 = arith.constant 0 : index
    %23 = vector.load %arg7[%c0_15, %c0_16, %c0_17] : memref<1x1x128xf32, #tpu.memory_space<vmem>>, vector<1x1x128xf32>
    %24 = vector.shape_cast %23 : vector<1x1x128xf32> to vector<1x128xf32>
    %25 = vector.shape_cast %22 : vector<1x128xf32> to vector<1x1x128xf32>
    tpu.vector_store %arg7[%c0_15, %c0_16, %c0_17], %25 {strides = array<i32>} : memref<1x1x128xf32, #tpu.memory_space<vmem>>, vector<1x1x128xf32>,
    return
  }
  func.func @transform_0(%arg0: i32) -> (i32, i32) {
    %c0_i32 = arith.constant 0 : i32
    %c0_i32_0 = arith.constant 0 : i32
    return %arg0, %c0_i32 : i32, i32
  }
  func.func @transform_1(%arg0: i32) -> (i32, i32) {
    %c0_i32 = arith.constant 0 : i32
    %c0_i32_0 = arith.constant 0 : i32
    %c0_i32_1 = arith.constant 0 : i32
    return %c0_i32, %c0_i32_0 : i32, i32
  }
  func.func @transform_2(%arg0: i32) -> (i32, i32) {
    %c0_i32 = arith.constant 0 : i32
    %c0_i32_0 = arith.constant 0 : i32
    %c0_i32_1 = arith.constant 0 : i32
    return %c0_i32, %c0_i32_0 : i32, i32
  }
  func.func @transform_3(%arg0: i32) -> (i32, i32) {
    %c0_i32 = arith.constant 0 : i32
    %c0_i32_0 = arith.constant 0 : i32
    %c0_i32_1 = arith.constant 0 : i32
    return %c0_i32, %c0_i32_0 : i32, i32
  }
  func.func @transform_4(%arg0: i32) -> (i32, i32) {
    %c0_i32 = arith.constant 0 : i32
    %c0_i32_0 = arith.constant 0 : i32
    return %arg0, %c0_i32 : i32, i32
  }
  func.func @transform_5(%arg0: i32) -> (i32, i32, i32) {
    %c0_i32 = arith.constant 0 : i32
    %c0_i32_0 = arith.constant 0 : i32
    %c0_i32_1 = arith.constant 0 : i32
    return %arg0, %c0_i32, %c0_i32_0 : i32, i32, i32
  }
  func.func @transform_6(%arg0: i32) -> (i32, i32, i32) {
    %c0_i32 = arith.constant 0 : i32
    %c0_i32_0 = arith.constant 0 : i32
    %c0_i32_1 = arith.constant 0 : i32
    return %arg0, %c0_i32, %c0_i32_0 : i32, i32, i32
  }
}

module attributes {stable_mosaic.version = 11 : i64} {
  func.func @_bn_add_relu_kernel(%arg0: i32, %arg1: memref<512x128xbf16, #tpu.memory_space<vmem>>, %arg2: memref<1x128xf32, #tpu.memory_space<vmem>>, %arg3: memref<1x128xf32, #tpu.memory_space<vmem>>, %arg4: memref<512x128xbf16, #tpu.memory_space<vmem>>, %arg5: memref<1x128xf32, #tpu.memory_space<vmem>>, %arg6: memref<1x128xf32, #tpu.memory_space<vmem>>, %arg7: memref<512x16xf32, #tpu.memory_space<vmem>>, %arg8: memref<512x16xf32, #tpu.memory_space<vmem>>) attributes {dimension_semantics = [#tpu.dimension_semantics<parallel>], iteration_bounds = array<i64: 1>, scalar_prefetch = 0 : i64, scratch_operands = 0 : i64, tpu.core_type = #tpu.core_type<tc>, window_params = [{transform_indices = @transform_0, window_bounds = array<i64: 512, 128>}, {pipeline_mode = #tpu.pipeline_mode<synchronous>, transform_indices = @transform_1, window_bounds = array<i64: 1, 128>}, {pipeline_mode = #tpu.pipeline_mode<synchronous>, transform_indices = @transform_2, window_bounds = array<i64: 1, 128>}, {transform_indices = @transform_3, window_bounds = array<i64: 512, 128>}, {pipeline_mode = #tpu.pipeline_mode<synchronous>, transform_indices = @transform_4, window_bounds = array<i64: 1, 128>}, {pipeline_mode = #tpu.pipeline_mode<synchronous>, transform_indices = @transform_5, window_bounds = array<i64: 1, 128>}, {transform_indices = @transform_6, window_bounds = array<i64: 512, 16>}, {transform_indices = @transform_7, window_bounds = array<i64: 512, 16>}]} {
    %c0 = arith.constant 0 : index
    %c0_0 = arith.constant 0 : index
    %0 = vector.load %arg1[%c0, %c0_0] : memref<512x128xbf16, #tpu.memory_space<vmem>>, vector<512x128xbf16>
    %1 = arith.extf %0 : vector<512x128xbf16> to vector<512x128xf32>
    %c0_1 = arith.constant 0 : index
    %c0_2 = arith.constant 0 : index
    %2 = vector.load %arg2[%c0_1, %c0_2] : memref<1x128xf32, #tpu.memory_space<vmem>>, vector<1x128xf32>
    %3 = vector.broadcast %2 : vector<1x128xf32> to vector<512x128xf32>
    %4 = arith.mulf %1, %3 : vector<512x128xf32>
    %c0_3 = arith.constant 0 : index
    %c0_4 = arith.constant 0 : index
    %5 = vector.load %arg3[%c0_3, %c0_4] : memref<1x128xf32, #tpu.memory_space<vmem>>, vector<1x128xf32>
    %6 = vector.broadcast %5 : vector<1x128xf32> to vector<512x128xf32>
    %7 = arith.addf %4, %6 : vector<512x128xf32>
    %c0_5 = arith.constant 0 : index
    %c0_6 = arith.constant 0 : index
    %8 = vector.load %arg4[%c0_5, %c0_6] : memref<512x128xbf16, #tpu.memory_space<vmem>>, vector<512x128xbf16>
    %9 = arith.extf %8 : vector<512x128xbf16> to vector<512x128xf32>
    %c0_7 = arith.constant 0 : index
    %c0_8 = arith.constant 0 : index
    %10 = vector.load %arg5[%c0_7, %c0_8] : memref<1x128xf32, #tpu.memory_space<vmem>>, vector<1x128xf32>
    %11 = vector.broadcast %10 : vector<1x128xf32> to vector<512x128xf32>
    %12 = arith.mulf %9, %11 : vector<512x128xf32>
    %13 = arith.addf %7, %12 : vector<512x128xf32>
    %c0_9 = arith.constant 0 : index
    %c0_10 = arith.constant 0 : index
    %14 = vector.load %arg6[%c0_9, %c0_10] : memref<1x128xf32, #tpu.memory_space<vmem>>, vector<1x128xf32>
    %15 = vector.broadcast %14 : vector<1x128xf32> to vector<512x128xf32>
    %16 = arith.addf %13, %15 : vector<512x128xf32>
    %17 = vector.extract_strided_slice %16 {offsets = [0, 0], sizes = [512, 16], strides = [1, 1]} : vector<512x128xf32> to vector<512x16xf32>
    %cst = arith.constant 0.000000e+00 : f32
    %18 = vector.broadcast %cst : f32 to vector<512x16xf32>
    %19 = arith.maximumf %17, %18 : vector<512x16xf32>
    %c0_11 = arith.constant 0 : index
    %c0_12 = arith.constant 0 : index
    %20 = vector.load %arg7[%c0_11, %c0_12] : memref<512x16xf32, #tpu.memory_space<vmem>>, vector<512x16xf32>
    tpu.vector_store %arg7[%c0_11, %c0_12], %19 {strides = array<i32>} : memref<512x16xf32, #tpu.memory_space<vmem>>, vector<512x16xf32>,
    %c0_13 = arith.constant 0 : index
    %c0_14 = arith.constant 0 : index
    %21 = vector.load %arg8[%c0_13, %c0_14] : memref<512x16xf32, #tpu.memory_space<vmem>>, vector<512x16xf32>
    tpu.vector_store %arg8[%c0_13, %c0_14], %17 {strides = array<i32>} : memref<512x16xf32, #tpu.memory_space<vmem>>, vector<512x16xf32>,
    return
  }
  func.func @transform_0(%arg0: i32) -> (i32, i32) {
    %c0_i32 = arith.constant 0 : i32
    %c0_i32_0 = arith.constant 0 : i32
    return %arg0, %c0_i32 : i32, i32
  }
  func.func @transform_1(%arg0: i32) -> (i32, i32) {
    %c0_i32 = arith.constant 0 : i32
    %c0_i32_0 = arith.constant 0 : i32
    %c0_i32_1 = arith.constant 0 : i32
    return %c0_i32, %c0_i32_0 : i32, i32
  }
  func.func @transform_2(%arg0: i32) -> (i32, i32) {
    %c0_i32 = arith.constant 0 : i32
    %c0_i32_0 = arith.constant 0 : i32
    %c0_i32_1 = arith.constant 0 : i32
    return %c0_i32, %c0_i32_0 : i32, i32
  }
  func.func @transform_3(%arg0: i32) -> (i32, i32) {
    %c0_i32 = arith.constant 0 : i32
    %c0_i32_0 = arith.constant 0 : i32
    return %arg0, %c0_i32 : i32, i32
  }
  func.func @transform_4(%arg0: i32) -> (i32, i32) {
    %c0_i32 = arith.constant 0 : i32
    %c0_i32_0 = arith.constant 0 : i32
    %c0_i32_1 = arith.constant 0 : i32
    return %c0_i32, %c0_i32_0 : i32, i32
  }
  func.func @transform_5(%arg0: i32) -> (i32, i32) {
    %c0_i32 = arith.constant 0 : i32
    %c0_i32_0 = arith.constant 0 : i32
    %c0_i32_1 = arith.constant 0 : i32
    return %c0_i32, %c0_i32_0 : i32, i32
  }
  func.func @transform_6(%arg0: i32) -> (i32, i32) {
    %c0_i32 = arith.constant 0 : i32
    %c0_i32_0 = arith.constant 0 : i32
    return %arg0, %c0_i32 : i32, i32
  }
  func.func @transform_7(%arg0: i32) -> (i32, i32) {
    %c0_i32 = arith.constant 0 : i32
    %c0_i32_0 = arith.constant 0 : i32
    return %arg0, %c0_i32 : i32, i32
  }
}

</mosaic_0001>

<bundles_post_ra>
// kernel: bottleneck_forward.7
= control target key start
LH: loop header
LB: loop body
LE: loop exit
PB: predicated region body
PF: predicated region fallthrough
CT: control target
= control target key end

     0   :  { %13 = vsyncpa [#allocation3], 0  ;;  %vm695_vm0 = vcmask 130048   ;;  %s1896_s0 = inlined_call_operand.vmem [shape: bf16[512,128], index: 0, kind: input, shape index: {}]   ;;  %s1897_s1 = inlined_call_operand.vmem [shape: f32[1,128], index: 1, kind: input, shape index: {}]   ;;  %s1898_s2 = inlined_call_operand.vmem [shape: f32[1,128], index: 2, kind: input, shape index: {}]   ;;  %s1899_s3 = inlined_call_operand.vmem [shape: bf16[512,128], index: 3, kind: input, shape index: {}]   ;;  %s1900_s4 = inlined_call_operand.vmem [shape: f32[1,128], index: 4, kind: input, shape index: {}]   ;;  %s1901_s5 = inlined_call_operand.vmem [shape: f32[1,128], index: 5, kind: input, shape index: {}]   ;;  %s1902_s6 = inlined_call_operand.hbm [shape: f32[512,16], index: 6, kind: output, shape index: {0}]   ;;  %s1903_s7 = inlined_call_operand.hbm [shape: f32[512,16], index: 7, kind: output, shape index: {1}]  }
   0x1   :  { %v861_v0 = vld [vmem:[%s1896_s0] sm:$0xff]   ;;  %v1116_v9 = vld [vmem:[%s1896_s0 + $0x8] sm:$0xff]   ;;  %v1117_v15 = vld [vmem:[%s1896_s0 + $0x10] sm:$0xff]  }
   0x2   :  { %v1280_v1 = vld [vmem:[%s1897_s1] ss:$0 sm:$0xff]  ;;  %v862_v2 = vunpack.c.l.bf16 %v861_v0  ;;  %v863_v5 = vunpack.c.h.bf16 %v861_v0  ;;  %v1147_v10 = vld [vmem:[%s1899_s3 + $0x8] sm:$0xff]   ;;  %v866_v13 = vunpack.c.l.bf16 %v1116_v9  ;;  %v1148_v16 = vld [vmem:[%s1899_s3 + $0x10] sm:$0xff]   ;;  %v867_v19 = vunpack.c.h.bf16 %v1116_v9 }
   0x3   :  { %v989_v3 = vld [vmem:[%s1899_s3] sm:$0xff]   ;;  %v994_v14 = vunpack.c.l.bf16 %v1147_v10  ;;  %v995_v20 = vunpack.c.h.bf16 %v1147_v10  ;;  %v870_v28 = vunpack.c.l.bf16 %v1117_v15  ;;  %v998_v29 = vunpack.c.l.bf16 %v1148_v16  ;;  %v1118_v34 = vld [vmem:[%s1896_s0 + $0x18] sm:$0xff]   ;;  %v1120_v9 = vld [vmem:[%s1896_s0 + $0x28] sm:$0xff]  }
   0x4   :  { %v1288_v4 = vld [vmem:[%s1900_s4] ss:$0 sm:$0xff]  ;;  %v990_v7 = vunpack.c.l.bf16 %v989_v3  ;;  %v991_v8 = vunpack.c.h.bf16 %v989_v3  ;;  %v162_v11 = vmul.f32 %v862_v2, %v1280_v1  ;;  %v163_v12 = vmul.f32 %v863_v5, %v1280_v1  ;;  %v1149_v43 = vld [vmem:[%s1899_s3 + $0x18] sm:$0xff]  }
   0x5   :  { %v1293_v6 = vld [vmem:[%s1898_s2] ss:$0 sm:$0xff]  ;;  %v164_v23 = vmul.f32 %v866_v13, %v1280_v1  ;;  %v434_v24 = vmul.f32 %v994_v14, %v1288_v4  ;;  %v165_v26 = vmul.f32 %v867_v19, %v1280_v1  ;;  %v435_v27 = vmul.f32 %v995_v20, %v1288_v4  ;;  %v1151_v14 = vld [vmem:[%s1899_s3 + $0x28] sm:$0xff]  }
   0x6   :  { %v432_v17 = vmul.f32 %v990_v7, %v1288_v4  ;;  %v433_v18 = vmul.f32 %v991_v8, %v1288_v4  ;;  %v233_v21 = vadd.f32 %v1293_v6, %v162_v11  ;;  %v234_v22 = vadd.f32 %v1293_v6, %v163_v12  ;;  %v1318_v25 = vld [vmem:[%s1901_s5] ss:$0 sm:$0xff] }
   0x7   :  { %v235_v32 = vadd.f32 %v1293_v6, %v164_v23  ;;  %v871_v33 = vunpack.c.h.bf16 %v1117_v15  ;;  %v236_v35 = vadd.f32 %v1293_v6, %v165_v26  ;;  %v166_v36 = vmul.f32 %v870_v28, %v1280_v1  ;;  %v1119_v56 = vld [vmem:[%s1896_s0 + $0x20] sm:$0xff]   ;;  %v1121_v28 = vld [vmem:[%s1896_s0 + $0x30] sm:$0xff]  }
   0x8   :  { %v496_v30 = vadd.f32 %v432_v17, %v233_v21  ;;  %v497_v31 = vadd.f32 %v433_v18, %v234_v22  ;;  %v436_v37 = vmul.f32 %v998_v29, %v1288_v4  ;;  %v999_v38 = vunpack.c.h.bf16 %v1148_v16  ;;  %v1150_v61 = vld [vmem:[%s1899_s3 + $0x20] sm:$0xff]  }
   0x9   :  { %v498_v41 = vadd.f32 %v434_v24, %v235_v32  ;;  %v167_v42 = vmul.f32 %v871_v33, %v1280_v1  ;;  %v499_v44 = vadd.f32 %v435_v27, %v236_v35  ;;  %v237_v45 = vadd.f32 %v1293_v6, %v166_v36  ;;  %v1152_v33 = vld [vmem:[%s1899_s3 + $0x30] sm:$0xff]  }
   0xa   :  { %v567_v39 = vadd.f32 %v1318_v25, %v496_v30  ;;  %v568_v40 = vadd.f32 %v1318_v25, %v497_v31  ;;  %v437_v46 = vmul.f32 %v999_v38, %v1288_v4  ;;  %v874_v47 = vunpack.c.l.bf16 %v1118_v34 }
   0xb   :  { %v569_v50 = vadd.f32 %v1318_v25, %v498_v41  ;;  %v238_v51 = vadd.f32 %v1293_v6, %v167_v42  ;;  %v570_v52 = vadd.f32 %v1318_v25, %v499_v44  ;;  %v500_v53 = vadd.f32 %v436_v37, %v237_v45 }
   0xc   :  { %v631_v48 = vmax.f32 %v567_v39, 0.0  ;;  %760 = vst.msk [vmem:[#allocation4] sm:$0xff] %vm695_vm0, %v567_v39  ;;  %v632_v49 = vmax.f32 %v568_v40, 0.0  ;;  %761 = vst.msk [vmem:[#allocation4 + $0x8] sm:$0xff] %vm695_vm0, %v568_v40  ;;  %v168_v54 = vmul.f32 %v874_v47, %v1280_v1  ;;  %v1002_v55 = vunpack.c.l.bf16 %v1149_v43 }
   0xd   :  { %v633_v57 = vmax.f32 %v569_v50, 0.0  ;;  %762 = vst.msk [vmem:[#allocation4 + $0x10] sm:$0xff] %vm695_vm0, %v569_v50  ;;  %v501_v58 = vadd.f32 %v437_v46, %v238_v51  ;;  %v875_v59 = vunpack.c.h.bf16 %v1118_v34  ;;  %v1003_v60 = vunpack.c.h.bf16 %v1149_v43  ;;  %763 = vst.msk [vmem:[#allocation4 + $0x18] sm:$0xff] %vm695_vm0, %v570_v52 }
   0xe   :  { %696 = vst.msk [vmem:[#allocation2] sm:$0xff] %vm695_vm0, %v631_v48  ;;  %697 = vst.msk [vmem:[#allocation2 + $0x8] sm:$0xff] %vm695_vm0, %v632_v49  ;;  %v634_v62 = vmax.f32 %v570_v52, 0.0  ;;  %v571_v63 = vadd.f32 %v1318_v25, %v500_v53  ;;  %v239_v0 = vadd.f32 %v1293_v6, %v168_v54  ;;  %v438_v2 = vmul.f32 %v1002_v55, %v1288_v4 }
   0xf   :  { %698 = vst.msk [vmem:[#allocation2 + $0x10] sm:$0xff] %vm695_vm0, %v633_v57  ;;  %v572_v3 = vadd.f32 %v1318_v25, %v501_v58  ;;  %v169_v5 = vmul.f32 %v875_v59, %v1280_v1  ;;  %v439_v7 = vmul.f32 %v1003_v60, %v1288_v4  ;;  %v878_v8 = vunpack.c.l.bf16 %v1119_v56 }
  0x10   :  { %699 = vst.msk [vmem:[#allocation2 + $0x18] sm:$0xff] %vm695_vm0, %v634_v62  ;;  %v635_v10 = vmax.f32 %v571_v63, 0.0  ;;  %764 = vst.msk [vmem:[#allocation4 + $0x20] sm:$0xff] %vm695_vm0, %v571_v63  ;;  %v502_v11 = vadd.f32 %v438_v2, %v239_v0  ;;  %v1006_v12 = vunpack.c.l.bf16 %v1150_v61  ;;  %v879_v13 = vunpack.c.h.bf16 %v1119_v56 }
  0x11   :  { %v636_v15 = vmax.f32 %v572_v3, 0.0  ;;  %765 = vst.msk [vmem:[#allocation4 + $0x28] sm:$0xff] %vm695_vm0, %v572_v3  ;;  %v240_v16 = vadd.f32 %v1293_v6, %v169_v5  ;;  %v170_v17 = vmul.f32 %v878_v8, %v1280_v1  ;;  %v1007_v18 = vunpack.c.h.bf16 %v1150_v61 }
  0x12   :  { %700 = vst.msk [vmem:[#allocation2 + $0x20] sm:$0xff] %vm695_vm0, %v635_v10  ;;  %v573_v19 = vadd.f32 %v1318_v25, %v502_v11  ;;  %v440_v20 = vmul.f32 %v1006_v12, %v1288_v4  ;;  %v171_v21 = vmul.f32 %v879_v13, %v1280_v1  ;;  %v882_v22 = vunpack.c.l.bf16 %v1120_v9 }
  0x13   :  { %701 = vst.msk [vmem:[#allocation2 + $0x28] sm:$0xff] %vm695_vm0, %v636_v15  ;;  %v503_v23 = vadd.f32 %v439_v7, %v240_v16  ;;  %v241_v24 = vadd.f32 %v1293_v6, %v170_v17  ;;  %v441_v26 = vmul.f32 %v1007_v18, %v1288_v4  ;;  %v1010_v27 = vunpack.c.l.bf16 %v1151_v14 }
  0x14   :  { %v637_v29 = vmax.f32 %v573_v19, 0.0  ;;  %766 = vst.msk [vmem:[#allocation4 + $0x30] sm:$0xff] %vm695_vm0, %v573_v19  ;;  %v242_v30 = vadd.f32 %v1293_v6, %v171_v21  ;;  %v172_v31 = vmul.f32 %v882_v22, %v1280_v1  ;;  %v883_v32 = vunpack.c.h.bf16 %v1120_v9 }
  0x15   :  { %v574_v34 = vadd.f32 %v1318_v25, %v503_v23  ;;  %v504_v35 = vadd.f32 %v440_v20, %v241_v24  ;;  %v442_v36 = vmul.f32 %v1010_v27, %v1288_v4  ;;  %v1011_v37 = vunpack.c.h.bf16 %v1151_v14 }
  0x16   :  { %702 = vst.msk [vmem:[#allocation2 + $0x30] sm:$0xff] %vm695_vm0, %v637_v29  ;;  %v505_v38 = vadd.f32 %v441_v26, %v242_v30  ;;  %v243_v39 = vadd.f32 %v1293_v6, %v172_v31  ;;  %v173_v40 = vmul.f32 %v883_v32, %v1280_v1  ;;  %v886_v41 = vunpack.c.l.bf16 %v1121_v28 }
  0x17   :  { %14 = vsyncpa [#allocation5], 0  ;;  %v638_v42 = vmax.f32 %v574_v34, 0.0  ;;  %767 = vst.msk [vmem:[#allocation4 + $0x38] sm:$0xff] %vm695_vm0, %v574_v34  ;;  %v575_v43 = vadd.f32 %v1318_v25, %v504_v35  ;;  %v443_v44 = vmul.f32 %v1011_v37, %v1288_v4  ;;  %v1014_v45 = vunpack.c.l.bf16 %v1152_v33  ;;  %v1122_v50 = vld [vmem:[%s1896_s0 + $0x38] sm:$0xff]   ;;  %v1123_v0 = vld [vmem:[%s1896_s0 + $0x40] sm:$0xff]  }
  0x18   :  { %v576_v46 = vadd.f32 %v1318_v25, %v505_v38  ;;  %v506_v47 = vadd.f32 %v442_v36, %v243_v39  ;;  %v244_v48 = vadd.f32 %v1293_v6, %v173_v40  ;;  %v174_v49 = vmul.f32 %v886_v41, %v1280_v1  ;;  %v1153_v51 = vld [vmem:[%s1899_s3 + $0x38] sm:$0xff]   ;;  %v1154_v8 = vld [vmem:[%s1899_s3 + $0x40] sm:$0xff]   ;;  %v1124_v21 = vld [vmem:[%s1896_s0 + $0x48] sm:$0xff]   ;;  %s1231_s25 = smov [#allocation2]  }
  0x19   :  { %703 = vst.msk [vmem:[#allocation2 + $0x38] sm:$0xff] %vm695_vm0, %v638_v42  ;;  %v639_v52 = vmax.f32 %v575_v43, 0.0  ;;  %768 = vst.msk [vmem:[#allocation4 + $0x40] sm:$0xff] %vm695_vm0, %v575_v43  ;;  %v444_v53 = vmul.f32 %v1014_v45, %v1288_v4  ;;  %v887_v54 = vunpack.c.h.bf16 %v1121_v28  ;;  %v1015_v55 = vunpack.c.h.bf16 %v1152_v33  ;;  %v1155_v27 = vld [vmem:[%s1899_s3 + $0x48] sm:$0xff]   ;;  %v1156_v45 = vld [vmem:[%s1899_s3 + $0x50] sm:$0xff]  }
  0x1a   :  { %v640_v56 = vmax.f32 %v576_v46, 0.0  ;;  %769 = vst.msk [vmem:[#allocation4 + $0x48] sm:$0xff] %vm695_vm0, %v576_v46  ;;  %v577_v57 = vadd.f32 %v1318_v25, %v506_v47  ;;  %v507_v58 = vadd.f32 %v443_v44, %v244_v48  ;;  %v245_v59 = vadd.f32 %v1293_v6, %v174_v49  ;;  %v1125_v44 = vld [vmem:[%s1896_s0 + $0x50] sm:$0xff]  }
  0x1b   :  { %704 = vst.msk [vmem:[#allocation2 + $0x40] sm:$0xff] %vm695_vm0, %v639_v52  ;;  %v175_v60 = vmul.f32 %v887_v54, %v1280_v1  ;;  %v445_v61 = vmul.f32 %v1015_v55, %v1288_v4  ;;  %v890_v62 = vunpack.c.l.bf16 %v1122_v50  ;;  %v1018_v63 = vunpack.c.l.bf16 %v1153_v51 }
  0x1c   :  { %705 = vst.msk [vmem:[#allocation2 + $0x48] sm:$0xff] %vm695_vm0, %v640_v56  ;;  %v641_v2 = vmax.f32 %v577_v57, 0.0  ;;  %770 = vst.msk [vmem:[#allocation4 + $0x50] sm:$0xff] %vm695_vm0, %v577_v57  ;;  %v578_v3 = vadd.f32 %v1318_v25, %v507_v58  ;;  %v508_v5 = vadd.f32 %v444_v53, %v245_v59  ;;  %v891_v7 = vunpack.c.h.bf16 %v1122_v50  ;;  %v1126_v58 = vld [vmem:[%s1896_s0 + $0x58] sm:$0xff]  }
  0x1d   :  { %v246_v9 = vadd.f32 %v1293_v6, %v175_v60  ;;  %v176_v10 = vmul.f32 %v890_v62, %v1280_v1  ;;  %v446_v11 = vmul.f32 %v1018_v63, %v1288_v4  ;;  %v1019_v12 = vunpack.c.h.bf16 %v1153_v51  ;;  %v1157_v63 = vld [vmem:[%s1899_s3 + $0x58] sm:$0xff]  }
  0x1e   :  { %706 = vst.msk [vmem:[#allocation2 + $0x50] sm:$0xff] %vm695_vm0, %v641_v2  ;;  %v642_v13 = vmax.f32 %v578_v3, 0.0  ;;  %771 = vst.msk [vmem:[#allocation4 + $0x58] sm:$0xff] %vm695_vm0, %v578_v3  ;;  %v579_v14 = vadd.f32 %v1318_v25, %v508_v5  ;;  %v177_v15 = vmul.f32 %v891_v7, %v1280_v1  ;;  %v894_v16 = vunpack.c.l.bf16 %v1123_v0 }
  0x1f   :  { %v509_v17 = vadd.f32 %v445_v61, %v246_v9  ;;  %v247_v18 = vadd.f32 %v1293_v6, %v176_v10  ;;  %v447_v19 = vmul.f32 %v1019_v12, %v1288_v4  ;;  %v1022_v20 = vunpack.c.l.bf16 %v1154_v8 }
  0x20   :  { %707 = vst.msk [vmem:[#allocation2 + $0x58] sm:$0xff] %vm695_vm0, %v642_v13  ;;  %v643_v22 = vmax.f32 %v579_v14, 0.0  ;;  %772 = vst.msk [vmem:[#allocation4 + $0x60] sm:$0xff] %vm695_vm0, %v579_v14  ;;  %v248_v23 = vadd.f32 %v1293_v6, %v177_v15  ;;  %v178_v24 = vmul.f32 %v894_v16, %v1280_v1  ;;  %v895_v26 = vunpack.c.h.bf16 %v1123_v0  ;;  %v1127_v15 = vld [vmem:[%s1896_s0 + $0x60] sm:$0xff]  }
  0x21   :  { %v580_v28 = vadd.f32 %v1318_v25, %v509_v17  ;;  %v510_v29 = vadd.f32 %v446_v11, %v247_v18  ;;  %v448_v30 = vmul.f32 %v1022_v20, %v1288_v4  ;;  %v1023_v31 = vunpack.c.h.bf16 %v1154_v8  ;;  %v1158_v20 = vld [vmem:[%s1899_s3 + $0x60] sm:$0xff]  }
  0x22   :  { %708 = vst.msk [vmem:[#allocation2 + $0x60] sm:$0xff] %vm695_vm0, %v643_v22  ;;  %v511_v32 = vadd.f32 %v447_v19, %v248_v23  ;;  %v249_v33 = vadd.f32 %v1293_v6, %v178_v24  ;;  %v179_v34 = vmul.f32 %v895_v26, %v1280_v1  ;;  %v898_v35 = vunpack.c.l.bf16 %v1124_v21 }
  0x23   :  { %v644_v36 = vmax.f32 %v580_v28, 0.0  ;;  %773 = vst.msk [vmem:[#allocation4 + $0x68] sm:$0xff] %vm695_vm0, %v580_v28  ;;  %v581_v37 = vadd.f32 %v1318_v25, %v510_v29  ;;  %v449_v38 = vmul.f32 %v1023_v31, %v1288_v4  ;;  %v1026_v39 = vunpack.c.l.bf16 %v1155_v27 }
  0x24   :  { %v582_v40 = vadd.f32 %v1318_v25, %v511_v32  ;;  %v512_v41 = vadd.f32 %v448_v30, %v249_v33  ;;  %v250_v42 = vadd.f32 %v1293_v6, %v179_v34  ;;  %v180_v43 = vmul.f32 %v898_v35, %v1280_v1 }
  0x25   :  { %709 = vst.msk [vmem:[#allocation2 + $0x68] sm:$0xff] %vm695_vm0, %v644_v36  ;;  %v645_v46 = vmax.f32 %v581_v37, 0.0  ;;  %774 = vst.msk [vmem:[#allocation4 + $0x70] sm:$0xff] %vm695_vm0, %v581_v37  ;;  %v450_v47 = vmul.f32 %v1026_v39, %v1288_v4  ;;  %v899_v48 = vunpack.c.h.bf16 %v1124_v21  ;;  %v1027_v49 = vunpack.c.h.bf16 %v1155_v27  ;;  %v1159_v39 = vld [vmem:[%s1899_s3 + $0x68] sm:$0xff]  }
  0x26   :  { %v646_v50 = vmax.f32 %v582_v40, 0.0  ;;  %775 = vst.msk [vmem:[#allocation4 + $0x78] sm:$0xff] %vm695_vm0, %v582_v40  ;;  %v583_v51 = vadd.f32 %v1318_v25, %v512_v41  ;;  %v513_v52 = vadd.f32 %v449_v38, %v250_v42  ;;  %v251_v53 = vadd.f32 %v1293_v6, %v180_v43  ;;  %v1128_v38 = vld [vmem:[%s1896_s0 + $0x68] sm:$0xff]  }
  0x27   :  { %710 = vst.msk [vmem:[#allocation2 + $0x70] sm:$0xff] %vm695_vm0, %v645_v46  ;;  %v181_v54 = vmul.f32 %v899_v48, %v1280_v1  ;;  %v451_v55 = vmul.f32 %v1027_v49, %v1288_v4  ;;  %v902_v56 = vunpack.c.l.bf16 %v1125_v44  ;;  %v1030_v57 = vunpack.c.l.bf16 %v1156_v45 }
  0x28   :  { %711 = vst.msk [vmem:[#allocation2 + $0x78] sm:$0xff] %vm695_vm0, %v646_v50  ;;  %v647_v59 = vmax.f32 %v583_v51, 0.0  ;;  %776 = vst.msk [vmem:[#allocation4 + $0x80] sm:$0xff] %vm695_vm0, %v583_v51  ;;  %v584_v60 = vadd.f32 %v1318_v25, %v513_v52  ;;  %v514_v61 = vadd.f32 %v450_v47, %v251_v53  ;;  %v903_v62 = vunpack.c.h.bf16 %v1125_v44  ;;  %v1129_v52 = vld [vmem:[%s1896_s0 + $0x70] sm:$0xff]  }
  0x29   :  { %v252_v0 = vadd.f32 %v1293_v6, %v181_v54  ;;  %v182_v2 = vmul.f32 %v902_v56, %v1280_v1  ;;  %v452_v3 = vmul.f32 %v1030_v57, %v1288_v4  ;;  %v1031_v5 = vunpack.c.h.bf16 %v1156_v45  ;;  %v1160_v57 = vld [vmem:[%s1899_s3 + $0x70] sm:$0xff]  }
  0x2a   :  { %712 = vst.msk [vmem:[#allocation2 + $0x80] sm:$0xff] %vm695_vm0, %v647_v59  ;;  %v648_v7 = vmax.f32 %v584_v60, 0.0  ;;  %777 = vst.msk [vmem:[#allocation4 + $0x88] sm:$0xff] %vm695_vm0, %v584_v60  ;;  %v585_v8 = vadd.f32 %v1318_v25, %v514_v61  ;;  %v183_v9 = vmul.f32 %v903_v62, %v1280_v1  ;;  %v906_v10 = vunpack.c.l.bf16 %v1126_v58 }
  0x2b   :  { %v515_v11 = vadd.f32 %v451_v55, %v252_v0  ;;  %v253_v12 = vadd.f32 %v1293_v6, %v182_v2  ;;  %v453_v13 = vmul.f32 %v1031_v5, %v1288_v4  ;;  %v1034_v14 = vunpack.c.l.bf16 %v1157_v63 }
  0x2c   :  { %713 = vst.msk [vmem:[#allocation2 + $0x88] sm:$0xff] %vm695_vm0, %v648_v7  ;;  %v649_v16 = vmax.f32 %v585_v8, 0.0  ;;  %778 = vst.msk [vmem:[#allocation4 + $0x90] sm:$0xff] %vm695_vm0, %v585_v8  ;;  %v254_v17 = vadd.f32 %v1293_v6, %v183_v9  ;;  %v184_v18 = vmul.f32 %v906_v10, %v1280_v1  ;;  %v907_v19 = vunpack.c.h.bf16 %v1126_v58  ;;  %v1130_v9 = vld [vmem:[%s1896_s0 + $0x78] sm:$0xff]  }
  0x2d   :  { %v586_v21 = vadd.f32 %v1318_v25, %v515_v11  ;;  %v516_v22 = vadd.f32 %v452_v3, %v253_v12  ;;  %v454_v23 = vmul.f32 %v1034_v14, %v1288_v4  ;;  %v1035_v24 = vunpack.c.h.bf16 %v1157_v63  ;;  %v1161_v14 = vld [vmem:[%s1899_s3 + $0x78] sm:$0xff]  }
  0x2e   :  { %714 = vst.msk [vmem:[#allocation2 + $0x90] sm:$0xff] %vm695_vm0, %v649_v16  ;;  %v517_v26 = vadd.f32 %v453_v13, %v254_v17  ;;  %v255_v27 = vadd.f32 %v1293_v6, %v184_v18  ;;  %v185_v28 = vmul.f32 %v907_v19, %v1280_v1  ;;  %v910_v29 = vunpack.c.l.bf16 %v1127_v15 }
  0x2f   :  { %v650_v30 = vmax.f32 %v586_v21, 0.0  ;;  %779 = vst.msk [vmem:[#allocation4 + $0x98] sm:$0xff] %vm695_vm0, %v586_v21  ;;  %v587_v31 = vadd.f32 %v1318_v25, %v516_v22  ;;  %v455_v32 = vmul.f32 %v1035_v24, %v1288_v4  ;;  %v1038_v33 = vunpack.c.l.bf16 %v1158_v20 }
  0x30   :  { %v588_v34 = vadd.f32 %v1318_v25, %v517_v26  ;;  %v518_v35 = vadd.f32 %v454_v23, %v255_v27  ;;  %v256_v36 = vadd.f32 %v1293_v6, %v185_v28  ;;  %v186_v37 = vmul.f32 %v910_v29, %v1280_v1 }
  0x31   :  { %715 = vst.msk [vmem:[#allocation2 + $0x98] sm:$0xff] %vm695_vm0, %v650_v30  ;;  %v651_v40 = vmax.f32 %v587_v31, 0.0  ;;  %780 = vst.msk [vmem:[#allocation4 + $0xa0] sm:$0xff] %vm695_vm0, %v587_v31  ;;  %v456_v41 = vmul.f32 %v1038_v33, %v1288_v4  ;;  %v911_v42 = vunpack.c.h.bf16 %v1127_v15  ;;  %v1039_v43 = vunpack.c.h.bf16 %v1158_v20  ;;  %v1162_v33 = vld [vmem:[%s1899_s3 + $0x80] sm:$0xff]  }
  0x32   :  { %v652_v44 = vmax.f32 %v588_v34, 0.0  ;;  %781 = vst.msk [vmem:[#allocation4 + $0xa8] sm:$0xff] %vm695_vm0, %v588_v34  ;;  %v589_v45 = vadd.f32 %v1318_v25, %v518_v35  ;;  %v519_v46 = vadd.f32 %v455_v32, %v256_v36  ;;  %v257_v47 = vadd.f32 %v1293_v6, %v186_v37  ;;  %v1131_v32 = vld [vmem:[%s1896_s0 + $0x80] sm:$0xff]  }
  0x33   :  { %716 = vst.msk [vmem:[#allocation2 + $0xa0] sm:$0xff] %vm695_vm0, %v651_v40  ;;  %v187_v48 = vmul.f32 %v911_v42, %v1280_v1  ;;  %v457_v49 = vmul.f32 %v1039_v43, %v1288_v4  ;;  %v914_v50 = vunpack.c.l.bf16 %v1128_v38  ;;  %v1042_v51 = vunpack.c.l.bf16 %v1159_v39 }
  0x34   :  { %717 = vst.msk [vmem:[#allocation2 + $0xa8] sm:$0xff] %vm695_vm0, %v652_v44  ;;  %v653_v53 = vmax.f32 %v589_v45, 0.0  ;;  %782 = vst.msk [vmem:[#allocation4 + $0xb0] sm:$0xff] %vm695_vm0, %v589_v45  ;;  %v590_v54 = vadd.f32 %v1318_v25, %v519_v46  ;;  %v520_v55 = vadd.f32 %v456_v41, %v257_v47  ;;  %v915_v56 = vunpack.c.h.bf16 %v1128_v38  ;;  %v1132_v46 = vld [vmem:[%s1896_s0 + $0x88] sm:$0xff]  }
  0x35   :  { %v258_v58 = vadd.f32 %v1293_v6, %v187_v48  ;;  %v188_v59 = vmul.f32 %v914_v50, %v1280_v1  ;;  %v458_v60 = vmul.f32 %v1042_v51, %v1288_v4  ;;  %v1043_v61 = vunpack.c.h.bf16 %v1159_v39  ;;  %v1163_v51 = vld [vmem:[%s1899_s3 + $0x88] sm:$0xff]  }
  0x36   :  { %718 = vst.msk [vmem:[#allocation2 + $0xb0] sm:$0xff] %vm695_vm0, %v653_v53  ;;  %v654_v62 = vmax.f32 %v590_v54, 0.0  ;;  %783 = vst.msk [vmem:[#allocation4 + $0xb8] sm:$0xff] %vm695_vm0, %v590_v54  ;;  %v591_v63 = vadd.f32 %v1318_v25, %v520_v55  ;;  %v189_v0 = vmul.f32 %v915_v56, %v1280_v1  ;;  %v918_v2 = vunpack.c.l.bf16 %v1129_v52 }
  0x37   :  { %v521_v3 = vadd.f32 %v457_v49, %v258_v58  ;;  %v259_v5 = vadd.f32 %v1293_v6, %v188_v59  ;;  %v459_v7 = vmul.f32 %v1043_v61, %v1288_v4  ;;  %v1046_v8 = vunpack.c.l.bf16 %v1160_v57 }
  0x38   :  { %719 = vst.msk [vmem:[#allocation2 + $0xb8] sm:$0xff] %vm695_vm0, %v654_v62  ;;  %v655_v10 = vmax.f32 %v591_v63, 0.0  ;;  %784 = vst.msk [vmem:[#allocation4 + $0xc0] sm:$0xff] %vm695_vm0, %v591_v63  ;;  %v260_v11 = vadd.f32 %v1293_v6, %v189_v0  ;;  %v190_v12 = vmul.f32 %v918_v2, %v1280_v1  ;;  %v919_v13 = vunpack.c.h.bf16 %v1129_v52  ;;  %v1133_v0 = vld [vmem:[%s1896_s0 + $0x90] sm:$0xff]  }
  0x39   :  { %v592_v15 = vadd.f32 %v1318_v25, %v521_v3  ;;  %v522_v16 = vadd.f32 %v458_v60, %v259_v5  ;;  %v460_v17 = vmul.f32 %v1046_v8, %v1288_v4  ;;  %v1047_v18 = vunpack.c.h.bf16 %v1160_v57  ;;  %v1164_v8 = vld [vmem:[%s1899_s3 + $0x90] sm:$0xff]  }
  0x3a   :  { %720 = vst.msk [vmem:[#allocation2 + $0xc0] sm:$0xff] %vm695_vm0, %v655_v10  ;;  %v523_v19 = vadd.f32 %v459_v7, %v260_v11  ;;  %v261_v20 = vadd.f32 %v1293_v6, %v190_v12  ;;  %v191_v21 = vmul.f32 %v919_v13, %v1280_v1  ;;  %v922_v22 = vunpack.c.l.bf16 %v1130_v9 }
  0x3b   :  { %v656_v23 = vmax.f32 %v592_v15, 0.0  ;;  %785 = vst.msk [vmem:[#allocation4 + $0xc8] sm:$0xff] %vm695_vm0, %v592_v15  ;;  %v593_v24 = vadd.f32 %v1318_v25, %v522_v16  ;;  %v461_v26 = vmul.f32 %v1047_v18, %v1288_v4  ;;  %v1050_v27 = vunpack.c.l.bf16 %v1161_v14 }
  0x3c   :  { %v594_v28 = vadd.f32 %v1318_v25, %v523_v19  ;;  %v524_v29 = vadd.f32 %v460_v17, %v261_v20  ;;  %v262_v30 = vadd.f32 %v1293_v6, %v191_v21  ;;  %v192_v31 = vmul.f32 %v922_v22, %v1280_v1 }
  0x3d   :  { %721 = vst.msk [vmem:[#allocation2 + $0xc8] sm:$0xff] %vm695_vm0, %v656_v23  ;;  %v657_v34 = vmax.f32 %v593_v24, 0.0  ;;  %786 = vst.msk [vmem:[#allocation4 + $0xd0] sm:$0xff] %vm695_vm0, %v593_v24  ;;  %v462_v35 = vmul.f32 %v1050_v27, %v1288_v4  ;;  %v923_v36 = vunpack.c.h.bf16 %v1130_v9  ;;  %v1051_v37 = vunpack.c.h.bf16 %v1161_v14  ;;  %v1165_v27 = vld [vmem:[%s1899_s3 + $0x98] sm:$0xff]  }
  0x3e   :  { %v658_v38 = vmax.f32 %v594_v28, 0.0  ;;  %787 = vst.msk [vmem:[#allocation4 + $0xd8] sm:$0xff] %vm695_vm0, %v594_v28  ;;  %v595_v39 = vadd.f32 %v1318_v25, %v524_v29  ;;  %v525_v40 = vadd.f32 %v461_v26, %v262_v30  ;;  %v263_v41 = vadd.f32 %v1293_v6, %v192_v31  ;;  %v1134_v26 = vld [vmem:[%s1896_s0 + $0x98] sm:$0xff]  }
  0x3f   :  { %722 = vst.msk [vmem:[#allocation2 + $0xd0] sm:$0xff] %vm695_vm0, %v657_v34  ;;  %v193_v42 = vmul.f32 %v923_v36, %v1280_v1  ;;  %v463_v43 = vmul.f32 %v1051_v37, %v1288_v4  ;;  %v926_v44 = vunpack.c.l.bf16 %v1131_v32  ;;  %v1054_v45 = vunpack.c.l.bf16 %v1162_v33 }
  0x40   :  { %723 = vst.msk [vmem:[#allocation2 + $0xd8] sm:$0xff] %vm695_vm0, %v658_v38  ;;  %v659_v47 = vmax.f32 %v595_v39, 0.0  ;;  %788 = vst.msk [vmem:[#allocation4 + $0xe0] sm:$0xff] %vm695_vm0, %v595_v39  ;;  %v596_v48 = vadd.f32 %v1318_v25, %v525_v40  ;;  %v526_v49 = vadd.f32 %v462_v35, %v263_v41  ;;  %v927_v50 = vunpack.c.h.bf16 %v1131_v32  ;;  %v1135_v40 = vld [vmem:[%s1896_s0 + $0xa0] sm:$0xff]  }
  0x41   :  { %v264_v52 = vadd.f32 %v1293_v6, %v193_v42  ;;  %v194_v53 = vmul.f32 %v926_v44, %v1280_v1  ;;  %v464_v54 = vmul.f32 %v1054_v45, %v1288_v4  ;;  %v1055_v55 = vunpack.c.h.bf16 %v1162_v33  ;;  %v1166_v45 = vld [vmem:[%s1899_s3 + $0xa0] sm:$0xff]  }
  0x42   :  { %724 = vst.msk [vmem:[#allocation2 + $0xe0] sm:$0xff] %vm695_vm0, %v659_v47  ;;  %v660_v56 = vmax.f32 %v596_v48, 0.0  ;;  %789 = vst.msk [vmem:[#allocation4 + $0xe8] sm:$0xff] %vm695_vm0, %v596_v48  ;;  %v597_v57 = vadd.f32 %v1318_v25, %v526_v49  ;;  %v195_v58 = vmul.f32 %v927_v50, %v1280_v1  ;;  %v930_v59 = vunpack.c.l.bf16 %v1132_v46 }
  0x43   :  { %v527_v60 = vadd.f32 %v463_v43, %v264_v52  ;;  %v265_v61 = vadd.f32 %v1293_v6, %v194_v53  ;;  %v465_v62 = vmul.f32 %v1055_v55, %v1288_v4  ;;  %v1058_v63 = vunpack.c.l.bf16 %v1163_v51 }
  0x44   :  { %725 = vst.msk [vmem:[#allocation2 + $0xe8] sm:$0xff] %vm695_vm0, %v660_v56  ;;  %v661_v2 = vmax.f32 %v597_v57, 0.0  ;;  %790 = vst.msk [vmem:[#allocation4 + $0xf0] sm:$0xff] %vm695_vm0, %v597_v57  ;;  %v266_v3 = vadd.f32 %v1293_v6, %v195_v58  ;;  %v196_v5 = vmul.f32 %v930_v59, %v1280_v1  ;;  %v931_v7 = vunpack.c.h.bf16 %v1132_v46  ;;  %v1136_v58 = vld [vmem:[%s1896_s0 + $0xa8] sm:$0xff]  }
  0x45   :  { %v598_v9 = vadd.f32 %v1318_v25, %v527_v60  ;;  %v528_v10 = vadd.f32 %v464_v54, %v265_v61  ;;  %v466_v11 = vmul.f32 %v1058_v63, %v1288_v4  ;;  %v1059_v12 = vunpack.c.h.bf16 %v1163_v51  ;;  %v1167_v63 = vld [vmem:[%s1899_s3 + $0xa8] sm:$0xff]  }
  0x46   :  { %726 = vst.msk [vmem:[#allocation2 + $0xf0] sm:$0xff] %vm695_vm0, %v661_v2  ;;  %v529_v13 = vadd.f32 %v465_v62, %v266_v3  ;;  %v267_v14 = vadd.f32 %v1293_v6, %v196_v5  ;;  %v197_v15 = vmul.f32 %v931_v7, %v1280_v1  ;;  %v934_v16 = vunpack.c.l.bf16 %v1133_v0 }
  0x47   :  { %v662_v17 = vmax.f32 %v598_v9, 0.0  ;;  %791 = vst.msk [vmem:[#allocation4 + $0xf8] sm:$0xff] %vm695_vm0, %v598_v9  ;;  %v599_v18 = vadd.f32 %v1318_v25, %v528_v10  ;;  %v467_v19 = vmul.f32 %v1059_v12, %v1288_v4  ;;  %v1062_v20 = vunpack.c.l.bf16 %v1164_v8 }
  0x48   :  { %v600_v21 = vadd.f32 %v1318_v25, %v529_v13  ;;  %v530_v22 = vadd.f32 %v466_v11, %v267_v14  ;;  %v268_v23 = vadd.f32 %v1293_v6, %v197_v15  ;;  %v198_v24 = vmul.f32 %v934_v16, %v1280_v1 }
  0x49   :  { %727 = vst.msk [vmem:[#allocation2 + $0xf8] sm:$0xff] %vm695_vm0, %v662_v17  ;;  %v663_v28 = vmax.f32 %v599_v18, 0.0  ;;  %792 = vst.msk [vmem:[#allocation4 + $0x100] sm:$0xff] %vm695_vm0, %v599_v18  ;;  %v468_v29 = vmul.f32 %v1062_v20, %v1288_v4  ;;  %v935_v30 = vunpack.c.h.bf16 %v1133_v0  ;;  %v1063_v31 = vunpack.c.h.bf16 %v1164_v8  ;;  %v1168_v20 = vld [vmem:[%s1899_s3 + $0xb0] sm:$0xff]  }
  0x4a   :  { %v664_v32 = vmax.f32 %v600_v21, 0.0  ;;  %793 = vst.msk [vmem:[#allocation4 + $0x108] sm:$0xff] %vm695_vm0, %v600_v21  ;;  %v601_v33 = vadd.f32 %v1318_v25, %v530_v22  ;;  %v531_v34 = vadd.f32 %v467_v19, %v268_v23  ;;  %v269_v35 = vadd.f32 %v1293_v6, %v198_v24  ;;  %v1137_v19 = vld [vmem:[%s1896_s0 + $0xb0] sm:$0xff]  }
  0x4b   :  { %728 = vst.msk [vmem:[#allocation2 + $0x100] sm:$0xff] %vm695_vm0, %v663_v28  ;;  %v199_v36 = vmul.f32 %v935_v30, %v1280_v1  ;;  %v469_v37 = vmul.f32 %v1063_v31, %v1288_v4  ;;  %v938_v38 = vunpack.c.l.bf16 %v1134_v26  ;;  %v1066_v39 = vunpack.c.l.bf16 %v1165_v27 }
  0x4c   :  { %729 = vst.msk [vmem:[#allocation2 + $0x108] sm:$0xff] %vm695_vm0, %v664_v32  ;;  %v665_v41 = vmax.f32 %v601_v33, 0.0  ;;  %794 = vst.msk [vmem:[#allocation4 + $0x110] sm:$0xff] %vm695_vm0, %v601_v33  ;;  %v602_v42 = vadd.f32 %v1318_v25, %v531_v34  ;;  %v532_v43 = vadd.f32 %v468_v29, %v269_v35  ;;  %v939_v44 = vunpack.c.h.bf16 %v1134_v26  ;;  %v1138_v34 = vld [vmem:[%s1896_s0 + $0xb8] sm:$0xff]  }
  0x4d   :  { %v270_v46 = vadd.f32 %v1293_v6, %v199_v36  ;;  %v200_v47 = vmul.f32 %v938_v38, %v1280_v1  ;;  %v470_v48 = vmul.f32 %v1066_v39, %v1288_v4  ;;  %v1067_v49 = vunpack.c.h.bf16 %v1165_v27  ;;  %v1169_v39 = vld [vmem:[%s1899_s3 + $0xb8] sm:$0xff]  }
  0x4e   :  { %730 = vst.msk [vmem:[#allocation2 + $0x110] sm:$0xff] %vm695_vm0, %v665_v41  ;;  %v666_v50 = vmax.f32 %v602_v42, 0.0  ;;  %795 = vst.msk [vmem:[#allocation4 + $0x118] sm:$0xff] %vm695_vm0, %v602_v42  ;;  %v603_v51 = vadd.f32 %v1318_v25, %v532_v43  ;;  %v201_v52 = vmul.f32 %v939_v44, %v1280_v1  ;;  %v942_v53 = vunpack.c.l.bf16 %v1135_v40 }
  0x4f   :  { %v533_v54 = vadd.f32 %v469_v37, %v270_v46  ;;  %v271_v55 = vadd.f32 %v1293_v6, %v200_v47  ;;  %v471_v56 = vmul.f32 %v1067_v49, %v1288_v4  ;;  %v1070_v57 = vunpack.c.l.bf16 %v1166_v45 }
  0x50   :  { %731 = vst.msk [vmem:[#allocation2 + $0x118] sm:$0xff] %vm695_vm0, %v666_v50  ;;  %v667_v59 = vmax.f32 %v603_v51, 0.0  ;;  %796 = vst.msk [vmem:[#allocation4 + $0x120] sm:$0xff] %vm695_vm0, %v603_v51  ;;  %v272_v60 = vadd.f32 %v1293_v6, %v201_v52  ;;  %v202_v61 = vmul.f32 %v942_v53, %v1280_v1  ;;  %v943_v62 = vunpack.c.h.bf16 %v1135_v40  ;;  %v1139_v52 = vld [vmem:[%s1896_s0 + $0xc0] sm:$0xff]  }
  0x51   :  { %v604_v0 = vadd.f32 %v1318_v25, %v533_v54  ;;  %v534_v2 = vadd.f32 %v470_v48, %v271_v55  ;;  %v472_v3 = vmul.f32 %v1070_v57, %v1288_v4  ;;  %v1071_v5 = vunpack.c.h.bf16 %v1166_v45  ;;  %v1170_v57 = vld [vmem:[%s1899_s3 + $0xc0] sm:$0xff]  }
  0x52   :  { %732 = vst.msk [vmem:[#allocation2 + $0x120] sm:$0xff] %vm695_vm0, %v667_v59  ;;  %v535_v7 = vadd.f32 %v471_v56, %v272_v60  ;;  %v273_v8 = vadd.f32 %v1293_v6, %v202_v61  ;;  %v203_v9 = vmul.f32 %v943_v62, %v1280_v1  ;;  %v946_v10 = vunpack.c.l.bf16 %v1136_v58 }
  0x53   :  { %v668_v11 = vmax.f32 %v604_v0, 0.0  ;;  %797 = vst.msk [vmem:[#allocation4 + $0x128] sm:$0xff] %vm695_vm0, %v604_v0  ;;  %v605_v12 = vadd.f32 %v1318_v25, %v534_v2  ;;  %v473_v13 = vmul.f32 %v1071_v5, %v1288_v4  ;;  %v1074_v14 = vunpack.c.l.bf16 %v1167_v63 }
  0x54   :  { %v606_v15 = vadd.f32 %v1318_v25, %v535_v7  ;;  %v536_v16 = vadd.f32 %v472_v3, %v273_v8  ;;  %v274_v17 = vadd.f32 %v1293_v6, %v203_v9  ;;  %v204_v18 = vmul.f32 %v946_v10, %v1280_v1  ;;  %v1721_v7 = vld [vmem:[%s1900_s4] ss:$0 sm:$0xff] }
  0x55   :  { %733 = vst.msk [vmem:[#allocation2 + $0x128] sm:$0xff] %vm695_vm0, %v668_v11  ;;  %v669_v21 = vmax.f32 %v605_v12, 0.0  ;;  %798 = vst.msk [vmem:[#allocation4 + $0x130] sm:$0xff] %vm695_vm0, %v605_v12  ;;  %v474_v22 = vmul.f32 %v1074_v14, %v1288_v4  ;;  %v947_v23 = vunpack.c.h.bf16 %v1136_v58  ;;  %v1075_v24 = vunpack.c.h.bf16 %v1167_v63  ;;  %v1734_v11 = vld [vmem:[%s1897_s1] ss:$0 sm:$0xff]  ;;  %v1171_v14 = vld [vmem:[%s1899_s3 + $0xc8] sm:$0xff]  }
  0x56   :  { %v670_v26 = vmax.f32 %v606_v15, 0.0  ;;  %799 = vst.msk [vmem:[#allocation4 + $0x138] sm:$0xff] %vm695_vm0, %v606_v15  ;;  %v607_v27 = vadd.f32 %v1318_v25, %v536_v16  ;;  %v537_v28 = vadd.f32 %v473_v13, %v274_v17  ;;  %v275_v29 = vadd.f32 %v1293_v6, %v204_v18  ;;  %v1140_v13 = vld [vmem:[%s1896_s0 + $0xc8] sm:$0xff]   ;;  %s829_s1 = sshll.u32 %s1231_s25, 4  ;;  %s830_s1 = int_to_ptr.vmem [resolvable:$true] %s829_s1 }
  0x57   :  { %734 = vst.msk [vmem:[#allocation2 + $0x130] sm:$0xff] %vm695_vm0, %v669_v21  ;;  %v205_v30 = vmul.f32 %v947_v23, %v1280_v1  ;;  %v475_v31 = vmul.f32 %v1075_v24, %v1288_v4  ;;  %v950_v32 = vunpack.c.l.bf16 %v1137_v19  ;;  %v1078_v33 = vunpack.c.l.bf16 %v1168_v20 }
  0x58   :  { %735 = vst.msk [vmem:[#allocation2 + $0x138] sm:$0xff] %vm695_vm0, %v670_v26  ;;  %v671_v35 = vmax.f32 %v607_v27, 0.0  ;;  %800 = vst.msk [vmem:[#allocation4 + $0x140] sm:$0xff] %vm695_vm0, %v607_v27  ;;  %v608_v36 = vadd.f32 %v1318_v25, %v537_v28  ;;  %v538_v37 = vadd.f32 %v474_v22, %v275_v29  ;;  %v951_v38 = vunpack.c.h.bf16 %v1137_v19  ;;  %v1141_v28 = vld [vmem:[%s1896_s0 + $0xd0] sm:$0xff]  }
  0x59   :  { %v276_v40 = vadd.f32 %v1293_v6, %v205_v30  ;;  %v206_v41 = vmul.f32 %v950_v32, %v1280_v1  ;;  %v476_v42 = vmul.f32 %v1078_v33, %v1288_v4  ;;  %v1079_v43 = vunpack.c.h.bf16 %v1168_v20  ;;  %v1172_v33 = vld [vmem:[%s1899_s3 + $0xd0] sm:$0xff]  }
  0x5a   :  { %736 = vst.msk [vmem:[#allocation2 + $0x140] sm:$0xff] %vm695_vm0, %v671_v35  ;;  %v672_v44 = vmax.f32 %v608_v36, 0.0  ;;  %801 = vst.msk [vmem:[#allocation4 + $0x148] sm:$0xff] %vm695_vm0, %v608_v36  ;;  %v609_v45 = vadd.f32 %v1318_v25, %v538_v37  ;;  %v207_v46 = vmul.f32 %v951_v38, %v1280_v1  ;;  %v954_v47 = vunpack.c.l.bf16 %v1138_v34 }
  0x5b   :  { %v539_v48 = vadd.f32 %v475_v31, %v276_v40  ;;  %v277_v49 = vadd.f32 %v1293_v6, %v206_v41  ;;  %v477_v50 = vmul.f32 %v1079_v43, %v1288_v4  ;;  %v1082_v51 = vunpack.c.l.bf16 %v1169_v39 }
  0x5c   :  { %737 = vst.msk [vmem:[#allocation2 + $0x148] sm:$0xff] %vm695_vm0, %v672_v44  ;;  %v673_v53 = vmax.f32 %v609_v45, 0.0  ;;  %802 = vst.msk [vmem:[#allocation4 + $0x150] sm:$0xff] %vm695_vm0, %v609_v45  ;;  %v278_v54 = vadd.f32 %v1293_v6, %v207_v46  ;;  %v208_v55 = vmul.f32 %v954_v47, %v1280_v1  ;;  %v955_v56 = vunpack.c.h.bf16 %v1138_v34  ;;  %v1142_v46 = vld [vmem:[%s1896_s0 + $0xd8] sm:$0xff]  }
  0x5d   :  { %v610_v58 = vadd.f32 %v1318_v25, %v539_v48  ;;  %v540_v59 = vadd.f32 %v476_v42, %v277_v49  ;;  %v478_v60 = vmul.f32 %v1082_v51, %v1288_v4  ;;  %v1083_v61 = vunpack.c.h.bf16 %v1169_v39  ;;  %v1173_v51 = vld [vmem:[%s1899_s3 + $0xd8] sm:$0xff]  }
  0x5e   :  { %738 = vst.msk [vmem:[#allocation2 + $0x150] sm:$0xff] %vm695_vm0, %v673_v53  ;;  %v541_v62 = vadd.f32 %v477_v50, %v278_v54  ;;  %v279_v63 = vadd.f32 %v1293_v6, %v208_v55  ;;  %v209_v0 = vmul.f32 %v955_v56, %v1280_v1  ;;  %v958_v2 = vunpack.c.l.bf16 %v1139_v52  ;;  %v1728_v1 = vld [vmem:[%s1898_s2] ss:$0 sm:$0xff] }
  0x5f   :  { %v674_v3 = vmax.f32 %v610_v58, 0.0  ;;  %803 = vst.msk [vmem:[#allocation4 + $0x158] sm:$0xff] %vm695_vm0, %v610_v58  ;;  %v611_v5 = vadd.f32 %v1318_v25, %v540_v59  ;;  %v479_v4 = vmul.f32 %v1721_v7, %v1083_v61  ;;  %v1086_v8 = vunpack.c.l.bf16 %v1170_v57 }
  0x60   :  { %v612_v9 = vadd.f32 %v1318_v25, %v541_v62  ;;  %v542_v10 = vadd.f32 %v478_v60, %v279_v63  ;;  %v280_v6 = vadd.f32 %v1728_v1, %v209_v0  ;;  %v210_v12 = vmul.f32 %v1734_v11, %v958_v2 }
  0x61   :  { %739 = vst.msk [vmem:[#allocation2 + $0x158] sm:$0xff] %vm695_vm0, %v674_v3  ;;  %v675_v15 = vmax.f32 %v611_v5, 0.0  ;;  %804 = vst.msk [vmem:[#allocation4 + $0x160] sm:$0xff] %vm695_vm0, %v611_v5  ;;  %v480_v16 = vmul.f32 %v1721_v7, %v1086_v8  ;;  %v959_v17 = vunpack.c.h.bf16 %v1139_v52  ;;  %v1087_v18 = vunpack.c.h.bf16 %v1170_v57  ;;  %v1174_v8 = vld [vmem:[%s1899_s3 + $0xe0] sm:$0xff]  }
  0x62   :  { %v676_v19 = vmax.f32 %v612_v9, 0.0  ;;  %805 = vst.msk [vmem:[#allocation4 + $0x168] sm:$0xff] %vm695_vm0, %v612_v9  ;;  %v613_v20 = vadd.f32 %v1318_v25, %v542_v10  ;;  %v543_v21 = vadd.f32 %v479_v4, %v280_v6  ;;  %v281_v22 = vadd.f32 %v1728_v1, %v210_v12  ;;  %v1760_v25 = vld [vmem:[%s1901_s5] ss:$0 sm:$0xff] }
  0x63   :  { %740 = vst.msk [vmem:[#allocation2 + $0x160] sm:$0xff] %vm695_vm0, %v675_v15  ;;  %v211_v23 = vmul.f32 %v1734_v11, %v959_v17  ;;  %v481_v24 = vmul.f32 %v1721_v7, %v1087_v18  ;;  %v962_v26 = vunpack.c.l.bf16 %v1140_v13  ;;  %v1090_v27 = vunpack.c.l.bf16 %v1171_v14  ;;  %v1143_v4 = vld [vmem:[%s1896_s0 + $0xe0] sm:$0xff]  }
  0x64   :  { %741 = vst.msk [vmem:[#allocation2 + $0x168] sm:$0xff] %vm695_vm0, %v676_v19  ;;  %v677_v29 = vmax.f32 %v613_v20, 0.0  ;;  %806 = vst.msk [vmem:[#allocation4 + $0x170] sm:$0xff] %vm695_vm0, %v613_v20  ;;  %v614_v30 = vadd.f32 %v1760_v25, %v543_v21  ;;  %v544_v31 = vadd.f32 %v480_v16, %v281_v22  ;;  %v963_v32 = vunpack.c.h.bf16 %v1140_v13  ;;  %v1144_v21 = vld [vmem:[%s1896_s0 + $0xe8] sm:$0xff]  }
  0x65   :  { %v282_v34 = vadd.f32 %v1728_v1, %v211_v23  ;;  %v212_v35 = vmul.f32 %v1734_v11, %v962_v26  ;;  %v482_v36 = vmul.f32 %v1721_v7, %v1090_v27  ;;  %v1091_v37 = vunpack.c.h.bf16 %v1171_v14  ;;  %v1175_v27 = vld [vmem:[%s1899_s3 + $0xe8] sm:$0xff]  }
  0x66   :  { %742 = vst.msk [vmem:[#allocation2 + $0x170] sm:$0xff] %vm695_vm0, %v677_v29  ;;  %v678_v38 = vmax.f32 %v614_v30, 0.0  ;;  %807 = vst.msk [vmem:[#allocation4 + $0x178] sm:$0xff] %vm695_vm0, %v614_v30  ;;  %v615_v39 = vadd.f32 %v1760_v25, %v544_v31  ;;  %v213_v40 = vmul.f32 %v1734_v11, %v963_v32  ;;  %v966_v41 = vunpack.c.l.bf16 %v1141_v28 }
  0x67   :  { %v545_v42 = vadd.f32 %v481_v24, %v282_v34  ;;  %v283_v43 = vadd.f32 %v1728_v1, %v212_v35  ;;  %v483_v44 = vmul.f32 %v1721_v7, %v1091_v37  ;;  %v1094_v45 = vunpack.c.l.bf16 %v1172_v33 }
  0x68   :  { %743 = vst.msk [vmem:[#allocation2 + $0x178] sm:$0xff] %vm695_vm0, %v678_v38  ;;  %v679_v47 = vmax.f32 %v615_v39, 0.0  ;;  %808 = vst.msk [vmem:[#allocation4 + $0x180] sm:$0xff] %vm695_vm0, %v615_v39  ;;  %v284_v48 = vadd.f32 %v1728_v1, %v213_v40  ;;  %v214_v49 = vmul.f32 %v1734_v11, %v966_v41  ;;  %v967_v50 = vunpack.c.h.bf16 %v1141_v28  ;;  %v1145_v40 = vld [vmem:[%s1896_s0 + $0xf0] sm:$0xff]  }
  0x69   :  { %v616_v52 = vadd.f32 %v1760_v25, %v545_v42  ;;  %v546_v53 = vadd.f32 %v482_v36, %v283_v43  ;;  %v484_v54 = vmul.f32 %v1721_v7, %v1094_v45  ;;  %v1095_v55 = vunpack.c.h.bf16 %v1172_v33  ;;  %v1176_v45 = vld [vmem:[%s1899_s3 + $0xf0] sm:$0xff]  }
  0x6a   :  { %744 = vst.msk [vmem:[#allocation2 + $0x180] sm:$0xff] %vm695_vm0, %v679_v47  ;;  %v547_v56 = vadd.f32 %v483_v44, %v284_v48  ;;  %v285_v57 = vadd.f32 %v1728_v1, %v214_v49  ;;  %v215_v58 = vmul.f32 %v1734_v11, %v967_v50  ;;  %v970_v59 = vunpack.c.l.bf16 %v1142_v46 }
  0x6b   :  { %v680_v60 = vmax.f32 %v616_v52, 0.0  ;;  %809 = vst.msk [vmem:[#allocation4 + $0x188] sm:$0xff] %vm695_vm0, %v616_v52  ;;  %v617_v61 = vadd.f32 %v1760_v25, %v546_v53  ;;  %v485_v62 = vmul.f32 %v1721_v7, %v1095_v55  ;;  %v1098_v63 = vunpack.c.l.bf16 %v1173_v51 }
  0x6c   :  { %v618_v0 = vadd.f32 %v1760_v25, %v547_v56  ;;  %v548_v2 = vadd.f32 %v484_v54, %v285_v57  ;;  %v286_v3 = vadd.f32 %v1728_v1, %v215_v58  ;;  %v216_v5 = vmul.f32 %v1734_v11, %v970_v59 }
  0x6d   :  { %745 = vst.msk [vmem:[#allocation2 + $0x188] sm:$0xff] %vm695_vm0, %v680_v60  ;;  %v681_v9 = vmax.f32 %v617_v61, 0.0  ;;  %810 = vst.msk [vmem:[#allocation4 + $0x190] sm:$0xff] %vm695_vm0, %v617_v61  ;;  %v486_v10 = vmul.f32 %v1721_v7, %v1098_v63  ;;  %v971_v6 = vunpack.c.h.bf16 %v1142_v46  ;;  %v1099_v12 = vunpack.c.h.bf16 %v1173_v51  ;;  %v1177_v63 = vld [vmem:[%s1899_s3 + $0xf8] sm:$0xff]  }
  0x6e   :  { %v682_v13 = vmax.f32 %v618_v0, 0.0  ;;  %811 = vst.msk [vmem:[#allocation4 + $0x198] sm:$0xff] %vm695_vm0, %v618_v0  ;;  %v619_v14 = vadd.f32 %v1760_v25, %v548_v2  ;;  %v549_v15 = vadd.f32 %v485_v62, %v286_v3  ;;  %v287_v16 = vadd.f32 %v1728_v1, %v216_v5  ;;  %v1146_v62 = vld [vmem:[%s1896_s0 + $0xf8] sm:$0xff]   ;;  %s1230_s0 = smov [#allocation4]  }
  0x6f   :  { %746 = vst.msk [vmem:[#allocation2 + $0x190] sm:$0xff] %vm695_vm0, %v681_v9  ;;  %v217_v17 = vmul.f32 %v1734_v11, %v971_v6  ;;  %v487_v18 = vmul.f32 %v1721_v7, %v1099_v12  ;;  %v974_v19 = vunpack.c.l.bf16 %v1143_v4  ;;  %v1102_v20 = vunpack.c.l.bf16 %v1174_v8  ;;  %s841_s3 = sshll.u32 %s1230_s0, 4  ;;  %s842_s3 = int_to_ptr.vmem [resolvable:$true] %s841_s3 }
  0x70   :  { %747 = vst.msk [vmem:[#allocation2 + $0x198] sm:$0xff] %vm695_vm0, %v682_v13  ;;  %v683_v22 = vmax.f32 %v619_v14, 0.0  ;;  %812 = vst.msk [vmem:[#allocation4 + $0x1a0] sm:$0xff] %vm695_vm0, %v619_v14  ;;  %v620_v23 = vadd.f32 %v1760_v25, %v549_v15  ;;  %v550_v24 = vadd.f32 %v486_v10, %v287_v16  ;;  %v975_v26 = vunpack.c.h.bf16 %v1143_v4  ;;  %s1186_s2 = scalar_lea.vmem %s842_s3, 8192  ;;  %p1191_p1 = scmp.lt.s32.totalorder %s842_s3, %s842_s3 }
  0x71   :  { %v288_v28 = vadd.f32 %v1728_v1, %v217_v17  ;;  %v218_v29 = vmul.f32 %v1734_v11, %v974_v19  ;;  %v488_v30 = vmul.f32 %v1721_v7, %v1102_v20  ;;  %v1103_v31 = vunpack.c.h.bf16 %v1174_v8  ;;  %p1187_p0 = scmp.ne.s32.totalorder %s842_s3, %s1186_s2  ;;  %p1192_p2 = scmp.lt.s32.totalorder %s1186_s2, %s1186_s2 }
  0x72   :  { %748 = vst.msk [vmem:[#allocation2 + $0x1a0] sm:$0xff] %vm695_vm0, %v683_v22  ;;  %v684_v32 = vmax.f32 %v620_v23, 0.0  ;;  %813 = vst.msk [vmem:[#allocation4 + $0x1a8] sm:$0xff] %vm695_vm0, %v620_v23  ;;  %v621_v33 = vadd.f32 %v1760_v25, %v550_v24  ;;  %v219_v34 = vmul.f32 %v1734_v11, %v975_v26  ;;  %v978_v35 = vunpack.c.l.bf16 %v1144_v21 }
  0x73   :  { %v551_v36 = vadd.f32 %v487_v18, %v288_v28  ;;  %v289_v37 = vadd.f32 %v1728_v1, %v218_v29  ;;  %v489_v38 = vmul.f32 %v1721_v7, %v1103_v31  ;;  %v1106_v39 = vunpack.c.l.bf16 %v1175_v27  ;;  %p1193_p3 = por %p1192_p2, %p1191_p1 }
  0x74   :  { %749 = vst.msk [vmem:[#allocation2 + $0x1a8] sm:$0xff] %vm695_vm0, %v684_v32  ;;  %v685_v41 = vmax.f32 %v621_v33, 0.0  ;;  %814 = vst.msk [vmem:[#allocation4 + $0x1b0] sm:$0xff] %vm695_vm0, %v621_v33  ;;  %v290_v42 = vadd.f32 %v1728_v1, %v219_v34  ;;  %v220_v43 = vmul.f32 %v1734_v11, %v978_v35  ;;  %v979_v44 = vunpack.c.h.bf16 %v1144_v21 }
  0x75   :  { %v622_v46 = vadd.f32 %v1760_v25, %v551_v36  ;;  %v552_v47 = vadd.f32 %v488_v30, %v289_v37  ;;  %v490_v48 = vmul.f32 %v1721_v7, %v1106_v39  ;;  %v1107_v49 = vunpack.c.h.bf16 %v1175_v27  ;;  %p1194_p4 = pnand %p1193_p3, %p1187_p0 }
  0x76   :  { %750 = vst.msk [vmem:[#allocation2 + $0x1b0] sm:$0xff] %vm695_vm0, %v685_v41  ;;  %v553_v50 = vadd.f32 %v489_v38, %v290_v42  ;;  %v291_v51 = vadd.f32 %v1728_v1, %v220_v43  ;;  %v221_v52 = vmul.f32 %v1734_v11, %v979_v44  ;;  %v982_v53 = vunpack.c.l.bf16 %v1145_v40 }
  0x77   :  { %v686_v54 = vmax.f32 %v622_v46, 0.0  ;;  %815 = vst.msk [vmem:[#allocation4 + $0x1b8] sm:$0xff] %vm695_vm0, %v622_v46  ;;  %v623_v55 = vadd.f32 %v1760_v25, %v552_v47  ;;  %v491_v56 = vmul.f32 %v1721_v7, %v1107_v49  ;;  %v1110_v57 = vunpack.c.l.bf16 %v1176_v45 }
  0x78   :  { %v624_v58 = vadd.f32 %v1760_v25, %v553_v50  ;;  %v554_v59 = vadd.f32 %v490_v48, %v291_v51  ;;  %v292_v60 = vadd.f32 %v1728_v1, %v221_v52  ;;  %v222_v61 = vmul.f32 %v1734_v11, %v982_v53 }
  0x79   :  { %751 = vst.msk [vmem:[#allocation2 + $0x1b8] sm:$0xff] %vm695_vm0, %v686_v54  ;;  %v687_v0 = vmax.f32 %v623_v55, 0.0  ;;  %816 = vst.msk [vmem:[#allocation4 + $0x1c0] sm:$0xff] %vm695_vm0, %v623_v55  ;;  %v492_v2 = vmul.f32 %v1721_v7, %v1110_v57  ;;  %v983_v3 = vunpack.c.h.bf16 %v1145_v40  ;;  %v1111_v5 = vunpack.c.h.bf16 %v1176_v45 }
  0x7a   :  { %v688_v4 = vmax.f32 %v624_v58, 0.0  ;;  %817 = vst.msk [vmem:[#allocation4 + $0x1c8] sm:$0xff] %vm695_vm0, %v624_v58  ;;  %v625_v8 = vadd.f32 %v1760_v25, %v554_v59  ;;  %v555_v9 = vadd.f32 %v491_v56, %v292_v60  ;;  %v293_v10 = vadd.f32 %v1728_v1, %v222_v61 }
  0x7b   :  { %752 = vst.msk [vmem:[#allocation2 + $0x1c0] sm:$0xff] %vm695_vm0, %v687_v0  ;;  %v223_v6 = vmul.f32 %v1734_v11, %v983_v3  ;;  %v493_v12 = vmul.f32 %v1721_v7, %v1111_v5  ;;  %v986_v13 = vunpack.c.l.bf16 %v1146_v62  ;;  %v1114_v14 = vunpack.c.l.bf16 %v1177_v63 }
  0x7c   :  { %753 = vst.msk [vmem:[#allocation2 + $0x1c8] sm:$0xff] %vm695_vm0, %v688_v4  ;;  %v689_v15 = vmax.f32 %v625_v8, 0.0  ;;  %818 = vst.msk [vmem:[#allocation4 + $0x1d0] sm:$0xff] %vm695_vm0, %v625_v8  ;;  %v626_v16 = vadd.f32 %v1760_v25, %v555_v9  ;;  %v556_v17 = vadd.f32 %v492_v2, %v293_v10  ;;  %v987_v18 = vunpack.c.h.bf16 %v1146_v62 }
  0x7d   :  { %v294_v19 = vadd.f32 %v1728_v1, %v223_v6  ;;  %v224_v20 = vmul.f32 %v1734_v11, %v986_v13  ;;  %v494_v21 = vmul.f32 %v1721_v7, %v1114_v14  ;;  %v1115_v22 = vunpack.c.h.bf16 %v1177_v63 }
  0x7e   :  { %754 = vst.msk [vmem:[#allocation2 + $0x1d0] sm:$0xff] %vm695_vm0, %v689_v15  ;;  %v690_v23 = vmax.f32 %v626_v16, 0.0  ;;  %819 = vst.msk [vmem:[#allocation4 + $0x1d8] sm:$0xff] %vm695_vm0, %v626_v16  ;;  %v627_v24 = vadd.f32 %v1760_v25, %v556_v17  ;;  %v225_v26 = vmul.f32 %v1734_v11, %v987_v18 }
  0x7f   :  { %v557_v27 = vadd.f32 %v493_v12, %v294_v19  ;;  %v295_v28 = vadd.f32 %v1728_v1, %v224_v20  ;;  %v495_v29 = vmul.f32 %v1721_v7, %v1115_v22 }
  0x80   :  { %755 = vst.msk [vmem:[#allocation2 + $0x1d8] sm:$0xff] %vm695_vm0, %v690_v23  ;;  %v691_v30 = vmax.f32 %v627_v24, 0.0  ;;  %820 = vst.msk [vmem:[#allocation4 + $0x1e0] sm:$0xff] %vm695_vm0, %v627_v24  ;;  %v296_v31 = vadd.f32 %v1728_v1, %v225_v26 }
  0x81   :  { %v628_v32 = vadd.f32 %v1760_v25, %v557_v27  ;;  %v558_v33 = vadd.f32 %v494_v21, %v295_v28 }
  0x82   :  { %756 = vst.msk [vmem:[#allocation2 + $0x1e0] sm:$0xff] %vm695_vm0, %v691_v30  ;;  %v559_v11 = vadd.f32 %v495_v29, %v296_v31 }
  0x83   :  { %v692_v34 = vmax.f32 %v628_v32, 0.0  ;;  %821 = vst.msk [vmem:[#allocation4 + $0x1e8] sm:$0xff] %vm695_vm0, %v628_v32  ;;  %v629_v7 = vadd.f32 %v1760_v25, %v558_v33 }
  0x84   :  { %v630_v35 = vadd.f32 %v1760_v25, %v559_v11 }
  0x85   :  { %757 = vst.msk [vmem:[#allocation2 + $0x1e8] sm:$0xff] %vm695_vm0, %v692_v34  ;;  %v693_v1 = vmax.f32 %v629_v7, 0.0  ;;  %822 = vst.msk [vmem:[#allocation4 + $0x1f0] sm:$0xff] %vm695_vm0, %v629_v7 }
  0x86   :  { %v694_v36 = vmax.f32 %v630_v35, 0.0  ;;  %823 = vst.msk [vmem:[#allocation4 + $0x1f8] sm:$0xff] %vm695_vm0, %v630_v35 }
  0x87   :  { %758 = vst.msk [vmem:[#allocation2 + $0x1f0] sm:$0xff] %vm695_vm0, %v693_v1 }
  0x88   :  { %1197 = shalt.err (!%p1194_p4)
}
  0x89   :  { %s1232_s26 = smov 128   ;;  %s1233_s27 = smov 8   ;;  %759 = vst.msk [vmem:[#allocation2 + $0x1f8] sm:$0xff] %vm695_vm0, %v694_v36 }
  0x8a   :  { %847 = dma.vmem_to_hbm [thread:$0]  %s842_s3, 8192, %s1903_s7, [#allocation5], %s1232_s26, %s1232_s26, %s1233_s27  }
  0x8b   :  { %s1206_s5 = scalar_lea.vmem %s830_s1, 8192  ;;  %p1211_p6 = scmp.lt.s32.totalorder %s830_s1, %s830_s1 }
  0x8c   :  { %p1207_p5 = scmp.ne.s32.totalorder %s830_s1, %s1206_s5  ;;  %p1212_p7 = scmp.lt.s32.totalorder %s1206_s5, %s1206_s5 }
  0x8e   :  { %p1213_p8 = por %p1212_p7, %p1211_p6 }
  0x90   :  { %p1214_p9 = pnand %p1213_p8, %p1207_p5 }
  0x92   :  { %1217 = shalt.err (!%p1214_p9)
}
  0x93   :  { %835 = dma.vmem_to_hbm [thread:$0]  %s830_s1, 8192, %s1902_s6, [#allocation3], %s1232_s26, %s1232_s26, %s1233_s27  }
  0x94   :  { %1226 = dma.done.wait [#allocation3], 8192  }
  0x95   :  { %1227 = vsyncadd [#allocation3], 4294959104 }
  0x96   :  { %1228 = dma.done.wait [#allocation5], 8192  }
  0x97   :  { %1229 = vsyncadd [#allocation5], 4294959104 }
  0x98   :  { %854 = vsyncpa [#allocation3], 1 }
  0x99   :  { %855 = vsyncpa [#allocation5], 1 }

// kernel: bottleneck_forward.6
= control target key start
LH: loop header
LB: loop body
LE: loop exit
PB: predicated region body
PF: predicated region fallthrough
CT: control target
= control target key end

     0   :  { %s2529_s3 = inlined_call_operand.vmem [shape: bf16[128,128], index: 3, kind: input, shape index: {}]   ;;  %s2530_s0 = inlined_call_operand.vmem [shape: bf16[512,128], index: 0, kind: input, shape index: {}]   ;;  %s2531_s1 = inlined_call_operand.vmem [shape: f32[1,128], index: 1, kind: input, shape index: {}]   ;;  %s2532_s2 = inlined_call_operand.vmem [shape: f32[1,128], index: 2, kind: input, shape index: {}]   ;;  %s2533_s4 = inlined_call_operand.vmem [shape: bf16[512,128], index: 4, kind: output, shape index: {0}]   ;;  %s2534_s5 = inlined_call_operand.vmem [shape: f32[1,1,128], index: 5, kind: output, shape index: {1}]   ;;  %s2535_s6 = inlined_call_operand.vmem [shape: f32[1,1,128], index: 6, kind: output, shape index: {2}]  }
   0x1   :  { %v1900_v0 = vld [vmem:[%s2529_s3 + $0x38] sm:$0xff]   ;;  %v1901_v1 = vld [vmem:[%s2529_s3 + $0x30] sm:$0xff]   ;;  %v1902_v2 = vld [vmem:[%s2529_s3 + $0x28] sm:$0xff]  }
   0x2   :  { %1804 = vmatprep.subr.bf16.mxu0 %v1900_v0  ;;  %1884 = vmatprep.subr.bf16.mxu1 %v1900_v0  ;;  %v1903_v3 = vld [vmem:[%s2529_s3 + $0x20] sm:$0xff]   ;;  %v1702_v8 = vld [vmem:[%s2530_s0 + $0x8] sm:$0xff]   ;;  %v1703_v9 = vld [vmem:[%s2530_s0 + $0x10] sm:$0xff]  }
   0x3   :  { %1805 = vmatpush3.bf16.msra.mxu0 %v1900_v0  ;;  %1892 = vmatpush3.bf16.msra.mxu1 %v1900_v0  ;;  %v1415_v4 = vld [vmem:[%s2530_s0] sm:$0xff]   ;;  %v1904_v13 = vld [vmem:[%s2529_s3 + $0x18] sm:$0xff]   ;;  %v1420_v14 = vunpack.c.l.bf16 %v1702_v8  ;;  %v1421_v15 = vunpack.c.h.bf16 %v1702_v8  ;;  %v1424_v16 = vunpack.c.l.bf16 %v1703_v9  ;;  %v1425_v19 = vunpack.c.h.bf16 %v1703_v9  ;;  %v1905_v22 = vld [vmem:[%s2529_s3 + $0x10] sm:$0xff]  }
   0x4   :  { %1806 = vmatprep.subr.bf16.mxu0 %v1901_v1  ;;  %1885 = vmatprep.subr.bf16.mxu1 %v1901_v1  ;;  %v1961_v5 = vld [vmem:[%s2531_s1] ss:$0 sm:$0xff]  ;;  %v1416_v6 = vunpack.c.l.bf16 %v1415_v4  ;;  %v1417_v7 = vunpack.c.h.bf16 %v1415_v4  ;;  %v1704_v26 = vld [vmem:[%s2530_s0 + $0x18] sm:$0xff]   ;;  %v1906_v31 = vld [vmem:[%s2529_s3 + $0x8] sm:$0xff]  }
   0x5   :  { %v1972_v10 = vld [vmem:[%s2532_s2] ss:$0 sm:$0xff]  ;;  %v158_v23 = vmul.f32 %v1420_v14, %v1961_v5  ;;  %v159_v24 = vmul.f32 %v1421_v15, %v1961_v5  ;;  %v160_v25 = vmul.f32 %v1424_v16, %v1961_v5  ;;  %v161_v28 = vmul.f32 %v1425_v19, %v1961_v5  ;;  %v1706_v38 = vld [vmem:[%s2530_s0 + $0x28] sm:$0xff]   ;;  %v1707_v41 = vld [vmem:[%s2530_s0 + $0x30] sm:$0xff]  }
   0x6   :  { %v156_v11 = vmul.f32 %v1416_v6, %v1961_v5  ;;  %v157_v12 = vmul.f32 %v1417_v7, %v1961_v5  ;;  %v1705_v29 = vld [vmem:[%s2530_s0 + $0x20] sm:$0xff]   ;;  %v1428_v30 = vunpack.c.l.bf16 %v1704_v26  ;;  %v1429_v35 = vunpack.c.h.bf16 %v1704_v26  ;;  %v1708_v42 = vld [vmem:[%s2530_s0 + $0x38] sm:$0xff]   ;;  %v1710_v63 = vld [vmem:[%s2530_s0 + $0x48] sm:$0xff]  }
   0x7   :  { %1807 = vmatpush3.bf16.msra.mxu0 %v1901_v1  ;;  %1893 = vmatpush3.bf16.msra.mxu1 %v1901_v1  ;;  %v229_v32 = vadd.f32 %v1972_v10, %v158_v23  ;;  %v230_v33 = vadd.f32 %v1972_v10, %v159_v24  ;;  %v231_v34 = vadd.f32 %v1972_v10, %v160_v25  ;;  %v1432_v37 = vunpack.c.l.bf16 %v1705_v29  ;;  %v1907_v43 = vld [vmem:[%s2529_s3] sm:$0xff]   ;;  %v1711_v4 = vld [vmem:[%s2530_s0 + $0x50] sm:$0xff]   ;;  %v1712_v23 = vld [vmem:[%s2530_s0 + $0x58] sm:$0xff]  }
   0x8   :  { %1808 = vmatprep.subr.bf16.mxu0 %v1902_v2  ;;  %1886 = vmatprep.subr.bf16.mxu1 %v1902_v2  ;;  %v227_v17 = vadd.f32 %v1972_v10, %v156_v11  ;;  %v228_v18 = vadd.f32 %v1972_v10, %v157_v12  ;;  %v232_v36 = vadd.f32 %v1972_v10, %v161_v28  ;;  %v1433_v40 = vunpack.c.h.bf16 %v1705_v29  ;;  %v1709_v48 = vld [vmem:[%s2530_s0 + $0x40] sm:$0xff]  }
   0x9   :  { %v162_v39 = vmul.f32 %v1428_v30, %v1961_v5  ;;  %v293_v44 = vmax.f32 %v229_v32, 0.0  ;;  %v294_v45 = vmax.f32 %v230_v33, 0.0  ;;  %v295_v46 = vmax.f32 %v231_v34, 0.0 }
   0xa   :  { %v291_v20 = vmax.f32 %v227_v17, 0.0  ;;  %v292_v21 = vmax.f32 %v228_v18, 0.0  ;;  %v163_v47 = vmul.f32 %v1429_v35, %v1961_v5  ;;  %v296_v49 = vmax.f32 %v232_v36, 0.0 }
   0xb   :  { %1809 = vmatpush3.bf16.msra.mxu0 %v1902_v2  ;;  %1894 = vmatpush3.bf16.msra.mxu1 %v1902_v2  ;;  %v164_v50 = vmul.f32 %v1432_v37, %v1961_v5  ;;  %v1436_v51 = vunpack.c.l.bf16 %v1706_v38  ;;  %v1437_v52 = vunpack.c.h.bf16 %v1706_v38  ;;  %v1440_v53 = vunpack.c.l.bf16 %v1707_v41 }
   0xc   :  { %1810 = vmatprep.subr.bf16.mxu0 %v1903_v3  ;;  %1887 = vmatprep.subr.bf16.mxu1 %v1903_v3  ;;  %v355_v27 = vpack.c.bf16 %v292_v21, %v291_v20  ;;  %v1441_v54 = vunpack.c.h.bf16 %v1707_v41  ;;  %v1444_v55 = vunpack.c.l.bf16 %v1708_v42  ;;  %v1445_v56 = vunpack.c.h.bf16 %v1708_v42 }
   0xd   :  { %v165_v57 = vmul.f32 %v1433_v40, %v1961_v5  ;;  %v1448_v58 = vunpack.c.l.bf16 %v1709_v48  ;;  %v1449_v59 = vunpack.c.h.bf16 %v1709_v48  ;;  %v356_v60 = vpack.c.bf16 %v294_v45, %v293_v44  ;;  %v1717_v44 = vld [vmem:[%s2530_s0 + $0x80] sm:$0xff]  }
   0xe   :  { %1820 = vmatprep.mubr.bf16.mxu0 %v355_v27  ;;  %v233_v61 = vadd.f32 %v1972_v10, %v162_v39  ;;  %v234_v62 = vadd.f32 %v1972_v10, %v163_v47  ;;  %v357_v0 = vpack.c.bf16 %v296_v49, %v295_v46  ;;  %v235_v1 = vadd.f32 %v1972_v10, %v164_v50 }
   0xf   :  { %1811 = vmatpush3.bf16.msra.mxu0 %v1903_v3  ;;  %1895 = vmatpush3.bf16.msra.mxu1 %v1903_v3  ;;  %v166_v2 = vmul.f32 %v1436_v51, %v1961_v5  ;;  %v167_v3 = vmul.f32 %v1437_v52, %v1961_v5  ;;  %v168_v6 = vmul.f32 %v1440_v53, %v1961_v5  ;;  %v1452_v14 = vunpack.c.l.bf16 %v1710_v63  ;;  %v2065_v52 = vld [vmem:[%s2530_s0 + $0x60] sm:$0xff]  }
  0x10   :  { %1812 = vmatprep.subr.bf16.mxu0 %v1904_v13  ;;  %1888 = vmatprep.subr.bf16.mxu1 %v1904_v13  ;;  %v169_v7 = vmul.f32 %v1441_v54, %v1961_v5  ;;  %v170_v8 = vmul.f32 %v1444_v55, %v1961_v5  ;;  %v171_v9 = vmul.f32 %v1445_v56, %v1961_v5  ;;  %v297_v15 = vmax.f32 %v233_v61, 0.0 }
  0x11   :  { %v236_v11 = vadd.f32 %v1972_v10, %v165_v57  ;;  %v172_v12 = vmul.f32 %v1448_v58, %v1961_v5  ;;  %v298_v16 = vmax.f32 %v234_v62, 0.0  ;;  %v1453_v17 = vunpack.c.h.bf16 %v1710_v63 }
  0x12   :  { %v1456_v18 = vunpack.c.l.bf16 %v1711_v4  ;;  %v299_v19 = vmax.f32 %v235_v1, 0.0  ;;  %v237_v20 = vadd.f32 %v1972_v10, %v166_v2  ;;  %v238_v21 = vadd.f32 %v1972_v10, %v167_v3 }
  0x13   :  { %1813 = vmatpush3.bf16.msra.mxu0 %v1904_v13  ;;  %1896 = vmatpush3.bf16.msra.mxu1 %v1904_v13  ;;  %v173_v13 = vmul.f32 %v1449_v59, %v1961_v5  ;;  %v239_v24 = vadd.f32 %v1972_v10, %v168_v6  ;;  %v240_v25 = vadd.f32 %v1972_v10, %v169_v7  ;;  %v300_v28 = vmax.f32 %v236_v11, 0.0  ;;  %v1718_v59 = vld [vmem:[%s2530_s0 + $0x88] sm:$0xff]   ;;  %v1720_v11 = vld [vmem:[%s2530_s0 + $0x98] sm:$0xff]  }
  0x14   :  { %1814 = vmatprep.subr.bf16.mxu0 %v1905_v22  ;;  %1889 = vmatprep.subr.bf16.mxu1 %v1905_v22  ;;  %v241_v26 = vadd.f32 %v1972_v10, %v170_v8  ;;  %v242_v27 = vadd.f32 %v1972_v10, %v171_v9  ;;  %v243_v29 = vadd.f32 %v1972_v10, %v172_v12  ;;  %v1460_v35 = vunpack.c.l.bf16 %v1712_v23 }
  0x15   :  { %v244_v30 = vadd.f32 %v1972_v10, %v173_v13  ;;  %v358_v32 = vpack.c.bf16 %v298_v16, %v297_v15  ;;  %v175_v33 = vmul.f32 %v1453_v17, %v1961_v5  ;;  %v176_v34 = vmul.f32 %v1456_v18, %v1961_v5 }
  0x16   :  { %v301_v36 = vmax.f32 %v237_v20, 0.0  ;;  %v302_v37 = vmax.f32 %v238_v21, 0.0  ;;  %v1461_v39 = vunpack.c.h.bf16 %v1712_v23  ;;  %v303_v40 = vmax.f32 %v239_v24, 0.0  ;;  %v1721_v24 = vld [vmem:[%s2530_s0 + $0xa0] sm:$0xff]  }
  0x17   :  { %1815 = vmatpush3.bf16.msra.mxu0 %v1905_v22  ;;  %1897 = vmatpush3.bf16.msra.mxu1 %v1905_v22  ;;  %v1457_v22 = vunpack.c.h.bf16 %v1711_v4  ;;  %v304_v41 = vmax.f32 %v240_v25, 0.0  ;;  %v305_v42 = vmax.f32 %v241_v26, 0.0  ;;  %v359_v45 = vpack.c.bf16 %v300_v28, %v299_v19 }
  0x18   :  { %1816 = vmatprep.subr.bf16.mxu0 %v1906_v31  ;;  %1890 = vmatprep.subr.bf16.mxu1 %v1906_v31  ;;  %v307_v46 = vmax.f32 %v243_v29, 0.0  ;;  %v308_v47 = vmax.f32 %v244_v30, 0.0  ;;  %v246_v49 = vadd.f32 %v1972_v10, %v175_v33  ;;  %v2059_v50 = vadd.f32 %v1972_v10, %v176_v34  ;;  %v1722_v33 = vld [vmem:[%s2530_s0 + $0xa8] sm:$0xff]  }
  0x19   :  { %v177_v38 = vmul.f32 %v1457_v22, %v1961_v5  ;;  %v178_v51 = vmul.f32 %v1460_v35, %v1961_v5  ;;  %v179_v54 = vmul.f32 %v1461_v39, %v1961_v5  ;;  %v1480_v55 = vunpack.c.l.bf16 %v1717_v44 }
  0x1a   :  { %v360_v56 = vpack.c.bf16 %v302_v37, %v301_v36  ;;  %v361_v57 = vpack.c.bf16 %v304_v41, %v303_v40  ;;  %v1464_v62 = vunpack.c.l.bf16 %v2065_v52  ;;  %v1481_v63 = vunpack.c.h.bf16 %v1717_v44 }
  0x1b   :  { %1817 = vmatpush3.bf16.msra.mxu0 %v1906_v31  ;;  %1898 = vmatpush3.bf16.msra.mxu1 %v1906_v31  ;;  %v174_v31 = vmul.f32 %v1452_v14, %v1961_v5  ;;  %v2068_v53 = vadd.f32 %v1972_v10, %v177_v38  ;;  %v310_v1 = vmax.f32 %v246_v49, 0.0  ;;  %v311_v2 = vmax.f32 %v2059_v50, 0.0 }
  0x1c   :  { %1818 = vmatprep.subr.bf16.mxu0 %v1907_v43  ;;  %1891 = vmatprep.subr.bf16.mxu1 %v1907_v43  ;;  %v2084_v3 = vadd.f32 %v1972_v10, %v178_v51  ;;  %v188_v4 = vmul.f32 %v1480_v55, %v1961_v5  ;;  %v2089_v7 = vadd.f32 %v1972_v10, %v179_v54  ;;  %v1484_v9 = vunpack.c.l.bf16 %v1718_v59 }
  0x1d   :  { %v245_v48 = vadd.f32 %v1972_v10, %v174_v31  ;;  %v312_v6 = vmax.f32 %v2068_v53, 0.0  ;;  %v189_v8 = vmul.f32 %v1481_v63, %v1961_v5  ;;  %v1465_v12 = vunpack.c.h.bf16 %v2065_v52 }
  0x1e   :  { %v259_v13 = vadd.f32 %v1972_v10, %v188_v4  ;;  %v1485_v14 = vunpack.c.h.bf16 %v1718_v59  ;;  %v2098_v16 = vmul.f32 %v1464_v62, %v1961_v5  ;;  %v190_v18 = vmul.f32 %v1484_v9, %v1961_v5 }
  0x1f   :  { %1819 = vmatpush3.bf16.msra.mxu0 %v1907_v43  ;;  %1899 = vmatpush3.bf16.msra.mxu1 %v1907_v43  ;;  %v306_v43 = vmax.f32 %v242_v27, 0.0  ;;  %v309_v61 = vmax.f32 %v245_v48, 0.0  ;;  %v260_v17 = vadd.f32 %v1972_v10, %v189_v8  ;;  %v1492_v23 = vunpack.c.l.bf16 %v1720_v11 }
  0x20   :  { %v323_v20 = vmax.f32 %v259_v13, 0.0  ;;  %v191_v21 = vmul.f32 %v1485_v14, %v1961_v5  ;;  %v261_v27 = vadd.f32 %v1972_v10, %v190_v18  ;;  %v1493_v31 = vunpack.c.h.bf16 %v1720_v11  ;;  %v1725_v18 = vld [vmem:[%s2530_s0 + $0xc0] sm:$0xff]  }
  0x21   :  { %v2071_v58 = vpack.c.bf16 %v306_v43, %v305_v42  ;;  %v2107_v25 = vpack.c.bf16 %v310_v1, %v309_v61  ;;  %v324_v26 = vmax.f32 %v260_v17, 0.0  ;;  %v1496_v37 = vunpack.c.l.bf16 %v1721_v24  ;;  %v1724_v1 = vld [vmem:[%s2530_s0 + $0xb8] sm:$0xff]  }
  0x22   :  { %1821 = vmatmul.mubr.bf16.vlgmr.msra.gmra.mxu0 %v356_v60  ;;  %v2076_v60 = vpack.c.bf16 %v308_v47, %v307_v46  ;;  %v262_v29 = vadd.f32 %v1972_v10, %v191_v21  ;;  %v325_v35 = vmax.f32 %v261_v27, 0.0  ;;  %v195_v40 = vmul.f32 %v1493_v31, %v1961_v5  ;;  %v1723_v46 = vld [vmem:[%s2530_s0 + $0xb0] sm:$0xff]   ;;  %v1714_v47 = vld [vmem:[%s2530_s0 + $0x68] sm:$0xff]  }
  0x23   :  { %1824 = vmatprep.mubr.bf16.mxu0 %v357_v0  ;;  %v1719_v0 = vld [vmem:[%s2530_s0 + $0x90] sm:$0xff]   ;;  %v371_v34 = vpack.c.bf16 %v324_v26, %v323_v20  ;;  %v1497_v43 = vunpack.c.h.bf16 %v1721_v24  ;;  %v196_v44 = vmul.f32 %v1496_v37, %v1961_v5  ;;  %v1501_v54 = vunpack.c.h.bf16 %v1722_v33 }
  0x24   :  { %v1488_v15 = vunpack.c.l.bf16 %v1719_v0  ;;  %v1489_v19 = vunpack.c.h.bf16 %v1719_v0  ;;  %v326_v38 = vmax.f32 %v262_v29, 0.0  ;;  %v266_v49 = vadd.f32 %v1972_v10, %v195_v40  ;;  %v1727_v40 = vld [vmem:[%s2530_s0 + $0xd0] sm:$0xff]  }
  0x25   :  { %1852 = vmatprep.mubr.bf16.mxu1 %v371_v34  ;;  %v199_v62 = vmul.f32 %v1501_v54, %v1961_v5  ;;  %v1504_v63 = vunpack.c.l.bf16 %v1723_v46  ;;  %v1505_v0 = vunpack.c.h.bf16 %v1723_v46  ;;  %v313_v4 = vmax.f32 %v2084_v3, 0.0 }
  0x26   :  { %v192_v22 = vmul.f32 %v1488_v15, %v1961_v5  ;;  %v193_v28 = vmul.f32 %v1489_v19, %v1961_v5  ;;  %v372_v48 = vpack.c.bf16 %v326_v38, %v325_v35  ;;  %v330_v61 = vmax.f32 %v266_v49, 0.0 }
  0x27   :  { %v1468_v8 = vunpack.c.l.bf16 %v1714_v47  ;;  %v314_v13 = vmax.f32 %v2089_v7, 0.0  ;;  %v1469_v14 = vunpack.c.h.bf16 %v1714_v47  ;;  %v200_v15 = vmul.f32 %v1504_v63, %v1961_v5 }
  0x28   :  { %v263_v30 = vadd.f32 %v1972_v10, %v192_v22  ;;  %v264_v36 = vadd.f32 %v1972_v10, %v193_v28  ;;  %1853 = vmatmul.mubr.bf16.vlgmr.msra.gmra.mxu1 %v372_v48  ;;  %v201_v17 = vmul.f32 %v1505_v0, %v1961_v5  ;;  %v181_v3 = vmul.f32 %v1465_v12, %v1961_v5 }
  0x29   :  { %v1508_v19 = vunpack.c.l.bf16 %v1724_v1  ;;  %v1509_v20 = vunpack.c.h.bf16 %v1724_v1  ;;  %v271_v24 = vadd.f32 %v1972_v10, %v200_v15  ;;  %v1512_v27 = vunpack.c.l.bf16 %v1725_v18  ;;  %v1728_v15 = vld [vmem:[%s2530_s0 + $0xd8] sm:$0xff]  }
  0x2a   :  { %1825 = vmatmul.mubr.bf16.gmra.mxu0 %v358_v32  ;;  %v194_v32 = vmul.f32 %v1492_v23, %v1961_v5  ;;  %v327_v39 = vmax.f32 %v263_v30, 0.0  ;;  %v328_v42 = vmax.f32 %v264_v36, 0.0  ;;  %v270_v23 = vadd.f32 %v1972_v10, %v199_v62 }
  0x2b   :  { %1828 = vmatprep.mubr.bf16.mxu0 %v359_v45  ;;  %v1500_v45 = vunpack.c.l.bf16 %v1722_v33  ;;  %v1513_v52 = vunpack.c.h.bf16 %v1725_v18  ;;  %v365_v12 = vpack.c.bf16 %v312_v6, %v311_v2  ;;  %v251_v28 = vadd.f32 %v1972_v10, %v2098_v16  ;;  %v1716_v33 = vld [vmem:[%s2530_s0 + $0x78] sm:$0xff]   ;;  %v1726_v16 = vld [vmem:[%s2530_s0 + $0xc8] sm:$0xff]  }
  0x2c   :  { %v265_v41 = vadd.f32 %v1972_v10, %v194_v32  ;;  %v373_v55 = vpack.c.bf16 %v328_v42, %v327_v39  ;;  %v252_v31 = vadd.f32 %v1972_v10, %v181_v3  ;;  %v182_v32 = vmul.f32 %v1468_v8, %v1961_v5 }
  0x2d   :  { %v198_v59 = vmul.f32 %v1500_v45, %v1961_v5  ;;  %v202_v34 = vmul.f32 %v1508_v19, %v1961_v5  ;;  %v203_v50 = vmul.f32 %v1509_v20, %v1961_v5  ;;  %v366_v35 = vpack.c.bf16 %v314_v13, %v313_v4 }
  0x2e   :  { %v329_v51 = vmax.f32 %v265_v41, 0.0  ;;  %1856 = vmatprep.mubr.bf16.mxu1 %v373_v55  ;;  %v183_v53 = vmul.f32 %v1469_v14, %v1961_v5  ;;  %v334_v6 = vmax.f32 %v270_v23, 0.0  ;;  %v335_v36 = vmax.f32 %v271_v24, 0.0 }
  0x2f   :  { %v269_v22 = vadd.f32 %v1972_v10, %v198_v59  ;;  %v204_v38 = vmul.f32 %v1512_v27, %v1961_v5  ;;  %v205_v39 = vmul.f32 %v1513_v52, %v1961_v5  ;;  %v315_v41 = vmax.f32 %v251_v28, 0.0 }
  0x30   :  { %v374_v21 = vpack.c.bf16 %v330_v61, %v329_v51  ;;  %v316_v45 = vmax.f32 %v252_v31, 0.0  ;;  %v273_v46 = vadd.f32 %v1972_v10, %v202_v34  ;;  %v274_v47 = vadd.f32 %v1972_v10, %v203_v50 }
  0x31   :  { %v333_v2 = vmax.f32 %v269_v22, 0.0  ;;  %v1516_v48 = vunpack.c.l.bf16 %v1726_v16  ;;  %v1517_v51 = vunpack.c.h.bf16 %v1726_v16  ;;  %v1520_v54 = vunpack.c.l.bf16 %v1727_v40 }
  0x32   :  { %1829 = vmatmul.mubr.bf16.gmra.mxu0 %v360_v56  ;;  %v197_v56 = vmul.f32 %v1497_v43, %v1961_v5  ;;  %1857 = vmatmul.mubr.bf16.gmra.mxu1 %v374_v21  ;;  %v1521_v55 = vunpack.c.h.bf16 %v1727_v40  ;;  %v276_v59 = vadd.f32 %v1972_v10, %v205_v39  ;;  %v254_v61 = vadd.f32 %v1972_v10, %v183_v53  ;;  %v1729_v21 = vld [vmem:[%s2530_s0 + $0xe0] sm:$0xff]  }
  0x33   :  { %1832 = vmatprep.mubr.bf16.mxu0 %v361_v57  ;;  %v267_v57 = vadd.f32 %v1972_v10, %v196_v44  ;;  %v1476_v44 = vunpack.c.l.bf16 %v1716_v33  ;;  %v376_v49 = vpack.c.bf16 %v334_v6, %v333_v2  ;;  %v1477_v0 = vunpack.c.h.bf16 %v1716_v33 }
  0x34   :  { %v268_v9 = vadd.f32 %v1972_v10, %v197_v56  ;;  %v253_v56 = vadd.f32 %v1972_v10, %v182_v32  ;;  %v367_v1 = vpack.c.bf16 %v316_v45, %v315_v41  ;;  %v337_v4 = vmax.f32 %v273_v46, 0.0  ;;  %v1731_v41 = vld [vmem:[%s2530_s0 + $0xf0] sm:$0xff]  }
  0x35   :  { %v331_v11 = vmax.f32 %v267_v57, 0.0  ;;  %v275_v57 = vadd.f32 %v1972_v10, %v204_v38  ;;  %v338_v8 = vmax.f32 %v274_v47, 0.0  ;;  %v208_v13 = vmul.f32 %v1520_v54, %v1961_v5 }
  0x36   :  { %v332_v7 = vmax.f32 %v268_v9, 0.0  ;;  %v206_v9 = vmul.f32 %v1516_v48, %v1961_v5  ;;  %v209_v14 = vmul.f32 %v1521_v55, %v1961_v5  ;;  %v340_v3 = vmax.f32 %v276_v59, 0.0 }
  0x37   :  { %v339_v18 = vmax.f32 %v275_v57, 0.0  ;;  %v187_v20 = vmul.f32 %v1477_v0, %v1961_v5  ;;  %v378_v23 = vpack.c.bf16 %v338_v8, %v337_v4  ;;  %v279_v27 = vadd.f32 %v1972_v10, %v208_v13 }
  0x38   :  { %v375_v26 = vpack.c.bf16 %v332_v7, %v331_v11  ;;  %v207_v11 = vmul.f32 %v1517_v51, %v1961_v5  ;;  %v318_v7 = vmax.f32 %v254_v61, 0.0  ;;  %v277_v24 = vadd.f32 %v1972_v10, %v206_v9 }
  0x39   :  { %v280_v52 = vadd.f32 %v1972_v10, %v209_v14  ;;  %v379_v28 = vpack.c.bf16 %v340_v3, %v339_v18  ;;  %v258_v33 = vadd.f32 %v1972_v10, %v187_v20  ;;  %v343_v2 = vmax.f32 %v279_v27, 0.0 }
  0x3a   :  { %1833 = vmatmul.mubr.bf16.gmra.mxu0 %v2071_v58  ;;  %v1715_v58 = vld [vmem:[%s2530_s0 + $0x70] sm:$0xff]   ;;  %1860 = vmatprep.mubr.bf16.mxu1 %v375_v26  ;;  %v1524_v26 = vunpack.c.l.bf16 %v1728_v15  ;;  %v341_v50 = vmax.f32 %v277_v24, 0.0  ;;  %v1536_v51 = vunpack.c.l.bf16 %v1731_v41  ;;  %v1537_v54 = vunpack.c.h.bf16 %v1731_v41 }
  0x3b   :  { %1836 = vmatprep.mubr.bf16.mxu0 %v2076_v60  ;;  %v272_v60 = vadd.f32 %v1972_v10, %v201_v17  ;;  %v1472_v29 = vunpack.c.l.bf16 %v1715_v58  ;;  %v1473_v30 = vunpack.c.h.bf16 %v1715_v58  ;;  %1861 = vmatmul.mubr.bf16.gmra.mxu1 %v376_v49  ;;  %v186_v17 = vmul.f32 %v1476_v44, %v1961_v5 }
  0x3c   :  { %v317_v58 = vmax.f32 %v253_v56, 0.0  ;;  %v344_v6 = vmax.f32 %v280_v52, 0.0  ;;  %v322_v40 = vmax.f32 %v258_v33, 0.0  ;;  %v217_v0 = vmul.f32 %v1537_v54, %v1961_v5 }
  0x3d   :  { %v336_v37 = vmax.f32 %v272_v60, 0.0  ;;  %v184_v42 = vmul.f32 %v1472_v29, %v1961_v5  ;;  %v185_v43 = vmul.f32 %v1473_v30, %v1961_v5  ;;  %v278_v60 = vadd.f32 %v1972_v10, %v207_v11 }
  0x3e   :  { %v1528_v29 = vunpack.c.l.bf16 %v1729_v21  ;;  %v1529_v30 = vunpack.c.h.bf16 %v1729_v21  ;;  %v368_v31 = vpack.c.bf16 %v318_v7, %v317_v58  ;;  %v257_v32 = vadd.f32 %v1972_v10, %v186_v17 }
  0x3f   :  { %v255_v62 = vadd.f32 %v1972_v10, %v184_v42  ;;  %v256_v63 = vadd.f32 %v1972_v10, %v185_v43  ;;  %v342_v53 = vmax.f32 %v278_v60, 0.0  ;;  %v381_v45 = vpack.c.bf16 %v344_v6, %v343_v2 }
  0x40   :  { %v213_v38 = vmul.f32 %v1529_v30, %v1961_v5  ;;  %v321_v39 = vmax.f32 %v257_v32, 0.0  ;;  %v288_v17 = vadd.f32 %v1972_v10, %v217_v0 }
  0x41   :  { %v319_v19 = vmax.f32 %v255_v62, 0.0  ;;  %v320_v22 = vmax.f32 %v256_v63, 0.0  ;;  %v380_v44 = vpack.c.bf16 %v342_v53, %v341_v50  ;;  %v216_v63 = vmul.f32 %v1536_v51, %v1961_v5 }
  0x42   :  { %1837 = vmatmul.mubr.bf16.gmra.mxu0 %v2107_v25  ;;  %v377_v25 = vpack.c.bf16 %v336_v37, %v335_v36  ;;  %v1730_v36 = vld [vmem:[%s2530_s0 + $0xe8] sm:$0xff]   ;;  %v212_v37 = vmul.f32 %v1528_v29, %v1961_v5  ;;  %v284_v49 = vadd.f32 %v1972_v10, %v213_v38  ;;  %v370_v55 = vpack.c.bf16 %v322_v40, %v321_v39 }
  0x43   :  { %1840 = vmatprep.mubr.bf16.mxu0 %v365_v12  ;;  %v1525_v12 = vunpack.c.h.bf16 %v1728_v15  ;;  %v369_v34 = vpack.c.bf16 %v320_v22, %v319_v19  ;;  %v1532_v43 = vunpack.c.l.bf16 %v1730_v36  ;;  %v1533_v47 = vunpack.c.h.bf16 %v1730_v36 }
  0x44   :  { %1864 = vmatprep.mubr.bf16.mxu1 %v377_v25  ;;  %v283_v48 = vadd.f32 %v1972_v10, %v212_v37  ;;  %v348_v62 = vmax.f32 %v284_v49, 0.0  ;;  %v287_v15 = vadd.f32 %v1972_v10, %v216_v63  ;;  %v352_v20 = vmax.f32 %v288_v17, 0.0 }
  0x45   :  { %1865 = vmatmul.mubr.bf16.gmra.mxu1 %v378_v23  ;;  %v211_v16 = vmul.f32 %v1525_v12, %v1961_v5  ;;  %v214_v56 = vmul.f32 %v1532_v43, %v1961_v5  ;;  %v215_v59 = vmul.f32 %v1533_v47, %v1961_v5 }
  0x46   :  { %1868 = vmatprep.mubr.bf16.mxu1 %v379_v28  ;;  %v347_v61 = vmax.f32 %v283_v48, 0.0  ;;  %v351_v19 = vmax.f32 %v287_v15, 0.0 }
  0x47   :  { %v282_v46 = vadd.f32 %v1972_v10, %v211_v16  ;;  %v285_v4 = vadd.f32 %v1972_v10, %v214_v56  ;;  %v286_v9 = vadd.f32 %v1972_v10, %v215_v59 }
  0x48   :  { %v383_v14 = vpack.c.bf16 %v348_v62, %v347_v61  ;;  %v385_v24 = vpack.c.bf16 %v352_v20, %v351_v19 }
  0x49   :  { %v346_v57 = vmax.f32 %v282_v46, 0.0  ;;  %v349_v18 = vmax.f32 %v285_v4, 0.0  ;;  %v350_v3 = vmax.f32 %v286_v9, 0.0 }
  0x4a   :  { %1841 = vmatmul.mubr.bf16.gmra.mxu0 %v366_v35  ;;  %v210_v35 = vmul.f32 %v1524_v26, %v1961_v5 }
  0x4b   :  { %1844 = vmatprep.mubr.bf16.mxu0 %v367_v1  ;;  %v1732_v1 = vld [vmem:[%s2530_s0 + $0xf8] sm:$0xff]   ;;  %v384_v21 = vpack.c.bf16 %v350_v3, %v349_v18 }
  0x4c   :  { %v281_v42 = vadd.f32 %v1972_v10, %v210_v35  ;;  %v1540_v11 = vunpack.c.l.bf16 %v1732_v1  ;;  %v1541_v13 = vunpack.c.h.bf16 %v1732_v1 }
  0x4d   :  { %1869 = vmatmul.mubr.bf16.gmra.mxu1 %v380_v44 }
  0x4e   :  { %v345_v25 = vmax.f32 %v281_v42, 0.0  ;;  %1872 = vmatprep.mubr.bf16.mxu1 %v381_v45  ;;  %v218_v58 = vmul.f32 %v1540_v11, %v1961_v5  ;;  %v219_v7 = vmul.f32 %v1541_v13, %v1961_v5 }
  0x50   :  { %v382_v8 = vpack.c.bf16 %v346_v57, %v345_v25  ;;  %v289_v22 = vadd.f32 %v1972_v10, %v218_v58  ;;  %v290_v23 = vadd.f32 %v1972_v10, %v219_v7 }
  0x52   :  { %1845 = vmatmul.mubr.bf16.gmra.mxu0 %v368_v31  ;;  %v353_v26 = vmax.f32 %v289_v22, 0.0  ;;  %v354_v60 = vmax.f32 %v290_v23, 0.0 }
  0x53   :  { %1848 = vmatprep.mubr.bf16.mxu0 %v369_v34 }
  0x54   :  { %v386_v27 = vpack.c.bf16 %v354_v60, %v353_v26 }
  0x55   :  { %1873 = vmatmul.mubr.bf16.gmra.mxu1 %v382_v8 }
  0x56   :  { %1876 = vmatprep.mubr.bf16.mxu1 %v383_v14 }
  0x5a   :  { %1849 = vmatmul.mubr.bf16.gmra.mxu0 %v370_v55 }
  0x5d   :  { %1877 = vmatmul.mubr.bf16.gmra.mxu1 %v384_v21 }
  0x5e   :  { %1880 = vmatprep.mubr.bf16.mxu1 %v385_v24 }
  0x65   :  { %1881 = vmatmul.mubr.bf16.gmra.mxu1 %v386_v27 }
  0xe2   :  { %v1822_v52 = vpop.f32.mrf.mxu0 }
  0xe3   :  { %v1132_v34 = vmul.f32 %v1822_v52, %v1822_v52 }
  0xe4   :  { %v485_v12 = vpop.f32.mrf.mxu0 }
  0xe5   :  { %v1130_v30 = vmul.f32 %v485_v12, %v485_v12 }
  0xe6   :  { %v1823_v28 = vpop.f32.mrf.mxu0 }
  0xe7   :  { %v1550_v29 = vpack.c.bf16 %v1823_v28, %v1822_v52  ;;  %v1133_v2 = vmul.f32 %v1823_v28, %v1823_v28 }
  0xe8   :  { %v488_v5 = vpop.f32.mrf.mxu0  ;;  %v2247_v0 = vpop.f32.mrf.mxu1 }
  0xe9   :  { %1733 = vst [vmem:[%s2533_s4 + $0x8] sm:$0xff] %v1550_v29   ;;  %v1545_v31 = vpack.c.bf16 %v488_v5, %v485_v12  ;;  %v1060_v32 = vadd.f32 %v488_v5, %v485_v12  ;;  %v1131_v10 = vmul.f32 %v488_v5, %v488_v5 }
  0xea   :  { %v1826_v33 = vpop.f32.mrf.mxu0  ;;  %v2252_v13 = vpop.f32.mrf.mxu1 }
  0xeb   :  { %1546 = vst [vmem:[%s2533_s4] sm:$0xff] %v1545_v31   ;;  %v1061_v50 = vadd.f32 %v1822_v52, %v1060_v32  ;;  %v1194_v35 = vadd.f32 %v1131_v10, %v1130_v30  ;;  %v1136_v47 = vmul.f32 %v1826_v33, %v1826_v33 }
  0xec   :  { %v501_v53 = vpop.f32.mrf.mxu0  ;;  %v2257_v3 = vpop.f32.mrf.mxu1 }
  0xed   :  { %v1195_v6 = vadd.f32 %v1194_v35, %v1132_v34  ;;  %v1062_v16 = vadd.f32 %v1823_v28, %v1061_v50  ;;  %v1134_v38 = vmul.f32 %v501_v53, %v501_v53  ;;  %v1630_v20 = vpack.c.bf16 %v2257_v3, %v2247_v0 }
  0xee   :  { %v1827_v36 = vpop.f32.mrf.mxu0  ;;  %v2261_v22 = vpop.f32.mrf.mxu1 }
  0xef   :  { %v1063_v37 = vadd.f32 %v1062_v16, %v501_v53  ;;  %v1196_v39 = vadd.f32 %v1195_v6, %v1133_v2  ;;  %v1560_v40 = vpack.c.bf16 %v1827_v36, %v1826_v33  ;;  %v1137_v54 = vmul.f32 %v1827_v36, %v1827_v36  ;;  %1749 = vst [vmem:[%s2533_s4 + $0x88] sm:$0xff] %v1630_v20  }
  0xf0   :  { %v504_v41 = vpop.f32.mrf.mxu0  ;;  %v1625_v52 = vpack.c.bf16 %v2261_v22, %v2252_v13 }
  0xf1   :  { %v1197_v42 = vadd.f32 %v1196_v39, %v1134_v38  ;;  %1735 = vst [vmem:[%s2533_s4 + $0x18] sm:$0xff] %v1560_v40   ;;  %v1555_v43 = vpack.c.bf16 %v504_v41, %v501_v53  ;;  %v1064_v44 = vadd.f32 %v1063_v37, %v504_v41  ;;  %v1135_v45 = vmul.f32 %v504_v41, %v504_v41 }
  0xf2   :  { %v1830_v46 = vpop.f32.mrf.mxu0  ;;  %v2268_v12 = vpop.f32.mrf.mxu1  ;;  %1748 = vst [vmem:[%s2533_s4 + $0x80] sm:$0xff] %v1625_v52  }
  0xf3   :  { %1734 = vst [vmem:[%s2533_s4 + $0x10] sm:$0xff] %v1555_v43   ;;  %v1065_v48 = vadd.f32 %v1826_v33, %v1064_v44  ;;  %v1198_v49 = vadd.f32 %v1197_v42, %v1135_v45  ;;  %v1140_v14 = vmul.f32 %v1830_v46, %v1830_v46 }
  0xf4   :  { %v517_v51 = vpop.f32.mrf.mxu0  ;;  %v2276_v32 = vpop.f32.mrf.mxu1 }
  0xf5   :  { %v1199_v55 = vadd.f32 %v1198_v49, %v1136_v47  ;;  %v1066_v56 = vadd.f32 %v1827_v36, %v1065_v48  ;;  %v1138_v59 = vmul.f32 %v517_v51, %v517_v51 }
  0xf6   :  { %v1831_v25 = vpop.f32.mrf.mxu0  ;;  %v2281_v35 = vpop.f32.mrf.mxu1 }
  0xf7   :  { %v1067_v57 = vadd.f32 %v1066_v56, %v517_v51  ;;  %v1200_v61 = vadd.f32 %v1199_v55, %v1137_v54  ;;  %v1570_v62 = vpack.c.bf16 %v1831_v25, %v1830_v46  ;;  %v1141_v58 = vmul.f32 %v1831_v25, %v1831_v25 }
  0xf8   :  { %v520_v63 = vpop.f32.mrf.mxu0  ;;  %v1640_v16 = vpack.c.bf16 %v2281_v35, %v2268_v12  ;;  %v2285_v37 = vpop.f32.mrf.mxu1 }
  0xf9   :  { %v1201_v1 = vadd.f32 %v1200_v61, %v1138_v59  ;;  %1737 = vst [vmem:[%s2533_s4 + $0x28] sm:$0xff] %v1570_v62   ;;  %v1565_v4 = vpack.c.bf16 %v520_v63, %v517_v51  ;;  %v1068_v8 = vadd.f32 %v1067_v57, %v520_v63  ;;  %v1139_v9 = vmul.f32 %v520_v63, %v520_v63 }
  0xfa   :  { %v1834_v11 = vpop.f32.mrf.mxu0  ;;  %1751 = vst [vmem:[%s2533_s4 + $0x98] sm:$0xff] %v1640_v16   ;;  %v1635_v43 = vpack.c.bf16 %v2285_v37, %v2276_v32 }
  0xfb   :  { %1736 = vst [vmem:[%s2533_s4 + $0x20] sm:$0xff] %v1565_v4   ;;  %v1069_v15 = vadd.f32 %v1830_v46, %v1068_v8  ;;  %v1202_v17 = vadd.f32 %v1201_v1, %v1139_v9  ;;  %v1144_v10 = vmul.f32 %v1834_v11, %v1834_v11  ;;  %v2292_v44 = vpop.f32.mrf.mxu1 }
  0xfc   :  { %v533_v18 = vpop.f32.mrf.mxu0  ;;  %1750 = vst [vmem:[%s2533_s4 + $0x90] sm:$0xff] %v1635_v43  }
  0xfd   :  { %v1203_v7 = vadd.f32 %v1202_v17, %v1140_v14  ;;  %v1070_v19 = vadd.f32 %v1831_v25, %v1069_v15  ;;  %v1142_v24 = vmul.f32 %v533_v18, %v533_v18  ;;  %v2300_v51 = vpop.f32.mrf.mxu1 }
  0xfe   :  { %v1835_v21 = vpop.f32.mrf.mxu0 }
  0xff   :  { %v1071_v23 = vadd.f32 %v1070_v19, %v533_v18  ;;  %v1204_v26 = vadd.f32 %v1203_v7, %v1141_v58  ;;  %v1580_v60 = vpack.c.bf16 %v1835_v21, %v1834_v11  ;;  %v1145_v53 = vmul.f32 %v1835_v21, %v1835_v21  ;;  %v2305_v57 = vpop.f32.mrf.mxu1 }
 0x100   :  { %v536_v27 = vpop.f32.mrf.mxu0  ;;  %v1650_v63 = vpack.c.bf16 %v2305_v57, %v2292_v44 }
 0x101   :  { %v1205_v28 = vadd.f32 %v1204_v26, %v1142_v24  ;;  %1739 = vst [vmem:[%s2533_s4 + $0x38] sm:$0xff] %v1580_v60   ;;  %v1575_v29 = vpack.c.bf16 %v536_v27, %v533_v18  ;;  %v1072_v5 = vadd.f32 %v1071_v23, %v536_v27  ;;  %v1143_v30 = vmul.f32 %v536_v27, %v536_v27  ;;  %v2309_v4 = vpop.f32.mrf.mxu1 }
 0x102   :  { %v1838_v31 = vpop.f32.mrf.mxu0  ;;  %1753 = vst [vmem:[%s2533_s4 + $0xa8] sm:$0xff] %v1650_v63   ;;  %v1645_v17 = vpack.c.bf16 %v2309_v4, %v2300_v51 }
 0x103   :  { %1738 = vst [vmem:[%s2533_s4 + $0x30] sm:$0xff] %v1575_v29   ;;  %v1073_v33 = vadd.f32 %v1834_v11, %v1072_v5  ;;  %v1206_v34 = vadd.f32 %v1205_v28, %v1143_v30  ;;  %v1148_v54 = vmul.f32 %v1838_v31, %v1838_v31 }
 0x104   :  { %v549_v50 = vpop.f32.mrf.mxu0  ;;  %1752 = vst [vmem:[%s2533_s4 + $0xa0] sm:$0xff] %v1645_v17  }
 0x105   :  { %v1207_v2 = vadd.f32 %v1206_v34, %v1144_v10  ;;  %v1074_v6 = vadd.f32 %v1835_v21, %v1073_v33  ;;  %v1146_v39 = vmul.f32 %v549_v50, %v549_v50  ;;  %v2316_v18 = vpop.f32.mrf.mxu1 }
 0x106   :  { %v1839_v36 = vpop.f32.mrf.mxu0 }
 0x107   :  { %v1075_v38 = vadd.f32 %v1074_v6, %v549_v50  ;;  %v1208_v40 = vadd.f32 %v1207_v2, %v1145_v53  ;;  %v1590_v41 = vpack.c.bf16 %v1839_v36, %v1838_v31  ;;  %v1149_v59 = vmul.f32 %v1839_v36, %v1839_v36  ;;  %v2324_v23 = vpop.f32.mrf.mxu1 }
 0x108   :  { %v552_v42 = vpop.f32.mrf.mxu0 }
 0x109   :  { %v1209_v45 = vadd.f32 %v1208_v40, %v1146_v39  ;;  %1741 = vst [vmem:[%s2533_s4 + $0x48] sm:$0xff] %v1590_v41   ;;  %v1585_v46 = vpack.c.bf16 %v552_v42, %v549_v50  ;;  %v1076_v47 = vadd.f32 %v1075_v38, %v552_v42  ;;  %v1147_v48 = vmul.f32 %v552_v42, %v552_v42  ;;  %v2329_v52 = vpop.f32.mrf.mxu1 }
 0x10a   :  { %v1842_v49 = vpop.f32.mrf.mxu0  ;;  %v1660_v30 = vpack.c.bf16 %v2329_v52, %v2316_v18 }
 0x10b   :  { %1740 = vst [vmem:[%s2533_s4 + $0x40] sm:$0xff] %v1585_v46   ;;  %v1077_v55 = vadd.f32 %v1838_v31, %v1076_v47  ;;  %v1210_v56 = vadd.f32 %v1209_v45, %v1147_v48  ;;  %v1152_v24 = vmul.f32 %v1842_v49, %v1842_v49  ;;  %v2333_v10 = vpop.f32.mrf.mxu1 }
 0x10c   :  { %v565_v25 = vpop.f32.mrf.mxu0  ;;  %1755 = vst [vmem:[%s2533_s4 + $0xb8] sm:$0xff] %v1660_v30   ;;  %v1655_v6 = vpack.c.bf16 %v2333_v10, %v2324_v23 }
 0x10d   :  { %v1211_v61 = vadd.f32 %v1210_v56, %v1148_v54  ;;  %v1078_v62 = vadd.f32 %v1839_v36, %v1077_v55  ;;  %v1150_v9 = vmul.f32 %v565_v25, %v565_v25  ;;  %v2340_v16 = vpop.f32.mrf.mxu1 }
 0x10e   :  { %v1843_v1 = vpop.f32.mrf.mxu0  ;;  %1754 = vst [vmem:[%s2533_s4 + $0xb0] sm:$0xff] %v1655_v6   ;;  %v1164_v6 = vmul.f32 %v2247_v0, %v2247_v0 }
 0x10f   :  { %v1079_v8 = vadd.f32 %v1078_v62, %v565_v25  ;;  %v1212_v11 = vadd.f32 %v1211_v61, %v1149_v59  ;;  %v1600_v14 = vpack.c.bf16 %v1843_v1, %v1842_v49  ;;  %v1153_v28 = vmul.f32 %v1843_v1, %v1843_v1  ;;  %v2348_v42 = vpop.f32.mrf.mxu1 }
 0x110   :  { %v568_v15 = vpop.f32.mrf.mxu0 }
 0x111   :  { %v1213_v58 = vadd.f32 %v1212_v11, %v1150_v9  ;;  %1743 = vst [vmem:[%s2533_s4 + $0x58] sm:$0xff] %v1600_v14   ;;  %v1595_v7 = vpack.c.bf16 %v568_v15, %v565_v25  ;;  %v1080_v19 = vadd.f32 %v1079_v8, %v568_v15  ;;  %v1151_v20 = vmul.f32 %v568_v15, %v568_v15  ;;  %v2353_v48 = vpop.f32.mrf.mxu1 }
 0x112   :  { %v1846_v21 = vpop.f32.mrf.mxu0  ;;  %v1670_v56 = vpack.c.bf16 %v2353_v48, %v2340_v16 }
 0x113   :  { %1742 = vst [vmem:[%s2533_s4 + $0x50] sm:$0xff] %v1595_v7   ;;  %v1081_v26 = vadd.f32 %v1842_v49, %v1080_v19  ;;  %v1214_v60 = vadd.f32 %v1213_v58, %v1151_v20  ;;  %v1156_v43 = vmul.f32 %v1846_v21, %v1846_v21  ;;  %v2357_v59 = vpop.f32.mrf.mxu1 }
 0x114   :  { %v581_v27 = vpop.f32.mrf.mxu0  ;;  %1757 = vst [vmem:[%s2533_s4 + $0xc8] sm:$0xff] %v1670_v56   ;;  %v1665_v9 = vpack.c.bf16 %v2357_v59, %v2348_v42  ;;  %v1167_v56 = vmul.f32 %v2285_v37, %v2285_v37 }
 0x115   :  { %v1215_v29 = vadd.f32 %v1214_v60, %v1152_v24  ;;  %v1082_v5 = vadd.f32 %v1843_v1, %v1081_v26  ;;  %v1154_v34 = vmul.f32 %v581_v27, %v581_v27  ;;  %v2364_v11 = vpop.f32.mrf.mxu1 }
 0x116   :  { %v1847_v31 = vpop.f32.mrf.mxu0  ;;  %1756 = vst [vmem:[%s2533_s4 + $0xc0] sm:$0xff] %v1665_v9  }
 0x117   :  { %v1083_v33 = vadd.f32 %v1082_v5, %v581_v27  ;;  %v1216_v50 = vadd.f32 %v1215_v29, %v1153_v28  ;;  %v1610_v53 = vpack.c.bf16 %v1847_v31, %v1846_v21  ;;  %v1157_v49 = vmul.f32 %v1847_v31, %v1847_v31  ;;  %v2372_v7 = vpop.f32.mrf.mxu1 }
 0x118   :  { %v584_v2 = vpop.f32.mrf.mxu0  ;;  %v1162_v5 = vmul.f32 %v2252_v13, %v2252_v13 }
 0x119   :  { %v1217_v36 = vadd.f32 %v1216_v50, %v1154_v34  ;;  %1745 = vst [vmem:[%s2533_s4 + $0x68] sm:$0xff] %v1610_v53   ;;  %v1605_v38 = vpack.c.bf16 %v584_v2, %v581_v27  ;;  %v1084_v39 = vadd.f32 %v1083_v33, %v584_v2  ;;  %v1155_v40 = vmul.f32 %v584_v2, %v584_v2  ;;  %v2377_v24 = vpop.f32.mrf.mxu1 }
 0x11a   :  { %v1850_v41 = vpop.f32.mrf.mxu0  ;;  %v1680_v28 = vpack.c.bf16 %v2377_v24, %v2364_v11  ;;  %v1163_v53 = vmul.f32 %v2261_v22, %v2261_v22 }
 0x11b   :  { %1744 = vst [vmem:[%s2533_s4 + $0x60] sm:$0xff] %v1605_v38   ;;  %v1085_v45 = vadd.f32 %v1846_v21, %v1084_v39  ;;  %v1218_v46 = vadd.f32 %v1217_v36, %v1155_v40  ;;  %v1160_v19 = vmul.f32 %v1850_v41, %v1850_v41  ;;  %v2381_v29 = vpop.f32.mrf.mxu1  ;;  %v1165_v40 = vmul.f32 %v2257_v3, %v2257_v3 }
 0x11c   :  { %v597_v47 = vpop.f32.mrf.mxu0  ;;  %1759 = vst [vmem:[%s2533_s4 + $0xd8] sm:$0xff] %v1680_v28   ;;  %v1675_v33 = vpack.c.bf16 %v2381_v29, %v2372_v7 }
 0x11d   :  { %v1219_v54 = vadd.f32 %v1218_v46, %v1156_v43  ;;  %v1086_v55 = vadd.f32 %v1847_v31, %v1085_v45  ;;  %v1158_v62 = vmul.f32 %v597_v47, %v597_v47  ;;  %v2391_v34 = vpop.f32.mrf.mxu1 }
 0x11e   :  { %v1851_v25 = vpop.f32.mrf.mxu0  ;;  %1758 = vst [vmem:[%s2533_s4 + $0xd0] sm:$0xff] %v1675_v33  }
 0x11f   :  { %v1087_v61 = vadd.f32 %v1086_v55, %v597_v47  ;;  %v1220_v63 = vadd.f32 %v1219_v54, %v1157_v49  ;;  %v1620_v1 = vpack.c.bf16 %v1851_v25, %v1850_v41  ;;  %v1161_v26 = vmul.f32 %v1851_v25, %v1851_v25 }
 0x120   :  { %v600_v8 = vpop.f32.mrf.mxu0 }
 0x121   :  { %v1221_v14 = vadd.f32 %v1220_v63, %v1158_v62  ;;  %1747 = vst [vmem:[%s2533_s4 + $0x78] sm:$0xff] %v1620_v1   ;;  %v1615_v15 = vpack.c.bf16 %v600_v8, %v597_v47  ;;  %v1088_v17 = vadd.f32 %v1087_v61, %v600_v8  ;;  %v1159_v58 = vmul.f32 %v600_v8, %v600_v8 }
 0x122   :  { %v1166_v47 = vmul.f32 %v2276_v32, %v2276_v32  ;;  %v1169_v1 = vmul.f32 %v2281_v35, %v2281_v35 }
 0x123   :  { %1746 = vst [vmem:[%s2533_s4 + $0x70] sm:$0xff] %v1615_v15   ;;  %v1089_v20 = vadd.f32 %v1850_v41, %v1088_v17  ;;  %v1222_v21 = vadd.f32 %v1221_v14, %v1159_v58  ;;  %v1170_v17 = vmul.f32 %v2300_v51, %v2300_v51 }
 0x125   :  { %v1090_v60 = vadd.f32 %v1851_v25, %v1089_v20  ;;  %v1223_v27 = vadd.f32 %v1222_v21, %v1160_v19  ;;  %v1168_v25 = vmul.f32 %v2268_v12, %v2268_v12  ;;  %v1171_v20 = vmul.f32 %v2309_v4, %v2309_v4 }
 0x127   :  { %v1224_v30 = vadd.f32 %v1223_v27, %v1161_v26  ;;  %v1091_v31 = vadd.f32 %v1090_v60, %v2252_v13  ;;  %v2399_v13 = vpop.f32.mrf.mxu1  ;;  %v1173_v60 = vmul.f32 %v2305_v57, %v2305_v57 }
 0x129   :  { %v1092_v50 = vadd.f32 %v1091_v31, %v2261_v22  ;;  %v1225_v2 = vadd.f32 %v1224_v30, %v1162_v5  ;;  %v2404_v39 = vpop.f32.mrf.mxu1 }
 0x12a   :  { %v1690_v43 = vpack.c.bf16 %v2404_v39, %v2391_v34 }
 0x12b   :  { %v1093_v36 = vadd.f32 %v2247_v0, %v1092_v50  ;;  %v1226_v38 = vadd.f32 %v1225_v2, %v1163_v53  ;;  %v2411_v45 = vpop.f32.mrf.mxu1  ;;  %v1175_v50 = vmul.f32 %v2333_v10, %v2333_v10 }
 0x12c   :  { %1761 = vst [vmem:[%s2533_s4 + $0xe8] sm:$0xff] %v1690_v43   ;;  %v1685_v49 = vpack.c.bf16 %v2411_v45, %v2399_v13 }
 0x12d   :  { %v1227_v41 = vadd.f32 %v1226_v38, %v1164_v6  ;;  %v1094_v22 = vadd.f32 %v2257_v3, %v1093_v36  ;;  %v2421_v54 = vpop.f32.mrf.mxu1  ;;  %v1178_v38 = vmul.f32 %v2348_v42, %v2348_v42 }
 0x12e   :  { %1760 = vst [vmem:[%s2533_s4 + $0xe0] sm:$0xff] %v1685_v49   ;;  %v1182_v49 = vmul.f32 %v2372_v7, %v2372_v7 }
 0x12f   :  { %v1095_v46 = vadd.f32 %v1094_v22, %v2276_v32  ;;  %v1228_v0 = vadd.f32 %v1227_v41, %v1165_v40  ;;  %v2429_v32 = vpop.f32.mrf.mxu1  ;;  %v1179_v22 = vmul.f32 %v2357_v59, %v2357_v59 }
 0x131   :  { %v1229_v3 = vadd.f32 %v1228_v0, %v1166_v47  ;;  %v1096_v55 = vadd.f32 %v1095_v46, %v2285_v37  ;;  %v2434_v63 = vpop.f32.mrf.mxu1 }
 0x132   :  { %v1700_v9 = vpack.c.bf16 %v2434_v63, %v2421_v54 }
 0x133   :  { %v1097_v61 = vadd.f32 %v2268_v12, %v1096_v55  ;;  %v1230_v62 = vadd.f32 %v1229_v3, %v1167_v56  ;;  %v2441_v14 = vpop.f32.mrf.mxu1  ;;  %v1183_v56 = vmul.f32 %v2381_v29, %v2381_v29 }
 0x134   :  { %1763 = vst [vmem:[%s2533_s4 + $0xf8] sm:$0xff] %v1700_v9   ;;  %v1695_v58 = vpack.c.bf16 %v2441_v14, %v2429_v32 }
 0x135   :  { %v1231_v8 = vadd.f32 %v1230_v62, %v1168_v25  ;;  %v1098_v37 = vadd.f32 %v2281_v35, %v1097_v61 }
 0x136   :  { %1762 = vst [vmem:[%s2533_s4 + $0xf0] sm:$0xff] %v1695_v58  }
 0x137   :  { %v1099_v15 = vadd.f32 %v1098_v37, %v2300_v51  ;;  %v1232_v12 = vadd.f32 %v1231_v8, %v1169_v1  ;;  %v1172_v51 = vmul.f32 %v2292_v44, %v2292_v44  ;;  %v1186_v8 = vmul.f32 %v2399_v13, %v2399_v13 }
 0x139   :  { %v1233_v19 = vadd.f32 %v1232_v12, %v1170_v17  ;;  %v1100_v35 = vadd.f32 %v1099_v15, %v2309_v4  ;;  %v1174_v4 = vmul.f32 %v2324_v23, %v2324_v23  ;;  %v1187_v15 = vmul.f32 %v2411_v45, %v2411_v45 }
 0x13b   :  { %v1101_v21 = vadd.f32 %v2292_v44, %v1100_v35  ;;  %v1234_v26 = vadd.f32 %v1233_v19, %v1171_v20  ;;  %v1176_v44 = vmul.f32 %v2316_v18, %v2316_v18  ;;  %v1190_v35 = vmul.f32 %v2429_v32, %v2429_v32 }
 0x13d   :  { %v1235_v27 = vadd.f32 %v1234_v26, %v1172_v51  ;;  %v1102_v28 = vadd.f32 %v2305_v57, %v1101_v21  ;;  %v1177_v57 = vmul.f32 %v2329_v52, %v2329_v52  ;;  %v1191_v21 = vmul.f32 %v2441_v14, %v2441_v14 }
 0x13f   :  { %v1103_v5 = vadd.f32 %v1102_v28, %v2324_v23  ;;  %v1236_v30 = vadd.f32 %v1235_v27, %v1173_v60 }
 0x141   :  { %v1237_v31 = vadd.f32 %v1236_v30, %v1174_v4  ;;  %v1104_v33 = vadd.f32 %v1103_v5, %v2333_v10 }
 0x143   :  { %v1105_v53 = vadd.f32 %v2316_v18, %v1104_v33  ;;  %v1238_v2 = vadd.f32 %v1237_v31, %v1175_v50  ;;  %v1180_v18 = vmul.f32 %v2340_v16, %v2340_v16 }
 0x145   :  { %v1239_v6 = vadd.f32 %v1238_v2, %v1176_v44  ;;  %v1106_v36 = vadd.f32 %v2329_v52, %v1105_v53  ;;  %v1181_v52 = vmul.f32 %v2353_v48, %v2353_v48 }
 0x147   :  { %v1107_v23 = vadd.f32 %v1106_v36, %v2348_v42  ;;  %v1240_v40 = vadd.f32 %v1239_v6, %v1177_v57 }
 0x149   :  { %v1241_v41 = vadd.f32 %v1240_v40, %v1178_v38  ;;  %v1108_v10 = vadd.f32 %v1107_v23, %v2357_v59 }
 0x14b   :  { %v1109_v43 = vadd.f32 %v2340_v16, %v1108_v10  ;;  %v1242_v46 = vadd.f32 %v1241_v41, %v1179_v22  ;;  %v1184_v16 = vmul.f32 %v2364_v11, %v2364_v11 }
 0x14d   :  { %v1243_v47 = vadd.f32 %v1242_v46, %v1180_v18  ;;  %v1110_v0 = vadd.f32 %v2353_v48, %v1109_v43  ;;  %v1185_v48 = vmul.f32 %v2377_v24, %v2377_v24 }
 0x14f   :  { %v1111_v42 = vadd.f32 %v1110_v0, %v2372_v7  ;;  %v1244_v3 = vadd.f32 %v1243_v47, %v1181_v52 }
 0x151   :  { %v1245_v55 = vadd.f32 %v1244_v3, %v1182_v49  ;;  %v1112_v59 = vadd.f32 %v1111_v42, %v2381_v29 }
 0x153   :  { %v1113_v25 = vadd.f32 %v2364_v11, %v1112_v59  ;;  %v1246_v61 = vadd.f32 %v1245_v55, %v1183_v56  ;;  %v1188_v11 = vmul.f32 %v2391_v34, %v2391_v34 }
 0x155   :  { %v1247_v62 = vadd.f32 %v1246_v61, %v1184_v16  ;;  %v1114_v1 = vadd.f32 %v2377_v24, %v1113_v25  ;;  %v1189_v24 = vmul.f32 %v2404_v39, %v2404_v39 }
 0x157   :  { %v1115_v7 = vadd.f32 %v1114_v1, %v2399_v13  ;;  %v1248_v37 = vadd.f32 %v1247_v62, %v1185_v48 }
 0x159   :  { %v1249_v9 = vadd.f32 %v1248_v37, %v1186_v8  ;;  %v1116_v29 = vadd.f32 %v1115_v7, %v2411_v45 }
 0x15b   :  { %v1117_v17 = vadd.f32 %v2391_v34, %v1116_v29  ;;  %v1250_v12 = vadd.f32 %v1249_v9, %v1187_v15  ;;  %v1192_v34 = vmul.f32 %v2421_v54, %v2421_v54 }
 0x15d   :  { %v1251_v58 = vadd.f32 %v1250_v12, %v1188_v11  ;;  %v1118_v19 = vadd.f32 %v2404_v39, %v1117_v17  ;;  %v1193_v39 = vmul.f32 %v2434_v63, %v2434_v63 }
 0x15f   :  { %v1119_v13 = vadd.f32 %v1118_v19, %v2429_v32  ;;  %v1252_v20 = vadd.f32 %v1251_v58, %v1189_v24 }
 0x161   :  { %v1253_v51 = vadd.f32 %v1252_v20, %v1190_v35  ;;  %v1120_v45 = vadd.f32 %v1119_v13, %v2441_v14 }
 0x163   :  { %v1121_v26 = vadd.f32 %v2421_v54, %v1120_v45  ;;  %v1254_v60 = vadd.f32 %v1253_v51, %v1191_v21 }
 0x165   :  { %v1122_v27 = vadd.f32 %v2434_v63, %v1121_v26  ;;  %v1255_v28 = vadd.f32 %v1254_v60, %v1192_v34 }
 0x167   :  { %v1123_v32 = vrot.slane %v1122_v27, 4  ;;  %v1256_v5 = vadd.f32 %v1255_v28, %v1193_v39 }
 0x169   :  { %v1124_v4 = vadd.f32 %v1123_v32, %v1122_v27  ;;  %v1257_v30 = vrot.slane %v1256_v5, 4 }
 0x16b   :  { %v1125_v31 = vrot.slane %v1124_v4, 2  ;;  %v1258_v33 = vadd.f32 %v1257_v30, %v1256_v5 }
 0x16d   :  { %v1126_v50 = vadd.f32 %v1125_v31, %v1124_v4  ;;  %v1259_v14 = vrot.slane %v1258_v33, 2 }
 0x16f   :  { %v1127_v44 = vrot.slane %v1126_v50, 1  ;;  %v1260_v53 = vadd.f32 %v1259_v14, %v1258_v33 }
 0x171   :  { %v1128_v2 = vadd.f32 %v1127_v44, %v1126_v50  ;;  %v1261_v57 = vrot.slane %v1260_v53, 1 }
 0x173   :  { %1129 = vst [vmem:[%s2534_s5] sm:$0x1] %v1128_v2  ;;  %v1262_v54 = vadd.f32 %v1261_v57, %v1260_v53 }
 0x175   :  { %1263 = vst [vmem:[%s2535_s6] sm:$0x1] %v1262_v54 }

// kernel: bottleneck_forward.4
= control target key start
LH: loop header
LB: loop body
LE: loop exit
PB: predicated region body
PF: predicated region fallthrough
CT: control target
= control target key end

     0   :  { %s3294_s1 = inlined_call_operand.vmem [shape: bf16[128,128], index: 1, kind: input, shape index: {}]   ;;  %s3295_s2 = inlined_call_operand.vmem [shape: bf16[128,128], index: 2, kind: input, shape index: {}]   ;;  %s3296_s0 = inlined_call_operand.vmem [shape: f32[512,128], index: 0, kind: input, shape index: {}]   ;;  %s3297_s3 = inlined_call_operand.vmem [shape: bf16[512,128], index: 3, kind: output, shape index: {0}]   ;;  %s3298_s4 = inlined_call_operand.vmem [shape: bf16[512,128], index: 4, kind: output, shape index: {1}]   ;;  %s3299_s5 = inlined_call_operand.vmem [shape: f32[1,1,128], index: 5, kind: output, shape index: {2}]   ;;  %s3300_s7 = inlined_call_operand.vmem [shape: f32[1,1,128], index: 7, kind: output, shape index: {4}]   ;;  %s3301_s6 = inlined_call_operand.vmem [shape: f32[1,1,128], index: 6, kind: output, shape index: {3}]   ;;  %s3302_s8 = inlined_call_operand.vmem [shape: f32[1,1,128], index: 8, kind: output, shape index: {5}]  }
   0x1   :  { %v2789_v0 = vld [vmem:[%s3294_s1 + $0x38] sm:$0xff]   ;;  %v2791_v2 = vld [vmem:[%s3294_s1 + $0x30] sm:$0xff]   ;;  %v2793_v4 = vld [vmem:[%s3294_s1 + $0x28] sm:$0xff]  }
   0x2   :  { %v2790_v1 = vld [vmem:[%s3295_s2 + $0x38] sm:$0xff]   ;;  %2629 = vmatprep.subr.bf16.mxu0 %v2789_v0  ;;  %v2792_v3 = vld [vmem:[%s3295_s2 + $0x30] sm:$0xff]   ;;  %v2794_v5 = vld [vmem:[%s3295_s2 + $0x28] sm:$0xff]  }
   0x3   :  { %2709 = vmatprep.subr.bf16.mxu1 %v2790_v1  ;;  %2630 = vmatpush3.bf16.msra.mxu0 %v2789_v0  ;;  %v2795_v6 = vld [vmem:[%s3294_s1 + $0x20] sm:$0xff]   ;;  %v2797_v8 = vld [vmem:[%s3294_s1 + $0x18] sm:$0xff]   ;;  %v2799_v10 = vld [vmem:[%s3294_s1 + $0x10] sm:$0xff]  }
   0x4   :  { %2710 = vmatpush3.bf16.msra.mxu1 %v2790_v1  ;;  %2631 = vmatprep.subr.bf16.mxu0 %v2791_v2  ;;  %v2796_v7 = vld [vmem:[%s3295_s2 + $0x20] sm:$0xff]   ;;  %v2798_v9 = vld [vmem:[%s3295_s2 + $0x18] sm:$0xff]   ;;  %v22_v12 = vld [vmem:[%s3296_s0 + $0x8] sm:$0xff] }
   0x5   :  { %2711 = vmatprep.subr.bf16.mxu1 %v2792_v3  ;;  %v21_v11 = vld [vmem:[%s3296_s0] sm:$0xff]  ;;  %v2800_v13 = vld [vmem:[%s3295_s2 + $0x10] sm:$0xff]   ;;  %v2801_v15 = vld [vmem:[%s3294_s1 + $0x8] sm:$0xff]  }
   0x6   :  { %v85_v14 = vpack.c.bf16 %v22_v12, %v21_v11  ;;  %v2802_v16 = vld [vmem:[%s3295_s2 + $0x8] sm:$0xff]   ;;  %v2803_v17 = vld [vmem:[%s3294_s1] sm:$0xff]   ;;  %v23_v19 = vld [vmem:[%s3296_s0 + $0x10] sm:$0xff] }
   0x7   :  { %2632 = vmatpush3.bf16.msra.mxu0 %v2791_v2  ;;  %v2804_v18 = vld [vmem:[%s3295_s2] sm:$0xff]   ;;  %v24_v20 = vld [vmem:[%s3296_s0 + $0x18] sm:$0xff]  ;;  %v26_v22 = vld [vmem:[%s3296_s0 + $0x28] sm:$0xff] }
   0x8   :  { %2712 = vmatpush3.bf16.msra.mxu1 %v2792_v3  ;;  %2633 = vmatprep.subr.bf16.mxu0 %v2793_v4  ;;  %v25_v21 = vld [vmem:[%s3296_s0 + $0x20] sm:$0xff]  ;;  %v86_v23 = vpack.c.bf16 %v24_v20, %v23_v19  ;;  %v27_v25 = vld [vmem:[%s3296_s0 + $0x30] sm:$0xff]  ;;  %v28_v26 = vld [vmem:[%s3296_s0 + $0x38] sm:$0xff] }
   0x9   :  { %2713 = vmatprep.subr.bf16.mxu1 %v2794_v5  ;;  %2645 = vmatprep.mubr.bf16.mxu0 %v85_v14  ;;  %v87_v24 = vpack.c.bf16 %v26_v22, %v25_v21  ;;  %v29_v27 = vld [vmem:[%s3296_s0 + $0x40] sm:$0xff]  ;;  %v30_v28 = vld [vmem:[%s3296_s0 + $0x48] sm:$0xff]  ;;  %v88_v29 = vpack.c.bf16 %v28_v26, %v27_v25  ;;  %v31_v31 = vld [vmem:[%s3296_s0 + $0x50] sm:$0xff] }
   0xa   :  { %2725 = vmatprep.mubr.bf16.mxu1 %v85_v14  ;;  %v89_v30 = vpack.c.bf16 %v30_v28, %v29_v27  ;;  %v32_v32 = vld [vmem:[%s3296_s0 + $0x58] sm:$0xff]  ;;  %v33_v33 = vld [vmem:[%s3296_s0 + $0x60] sm:$0xff]  ;;  %v34_v34 = vld [vmem:[%s3296_s0 + $0x68] sm:$0xff] }
   0xb   :  { %2634 = vmatpush3.bf16.msra.mxu0 %v2793_v4  ;;  %v90_v35 = vpack.c.bf16 %v32_v32, %v31_v31  ;;  %v91_v36 = vpack.c.bf16 %v34_v34, %v33_v33  ;;  %v35_v37 = vld [vmem:[%s3296_s0 + $0x70] sm:$0xff]  ;;  %v36_v38 = vld [vmem:[%s3296_s0 + $0x78] sm:$0xff]  ;;  %v37_v39 = vld [vmem:[%s3296_s0 + $0x80] sm:$0xff] }
   0xc   :  { %2714 = vmatpush3.bf16.msra.mxu1 %v2794_v5  ;;  %2635 = vmatprep.subr.bf16.mxu0 %v2795_v6  ;;  %v38_v40 = vld [vmem:[%s3296_s0 + $0x88] sm:$0xff]  ;;  %v92_v41 = vpack.c.bf16 %v36_v38, %v35_v37  ;;  %v39_v43 = vld [vmem:[%s3296_s0 + $0x90] sm:$0xff]  ;;  %v40_v44 = vld [vmem:[%s3296_s0 + $0x98] sm:$0xff] }
   0xd   :  { %2715 = vmatprep.subr.bf16.mxu1 %v2796_v7  ;;  %v93_v42 = vpack.c.bf16 %v38_v40, %v37_v39  ;;  %v41_v45 = vld [vmem:[%s3296_s0 + $0xa0] sm:$0xff]  ;;  %v42_v46 = vld [vmem:[%s3296_s0 + $0xa8] sm:$0xff]  ;;  %v94_v47 = vpack.c.bf16 %v40_v44, %v39_v43  ;;  %v43_v49 = vld [vmem:[%s3296_s0 + $0xb0] sm:$0xff] }
   0xe   :  { %v95_v48 = vpack.c.bf16 %v42_v46, %v41_v45  ;;  %v44_v50 = vld [vmem:[%s3296_s0 + $0xb8] sm:$0xff]  ;;  %v45_v51 = vld [vmem:[%s3296_s0 + $0xc0] sm:$0xff]  ;;  %v46_v52 = vld [vmem:[%s3296_s0 + $0xc8] sm:$0xff] }
   0xf   :  { %2636 = vmatpush3.bf16.msra.mxu0 %v2795_v6  ;;  %v96_v53 = vpack.c.bf16 %v44_v50, %v43_v49  ;;  %v97_v54 = vpack.c.bf16 %v46_v52, %v45_v51  ;;  %v47_v55 = vld [vmem:[%s3296_s0 + $0xd0] sm:$0xff]  ;;  %v48_v56 = vld [vmem:[%s3296_s0 + $0xd8] sm:$0xff]  ;;  %v49_v57 = vld [vmem:[%s3296_s0 + $0xe0] sm:$0xff] }
  0x10   :  { %2716 = vmatpush3.bf16.msra.mxu1 %v2796_v7  ;;  %2637 = vmatprep.subr.bf16.mxu0 %v2797_v8  ;;  %v50_v58 = vld [vmem:[%s3296_s0 + $0xe8] sm:$0xff]  ;;  %v98_v59 = vpack.c.bf16 %v48_v56, %v47_v55  ;;  %v51_v61 = vld [vmem:[%s3296_s0 + $0xf0] sm:$0xff]  ;;  %v52_v62 = vld [vmem:[%s3296_s0 + $0xf8] sm:$0xff] }
  0x11   :  { %2717 = vmatprep.subr.bf16.mxu1 %v2798_v9  ;;  %v99_v60 = vpack.c.bf16 %v50_v58, %v49_v57  ;;  %v53_v63 = vld [vmem:[%s3296_s0 + $0x100] sm:$0xff]  ;;  %v54_v0 = vld [vmem:[%s3296_s0 + $0x108] sm:$0xff]  ;;  %v100_v1 = vpack.c.bf16 %v52_v62, %v51_v61  ;;  %v55_v3 = vld [vmem:[%s3296_s0 + $0x110] sm:$0xff] }
  0x12   :  { %v101_v2 = vpack.c.bf16 %v54_v0, %v53_v63  ;;  %v56_v4 = vld [vmem:[%s3296_s0 + $0x118] sm:$0xff]  ;;  %v57_v5 = vld [vmem:[%s3296_s0 + $0x120] sm:$0xff]  ;;  %v58_v6 = vld [vmem:[%s3296_s0 + $0x128] sm:$0xff] }
  0x13   :  { %2638 = vmatpush3.bf16.msra.mxu0 %v2797_v8  ;;  %v102_v7 = vpack.c.bf16 %v56_v4, %v55_v3  ;;  %v103_v8 = vpack.c.bf16 %v58_v6, %v57_v5  ;;  %v61_v11 = vld [vmem:[%s3296_s0 + $0x140] sm:$0xff]  ;;  %v62_v12 = vld [vmem:[%s3296_s0 + $0x148] sm:$0xff]  ;;  %v67_v21 = vld [vmem:[%s3296_s0 + $0x170] sm:$0xff] }
  0x14   :  { %2718 = vmatpush3.bf16.msra.mxu1 %v2798_v9  ;;  %2639 = vmatprep.subr.bf16.mxu0 %v2799_v10  ;;  %v59_v9 = vld [vmem:[%s3296_s0 + $0x130] sm:$0xff]  ;;  %v105_v14 = vpack.c.bf16 %v62_v12, %v61_v11  ;;  %v68_v22 = vld [vmem:[%s3296_s0 + $0x178] sm:$0xff] }
  0x15   :  { %2719 = vmatprep.subr.bf16.mxu1 %v2800_v13  ;;  %v108_v25 = vpack.c.bf16 %v68_v22, %v67_v21  ;;  %v71_v27 = vld [vmem:[%s3296_s0 + $0x190] sm:$0xff]  ;;  %v72_v28 = vld [vmem:[%s3296_s0 + $0x198] sm:$0xff] }
  0x16   :  { %v110_v31 = vpack.c.bf16 %v72_v28, %v71_v27  ;;  %v75_v33 = vld [vmem:[%s3296_s0 + $0x1b0] sm:$0xff]  ;;  %v76_v34 = vld [vmem:[%s3296_s0 + $0x1b8] sm:$0xff] }
  0x17   :  { %2640 = vmatpush3.bf16.msra.mxu0 %v2799_v10  ;;  %v60_v10 = vld [vmem:[%s3296_s0 + $0x138] sm:$0xff]  ;;  %v112_v37 = vpack.c.bf16 %v76_v34, %v75_v33  ;;  %v79_v39 = vld [vmem:[%s3296_s0 + $0x1d0] sm:$0xff] }
  0x18   :  { %2720 = vmatpush3.bf16.msra.mxu1 %v2800_v13  ;;  %2641 = vmatprep.subr.bf16.mxu0 %v2801_v15  ;;  %v104_v13 = vpack.c.bf16 %v60_v10, %v59_v9  ;;  %v80_v40 = vld [vmem:[%s3296_s0 + $0x1d8] sm:$0xff]  ;;  %v83_v45 = vld [vmem:[%s3296_s0 + $0x1f0] sm:$0xff] }
  0x19   :  { %2721 = vmatprep.subr.bf16.mxu1 %v2802_v16  ;;  %v114_v43 = vpack.c.bf16 %v80_v40, %v79_v39  ;;  %v84_v46 = vld [vmem:[%s3296_s0 + $0x1f8] sm:$0xff] }
  0x1b   :  { %2642 = vmatpush3.bf16.msra.mxu0 %v2801_v15  ;;  %v63_v15 = vld [vmem:[%s3296_s0 + $0x150] sm:$0xff] }
  0x1c   :  { %2722 = vmatpush3.bf16.msra.mxu1 %v2802_v16  ;;  %2643 = vmatprep.subr.bf16.mxu0 %v2803_v17  ;;  %v64_v16 = vld [vmem:[%s3296_s0 + $0x158] sm:$0xff] }
  0x1d   :  { %2723 = vmatprep.subr.bf16.mxu1 %v2804_v18  ;;  %v106_v19 = vpack.c.bf16 %v64_v16, %v63_v15 }
  0x1f   :  { %2644 = vmatpush3.bf16.msra.mxu0 %v2803_v17  ;;  %v65_v17 = vld [vmem:[%s3296_s0 + $0x160] sm:$0xff] }
  0x20   :  { %2724 = vmatpush3.bf16.msra.mxu1 %v2804_v18  ;;  %v66_v18 = vld [vmem:[%s3296_s0 + $0x168] sm:$0xff] }
  0x21   :  { %v107_v20 = vpack.c.bf16 %v66_v18, %v65_v17 }
  0x22   :  { %2646 = vmatmul.mubr.bf16.vlgmr.msra.gmra.mxu0 %v86_v23 }
  0x23   :  { %2726 = vmatmul.mubr.bf16.vlgmr.msra.gmra.mxu1 %v86_v23  ;;  %2649 = vmatprep.mubr.bf16.mxu0 %v87_v24  ;;  %v69_v23 = vld [vmem:[%s3296_s0 + $0x180] sm:$0xff] }
  0x24   :  { %2729 = vmatprep.mubr.bf16.mxu1 %v87_v24  ;;  %v70_v24 = vld [vmem:[%s3296_s0 + $0x188] sm:$0xff] }
  0x25   :  { %v109_v26 = vpack.c.bf16 %v70_v24, %v69_v23 }
  0x2a   :  { %2650 = vmatmul.mubr.bf16.gmra.mxu0 %v88_v29 }
  0x2b   :  { %2730 = vmatmul.mubr.bf16.gmra.mxu1 %v88_v29  ;;  %2653 = vmatprep.mubr.bf16.mxu0 %v89_v30  ;;  %v73_v29 = vld [vmem:[%s3296_s0 + $0x1a0] sm:$0xff] }
  0x2c   :  { %2733 = vmatprep.mubr.bf16.mxu1 %v89_v30  ;;  %v74_v30 = vld [vmem:[%s3296_s0 + $0x1a8] sm:$0xff] }
  0x2d   :  { %v111_v32 = vpack.c.bf16 %v74_v30, %v73_v29 }
  0x32   :  { %2654 = vmatmul.mubr.bf16.gmra.mxu0 %v90_v35 }
  0x33   :  { %2734 = vmatmul.mubr.bf16.gmra.mxu1 %v90_v35  ;;  %2657 = vmatprep.mubr.bf16.mxu0 %v91_v36  ;;  %v77_v35 = vld [vmem:[%s3296_s0 + $0x1c0] sm:$0xff] }
  0x34   :  { %2737 = vmatprep.mubr.bf16.mxu1 %v91_v36  ;;  %v78_v36 = vld [vmem:[%s3296_s0 + $0x1c8] sm:$0xff] }
  0x35   :  { %v113_v38 = vpack.c.bf16 %v78_v36, %v77_v35 }
  0x3a   :  { %2658 = vmatmul.mubr.bf16.gmra.mxu0 %v92_v41 }
  0x3b   :  { %2738 = vmatmul.mubr.bf16.gmra.mxu1 %v92_v41  ;;  %2661 = vmatprep.mubr.bf16.mxu0 %v93_v42  ;;  %v81_v41 = vld [vmem:[%s3296_s0 + $0x1e0] sm:$0xff] }
  0x3c   :  { %2741 = vmatprep.mubr.bf16.mxu1 %v93_v42  ;;  %v82_v42 = vld [vmem:[%s3296_s0 + $0x1e8] sm:$0xff] }
  0x3d   :  { %v115_v44 = vpack.c.bf16 %v82_v42, %v81_v41 }
  0x42   :  { %2662 = vmatmul.mubr.bf16.gmra.mxu0 %v94_v47 }
  0x43   :  { %2742 = vmatmul.mubr.bf16.gmra.mxu1 %v94_v47  ;;  %2665 = vmatprep.mubr.bf16.mxu0 %v95_v48  ;;  %v116_v47 = vpack.c.bf16 %v84_v46, %v83_v45 }
  0x44   :  { %2745 = vmatprep.mubr.bf16.mxu1 %v95_v48 }
  0x4a   :  { %2666 = vmatmul.mubr.bf16.gmra.mxu0 %v96_v53 }
  0x4b   :  { %2746 = vmatmul.mubr.bf16.gmra.mxu1 %v96_v53  ;;  %2669 = vmatprep.mubr.bf16.mxu0 %v97_v54 }
  0x4c   :  { %2749 = vmatprep.mubr.bf16.mxu1 %v97_v54 }
  0x52   :  { %2670 = vmatmul.mubr.bf16.gmra.mxu0 %v98_v59 }
  0x53   :  { %2750 = vmatmul.mubr.bf16.gmra.mxu1 %v98_v59  ;;  %2673 = vmatprep.mubr.bf16.mxu0 %v99_v60 }
  0x54   :  { %2753 = vmatprep.mubr.bf16.mxu1 %v99_v60 }
  0x5a   :  { %2674 = vmatmul.mubr.bf16.gmra.mxu0 %v100_v1 }
  0x5b   :  { %2754 = vmatmul.mubr.bf16.gmra.mxu1 %v100_v1  ;;  %2677 = vmatprep.mubr.bf16.mxu0 %v101_v2 }
  0x5c   :  { %2757 = vmatprep.mubr.bf16.mxu1 %v101_v2 }
  0x62   :  { %2678 = vmatmul.mubr.bf16.gmra.mxu0 %v102_v7 }
  0x63   :  { %2758 = vmatmul.mubr.bf16.gmra.mxu1 %v102_v7  ;;  %2681 = vmatprep.mubr.bf16.mxu0 %v103_v8 }
  0x64   :  { %2761 = vmatprep.mubr.bf16.mxu1 %v103_v8 }
  0x6a   :  { %2682 = vmatmul.mubr.bf16.gmra.mxu0 %v104_v13 }
  0x6b   :  { %2762 = vmatmul.mubr.bf16.gmra.mxu1 %v104_v13  ;;  %2685 = vmatprep.mubr.bf16.mxu0 %v105_v14 }
  0x6c   :  { %2765 = vmatprep.mubr.bf16.mxu1 %v105_v14 }
  0x72   :  { %2686 = vmatmul.mubr.bf16.gmra.mxu0 %v106_v19 }
  0x73   :  { %2766 = vmatmul.mubr.bf16.gmra.mxu1 %v106_v19  ;;  %2689 = vmatprep.mubr.bf16.mxu0 %v107_v20 }
  0x74   :  { %2769 = vmatprep.mubr.bf16.mxu1 %v107_v20 }
  0x7a   :  { %2690 = vmatmul.mubr.bf16.gmra.mxu0 %v108_v25 }
  0x7b   :  { %2770 = vmatmul.mubr.bf16.gmra.mxu1 %v108_v25  ;;  %2693 = vmatprep.mubr.bf16.mxu0 %v109_v26 }
  0x7c   :  { %2773 = vmatprep.mubr.bf16.mxu1 %v109_v26 }
  0x82   :  { %2694 = vmatmul.mubr.bf16.gmra.mxu0 %v110_v31 }
  0x83   :  { %2774 = vmatmul.mubr.bf16.gmra.mxu1 %v110_v31  ;;  %2697 = vmatprep.mubr.bf16.mxu0 %v111_v32 }
  0x84   :  { %2777 = vmatprep.mubr.bf16.mxu1 %v111_v32 }
  0x8a   :  { %2698 = vmatmul.mubr.bf16.gmra.mxu0 %v112_v37 }
  0x8b   :  { %2778 = vmatmul.mubr.bf16.gmra.mxu1 %v112_v37  ;;  %2701 = vmatprep.mubr.bf16.mxu0 %v113_v38 }
  0x8c   :  { %2781 = vmatprep.mubr.bf16.mxu1 %v113_v38 }
  0x92   :  { %2702 = vmatmul.mubr.bf16.gmra.mxu0 %v114_v43 }
  0x93   :  { %2782 = vmatmul.mubr.bf16.gmra.mxu1 %v114_v43  ;;  %2705 = vmatprep.mubr.bf16.mxu0 %v115_v44 }
  0x94   :  { %2785 = vmatprep.mubr.bf16.mxu1 %v115_v44 }
  0x9a   :  { %2706 = vmatmul.mubr.bf16.gmra.mxu0 %v116_v47 }
  0x9b   :  { %2786 = vmatmul.mubr.bf16.gmra.mxu1 %v116_v47 }
  0xe2   :  { %v2647_v48 = vpop.f32.mrf.mxu0 }
  0xe3   :  { %v2727_v49 = vpop.f32.mrf.mxu1  ;;  %v1535_v3 = vmul.f32 %v2647_v48, %v2647_v48 }
  0xe4   :  { %v215_v50 = vpop.f32.mrf.mxu0  ;;  %v1739_v7 = vmul.f32 %v2727_v49, %v2727_v49 }
  0xe5   :  { %v568_v51 = vpop.f32.mrf.mxu1  ;;  %v1533_v57 = vmul.f32 %v215_v50, %v215_v50 }
  0xe6   :  { %v2648_v52 = vpop.f32.mrf.mxu0  ;;  %v1737_v62 = vmul.f32 %v568_v51, %v568_v51 }
  0xe7   :  { %v2175_v53 = vpack.c.bf16 %v2648_v52, %v2647_v48  ;;  %v2728_v54 = vpop.f32.mrf.mxu1  ;;  %v1536_v11 = vmul.f32 %v2648_v52, %v2648_v52 }
  0xe8   :  { %v2335_v55 = vpack.c.bf16 %v2728_v54, %v2727_v49  ;;  %v218_v56 = vpop.f32.mrf.mxu0  ;;  %v1740_v15 = vmul.f32 %v2728_v54, %v2728_v54 }
  0xe9   :  { %2487 = vst [vmem:[%s3297_s3 + $0x8] sm:$0xff] %v2175_v53   ;;  %v2170_v58 = vpack.c.bf16 %v218_v56, %v215_v50  ;;  %v1463_v59 = vadd.f32 %v218_v56, %v215_v50  ;;  %v1534_v60 = vmul.f32 %v218_v56, %v218_v56  ;;  %v571_v61 = vpop.f32.mrf.mxu1 }
  0xea   :  { %2518 = vst [vmem:[%s3298_s4 + $0x8] sm:$0xff] %v2335_v55   ;;  %v2330_v63 = vpack.c.bf16 %v571_v61, %v568_v51  ;;  %v1667_v0 = vadd.f32 %v571_v61, %v568_v51  ;;  %v1738_v1 = vmul.f32 %v571_v61, %v571_v61  ;;  %v2651_v2 = vpop.f32.mrf.mxu0 }
  0xeb   :  { %2171 = vst [vmem:[%s3297_s3] sm:$0xff] %v2170_v58   ;;  %v1464_v4 = vadd.f32 %v2647_v48, %v1463_v59  ;;  %v1597_v5 = vadd.f32 %v1534_v60, %v1533_v57  ;;  %v2731_v6 = vpop.f32.mrf.mxu1  ;;  %v1539_v39 = vmul.f32 %v2651_v2, %v2651_v2 }
  0xec   :  { %2331 = vst [vmem:[%s3298_s4] sm:$0xff] %v2330_v63   ;;  %v1668_v8 = vadd.f32 %v2727_v49, %v1667_v0  ;;  %v1801_v9 = vadd.f32 %v1738_v1, %v1737_v62  ;;  %v231_v10 = vpop.f32.mrf.mxu0  ;;  %v1743_v43 = vmul.f32 %v2731_v6, %v2731_v6 }
  0xed   :  { %v1598_v12 = vadd.f32 %v1597_v5, %v1535_v3  ;;  %v1465_v13 = vadd.f32 %v2648_v52, %v1464_v4  ;;  %v584_v14 = vpop.f32.mrf.mxu1  ;;  %v1537_v20 = vmul.f32 %v231_v10, %v231_v10 }
  0xee   :  { %v1802_v16 = vadd.f32 %v1801_v9, %v1739_v7  ;;  %v1669_v17 = vadd.f32 %v2728_v54, %v1668_v8  ;;  %v2652_v18 = vpop.f32.mrf.mxu0  ;;  %v1741_v25 = vmul.f32 %v584_v14, %v584_v14 }
  0xef   :  { %v1466_v19 = vadd.f32 %v1465_v13, %v231_v10  ;;  %v1599_v21 = vadd.f32 %v1598_v12, %v1536_v11  ;;  %v2185_v22 = vpack.c.bf16 %v2652_v18, %v2651_v2  ;;  %v2732_v23 = vpop.f32.mrf.mxu1  ;;  %v1540_v47 = vmul.f32 %v2652_v18, %v2652_v18 }
  0xf0   :  { %v1670_v24 = vadd.f32 %v1669_v17, %v584_v14  ;;  %v1803_v26 = vadd.f32 %v1802_v16, %v1740_v15  ;;  %v2345_v27 = vpack.c.bf16 %v2732_v23, %v2731_v6  ;;  %v234_v28 = vpop.f32.mrf.mxu0  ;;  %v1744_v51 = vmul.f32 %v2732_v23, %v2732_v23 }
  0xf1   :  { %v1600_v29 = vadd.f32 %v1599_v21, %v1537_v20  ;;  %2489 = vst [vmem:[%s3297_s3 + $0x18] sm:$0xff] %v2185_v22   ;;  %v2180_v30 = vpack.c.bf16 %v234_v28, %v231_v10  ;;  %v1467_v31 = vadd.f32 %v1466_v19, %v234_v28  ;;  %v1538_v32 = vmul.f32 %v234_v28, %v234_v28  ;;  %v587_v33 = vpop.f32.mrf.mxu1 }
  0xf2   :  { %v1804_v34 = vadd.f32 %v1803_v26, %v1741_v25  ;;  %2520 = vst [vmem:[%s3298_s4 + $0x18] sm:$0xff] %v2345_v27   ;;  %v2340_v35 = vpack.c.bf16 %v587_v33, %v584_v14  ;;  %v1671_v36 = vadd.f32 %v1670_v24, %v587_v33  ;;  %v1742_v37 = vmul.f32 %v587_v33, %v587_v33  ;;  %v2655_v38 = vpop.f32.mrf.mxu0 }
  0xf3   :  { %2488 = vst [vmem:[%s3297_s3 + $0x10] sm:$0xff] %v2180_v30   ;;  %v1468_v40 = vadd.f32 %v2651_v2, %v1467_v31  ;;  %v1601_v41 = vadd.f32 %v1600_v29, %v1538_v32  ;;  %v2735_v42 = vpop.f32.mrf.mxu1  ;;  %v1543_v11 = vmul.f32 %v2655_v38, %v2655_v38 }
  0xf4   :  { %2519 = vst [vmem:[%s3298_s4 + $0x10] sm:$0xff] %v2340_v35   ;;  %v1672_v44 = vadd.f32 %v2731_v6, %v1671_v36  ;;  %v1805_v45 = vadd.f32 %v1804_v34, %v1742_v37  ;;  %v247_v46 = vpop.f32.mrf.mxu0  ;;  %v1747_v15 = vmul.f32 %v2735_v42, %v2735_v42 }
  0xf5   :  { %v1602_v48 = vadd.f32 %v1601_v41, %v1539_v39  ;;  %v1469_v49 = vadd.f32 %v2652_v18, %v1468_v40  ;;  %v600_v50 = vpop.f32.mrf.mxu1  ;;  %v1541_v56 = vmul.f32 %v247_v46, %v247_v46 }
  0xf6   :  { %v1806_v52 = vadd.f32 %v1805_v45, %v1743_v43  ;;  %v1673_v53 = vadd.f32 %v2732_v23, %v1672_v44  ;;  %v2656_v54 = vpop.f32.mrf.mxu0  ;;  %v1745_v61 = vmul.f32 %v600_v50, %v600_v50 }
  0xf7   :  { %v1470_v55 = vadd.f32 %v1469_v49, %v247_v46  ;;  %v1603_v57 = vadd.f32 %v1602_v48, %v1540_v47  ;;  %v2195_v58 = vpack.c.bf16 %v2656_v54, %v2655_v38  ;;  %v2736_v59 = vpop.f32.mrf.mxu1  ;;  %v1544_v19 = vmul.f32 %v2656_v54, %v2656_v54 }
  0xf8   :  { %v1674_v60 = vadd.f32 %v1673_v53, %v600_v50  ;;  %v1807_v62 = vadd.f32 %v1806_v52, %v1744_v51  ;;  %v2355_v63 = vpack.c.bf16 %v2736_v59, %v2735_v42  ;;  %v250_v0 = vpop.f32.mrf.mxu0  ;;  %v1748_v23 = vmul.f32 %v2736_v59, %v2736_v59 }
  0xf9   :  { %v1604_v1 = vadd.f32 %v1603_v57, %v1541_v56  ;;  %2491 = vst [vmem:[%s3297_s3 + $0x28] sm:$0xff] %v2195_v58   ;;  %v2190_v2 = vpack.c.bf16 %v250_v0, %v247_v46  ;;  %v1471_v3 = vadd.f32 %v1470_v55, %v250_v0  ;;  %v1542_v4 = vmul.f32 %v250_v0, %v250_v0  ;;  %v603_v5 = vpop.f32.mrf.mxu1 }
  0xfa   :  { %v1808_v6 = vadd.f32 %v1807_v62, %v1745_v61  ;;  %2522 = vst [vmem:[%s3298_s4 + $0x28] sm:$0xff] %v2355_v63   ;;  %v2350_v7 = vpack.c.bf16 %v603_v5, %v600_v50  ;;  %v1675_v8 = vadd.f32 %v1674_v60, %v603_v5  ;;  %v1746_v9 = vmul.f32 %v603_v5, %v603_v5  ;;  %v2659_v10 = vpop.f32.mrf.mxu0 }
  0xfb   :  { %2490 = vst [vmem:[%s3297_s3 + $0x20] sm:$0xff] %v2190_v2   ;;  %v1472_v12 = vadd.f32 %v2655_v38, %v1471_v3  ;;  %v1605_v13 = vadd.f32 %v1604_v1, %v1542_v4  ;;  %v2739_v14 = vpop.f32.mrf.mxu1  ;;  %v1547_v47 = vmul.f32 %v2659_v10, %v2659_v10 }
  0xfc   :  { %2521 = vst [vmem:[%s3298_s4 + $0x20] sm:$0xff] %v2350_v7   ;;  %v1676_v16 = vadd.f32 %v2735_v42, %v1675_v8  ;;  %v1809_v17 = vadd.f32 %v1808_v6, %v1746_v9  ;;  %v263_v18 = vpop.f32.mrf.mxu0  ;;  %v1751_v51 = vmul.f32 %v2739_v14, %v2739_v14 }
  0xfd   :  { %v1606_v20 = vadd.f32 %v1605_v13, %v1543_v11  ;;  %v1473_v21 = vadd.f32 %v2656_v54, %v1472_v12  ;;  %v616_v22 = vpop.f32.mrf.mxu1  ;;  %v1545_v28 = vmul.f32 %v263_v18, %v263_v18 }
  0xfe   :  { %v1810_v24 = vadd.f32 %v1809_v17, %v1747_v15  ;;  %v1677_v25 = vadd.f32 %v2736_v59, %v1676_v16  ;;  %v2660_v26 = vpop.f32.mrf.mxu0  ;;  %v1749_v33 = vmul.f32 %v616_v22, %v616_v22 }
  0xff   :  { %v1474_v27 = vadd.f32 %v1473_v21, %v263_v18  ;;  %v1607_v29 = vadd.f32 %v1606_v20, %v1544_v19  ;;  %v2205_v30 = vpack.c.bf16 %v2660_v26, %v2659_v10  ;;  %v2740_v31 = vpop.f32.mrf.mxu1  ;;  %v1548_v55 = vmul.f32 %v2660_v26, %v2660_v26 }
 0x100   :  { %v1678_v32 = vadd.f32 %v1677_v25, %v616_v22  ;;  %v1811_v34 = vadd.f32 %v1810_v24, %v1748_v23  ;;  %v2365_v35 = vpack.c.bf16 %v2740_v31, %v2739_v14  ;;  %v266_v36 = vpop.f32.mrf.mxu0  ;;  %v1752_v59 = vmul.f32 %v2740_v31, %v2740_v31 }
 0x101   :  { %v1608_v37 = vadd.f32 %v1607_v29, %v1545_v28  ;;  %2493 = vst [vmem:[%s3297_s3 + $0x38] sm:$0xff] %v2205_v30   ;;  %v2200_v38 = vpack.c.bf16 %v266_v36, %v263_v18  ;;  %v1475_v39 = vadd.f32 %v1474_v27, %v266_v36  ;;  %v1546_v40 = vmul.f32 %v266_v36, %v266_v36  ;;  %v619_v41 = vpop.f32.mrf.mxu1 }
 0x102   :  { %v1812_v42 = vadd.f32 %v1811_v34, %v1749_v33  ;;  %2524 = vst [vmem:[%s3298_s4 + $0x38] sm:$0xff] %v2365_v35   ;;  %v2360_v43 = vpack.c.bf16 %v619_v41, %v616_v22  ;;  %v1679_v44 = vadd.f32 %v1678_v32, %v619_v41  ;;  %v1750_v45 = vmul.f32 %v619_v41, %v619_v41  ;;  %v2663_v46 = vpop.f32.mrf.mxu0 }
 0x103   :  { %2492 = vst [vmem:[%s3297_s3 + $0x30] sm:$0xff] %v2200_v38   ;;  %v1476_v48 = vadd.f32 %v2659_v10, %v1475_v39  ;;  %v1609_v49 = vadd.f32 %v1608_v37, %v1546_v40  ;;  %v2743_v50 = vpop.f32.mrf.mxu1  ;;  %v1551_v19 = vmul.f32 %v2663_v46, %v2663_v46 }
 0x104   :  { %2523 = vst [vmem:[%s3298_s4 + $0x30] sm:$0xff] %v2360_v43   ;;  %v1680_v52 = vadd.f32 %v2739_v14, %v1679_v44  ;;  %v1813_v53 = vadd.f32 %v1812_v42, %v1750_v45  ;;  %v279_v54 = vpop.f32.mrf.mxu0  ;;  %v1755_v23 = vmul.f32 %v2743_v50, %v2743_v50 }
 0x105   :  { %v1610_v56 = vadd.f32 %v1609_v49, %v1547_v47  ;;  %v1477_v57 = vadd.f32 %v2660_v26, %v1476_v48  ;;  %v632_v58 = vpop.f32.mrf.mxu1  ;;  %v1549_v0 = vmul.f32 %v279_v54, %v279_v54 }
 0x106   :  { %v1814_v60 = vadd.f32 %v1813_v53, %v1751_v51  ;;  %v1681_v61 = vadd.f32 %v2740_v31, %v1680_v52  ;;  %v2664_v62 = vpop.f32.mrf.mxu0  ;;  %v1753_v5 = vmul.f32 %v632_v58, %v632_v58 }
 0x107   :  { %v1478_v63 = vadd.f32 %v1477_v57, %v279_v54  ;;  %v1611_v1 = vadd.f32 %v1610_v56, %v1548_v55  ;;  %v2215_v2 = vpack.c.bf16 %v2664_v62, %v2663_v46  ;;  %v2744_v3 = vpop.f32.mrf.mxu1  ;;  %v1552_v27 = vmul.f32 %v2664_v62, %v2664_v62 }
 0x108   :  { %v1682_v4 = vadd.f32 %v1681_v61, %v632_v58  ;;  %v1815_v6 = vadd.f32 %v1814_v60, %v1752_v59  ;;  %v2375_v7 = vpack.c.bf16 %v2744_v3, %v2743_v50  ;;  %v282_v8 = vpop.f32.mrf.mxu0  ;;  %v1756_v31 = vmul.f32 %v2744_v3, %v2744_v3 }
 0x109   :  { %v1612_v9 = vadd.f32 %v1611_v1, %v1549_v0  ;;  %2495 = vst [vmem:[%s3297_s3 + $0x48] sm:$0xff] %v2215_v2   ;;  %v2210_v10 = vpack.c.bf16 %v282_v8, %v279_v54  ;;  %v1479_v11 = vadd.f32 %v1478_v63, %v282_v8  ;;  %v1550_v12 = vmul.f32 %v282_v8, %v282_v8  ;;  %v635_v13 = vpop.f32.mrf.mxu1 }
 0x10a   :  { %v1816_v14 = vadd.f32 %v1815_v6, %v1753_v5  ;;  %2526 = vst [vmem:[%s3298_s4 + $0x48] sm:$0xff] %v2375_v7   ;;  %v2370_v15 = vpack.c.bf16 %v635_v13, %v632_v58  ;;  %v1683_v16 = vadd.f32 %v1682_v4, %v635_v13  ;;  %v1754_v17 = vmul.f32 %v635_v13, %v635_v13  ;;  %v2667_v18 = vpop.f32.mrf.mxu0 }
 0x10b   :  { %2494 = vst [vmem:[%s3297_s3 + $0x40] sm:$0xff] %v2210_v10   ;;  %v1480_v20 = vadd.f32 %v2663_v46, %v1479_v11  ;;  %v1613_v21 = vadd.f32 %v1612_v9, %v1550_v12  ;;  %v2747_v22 = vpop.f32.mrf.mxu1  ;;  %v1555_v55 = vmul.f32 %v2667_v18, %v2667_v18 }
 0x10c   :  { %2525 = vst [vmem:[%s3298_s4 + $0x40] sm:$0xff] %v2370_v15   ;;  %v1684_v24 = vadd.f32 %v2743_v50, %v1683_v16  ;;  %v1817_v25 = vadd.f32 %v1816_v14, %v1754_v17  ;;  %v295_v26 = vpop.f32.mrf.mxu0  ;;  %v1759_v59 = vmul.f32 %v2747_v22, %v2747_v22 }
 0x10d   :  { %v1614_v28 = vadd.f32 %v1613_v21, %v1551_v19  ;;  %v1481_v29 = vadd.f32 %v2664_v62, %v1480_v20  ;;  %v648_v30 = vpop.f32.mrf.mxu1  ;;  %v1553_v36 = vmul.f32 %v295_v26, %v295_v26 }
 0x10e   :  { %v1818_v32 = vadd.f32 %v1817_v25, %v1755_v23  ;;  %v1685_v33 = vadd.f32 %v2744_v3, %v1684_v24  ;;  %v2668_v34 = vpop.f32.mrf.mxu0  ;;  %v1757_v41 = vmul.f32 %v648_v30, %v648_v30 }
 0x10f   :  { %v1482_v35 = vadd.f32 %v1481_v29, %v295_v26  ;;  %v1615_v37 = vadd.f32 %v1614_v28, %v1552_v27  ;;  %v2225_v38 = vpack.c.bf16 %v2668_v34, %v2667_v18  ;;  %v2748_v39 = vpop.f32.mrf.mxu1  ;;  %v1556_v63 = vmul.f32 %v2668_v34, %v2668_v34 }
 0x110   :  { %v1686_v40 = vadd.f32 %v1685_v33, %v648_v30  ;;  %v1819_v42 = vadd.f32 %v1818_v32, %v1756_v31  ;;  %v2385_v43 = vpack.c.bf16 %v2748_v39, %v2747_v22  ;;  %v298_v44 = vpop.f32.mrf.mxu0  ;;  %v1760_v3 = vmul.f32 %v2748_v39, %v2748_v39 }
 0x111   :  { %v1616_v45 = vadd.f32 %v1615_v37, %v1553_v36  ;;  %2497 = vst [vmem:[%s3297_s3 + $0x58] sm:$0xff] %v2225_v38   ;;  %v2220_v46 = vpack.c.bf16 %v298_v44, %v295_v26  ;;  %v1483_v47 = vadd.f32 %v1482_v35, %v298_v44  ;;  %v1554_v48 = vmul.f32 %v298_v44, %v298_v44  ;;  %v651_v49 = vpop.f32.mrf.mxu1 }
 0x112   :  { %v1820_v50 = vadd.f32 %v1819_v42, %v1757_v41  ;;  %2528 = vst [vmem:[%s3298_s4 + $0x58] sm:$0xff] %v2385_v43   ;;  %v2380_v51 = vpack.c.bf16 %v651_v49, %v648_v30  ;;  %v1687_v52 = vadd.f32 %v1686_v40, %v651_v49  ;;  %v1758_v53 = vmul.f32 %v651_v49, %v651_v49  ;;  %v2671_v54 = vpop.f32.mrf.mxu0 }
 0x113   :  { %2496 = vst [vmem:[%s3297_s3 + $0x50] sm:$0xff] %v2220_v46   ;;  %v1484_v56 = vadd.f32 %v2667_v18, %v1483_v47  ;;  %v1617_v57 = vadd.f32 %v1616_v45, %v1554_v48  ;;  %v2751_v58 = vpop.f32.mrf.mxu1  ;;  %v1559_v27 = vmul.f32 %v2671_v54, %v2671_v54 }
 0x114   :  { %2527 = vst [vmem:[%s3298_s4 + $0x50] sm:$0xff] %v2380_v51   ;;  %v1688_v60 = vadd.f32 %v2747_v22, %v1687_v52  ;;  %v1821_v61 = vadd.f32 %v1820_v50, %v1758_v53  ;;  %v311_v62 = vpop.f32.mrf.mxu0  ;;  %v1763_v31 = vmul.f32 %v2751_v58, %v2751_v58 }
 0x115   :  { %v1618_v0 = vadd.f32 %v1617_v57, %v1555_v55  ;;  %v1485_v1 = vadd.f32 %v2668_v34, %v1484_v56  ;;  %v664_v2 = vpop.f32.mrf.mxu1  ;;  %v1557_v8 = vmul.f32 %v311_v62, %v311_v62 }
 0x116   :  { %v1822_v4 = vadd.f32 %v1821_v61, %v1759_v59  ;;  %v1689_v5 = vadd.f32 %v2748_v39, %v1688_v60  ;;  %v2672_v6 = vpop.f32.mrf.mxu0  ;;  %v1761_v13 = vmul.f32 %v664_v2, %v664_v2 }
 0x117   :  { %v1486_v7 = vadd.f32 %v1485_v1, %v311_v62  ;;  %v1619_v9 = vadd.f32 %v1618_v0, %v1556_v63  ;;  %v2235_v10 = vpack.c.bf16 %v2672_v6, %v2671_v54  ;;  %v2752_v11 = vpop.f32.mrf.mxu1  ;;  %v1560_v35 = vmul.f32 %v2672_v6, %v2672_v6 }
 0x118   :  { %v1690_v12 = vadd.f32 %v1689_v5, %v664_v2  ;;  %v1823_v14 = vadd.f32 %v1822_v4, %v1760_v3  ;;  %v2395_v15 = vpack.c.bf16 %v2752_v11, %v2751_v58  ;;  %v314_v16 = vpop.f32.mrf.mxu0  ;;  %v1764_v39 = vmul.f32 %v2752_v11, %v2752_v11 }
 0x119   :  { %v1620_v17 = vadd.f32 %v1619_v9, %v1557_v8  ;;  %2499 = vst [vmem:[%s3297_s3 + $0x68] sm:$0xff] %v2235_v10   ;;  %v2230_v18 = vpack.c.bf16 %v314_v16, %v311_v62  ;;  %v1487_v19 = vadd.f32 %v1486_v7, %v314_v16  ;;  %v1558_v20 = vmul.f32 %v314_v16, %v314_v16  ;;  %v667_v21 = vpop.f32.mrf.mxu1 }
 0x11a   :  { %v1824_v22 = vadd.f32 %v1823_v14, %v1761_v13  ;;  %2530 = vst [vmem:[%s3298_s4 + $0x68] sm:$0xff] %v2395_v15   ;;  %v2390_v23 = vpack.c.bf16 %v667_v21, %v664_v2  ;;  %v1691_v24 = vadd.f32 %v1690_v12, %v667_v21  ;;  %v1762_v25 = vmul.f32 %v667_v21, %v667_v21  ;;  %v2675_v26 = vpop.f32.mrf.mxu0 }
 0x11b   :  { %2498 = vst [vmem:[%s3297_s3 + $0x60] sm:$0xff] %v2230_v18   ;;  %v1488_v28 = vadd.f32 %v2671_v54, %v1487_v19  ;;  %v1621_v29 = vadd.f32 %v1620_v17, %v1558_v20  ;;  %v2755_v30 = vpop.f32.mrf.mxu1  ;;  %v1563_v63 = vmul.f32 %v2675_v26, %v2675_v26 }
 0x11c   :  { %2529 = vst [vmem:[%s3298_s4 + $0x60] sm:$0xff] %v2390_v23   ;;  %v1692_v32 = vadd.f32 %v2751_v58, %v1691_v24  ;;  %v1825_v33 = vadd.f32 %v1824_v22, %v1762_v25  ;;  %v327_v34 = vpop.f32.mrf.mxu0  ;;  %v1767_v3 = vmul.f32 %v2755_v30, %v2755_v30 }
 0x11d   :  { %v1622_v36 = vadd.f32 %v1621_v29, %v1559_v27  ;;  %v1489_v37 = vadd.f32 %v2672_v6, %v1488_v28  ;;  %v680_v38 = vpop.f32.mrf.mxu1  ;;  %v1561_v44 = vmul.f32 %v327_v34, %v327_v34 }
 0x11e   :  { %v1826_v40 = vadd.f32 %v1825_v33, %v1763_v31  ;;  %v1693_v41 = vadd.f32 %v2752_v11, %v1692_v32  ;;  %v2676_v42 = vpop.f32.mrf.mxu0  ;;  %v1765_v49 = vmul.f32 %v680_v38, %v680_v38 }
 0x11f   :  { %v1490_v43 = vadd.f32 %v1489_v37, %v327_v34  ;;  %v1623_v45 = vadd.f32 %v1622_v36, %v1560_v35  ;;  %v2245_v46 = vpack.c.bf16 %v2676_v42, %v2675_v26  ;;  %v2756_v47 = vpop.f32.mrf.mxu1  ;;  %v1564_v7 = vmul.f32 %v2676_v42, %v2676_v42 }
 0x120   :  { %v1694_v48 = vadd.f32 %v1693_v41, %v680_v38  ;;  %v1827_v50 = vadd.f32 %v1826_v40, %v1764_v39  ;;  %v2405_v51 = vpack.c.bf16 %v2756_v47, %v2755_v30  ;;  %v330_v52 = vpop.f32.mrf.mxu0  ;;  %v1768_v11 = vmul.f32 %v2756_v47, %v2756_v47 }
 0x121   :  { %v1624_v53 = vadd.f32 %v1623_v45, %v1561_v44  ;;  %2501 = vst [vmem:[%s3297_s3 + $0x78] sm:$0xff] %v2245_v46   ;;  %v2240_v54 = vpack.c.bf16 %v330_v52, %v327_v34  ;;  %v1491_v55 = vadd.f32 %v1490_v43, %v330_v52  ;;  %v1562_v56 = vmul.f32 %v330_v52, %v330_v52  ;;  %v683_v57 = vpop.f32.mrf.mxu1 }
 0x122   :  { %v1828_v58 = vadd.f32 %v1827_v50, %v1765_v49  ;;  %2532 = vst [vmem:[%s3298_s4 + $0x78] sm:$0xff] %v2405_v51   ;;  %v2400_v59 = vpack.c.bf16 %v683_v57, %v680_v38  ;;  %v1695_v60 = vadd.f32 %v1694_v48, %v683_v57  ;;  %v1766_v61 = vmul.f32 %v683_v57, %v683_v57  ;;  %v2679_v62 = vpop.f32.mrf.mxu0 }
 0x123   :  { %2500 = vst [vmem:[%s3297_s3 + $0x70] sm:$0xff] %v2240_v54   ;;  %v1492_v0 = vadd.f32 %v2675_v26, %v1491_v55  ;;  %v1625_v1 = vadd.f32 %v1624_v53, %v1562_v56  ;;  %v2759_v2 = vpop.f32.mrf.mxu1  ;;  %v1567_v35 = vmul.f32 %v2679_v62, %v2679_v62 }
 0x124   :  { %2531 = vst [vmem:[%s3298_s4 + $0x70] sm:$0xff] %v2400_v59   ;;  %v1696_v4 = vadd.f32 %v2755_v30, %v1695_v60  ;;  %v1829_v5 = vadd.f32 %v1828_v58, %v1766_v61  ;;  %v343_v6 = vpop.f32.mrf.mxu0  ;;  %v1771_v39 = vmul.f32 %v2759_v2, %v2759_v2 }
 0x125   :  { %v1626_v8 = vadd.f32 %v1625_v1, %v1563_v63  ;;  %v1493_v9 = vadd.f32 %v2676_v42, %v1492_v0  ;;  %v696_v10 = vpop.f32.mrf.mxu1  ;;  %v1565_v16 = vmul.f32 %v343_v6, %v343_v6 }
 0x126   :  { %v1830_v12 = vadd.f32 %v1829_v5, %v1767_v3  ;;  %v1697_v13 = vadd.f32 %v2756_v47, %v1696_v4  ;;  %v2680_v14 = vpop.f32.mrf.mxu0  ;;  %v1769_v21 = vmul.f32 %v696_v10, %v696_v10 }
 0x127   :  { %v1494_v15 = vadd.f32 %v1493_v9, %v343_v6  ;;  %v1627_v17 = vadd.f32 %v1626_v8, %v1564_v7  ;;  %v2255_v18 = vpack.c.bf16 %v2680_v14, %v2679_v62  ;;  %v2760_v19 = vpop.f32.mrf.mxu1  ;;  %v1568_v43 = vmul.f32 %v2680_v14, %v2680_v14 }
 0x128   :  { %v1698_v20 = vadd.f32 %v1697_v13, %v696_v10  ;;  %v1831_v22 = vadd.f32 %v1830_v12, %v1768_v11  ;;  %v2415_v23 = vpack.c.bf16 %v2760_v19, %v2759_v2  ;;  %v346_v24 = vpop.f32.mrf.mxu0  ;;  %v1772_v47 = vmul.f32 %v2760_v19, %v2760_v19 }
 0x129   :  { %v1628_v25 = vadd.f32 %v1627_v17, %v1565_v16  ;;  %2503 = vst [vmem:[%s3297_s3 + $0x88] sm:$0xff] %v2255_v18   ;;  %v2250_v26 = vpack.c.bf16 %v346_v24, %v343_v6  ;;  %v1495_v27 = vadd.f32 %v1494_v15, %v346_v24  ;;  %v1566_v28 = vmul.f32 %v346_v24, %v346_v24  ;;  %v699_v29 = vpop.f32.mrf.mxu1 }
 0x12a   :  { %v1832_v30 = vadd.f32 %v1831_v22, %v1769_v21  ;;  %2534 = vst [vmem:[%s3298_s4 + $0x88] sm:$0xff] %v2415_v23   ;;  %v2410_v31 = vpack.c.bf16 %v699_v29, %v696_v10  ;;  %v1699_v32 = vadd.f32 %v1698_v20, %v699_v29  ;;  %v1770_v33 = vmul.f32 %v699_v29, %v699_v29  ;;  %v2683_v34 = vpop.f32.mrf.mxu0 }
 0x12b   :  { %2502 = vst [vmem:[%s3297_s3 + $0x80] sm:$0xff] %v2250_v26   ;;  %v1496_v36 = vadd.f32 %v2679_v62, %v1495_v27  ;;  %v1629_v37 = vadd.f32 %v1628_v25, %v1566_v28  ;;  %v2763_v38 = vpop.f32.mrf.mxu1  ;;  %v1571_v7 = vmul.f32 %v2683_v34, %v2683_v34 }
 0x12c   :  { %2533 = vst [vmem:[%s3298_s4 + $0x80] sm:$0xff] %v2410_v31   ;;  %v1700_v40 = vadd.f32 %v2759_v2, %v1699_v32  ;;  %v1833_v41 = vadd.f32 %v1832_v30, %v1770_v33  ;;  %v359_v42 = vpop.f32.mrf.mxu0  ;;  %v1775_v11 = vmul.f32 %v2763_v38, %v2763_v38 }
 0x12d   :  { %v1630_v44 = vadd.f32 %v1629_v37, %v1567_v35  ;;  %v1497_v45 = vadd.f32 %v2680_v14, %v1496_v36  ;;  %v712_v46 = vpop.f32.mrf.mxu1  ;;  %v1569_v52 = vmul.f32 %v359_v42, %v359_v42 }
 0x12e   :  { %v1834_v48 = vadd.f32 %v1833_v41, %v1771_v39  ;;  %v1701_v49 = vadd.f32 %v2760_v19, %v1700_v40  ;;  %v2684_v50 = vpop.f32.mrf.mxu0  ;;  %v1773_v57 = vmul.f32 %v712_v46, %v712_v46 }
 0x12f   :  { %v1498_v51 = vadd.f32 %v1497_v45, %v359_v42  ;;  %v1631_v53 = vadd.f32 %v1630_v44, %v1568_v43  ;;  %v2265_v54 = vpack.c.bf16 %v2684_v50, %v2683_v34  ;;  %v2764_v55 = vpop.f32.mrf.mxu1  ;;  %v1572_v15 = vmul.f32 %v2684_v50, %v2684_v50 }
 0x130   :  { %v1702_v56 = vadd.f32 %v1701_v49, %v712_v46  ;;  %v1835_v58 = vadd.f32 %v1834_v48, %v1772_v47  ;;  %v2425_v59 = vpack.c.bf16 %v2764_v55, %v2763_v38  ;;  %v362_v60 = vpop.f32.mrf.mxu0  ;;  %v1776_v19 = vmul.f32 %v2764_v55, %v2764_v55 }
 0x131   :  { %v1632_v61 = vadd.f32 %v1631_v53, %v1569_v52  ;;  %2505 = vst [vmem:[%s3297_s3 + $0x98] sm:$0xff] %v2265_v54   ;;  %v2260_v62 = vpack.c.bf16 %v362_v60, %v359_v42  ;;  %v1499_v63 = vadd.f32 %v1498_v51, %v362_v60  ;;  %v1570_v0 = vmul.f32 %v362_v60, %v362_v60  ;;  %v715_v1 = vpop.f32.mrf.mxu1 }
 0x132   :  { %v1836_v2 = vadd.f32 %v1835_v58, %v1773_v57  ;;  %2536 = vst [vmem:[%s3298_s4 + $0x98] sm:$0xff] %v2425_v59   ;;  %v2420_v3 = vpack.c.bf16 %v715_v1, %v712_v46  ;;  %v1703_v4 = vadd.f32 %v1702_v56, %v715_v1  ;;  %v1774_v5 = vmul.f32 %v715_v1, %v715_v1  ;;  %v2687_v6 = vpop.f32.mrf.mxu0 }
 0x133   :  { %2504 = vst [vmem:[%s3297_s3 + $0x90] sm:$0xff] %v2260_v62   ;;  %v1500_v8 = vadd.f32 %v2683_v34, %v1499_v63  ;;  %v1633_v9 = vadd.f32 %v1632_v61, %v1570_v0  ;;  %v2767_v10 = vpop.f32.mrf.mxu1  ;;  %v1575_v43 = vmul.f32 %v2687_v6, %v2687_v6 }
 0x134   :  { %2535 = vst [vmem:[%s3298_s4 + $0x90] sm:$0xff] %v2420_v3   ;;  %v1704_v12 = vadd.f32 %v2763_v38, %v1703_v4  ;;  %v1837_v13 = vadd.f32 %v1836_v2, %v1774_v5  ;;  %v375_v14 = vpop.f32.mrf.mxu0  ;;  %v1779_v47 = vmul.f32 %v2767_v10, %v2767_v10 }
 0x135   :  { %v1634_v16 = vadd.f32 %v1633_v9, %v1571_v7  ;;  %v1501_v17 = vadd.f32 %v2684_v50, %v1500_v8  ;;  %v728_v18 = vpop.f32.mrf.mxu1  ;;  %v1573_v24 = vmul.f32 %v375_v14, %v375_v14 }
 0x136   :  { %v1838_v20 = vadd.f32 %v1837_v13, %v1775_v11  ;;  %v1705_v21 = vadd.f32 %v2764_v55, %v1704_v12  ;;  %v2688_v22 = vpop.f32.mrf.mxu0  ;;  %v1777_v29 = vmul.f32 %v728_v18, %v728_v18 }
 0x137   :  { %v1502_v23 = vadd.f32 %v1501_v17, %v375_v14  ;;  %v1635_v25 = vadd.f32 %v1634_v16, %v1572_v15  ;;  %v2275_v26 = vpack.c.bf16 %v2688_v22, %v2687_v6  ;;  %v2768_v27 = vpop.f32.mrf.mxu1  ;;  %v1576_v51 = vmul.f32 %v2688_v22, %v2688_v22 }
 0x138   :  { %v1706_v28 = vadd.f32 %v1705_v21, %v728_v18  ;;  %v1839_v30 = vadd.f32 %v1838_v20, %v1776_v19  ;;  %v2435_v31 = vpack.c.bf16 %v2768_v27, %v2767_v10  ;;  %v378_v32 = vpop.f32.mrf.mxu0  ;;  %v1780_v55 = vmul.f32 %v2768_v27, %v2768_v27 }
 0x139   :  { %v1636_v33 = vadd.f32 %v1635_v25, %v1573_v24  ;;  %2507 = vst [vmem:[%s3297_s3 + $0xa8] sm:$0xff] %v2275_v26   ;;  %v2270_v34 = vpack.c.bf16 %v378_v32, %v375_v14  ;;  %v1503_v35 = vadd.f32 %v1502_v23, %v378_v32  ;;  %v1574_v36 = vmul.f32 %v378_v32, %v378_v32  ;;  %v731_v37 = vpop.f32.mrf.mxu1 }
 0x13a   :  { %v1840_v38 = vadd.f32 %v1839_v30, %v1777_v29  ;;  %2538 = vst [vmem:[%s3298_s4 + $0xa8] sm:$0xff] %v2435_v31   ;;  %v2430_v39 = vpack.c.bf16 %v731_v37, %v728_v18  ;;  %v1707_v40 = vadd.f32 %v1706_v28, %v731_v37  ;;  %v1778_v41 = vmul.f32 %v731_v37, %v731_v37  ;;  %v2691_v42 = vpop.f32.mrf.mxu0 }
 0x13b   :  { %2506 = vst [vmem:[%s3297_s3 + $0xa0] sm:$0xff] %v2270_v34   ;;  %v1504_v44 = vadd.f32 %v2687_v6, %v1503_v35  ;;  %v1637_v45 = vadd.f32 %v1636_v33, %v1574_v36  ;;  %v2771_v46 = vpop.f32.mrf.mxu1  ;;  %v1579_v15 = vmul.f32 %v2691_v42, %v2691_v42 }
 0x13c   :  { %2537 = vst [vmem:[%s3298_s4 + $0xa0] sm:$0xff] %v2430_v39   ;;  %v1708_v48 = vadd.f32 %v2767_v10, %v1707_v40  ;;  %v1841_v49 = vadd.f32 %v1840_v38, %v1778_v41  ;;  %v391_v50 = vpop.f32.mrf.mxu0  ;;  %v1783_v19 = vmul.f32 %v2771_v46, %v2771_v46 }
 0x13d   :  { %v1638_v52 = vadd.f32 %v1637_v45, %v1575_v43  ;;  %v1505_v53 = vadd.f32 %v2688_v22, %v1504_v44  ;;  %v744_v54 = vpop.f32.mrf.mxu1  ;;  %v1577_v60 = vmul.f32 %v391_v50, %v391_v50 }
 0x13e   :  { %v1842_v56 = vadd.f32 %v1841_v49, %v1779_v47  ;;  %v1709_v57 = vadd.f32 %v2768_v27, %v1708_v48  ;;  %v2692_v58 = vpop.f32.mrf.mxu0  ;;  %v1781_v1 = vmul.f32 %v744_v54, %v744_v54 }
 0x13f   :  { %v1506_v59 = vadd.f32 %v1505_v53, %v391_v50  ;;  %v1639_v61 = vadd.f32 %v1638_v52, %v1576_v51  ;;  %v2285_v62 = vpack.c.bf16 %v2692_v58, %v2691_v42  ;;  %v2772_v63 = vpop.f32.mrf.mxu1  ;;  %v1580_v23 = vmul.f32 %v2692_v58, %v2692_v58 }
 0x140   :  { %v1710_v0 = vadd.f32 %v1709_v57, %v744_v54  ;;  %v1843_v2 = vadd.f32 %v1842_v56, %v1780_v55  ;;  %v2445_v3 = vpack.c.bf16 %v2772_v63, %v2771_v46  ;;  %v394_v4 = vpop.f32.mrf.mxu0  ;;  %v1784_v27 = vmul.f32 %v2772_v63, %v2772_v63 }
 0x141   :  { %v1640_v5 = vadd.f32 %v1639_v61, %v1577_v60  ;;  %2509 = vst [vmem:[%s3297_s3 + $0xb8] sm:$0xff] %v2285_v62   ;;  %v2280_v6 = vpack.c.bf16 %v394_v4, %v391_v50  ;;  %v1507_v7 = vadd.f32 %v1506_v59, %v394_v4  ;;  %v1578_v8 = vmul.f32 %v394_v4, %v394_v4  ;;  %v747_v9 = vpop.f32.mrf.mxu1 }
 0x142   :  { %v1844_v10 = vadd.f32 %v1843_v2, %v1781_v1  ;;  %2540 = vst [vmem:[%s3298_s4 + $0xb8] sm:$0xff] %v2445_v3   ;;  %v2440_v11 = vpack.c.bf16 %v747_v9, %v744_v54  ;;  %v1711_v12 = vadd.f32 %v1710_v0, %v747_v9  ;;  %v1782_v13 = vmul.f32 %v747_v9, %v747_v9  ;;  %v2695_v14 = vpop.f32.mrf.mxu0 }
 0x143   :  { %2508 = vst [vmem:[%s3297_s3 + $0xb0] sm:$0xff] %v2280_v6   ;;  %v1508_v16 = vadd.f32 %v2691_v42, %v1507_v7  ;;  %v1641_v17 = vadd.f32 %v1640_v5, %v1578_v8  ;;  %v2775_v18 = vpop.f32.mrf.mxu1  ;;  %v1583_v51 = vmul.f32 %v2695_v14, %v2695_v14 }
 0x144   :  { %2539 = vst [vmem:[%s3298_s4 + $0xb0] sm:$0xff] %v2440_v11   ;;  %v1712_v20 = vadd.f32 %v2771_v46, %v1711_v12  ;;  %v1845_v21 = vadd.f32 %v1844_v10, %v1782_v13  ;;  %v407_v22 = vpop.f32.mrf.mxu0  ;;  %v1787_v55 = vmul.f32 %v2775_v18, %v2775_v18 }
 0x145   :  { %v1642_v24 = vadd.f32 %v1641_v17, %v1579_v15  ;;  %v1509_v25 = vadd.f32 %v2692_v58, %v1508_v16  ;;  %v760_v26 = vpop.f32.mrf.mxu1  ;;  %v1581_v32 = vmul.f32 %v407_v22, %v407_v22 }
 0x146   :  { %v1846_v28 = vadd.f32 %v1845_v21, %v1783_v19  ;;  %v1713_v29 = vadd.f32 %v2772_v63, %v1712_v20  ;;  %v2696_v30 = vpop.f32.mrf.mxu0  ;;  %v1785_v37 = vmul.f32 %v760_v26, %v760_v26 }
 0x147   :  { %v1510_v31 = vadd.f32 %v1509_v25, %v407_v22  ;;  %v1643_v33 = vadd.f32 %v1642_v24, %v1580_v23  ;;  %v2295_v34 = vpack.c.bf16 %v2696_v30, %v2695_v14  ;;  %v2776_v35 = vpop.f32.mrf.mxu1  ;;  %v1584_v59 = vmul.f32 %v2696_v30, %v2696_v30 }
 0x148   :  { %v1714_v36 = vadd.f32 %v1713_v29, %v760_v26  ;;  %v1847_v38 = vadd.f32 %v1846_v28, %v1784_v27  ;;  %v2455_v39 = vpack.c.bf16 %v2776_v35, %v2775_v18  ;;  %v410_v40 = vpop.f32.mrf.mxu0  ;;  %v1788_v63 = vmul.f32 %v2776_v35, %v2776_v35 }
 0x149   :  { %v1644_v41 = vadd.f32 %v1643_v33, %v1581_v32  ;;  %2511 = vst [vmem:[%s3297_s3 + $0xc8] sm:$0xff] %v2295_v34   ;;  %v2290_v42 = vpack.c.bf16 %v410_v40, %v407_v22  ;;  %v1511_v43 = vadd.f32 %v1510_v31, %v410_v40  ;;  %v1582_v44 = vmul.f32 %v410_v40, %v410_v40  ;;  %v763_v45 = vpop.f32.mrf.mxu1 }
 0x14a   :  { %v1848_v46 = vadd.f32 %v1847_v38, %v1785_v37  ;;  %2542 = vst [vmem:[%s3298_s4 + $0xc8] sm:$0xff] %v2455_v39   ;;  %v2450_v47 = vpack.c.bf16 %v763_v45, %v760_v26  ;;  %v1715_v48 = vadd.f32 %v1714_v36, %v763_v45  ;;  %v1786_v49 = vmul.f32 %v763_v45, %v763_v45  ;;  %v2699_v50 = vpop.f32.mrf.mxu0 }
 0x14b   :  { %2510 = vst [vmem:[%s3297_s3 + $0xc0] sm:$0xff] %v2290_v42   ;;  %v1512_v52 = vadd.f32 %v2695_v14, %v1511_v43  ;;  %v1645_v53 = vadd.f32 %v1644_v41, %v1582_v44  ;;  %v2779_v54 = vpop.f32.mrf.mxu1  ;;  %v1587_v23 = vmul.f32 %v2699_v50, %v2699_v50 }
 0x14c   :  { %2541 = vst [vmem:[%s3298_s4 + $0xc0] sm:$0xff] %v2450_v47   ;;  %v1716_v56 = vadd.f32 %v2775_v18, %v1715_v48  ;;  %v1849_v57 = vadd.f32 %v1848_v46, %v1786_v49  ;;  %v423_v58 = vpop.f32.mrf.mxu0  ;;  %v1791_v27 = vmul.f32 %v2779_v54, %v2779_v54 }
 0x14d   :  { %v1646_v60 = vadd.f32 %v1645_v53, %v1583_v51  ;;  %v1513_v61 = vadd.f32 %v2696_v30, %v1512_v52  ;;  %v776_v62 = vpop.f32.mrf.mxu1  ;;  %v1585_v4 = vmul.f32 %v423_v58, %v423_v58 }
 0x14e   :  { %v1850_v0 = vadd.f32 %v1849_v57, %v1787_v55  ;;  %v1717_v1 = vadd.f32 %v2776_v35, %v1716_v56  ;;  %v2700_v2 = vpop.f32.mrf.mxu0  ;;  %v1789_v9 = vmul.f32 %v776_v62, %v776_v62 }
 0x14f   :  { %v1514_v3 = vadd.f32 %v1513_v61, %v423_v58  ;;  %v1647_v5 = vadd.f32 %v1646_v60, %v1584_v59  ;;  %v2305_v6 = vpack.c.bf16 %v2700_v2, %v2699_v50  ;;  %v2780_v7 = vpop.f32.mrf.mxu1  ;;  %v1588_v31 = vmul.f32 %v2700_v2, %v2700_v2 }
 0x150   :  { %v1718_v8 = vadd.f32 %v1717_v1, %v776_v62  ;;  %v1851_v10 = vadd.f32 %v1850_v0, %v1788_v63  ;;  %v2465_v11 = vpack.c.bf16 %v2780_v7, %v2779_v54  ;;  %v426_v12 = vpop.f32.mrf.mxu0  ;;  %v1792_v35 = vmul.f32 %v2780_v7, %v2780_v7 }
 0x151   :  { %v1648_v13 = vadd.f32 %v1647_v5, %v1585_v4  ;;  %2513 = vst [vmem:[%s3297_s3 + $0xd8] sm:$0xff] %v2305_v6   ;;  %v2300_v14 = vpack.c.bf16 %v426_v12, %v423_v58  ;;  %v1515_v15 = vadd.f32 %v1514_v3, %v426_v12  ;;  %v1586_v16 = vmul.f32 %v426_v12, %v426_v12  ;;  %v779_v17 = vpop.f32.mrf.mxu1 }
 0x152   :  { %v1852_v18 = vadd.f32 %v1851_v10, %v1789_v9  ;;  %2544 = vst [vmem:[%s3298_s4 + $0xd8] sm:$0xff] %v2465_v11   ;;  %v2460_v19 = vpack.c.bf16 %v779_v17, %v776_v62  ;;  %v1719_v20 = vadd.f32 %v1718_v8, %v779_v17  ;;  %v1790_v21 = vmul.f32 %v779_v17, %v779_v17  ;;  %v2703_v22 = vpop.f32.mrf.mxu0 }
 0x153   :  { %2512 = vst [vmem:[%s3297_s3 + $0xd0] sm:$0xff] %v2300_v14   ;;  %v1516_v24 = vadd.f32 %v2699_v50, %v1515_v15  ;;  %v1649_v25 = vadd.f32 %v1648_v13, %v1586_v16  ;;  %v2783_v26 = vpop.f32.mrf.mxu1  ;;  %v1591_v59 = vmul.f32 %v2703_v22, %v2703_v22 }
 0x154   :  { %2543 = vst [vmem:[%s3298_s4 + $0xd0] sm:$0xff] %v2460_v19   ;;  %v1720_v28 = vadd.f32 %v2779_v54, %v1719_v20  ;;  %v1853_v29 = vadd.f32 %v1852_v18, %v1790_v21  ;;  %v439_v30 = vpop.f32.mrf.mxu0  ;;  %v1795_v63 = vmul.f32 %v2783_v26, %v2783_v26 }
 0x155   :  { %v1650_v32 = vadd.f32 %v1649_v25, %v1587_v23  ;;  %v1517_v33 = vadd.f32 %v2700_v2, %v1516_v24  ;;  %v792_v34 = vpop.f32.mrf.mxu1  ;;  %v1589_v40 = vmul.f32 %v439_v30, %v439_v30 }
 0x156   :  { %v1854_v36 = vadd.f32 %v1853_v29, %v1791_v27  ;;  %v1721_v37 = vadd.f32 %v2780_v7, %v1720_v28  ;;  %v2704_v38 = vpop.f32.mrf.mxu0  ;;  %v1793_v45 = vmul.f32 %v792_v34, %v792_v34 }
 0x157   :  { %v1518_v39 = vadd.f32 %v1517_v33, %v439_v30  ;;  %v1651_v41 = vadd.f32 %v1650_v32, %v1588_v31  ;;  %v2315_v42 = vpack.c.bf16 %v2704_v38, %v2703_v22  ;;  %v2784_v43 = vpop.f32.mrf.mxu1  ;;  %v1592_v3 = vmul.f32 %v2704_v38, %v2704_v38 }
 0x158   :  { %v1722_v44 = vadd.f32 %v1721_v37, %v792_v34  ;;  %v1855_v46 = vadd.f32 %v1854_v36, %v1792_v35  ;;  %v2475_v47 = vpack.c.bf16 %v2784_v43, %v2783_v26  ;;  %v442_v48 = vpop.f32.mrf.mxu0  ;;  %v1796_v7 = vmul.f32 %v2784_v43, %v2784_v43 }
 0x159   :  { %v1652_v49 = vadd.f32 %v1651_v41, %v1589_v40  ;;  %2515 = vst [vmem:[%s3297_s3 + $0xe8] sm:$0xff] %v2315_v42   ;;  %v2310_v50 = vpack.c.bf16 %v442_v48, %v439_v30  ;;  %v1519_v51 = vadd.f32 %v1518_v39, %v442_v48  ;;  %v1590_v52 = vmul.f32 %v442_v48, %v442_v48  ;;  %v795_v53 = vpop.f32.mrf.mxu1 }
 0x15a   :  { %v1856_v54 = vadd.f32 %v1855_v46, %v1793_v45  ;;  %2546 = vst [vmem:[%s3298_s4 + $0xe8] sm:$0xff] %v2475_v47   ;;  %v2470_v55 = vpack.c.bf16 %v795_v53, %v792_v34  ;;  %v1723_v56 = vadd.f32 %v1722_v44, %v795_v53  ;;  %v1794_v57 = vmul.f32 %v795_v53, %v795_v53  ;;  %v2707_v58 = vpop.f32.mrf.mxu0 }
 0x15b   :  { %2514 = vst [vmem:[%s3297_s3 + $0xe0] sm:$0xff] %v2310_v50   ;;  %v1520_v60 = vadd.f32 %v2703_v22, %v1519_v51  ;;  %v1653_v61 = vadd.f32 %v1652_v49, %v1590_v52  ;;  %v2787_v62 = vpop.f32.mrf.mxu1  ;;  %v1595_v30 = vmul.f32 %v2707_v58, %v2707_v58 }
 0x15c   :  { %2545 = vst [vmem:[%s3298_s4 + $0xe0] sm:$0xff] %v2470_v55   ;;  %v1724_v0 = vadd.f32 %v2783_v26, %v1723_v56  ;;  %v1857_v1 = vadd.f32 %v1856_v54, %v1794_v57  ;;  %v455_v2 = vpop.f32.mrf.mxu0  ;;  %v1799_v33 = vmul.f32 %v2787_v62, %v2787_v62 }
 0x15d   :  { %v1654_v4 = vadd.f32 %v1653_v61, %v1591_v59  ;;  %v1521_v5 = vadd.f32 %v2704_v38, %v1520_v60  ;;  %v808_v6 = vpop.f32.mrf.mxu1  ;;  %v1593_v12 = vmul.f32 %v455_v2, %v455_v2 }
 0x15e   :  { %v1858_v8 = vadd.f32 %v1857_v1, %v1795_v63  ;;  %v1725_v9 = vadd.f32 %v2784_v43, %v1724_v0  ;;  %v2708_v10 = vpop.f32.mrf.mxu0  ;;  %v1797_v17 = vmul.f32 %v808_v6, %v808_v6 }
 0x15f   :  { %v1522_v11 = vadd.f32 %v1521_v5, %v455_v2  ;;  %v1655_v13 = vadd.f32 %v1654_v4, %v1592_v3  ;;  %v2325_v14 = vpack.c.bf16 %v2708_v10, %v2707_v58  ;;  %v2788_v15 = vpop.f32.mrf.mxu1  ;;  %v1596_v36 = vmul.f32 %v2708_v10, %v2708_v10 }
 0x160   :  { %v1726_v16 = vadd.f32 %v1725_v9, %v808_v6  ;;  %v1859_v18 = vadd.f32 %v1858_v8, %v1796_v7  ;;  %v2485_v19 = vpack.c.bf16 %v2788_v15, %v2787_v62  ;;  %v458_v20 = vpop.f32.mrf.mxu0  ;;  %v1800_v39 = vmul.f32 %v2788_v15, %v2788_v15 }
 0x161   :  { %v1656_v21 = vadd.f32 %v1655_v13, %v1593_v12  ;;  %2517 = vst [vmem:[%s3297_s3 + $0xf8] sm:$0xff] %v2325_v14   ;;  %v2320_v22 = vpack.c.bf16 %v458_v20, %v455_v2  ;;  %v1523_v23 = vadd.f32 %v1522_v11, %v458_v20  ;;  %v1594_v24 = vmul.f32 %v458_v20, %v458_v20  ;;  %v811_v25 = vpop.f32.mrf.mxu1 }
 0x162   :  { %v1860_v26 = vadd.f32 %v1859_v18, %v1797_v17  ;;  %2548 = vst [vmem:[%s3298_s4 + $0xf8] sm:$0xff] %v2485_v19   ;;  %v2480_v27 = vpack.c.bf16 %v811_v25, %v808_v6  ;;  %v1727_v28 = vadd.f32 %v1726_v16, %v811_v25  ;;  %v1798_v29 = vmul.f32 %v811_v25, %v811_v25 }
 0x163   :  { %2516 = vst [vmem:[%s3297_s3 + $0xf0] sm:$0xff] %v2320_v22   ;;  %v1524_v31 = vadd.f32 %v2707_v58, %v1523_v23  ;;  %v1657_v32 = vadd.f32 %v1656_v21, %v1594_v24 }
 0x164   :  { %2547 = vst [vmem:[%s3298_s4 + $0xf0] sm:$0xff] %v2480_v27   ;;  %v1728_v34 = vadd.f32 %v2787_v62, %v1727_v28  ;;  %v1861_v35 = vadd.f32 %v1860_v26, %v1798_v29 }
 0x165   :  { %v1525_v37 = vadd.f32 %v2708_v10, %v1524_v31  ;;  %v1658_v38 = vadd.f32 %v1657_v32, %v1595_v30 }
 0x166   :  { %v1729_v40 = vadd.f32 %v2788_v15, %v1728_v34  ;;  %v1862_v41 = vadd.f32 %v1861_v35, %v1799_v33 }
 0x167   :  { %v1526_v42 = vrot.slane %v1525_v37, 4  ;;  %v1659_v43 = vadd.f32 %v1658_v38, %v1596_v36 }
 0x168   :  { %v1730_v44 = vrot.slane %v1729_v40, 4  ;;  %v1863_v45 = vadd.f32 %v1862_v41, %v1800_v39 }
 0x169   :  { %v1527_v46 = vadd.f32 %v1526_v42, %v1525_v37  ;;  %v1660_v47 = vrot.slane %v1659_v43, 4 }
 0x16a   :  { %v1731_v48 = vadd.f32 %v1730_v44, %v1729_v40  ;;  %v1864_v49 = vrot.slane %v1863_v45, 4 }
 0x16b   :  { %v1528_v50 = vrot.slane %v1527_v46, 2  ;;  %v1661_v51 = vadd.f32 %v1660_v47, %v1659_v43 }
 0x16c   :  { %v1732_v52 = vrot.slane %v1731_v48, 2  ;;  %v1865_v53 = vadd.f32 %v1864_v49, %v1863_v45 }
 0x16d   :  { %v1529_v54 = vadd.f32 %v1528_v50, %v1527_v46  ;;  %v1662_v55 = vrot.slane %v1661_v51, 2 }
 0x16e   :  { %v1733_v56 = vadd.f32 %v1732_v52, %v1731_v48  ;;  %v1866_v57 = vrot.slane %v1865_v53, 2 }
 0x16f   :  { %v1530_v58 = vrot.slane %v1529_v54, 1  ;;  %v1663_v59 = vadd.f32 %v1662_v55, %v1661_v51 }
 0x170   :  { %v1734_v60 = vrot.slane %v1733_v56, 1  ;;  %v1867_v61 = vadd.f32 %v1866_v57, %v1865_v53 }
 0x171   :  { %v1531_v62 = vadd.f32 %v1530_v58, %v1529_v54  ;;  %v1664_v63 = vrot.slane %v1663_v59, 1 }
 0x172   :  { %v1735_v0 = vadd.f32 %v1734_v60, %v1733_v56  ;;  %v1868_v1 = vrot.slane %v1867_v61, 1 }
 0x173   :  { %1532 = vst [vmem:[%s3299_s5] sm:$0x1] %v1531_v62  ;;  %v1665_v2 = vadd.f32 %v1664_v63, %v1663_v59 }
 0x174   :  { %1736 = vst [vmem:[%s3300_s7] sm:$0x1] %v1735_v0  ;;  %v1869_v3 = vadd.f32 %v1868_v1, %v1867_v61 }
 0x175   :  { %1666 = vst [vmem:[%s3301_s6] sm:$0x1] %v1665_v2 }
 0x176   :  { %1870 = vst [vmem:[%s3302_s8] sm:$0x1] %v1869_v3 }

// kernel: bottleneck_forward.5
= control target key start
LH: loop header
LB: loop body
LE: loop exit
PB: predicated region body
PF: predicated region fallthrough
CT: control target
= control target key end

     0   :  { %s5464_s21 = smov 0   ;;  %s6686_s0 = inlined_call_operand.vmem [shape: bf16[2,16,16,128], index: 0, kind: input, shape index: {}]   ;;  %s6687_s1 = inlined_call_operand.vmem [shape: f32[1,128], index: 1, kind: input, shape index: {}]   ;;  %s6688_s2 = inlined_call_operand.vmem [shape: f32[1,128], index: 2, kind: input, shape index: {}]   ;;  %s6689_s3 = inlined_call_operand.vmem [shape: bf16[3,3,128,128], index: 3, kind: input, shape index: {}]   ;;  %s6690_s4 = inlined_call_operand.vmem [shape: bf16[2,256,128], index: 4, kind: output, shape index: {0}]   ;;  %s6691_s5 = inlined_call_operand.vmem [shape: f32[2,1,128], index: 5, kind: output, shape index: {1}]   ;;  %s6692_s6 = inlined_call_operand.vmem [shape: f32[2,1,128], index: 6, kind: output, shape index: {2}]  }
   0x1 LB: > { %s4220_s22 = sadd.s32 4294967295, %s5425_s21   ;;  %p4224_p0 = scmp.ge.s32.totalorder %s5425_s21, 1  ;;  %s5425_s21 = sphi %s5464_s21, %s17_s21  }
   0x2   : > { %p217_p1 = scmp.lt.s32.totalorder %s5425_s21, 3 }
   0x4   : > { %p218_p2 = pnand %p4224_p0, %p217_p1 }
   0x6   : > { %221 = sbr.rel (%p218_p2) target bundleno = 550 (0x226), region = 36 }
   0xb   : > { %v5346_v0 = vld [vmem:[%s6689_s3 + $0x38] sm:$0xff]   ;;  %v5347_v1 = vld [vmem:[%s6689_s3 + $0x30] sm:$0xff]   ;;  %v5427_v2 = vmov 0.0   ;;  %p253_p3 = scmp.lt.s32.totalorder %s4220_s22, 1  ;;  %v5348_v3 = vld [vmem:[%s6689_s3 + $0x28] sm:$0xff]  }
   0xc   : > { %270 = vst [vmem:[#allocation2] sm:$0xff] %v5427_v2  ;;  %271 = vst [vmem:[#allocation2 + $0x8] sm:$0xff] %v5427_v2  ;;  %4889 = vmatprep.subr.bf16.mxu0 %v5346_v0  ;;  %5321 = vmatprep.subr.bf16.mxu1 %v5346_v0  ;;  %v5349_v4 = vld [vmem:[%s6689_s3 + $0x20] sm:$0xff]   ;;  %v5350_v19 = vld [vmem:[%s6689_s3 + $0x18] sm:$0xff]  }
   0xd   : > { %272 = vst [vmem:[#allocation2 + $0x10] sm:$0xff] %v5427_v2  ;;  %273 = vst [vmem:[#allocation2 + $0x18] sm:$0xff] %v5427_v2  ;;  %4890 = vmatpush3.bf16.msra.mxu0 %v5346_v0  ;;  %5329 = vmatpush3.bf16.msra.mxu1 %v5346_v0  ;;  %s6778_s22 = smov (!%p253_p3, %s4220_s22), 1  ;;  %v5501_v8 = vld [vmem:[%s6687_s1] ss:$0 sm:$0xff]  ;;  %v5351_v26 = vld [vmem:[%s6689_s3 + $0x10] sm:$0xff]  }
   0xe   : > { %274 = vst [vmem:[#allocation2 + $0x20] sm:$0xff] %v5427_v2  ;;  %277 = vst [vmem:[#allocation2 + $0x38] sm:$0xff] %v5427_v2  ;;  %4891 = vmatprep.subr.bf16.mxu0 %v5347_v1  ;;  %5322 = vmatprep.subr.bf16.mxu1 %v5347_v1  ;;  %s4465_s29 = sshll.u32 %s6778_s22, 7  ;;  %v5509_v16 = vld [vmem:[%s6688_s2] ss:$0 sm:$0xff]  ;;  %v5352_v54 = vld [vmem:[%s6689_s3 + $0x8] sm:$0xff]   ;;  %s265_s11 = scalar_lea.vmem %s6691_s5, %s6778_s22 }
   0xf   : > { %278 = vst [vmem:[#allocation2 + $0x40] sm:$0xff] %v5427_v2  ;;  %281 = vst [vmem:[#allocation2 + $0x58] sm:$0xff] %v5427_v2  ;;  %s5493_s8 = scalar_lea.vmem %s6686_s0, %s4465_s29  ;;  %v5584_v63 = vld [vmem:[%s6689_s3] sm:$0xff]   ;;  %s6593_s9 = scalar_lea.vmem %s6690_s4, %s4465_s29 }
  0x10   : > { %282 = vst [vmem:[#allocation2 + $0x60] sm:$0xff] %v5427_v2  ;;  %285 = vst [vmem:[#allocation2 + $0x78] sm:$0xff] %v5427_v2  ;;  %v4649_v9 = vld [vmem:[%s5493_s8 + $0x38] sm:$0xff]   ;;  %v4500_v10 = vld [vmem:[%s5493_s8] sm:$0xff]   ;;  %s268_s14 = scalar_lea.vmem %s6692_s6, %s6778_s22 }
  0x11   : > { %286 = vst [vmem:[#allocation2 + $0x80] sm:$0xff] %v5427_v2  ;;  %289 = vst [vmem:[#allocation2 + $0x98] sm:$0xff] %v5427_v2  ;;  %4892 = vmatpush3.bf16.msra.mxu0 %v5347_v1  ;;  %5330 = vmatpush3.bf16.msra.mxu1 %v5347_v1  ;;  %v4529_v11 = vunpack.c.l.bf16 %v4649_v9  ;;  %v4530_v12 = vunpack.c.h.bf16 %v4649_v9  ;;  %v4501_v13 = vunpack.c.l.bf16 %v4500_v10  ;;  %v4502_v14 = vunpack.c.h.bf16 %v4500_v10  ;;  %v4650_v15 = vld [vmem:[%s5493_s8 + $0x40] sm:$0xff]   ;;  %v4643_v30 = vld [vmem:[%s5493_s8 + $0x8] sm:$0xff]  }
  0x12   : > { %290 = vst [vmem:[#allocation2 + $0xa0] sm:$0xff] %v5427_v2  ;;  %293 = vst [vmem:[#allocation2 + $0xb8] sm:$0xff] %v5427_v2  ;;  %4893 = vmatprep.subr.bf16.mxu0 %v5348_v3  ;;  %5323 = vmatprep.subr.bf16.mxu1 %v5348_v3  ;;  %v4533_v17 = vunpack.c.l.bf16 %v4650_v15  ;;  %v4534_v18 = vunpack.c.h.bf16 %v4650_v15  ;;  %v4505_v34 = vunpack.c.l.bf16 %v4643_v30  ;;  %v4651_v35 = vld [vmem:[%s5493_s8 + $0x48] sm:$0xff]   ;;  %v4644_v36 = vld [vmem:[%s5493_s8 + $0x10] sm:$0xff]   ;;  %v4506_v40 = vunpack.c.h.bf16 %v4643_v30 }
  0x13   : > { %294 = vst [vmem:[#allocation2 + $0xc0] sm:$0xff] %v5427_v2  ;;  %297 = vst [vmem:[#allocation2 + $0xd8] sm:$0xff] %v5427_v2  ;;  %v549_v5 = vld [vmem:[#allocation2 + $0x7] sm:$0xff]  ;;  %v428_v20 = vmul.f32 %v4529_v11, %v5501_v8  ;;  %v429_v21 = vmul.f32 %v4530_v12, %v5501_v8  ;;  %v414_v22 = vmul.f32 %v4501_v13, %v5501_v8  ;;  %v4652_v41 = vld [vmem:[%s5493_s8 + $0x50] sm:$0xff]   ;;  %v4537_v47 = vunpack.c.l.bf16 %v4651_v35 }
  0x14   : > { %298 = vst [vmem:[#allocation2 + $0xe0] sm:$0xff] %v5427_v2  ;;  %301 = vst [vmem:[#allocation2 + $0xf8] sm:$0xff] %v5427_v2  ;;  %v550_v6 = vld [vmem:[#allocation2 + $0xf] sm:$0xff]  ;;  %v415_v23 = vmul.f32 %v4502_v14, %v5501_v8  ;;  %v430_v24 = vmul.f32 %v4533_v17, %v5501_v8  ;;  %v431_v25 = vmul.f32 %v4534_v18, %v5501_v8  ;;  %v4538_v48 = vunpack.c.h.bf16 %v4651_v35  ;;  %v4645_v58 = vld [vmem:[%s5493_s8 + $0x18] sm:$0xff]  }
  0x15   : > { %302 = vst [vmem:[#allocation2 + $0x100] sm:$0xff] %v5427_v2  ;;  %305 = vst [vmem:[#allocation2 + $0x118] sm:$0xff] %v5427_v2  ;;  %v581_v7 = vpack.c.bf16 %v550_v6, %v549_v5  ;;  %4894 = vmatpush3.bf16.msra.mxu0 %v5348_v3  ;;  %5331 = vmatpush3.bf16.msra.mxu1 %v5348_v3  ;;  %v5524_v27 = vadd.f32 %v5509_v16, %v428_v20  ;;  %v4509_v49 = vunpack.c.l.bf16 %v4644_v36  ;;  %v4653_v9 = vld [vmem:[%s5493_s8 + $0x58] sm:$0xff]   ;;  %v4646_v14 = vld [vmem:[%s5493_s8 + $0x20] sm:$0xff]  }
  0x16   : > { %306 = vst [vmem:[#allocation2 + $0x120] sm:$0xff] %v5427_v2  ;;  %309 = vst [vmem:[#allocation2 + $0x138] sm:$0xff] %v5427_v2  ;;  %4895 = vmatprep.subr.bf16.mxu0 %v5349_v4  ;;  %5324 = vmatprep.subr.bf16.mxu1 %v5349_v4  ;;  %v5527_v28 = vadd.f32 %v5509_v16, %v429_v21  ;;  %v5530_v29 = vadd.f32 %v5509_v16, %v414_v22  ;;  %v4510_v51 = vunpack.c.h.bf16 %v4644_v36  ;;  %v4654_v15 = vld [vmem:[%s5493_s8 + $0x60] sm:$0xff]  }
  0x17   : > { %310 = vst [vmem:[#allocation2 + $0x140] sm:$0xff] %v5427_v2  ;;  %313 = vst [vmem:[#allocation2 + $0x158] sm:$0xff] %v5427_v2  ;;  %4905 = vmatprep.mubr.bf16.mxu0 %v581_v7  ;;  %v5534_v31 = vadd.f32 %v5509_v16, %v415_v23  ;;  %v5537_v32 = vadd.f32 %v5509_v16, %v430_v24  ;;  %v5540_v33 = vadd.f32 %v5509_v16, %v431_v25 }
  0x18   : > { %314 = vst [vmem:[#allocation2 + $0x160] sm:$0xff] %v5427_v2  ;;  %317 = vst [vmem:[#allocation2 + $0x178] sm:$0xff] %v5427_v2  ;;  %v498_v37 = vmax.f32 %v5524_v27, 0.0  ;;  %v499_v38 = vmax.f32 %v5527_v28, 0.0  ;;  %v6704_v39 = vmax.f32 %v5530_v29, 0.0  ;;  %v416_v45 = vmul.f32 %v4505_v34, %v5501_v8 }
  0x19   : > { %318 = vst [vmem:[#allocation2 + $0x180] sm:$0xff] %v5427_v2  ;;  %321 = vst [vmem:[#allocation2 + $0x198] sm:$0xff] %v5427_v2  ;;  %4896 = vmatpush3.bf16.msra.mxu0 %v5349_v4  ;;  %5332 = vmatpush3.bf16.msra.mxu1 %v5349_v4  ;;  %v6703_v42 = vmax.f32 %v5534_v31, 0.0  ;;  %v500_v43 = vmax.f32 %v5537_v32, 0.0  ;;  %v501_v44 = vmax.f32 %v5540_v33, 0.0  ;;  %v417_v46 = vmul.f32 %v4506_v40, %v5501_v8 }
  0x1a   : > { %322 = vst [vmem:[#allocation2 + $0x1a0] sm:$0xff] %v5427_v2  ;;  %325 = vst [vmem:[#allocation2 + $0x1b8] sm:$0xff] %v5427_v2  ;;  %4897 = vmatprep.subr.bf16.mxu0 %v5350_v19  ;;  %5325 = vmatprep.subr.bf16.mxu1 %v5350_v19  ;;  %v5566_v50 = vadd.f32 %v5509_v16, %v416_v45  ;;  %v4541_v52 = vunpack.c.l.bf16 %v4652_v41  ;;  %v4542_v53 = vunpack.c.h.bf16 %v4652_v41  ;;  %v4513_v7 = vunpack.c.l.bf16 %v4645_v58 }
  0x1b   : > { %326 = vst [vmem:[#allocation2 + $0x1c0] sm:$0xff] %v5427_v2  ;;  %329 = vst [vmem:[#allocation2 + $0x1d8] sm:$0xff] %v5427_v2  ;;  %v5572_v55 = vadd.f32 %v5509_v16, %v417_v46  ;;  %v432_v56 = vmul.f32 %v4537_v47, %v5501_v8  ;;  %v433_v57 = vmul.f32 %v4538_v48, %v5501_v8  ;;  %v4514_v13 = vunpack.c.h.bf16 %v4645_v58  ;;  %v5354_v47 = vld [vmem:[%s6689_s3 + $0x78] sm:$0xff]  }
  0x1c   : > { %330 = vst [vmem:[#allocation2 + $0x1e0] sm:$0xff] %v5427_v2  ;;  %333 = vst [vmem:[#allocation2 + $0x1f8] sm:$0xff] %v5427_v2  ;;  %v6700_v59 = vmax.f32 %v5566_v50, 0.0  ;;  %v418_v60 = vmul.f32 %v4509_v49, %v5501_v8  ;;  %v419_v61 = vmul.f32 %v4510_v51, %v5501_v8  ;;  %v434_v62 = vmul.f32 %v4541_v52, %v5501_v8  ;;  %v5355_v48 = vld [vmem:[%s6689_s3 + $0xb8] sm:$0xff]  }
  0x1d   : > { %334 = vst [vmem:[#allocation2 + $0x200] sm:$0xff] %v5427_v2  ;;  %337 = vst [vmem:[#allocation2 + $0x218] sm:$0xff] %v5427_v2  ;;  %4898 = vmatpush3.bf16.msra.mxu0 %v5350_v19  ;;  %5333 = vmatpush3.bf16.msra.mxu1 %v5350_v19  ;;  %v6699_v0 = vmax.f32 %v5572_v55, 0.0  ;;  %v5588_v1 = vadd.f32 %v5509_v16, %v432_v56  ;;  %v435_v3 = vmul.f32 %v4542_v53, %v5501_v8 }
  0x1e   : > { %338 = vst [vmem:[#allocation2 + $0x220] sm:$0xff] %v5427_v2  ;;  %339 = vst [vmem:[#allocation2 + $0x228] sm:$0xff] %v5427_v2  ;;  %4899 = vmatprep.subr.bf16.mxu0 %v5351_v26  ;;  %5326 = vmatprep.subr.bf16.mxu1 %v5351_v26  ;;  %v5597_v4 = vadd.f32 %v5509_v16, %v418_v60  ;;  %v5600_v5 = vadd.f32 %v5509_v16, %v419_v61  ;;  %v4545_v36 = vunpack.c.l.bf16 %v4653_v9  ;;  %v5659_v61 = vld [vmem:[%s6689_s3 + $0x70] sm:$0xff]  }
  0x1f   : > { %340 = vst [vmem:[#allocation2 + $0x230] sm:$0xff] %v5427_v2  ;;  %341 = vst [vmem:[#allocation2 + $0x238] sm:$0xff] %v5427_v2  ;;  %v5591_v2 = vadd.f32 %v5509_v16, %v433_v57  ;;  %v5603_v6 = vadd.f32 %v5509_v16, %v434_v62  ;;  %v502_v10 = vmax.f32 %v5588_v1, 0.0  ;;  %v5611_v12 = vadd.f32 %v5509_v16, %v435_v3  ;;  %v5664_v62 = vld [vmem:[%s6689_s3 + $0xb0] sm:$0xff]  }
  0x20   : > { %531 = vst [vmem:[#allocation2 + $0x108] sm:$0xff] %v498_v37  ;;  %532 = vst [vmem:[#allocation2 + $0x110] sm:$0xff] %v499_v38  ;;  %v6698_v20 = vmax.f32 %v5597_v4, 0.0  ;;  %v6697_v21 = vmax.f32 %v5600_v5, 0.0  ;;  %v420_v23 = vmul.f32 %v4513_v7, %v5501_v8  ;;  %v421_v35 = vmul.f32 %v4514_v13, %v5501_v8 }
  0x21   : > { %517 = vst [vmem:[#allocation2 + $0x28] sm:$0xff] %v6704_v39  ;;  %518 = vst [vmem:[#allocation2 + $0x30] sm:$0xff] %v6703_v42  ;;  %4900 = vmatpush3.bf16.msra.mxu0 %v5351_v26  ;;  %5334 = vmatpush3.bf16.msra.mxu1 %v5351_v26  ;;  %v503_v11 = vmax.f32 %v5591_v2, 0.0  ;;  %v504_v22 = vmax.f32 %v5603_v6, 0.0  ;;  %v505_v34 = vmax.f32 %v5611_v12, 0.0  ;;  %v4546_v46 = vunpack.c.h.bf16 %v4653_v9 }
  0x22   : > { %533 = vst [vmem:[#allocation2 + $0x128] sm:$0xff] %v500_v43  ;;  %534 = vst [vmem:[#allocation2 + $0x130] sm:$0xff] %v501_v44  ;;  %4901 = vmatprep.subr.bf16.mxu0 %v5352_v54  ;;  %5327 = vmatprep.subr.bf16.mxu1 %v5352_v54  ;;  %v5637_v45 = vadd.f32 %v5509_v16, %v420_v23  ;;  %v5650_v49 = vadd.f32 %v5509_v16, %v421_v35  ;;  %v4517_v52 = vunpack.c.l.bf16 %v4646_v14  ;;  %v4648_v35 = vld [vmem:[%s5493_s8 + $0x30] sm:$0xff]  }
  0x23   : > { %519 = vst [vmem:[#allocation2 + $0x48] sm:$0xff] %v6700_v59  ;;  %520 = vst [vmem:[#allocation2 + $0x50] sm:$0xff] %v6699_v0  ;;  %v436_v51 = vmul.f32 %v4545_v36, %v5501_v8  ;;  %v4518_v53 = vunpack.c.h.bf16 %v4646_v14  ;;  %v437_v57 = vmul.f32 %v4546_v46, %v5501_v8  ;;  %v4549_v58 = vunpack.c.l.bf16 %v4654_v15  ;;  %v5695_v36 = vld [vmem:[%s5493_s8 + $0x70] sm:$0xff]  }
  0x24   : > { %535 = vst [vmem:[#allocation2 + $0x148] sm:$0xff] %v502_v10  ;;  %536 = vst [vmem:[#allocation2 + $0x150] sm:$0xff] %v503_v11  ;;  %v6694_v56 = vmax.f32 %v5637_v45, 0.0  ;;  %v4550_v60 = vunpack.c.h.bf16 %v4654_v15  ;;  %v6693_v7 = vmax.f32 %v5650_v49, 0.0  ;;  %v422_v13 = vmul.f32 %v4517_v52, %v5501_v8 }
  0x25   : > { %4902 = vmatpush3.bf16.msra.mxu0 %v5352_v54  ;;  %5335 = vmatpush3.bf16.msra.mxu1 %v5352_v54  ;;  %521 = vst [vmem:[#allocation2 + $0x68] sm:$0xff] %v6698_v20  ;;  %522 = vst [vmem:[#allocation2 + $0x70] sm:$0xff] %v6697_v21  ;;  %v4647_v54 = vld [vmem:[%s5493_s8 + $0x28] sm:$0xff]   ;;  %v5668_v9 = vadd.f32 %v5509_v16, %v436_v51  ;;  %v423_v14 = vmul.f32 %v4518_v53, %v5501_v8  ;;  %v4558_v21 = vunpack.c.h.bf16 %v5695_v36 }
  0x26   : > { %537 = vst [vmem:[#allocation2 + $0x168] sm:$0xff] %v504_v22  ;;  %4903 = vmatprep.subr.bf16.mxu0 %v5584_v63  ;;  %5328 = vmatprep.subr.bf16.mxu1 %v5584_v63  ;;  %538 = vst [vmem:[#allocation2 + $0x170] sm:$0xff] %v505_v34  ;;  %v4521_v23 = vunpack.c.l.bf16 %v4647_v54  ;;  %v5825_v27 = vpack.c.bf16 %v505_v34, %v504_v22 }
  0x27   : > { %v565_v17 = vld [vmem:[#allocation2 + $0x107] sm:$0xff]  ;;  %v566_v18 = vld [vmem:[#allocation2 + $0x10f] sm:$0xff]  ;;  %523 = vst [vmem:[#allocation2 + $0x88] sm:$0xff] %v6694_v56  ;;  %524 = vst [vmem:[#allocation2 + $0x90] sm:$0xff] %v6693_v7 }
  0x28   : > { %v551_v19 = vld [vmem:[#allocation2 + $0x27] sm:$0xff]  ;;  %v589_v24 = vpack.c.bf16 %v566_v18, %v565_v17  ;;  %v552_v25 = vld [vmem:[#allocation2 + $0x2f] sm:$0xff]  ;;  %v5677_v17 = vadd.f32 %v5509_v16, %v437_v57  ;;  %v438_v18 = vmul.f32 %v4549_v58, %v5501_v8  ;;  %v4522_v58 = vunpack.c.h.bf16 %v4647_v54 }
  0x29   : > { %v5619_v26 = vld [vmem:[#allocation2 + $0x127] sm:$0xff]  ;;  %v568_v30 = vld [vmem:[#allocation2 + $0x12f] sm:$0xff]  ;;  %v5627_v40 = vpack.c.bf16 %v552_v25, %v551_v19  ;;  %4904 = vmatpush3.bf16.msra.mxu0 %v5584_v63  ;;  %5336 = vmatpush3.bf16.msra.mxu1 %v5584_v63  ;;  %v439_v19 = vmul.f32 %v4550_v60, %v5501_v8  ;;  %v506_v63 = vmax.f32 %v5668_v9, 0.0 }
  0x2a   : > { %v590_v41 = vpack.c.bf16 %v568_v30, %v5619_v26  ;;  %4921 = vmatprep.mubr.bf16.mxu1 %v589_v24  ;;  %v553_v3 = vld [vmem:[#allocation2 + $0x47] sm:$0xff]  ;;  %v554_v15 = vld [vmem:[#allocation2 + $0x4f] sm:$0xff]  ;;  %4937 = vmatprep.subr.bf16.mxu1 %v5354_v47  ;;  %v5688_v26 = vadd.f32 %v5509_v16, %v422_v13  ;;  %v5691_v30 = vadd.f32 %v5509_v16, %v423_v14  ;;  %v507_v52 = vmax.f32 %v5677_v17, 0.0 }
  0x2b   : > { %v4655_v24 = vld [vmem:[%s5493_s8 + $0x68] sm:$0xff]   ;;  %4985 = vmatprep.subr.bf16.mxu0 %v5355_v48  ;;  %v5682_v25 = vpack.c.bf16 %v554_v15, %v553_v3  ;;  %v5699_v53 = vadd.f32 %v5509_v16, %v438_v18  ;;  %v5702_v57 = vadd.f32 %v5509_v16, %v439_v19  ;;  %539 = vst [vmem:[#allocation2 + $0x188] sm:$0xff] %v506_v63  ;;  %v1225_v17 = vld [vmem:[#allocation2 + $0x11] sm:$0xff] }
  0x2c   : > { %v569_v46 = vld [vmem:[#allocation2 + $0x147] sm:$0xff]  ;;  %v570_v51 = vld [vmem:[#allocation2 + $0x14f] sm:$0xff]  ;;  %4906 = vmatmul.mubr.bf16.vlgmr.msra.gmra.mxu0 %v5627_v40  ;;  %4922 = vmatmul.mubr.bf16.vlgmr.msra.gmra.mxu1 %v590_v41  ;;  %v6696_v15 = vmax.f32 %v5688_v26, 0.0  ;;  %v6695_v7 = vmax.f32 %v5691_v30, 0.0  ;;  %v424_v18 = vmul.f32 %v4521_v23, %v5501_v8  ;;  %540 = vst [vmem:[#allocation2 + $0x190] sm:$0xff] %v507_v52  ;;  %v5831_v28 = vpack.c.bf16 %v507_v52, %v506_v63 }
  0x2d   : > { %v591_v60 = vpack.c.bf16 %v570_v51, %v569_v46  ;;  %v555_v3 = vld [vmem:[#allocation2 + $0x67] sm:$0xff]  ;;  %v556_v13 = vld [vmem:[#allocation2 + $0x6f] sm:$0xff]  ;;  %4938 = vmatpush3.bf16.msra.mxu1 %v5354_v47  ;;  %4986 = vmatpush3.bf16.msra.mxu0 %v5355_v48  ;;  %v508_v41 = vmax.f32 %v5699_v53, 0.0  ;;  %v6705_v46 = vmax.f32 %v5702_v57, 0.0  ;;  %v425_v51 = vmul.f32 %v4522_v58, %v5501_v8 }
  0x2e   : > { %v571_v14 = vld [vmem:[#allocation2 + $0x167] sm:$0xff]  ;;  %v5710_v19 = vpack.c.bf16 %v556_v13, %v555_v3  ;;  %v572_v54 = vld [vmem:[#allocation2 + $0x16f] sm:$0xff]  ;;  %4939 = vmatprep.subr.bf16.mxu1 %v5659_v61  ;;  %4987 = vmatprep.subr.bf16.mxu0 %v5664_v62  ;;  %525 = vst [vmem:[#allocation2 + $0xa8] sm:$0xff] %v6696_v15  ;;  %526 = vst [vmem:[#allocation2 + $0xb0] sm:$0xff] %v6695_v7  ;;  %v5730_v23 = vadd.f32 %v5509_v16, %v424_v18  ;;  %v4553_v58 = vunpack.c.l.bf16 %v4655_v24 }
  0x2f   : > { %v592_v56 = vpack.c.bf16 %v572_v54, %v571_v14  ;;  %v5358_v47 = vld [vmem:[%s6689_s3 + $0x68] sm:$0xff]   ;;  %v4554_v3 = vunpack.c.h.bf16 %v4655_v24  ;;  %4909 = vmatprep.mubr.bf16.mxu0 %v5682_v25  ;;  %4925 = vmatprep.mubr.bf16.mxu1 %v591_v60  ;;  %541 = vst [vmem:[#allocation2 + $0x1a8] sm:$0xff] %v508_v41  ;;  %542 = vst [vmem:[#allocation2 + $0x1b0] sm:$0xff] %v6705_v46  ;;  %v5738_v13 = vadd.f32 %v5509_v16, %v425_v51  ;;  %v5368_v52 = vld [vmem:[%s6689_s3 + $0x40] sm:$0xff]  }
  0x30   : > { %v5359_v48 = vld [vmem:[%s6689_s3 + $0xa8] sm:$0xff]   ;;  %v4525_v14 = vunpack.c.l.bf16 %v4648_v35  ;;  %v4526_v54 = vunpack.c.h.bf16 %v4648_v35  ;;  %v4557_v7 = vunpack.c.l.bf16 %v5695_v36  ;;  %v6701_v15 = vmax.f32 %v5730_v23, 0.0  ;;  %v5369_v53 = vld [vmem:[%s6689_s3 + $0x80] sm:$0xff]  }
  0x31   : > { %v557_v18 = vld [vmem:[#allocation2 + $0x87] sm:$0xff]  ;;  %v440_v24 = vmul.f32 %v4553_v58, %v5501_v8  ;;  %v441_v60 = vmul.f32 %v4554_v3, %v5501_v8  ;;  %4940 = vmatpush3.bf16.msra.mxu1 %v5659_v61  ;;  %4988 = vmatpush3.bf16.msra.mxu0 %v5664_v62  ;;  %v558_v20 = vld [vmem:[#allocation2 + $0x8f] sm:$0xff]  ;;  %v6702_v51 = vmax.f32 %v5738_v13, 0.0  ;;  %v6706_v32 = vmax.f32 %v5702_v57, 0.0 }
  0x32   : > { %v426_v35 = vmul.f32 %v4525_v14, %v5501_v8  ;;  %v427_v0 = vmul.f32 %v4526_v54, %v5501_v8  ;;  %v442_v59 = vmul.f32 %v4557_v7, %v5501_v8  ;;  %4941 = vmatprep.subr.bf16.mxu1 %v5358_v47  ;;  %4989 = vmatprep.subr.bf16.mxu0 %v5359_v48  ;;  %v5360_v58 = vld [vmem:[%s6689_s3 + $0x60] sm:$0xff]   ;;  %v1224_v9 = vld [vmem:[#allocation2 + $0x9] sm:$0xff] }
  0x33   : > { %v5361_v61 = vld [vmem:[%s6689_s3 + $0xa0] sm:$0xff]   ;;  %v5757_v62 = vpack.c.bf16 %v558_v20, %v557_v18  ;;  %527 = vst [vmem:[#allocation2 + $0xc8] sm:$0xff] %v6701_v15  ;;  %v478_v36 = vadd.f32 %v5509_v16, %v440_v24  ;;  %v479_v3 = vadd.f32 %v5509_v16, %v441_v60  ;;  %528 = vst [vmem:[#allocation2 + $0xd0] sm:$0xff] %v6702_v51  ;;  %v574_v24 = vld [vmem:[#allocation2 + $0x18f] sm:$0xff] }
  0x34   : > { %v573_v7 = vld [vmem:[#allocation2 + $0x187] sm:$0xff]  ;;  %v5766_v14 = vadd.f32 %v5509_v16, %v426_v35  ;;  %v5769_v54 = vadd.f32 %v5509_v16, %v427_v0  ;;  %v443_v20 = vmul.f32 %v4558_v21, %v5501_v8  ;;  %v480_v18 = vadd.f32 %v5509_v16, %v442_v59  ;;  %4910 = vmatmul.mubr.bf16.gmra.mxu0 %v5710_v19  ;;  %v5362_v60 = vld [vmem:[%s6689_s3 + $0x58] sm:$0xff]  }
  0x35   : > { %4926 = vmatmul.mubr.bf16.gmra.mxu1 %v592_v56  ;;  %v510_v15 = vmax.f32 %v478_v36, 0.0  ;;  %v511_v51 = vmax.f32 %v479_v3, 0.0  ;;  %4990 = vmatpush3.bf16.msra.mxu0 %v5359_v48  ;;  %v5777_v35 = vpack.c.bf16 %v574_v24, %v573_v7  ;;  %v559_v0 = vld [vmem:[#allocation2 + $0xa7] sm:$0xff]  ;;  %v560_v42 = vld [vmem:[#allocation2 + $0xaf] sm:$0xff]  ;;  %v5363_v36 = vld [vmem:[%s6689_s3 + $0x98] sm:$0xff]   ;;  %v5837_v33 = vpack.c.bf16 %v6706_v32, %v508_v41 }
  0x36   : > { %4942 = vmatpush3.bf16.msra.mxu1 %v5358_v47  ;;  %v496_v21 = vmax.f32 %v5766_v14, 0.0  ;;  %v497_v59 = vmax.f32 %v5769_v54, 0.0  ;;  %v481_v39 = vadd.f32 %v5509_v16, %v443_v20  ;;  %4991 = vmatprep.subr.bf16.mxu0 %v5361_v61  ;;  %v575_v56 = vld [vmem:[#allocation2 + $0x1a7] sm:$0xff]  ;;  %v576_v46 = vld [vmem:[#allocation2 + $0x1af] sm:$0xff]  ;;  %v512_v47 = vmax.f32 %v480_v18, 0.0 }
  0x37   : > { %4943 = vmatprep.subr.bf16.mxu1 %v5360_v58  ;;  %543 = vst [vmem:[#allocation2 + $0x1c8] sm:$0xff] %v510_v15  ;;  %544 = vst [vmem:[#allocation2 + $0x1d0] sm:$0xff] %v511_v51  ;;  %4913 = vmatprep.mubr.bf16.mxu0 %v5757_v62  ;;  %v5791_v3 = vpack.c.bf16 %v560_v42, %v559_v0  ;;  %v5793_v7 = vpack.c.bf16 %v576_v46, %v575_v56  ;;  %v5364_v20 = vld [vmem:[%s6689_s3 + $0x50] sm:$0xff]   ;;  %v5428_v0 = vmov 0.0|0.0   ;;  %v5385_v14 = vld [vmem:[%s6689_s3 + $0x100] sm:$0xff]  }
  0x38   : > { %4929 = vmatprep.mubr.bf16.mxu1 %v5777_v35  ;;  %529 = vst [vmem:[#allocation2 + $0xe8] sm:$0xff] %v496_v21  ;;  %530 = vst [vmem:[#allocation2 + $0xf0] sm:$0xff] %v497_v59  ;;  %v513_v48 = vmax.f32 %v481_v39, 0.0  ;;  %v5365_v24 = vld [vmem:[%s6689_s3 + $0x90] sm:$0xff]   ;;  %v5805_v42 = vpack.c.bf16 %v499_v38, %v498_v37  ;;  %v5811_v46 = vpack.c.bf16 %v501_v44, %v500_v43  ;;  %v5366_v37 = vld [vmem:[%s6689_s3 + $0x48] sm:$0xff]  }
  0x39   : > { %545 = vst [vmem:[#allocation2 + $0x1e8] sm:$0xff] %v512_v47  ;;  %4992 = vmatpush3.bf16.msra.mxu0 %v5361_v61  ;;  %v5844_v38 = vpack.c.bf16 %v511_v51, %v510_v15  ;;  %v1256_v57 = vpack.c.bf16 %v1225_v17, %v1224_v9  ;;  %v1226_v15 = vld [vmem:[#allocation2 + $0x29] sm:$0xff]  ;;  %v1227_v41 = vld [vmem:[#allocation2 + $0x31] sm:$0xff]  ;;  %v6713_v17 = vmax.f32 %v5637_v45, 0.0 }
  0x3a   : > { %4944 = vmatpush3.bf16.msra.mxu1 %v5360_v58  ;;  %v561_v18 = vld [vmem:[#allocation2 + $0xc7] sm:$0xff]  ;;  %546 = vst [vmem:[#allocation2 + $0x1f0] sm:$0xff] %v513_v48  ;;  %4993 = vmatprep.subr.bf16.mxu0 %v5363_v36  ;;  %v562_v39 = vld [vmem:[#allocation2 + $0xcf] sm:$0xff]  ;;  %v5817_v58 = vpack.c.bf16 %v503_v11, %v502_v10  ;;  %v5846_v43 = vpack.c.bf16 %v513_v48, %v512_v47  ;;  %v5370_v51 = vld [vmem:[%s6689_s3 + $0xf8] sm:$0xff]   ;;  %v6707_v47 = vmax.f32 %v5530_v29, 0.0  ;;  %v6708_v48 = vmax.f32 %v5534_v31, 0.0 }
  0x3b   : > { %4945 = vmatprep.subr.bf16.mxu1 %v5362_v60  ;;  %v5819_v61 = vpack.c.bf16 %v562_v39, %v561_v18  ;;  %v5367_v11 = vld [vmem:[%s6689_s3 + $0x88] sm:$0xff]   ;;  %v5879_v18 = vpack.c.bf16 %v1227_v41, %v1226_v15  ;;  %v6710_v39 = vmax.f32 %v5572_v55, 0.0  ;;  %v1231_v29 = vld [vmem:[#allocation2 + $0x71] sm:$0xff] }
  0x3c   : > { %4914 = vmatmul.mubr.bf16.gmra.mxu0 %v5791_v3  ;;  %v1228_v56 = vld [vmem:[#allocation2 + $0x49] sm:$0xff]  ;;  %v1233_v55 = vld [vmem:[#allocation2 + $0x91] sm:$0xff] }
  0x3d   : > { %4930 = vmatmul.mubr.bf16.gmra.mxu1 %v5793_v7  ;;  %4994 = vmatpush3.bf16.msra.mxu0 %v5363_v36  ;;  %v1229_v36 = vld [vmem:[#allocation2 + $0x51] sm:$0xff]  ;;  %v1234_v45 = vld [vmem:[#allocation2 + $0xa9] sm:$0xff] }
  0x3e   : > { %4946 = vmatpush3.bf16.msra.mxu1 %v5362_v60  ;;  %v577_v44 = vld [vmem:[#allocation2 + $0x1c7] sm:$0xff]  ;;  %v578_v1 = vld [vmem:[#allocation2 + $0x1cf] sm:$0xff]  ;;  %4995 = vmatprep.subr.bf16.mxu0 %v5365_v24  ;;  %v5371_v60 = vld [vmem:[%s6689_s3 + $0x138] sm:$0xff]  }
  0x3f   : > { %4947 = vmatprep.subr.bf16.mxu1 %v5364_v20  ;;  %v5848_v2 = vpack.c.bf16 %v578_v1, %v577_v44  ;;  %v563_v6 = vld [vmem:[#allocation2 + $0xe7] sm:$0xff]  ;;  %v564_v10 = vld [vmem:[#allocation2 + $0xef] sm:$0xff]  ;;  %4917 = vmatprep.mubr.bf16.mxu0 %v5819_v61 }
  0x40   : > { %v579_v12 = vld [vmem:[#allocation2 + $0x1e7] sm:$0xff]  ;;  %v5855_v22 = vpack.c.bf16 %v564_v10, %v563_v6  ;;  %v5372_v31 = vld [vmem:[%s6689_s3 + $0xf0] sm:$0xff]  }
  0x41   : > { %4933 = vmatprep.mubr.bf16.mxu1 %v5848_v2  ;;  %v580_v34 = vld [vmem:[#allocation2 + $0x1ef] sm:$0xff]  ;;  %4996 = vmatpush3.bf16.msra.mxu0 %v5365_v24  ;;  %v6709_v24 = vmax.f32 %v5566_v50, 0.0 }
  0x42   : > { %4948 = vmatpush3.bf16.msra.mxu1 %v5364_v20  ;;  %v5857_v63 = vpack.c.bf16 %v580_v34, %v579_v12  ;;  %4997 = vmatprep.subr.bf16.mxu0 %v5367_v11  ;;  %v5877_v20 = vpack.c.bf16 %v6708_v48, %v6707_v47  ;;  %v1230_v44 = vld [vmem:[#allocation2 + $0x69] sm:$0xff]  ;;  %v6712_v12 = vmax.f32 %v5600_v5, 0.0  ;;  %v5377_v5 = vld [vmem:[%s6689_s3 + $0x120] sm:$0xff]   ;;  %v1237_v41 = vld [vmem:[#allocation2 + $0xd1] sm:$0xff]  ;;  %v6717_v48 = vmax.f32 %v5730_v23, 0.0 }
  0x43   : > { %4949 = vmatprep.subr.bf16.mxu1 %v5366_v37  ;;  %v5885_v32 = vpack.c.bf16 %v6710_v39, %v6709_v24  ;;  %v5373_v1 = vld [vmem:[%s6689_s3 + $0x130] sm:$0xff]   ;;  %v5374_v6 = vld [vmem:[%s6689_s3 + $0xe8] sm:$0xff]   ;;  %v5911_v9 = vpack.c.bf16 %v1231_v29, %v1230_v44  ;;  %v6718_v24 = vmax.f32 %v5738_v13, 0.0 }
  0x44   : > { %4918 = vmatmul.mubr.bf16.gmra.mxu0 %v5855_v22  ;;  %v1232_v50 = vld [vmem:[#allocation2 + $0x89] sm:$0xff]  ;;  %v1239_v13 = vld [vmem:[#allocation2 + $0xf1] sm:$0xff] }
  0x45   : > { %4934 = vmatmul.mubr.bf16.gmra.mxu1 %v5857_v63  ;;  %4998 = vmatpush3.bf16.msra.mxu0 %v5367_v11  ;;  %v5375_v10 = vld [vmem:[%s6689_s3 + $0x128] sm:$0xff]   ;;  %v6711_v11 = vmax.f32 %v5597_v4, 0.0  ;;  %v5376_v4 = vld [vmem:[%s6689_s3 + $0xe0] sm:$0xff]   ;;  %v5949_v39 = vpack.c.bf16 %v6718_v24, %v6717_v48  ;;  %v1247_v48 = vld [vmem:[#allocation2 + $0x171] sm:$0xff] }
  0x46   : > { %4950 = vmatpush3.bf16.msra.mxu1 %v5366_v37  ;;  %4999 = vmatprep.subr.bf16.mxu0 %v5369_v53  ;;  %v5887_v37 = vpack.c.bf16 %v1229_v36, %v1228_v56  ;;  %v1236_v15 = vld [vmem:[#allocation2 + $0xc9] sm:$0xff]  ;;  %v6716_v56 = vmax.f32 %v5691_v30, 0.0 }
  0x47   : > { %4951 = vmatprep.subr.bf16.mxu1 %v5368_v52  ;;  %4953 = vmatprep.mubr.bf16.mxu1 %v5428_v0  ;;  %v5909_v34 = vpack.c.bf16 %v6712_v12, %v6711_v11  ;;  %v6715_v0 = vmax.f32 %v5688_v26, 0.0  ;;  %v5951_v44 = vpack.c.bf16 %v1237_v41, %v1236_v15  ;;  %v5380_v26 = vld [vmem:[%s6689_s3 + $0xd0] sm:$0xff]   ;;  %v4657_v11 = vld [vmem:[%s5493_s8 + $0x78] sm:$0xff]  }
  0x48   : > { %5001 = vmatprep.mubr.bf16.mxu0 %v1256_v57  ;;  %v5919_v57 = vpack.c.bf16 %v1233_v55, %v1232_v50  ;;  %v5381_v30 = vld [vmem:[%s6689_s3 + $0x110] sm:$0xff]   ;;  %v5383_v50 = vld [vmem:[%s6689_s3 + $0x108] sm:$0xff]   ;;  %v5973_v55 = vpack.c.bf16 %v497_v59, %v496_v21  ;;  %v4561_v12 = vunpack.c.l.bf16 %v4657_v11  ;;  %v5386_v41 = vld [vmem:[%s6689_s3 + $0x178] sm:$0xff]  }
  0x49   : > { %5000 = vmatpush3.bf16.msra.mxu0 %v5369_v53  ;;  %v5941_v36 = vpack.c.bf16 %v6716_v56, %v6715_v0  ;;  %v1238_v23 = vld [vmem:[#allocation2 + $0xe9] sm:$0xff] }
  0x4a   : > { %4952 = vmatpush3.bf16.msra.mxu1 %v5368_v52  ;;  %5081 = vmatprep.subr.bf16.mxu0 %v5371_v60  ;;  %v6714_v52 = vmax.f32 %v5650_v49, 0.0  ;;  %v1235_v49 = vld [vmem:[#allocation2 + $0xb1] sm:$0xff]  ;;  %v1240_v29 = vld [vmem:[#allocation2 + $0x109] sm:$0xff]  ;;  %v444_v21 = vmul.f32 %v4561_v12, %v5501_v8 }
  0x4b   : > { %5033 = vmatprep.subr.bf16.mxu1 %v5370_v51  ;;  %v5943_v47 = vpack.c.bf16 %v1235_v49, %v1234_v45  ;;  %v1242_v54 = vld [vmem:[#allocation2 + $0x129] sm:$0xff]  ;;  %v1245_v45 = vld [vmem:[#allocation2 + $0x151] sm:$0xff] }
  0x4c   : > { %5002 = vmatmul.mubr.bf16.vlgmr.msra.gmra.mxu0 %v5879_v18  ;;  %v5917_v53 = vpack.c.bf16 %v6714_v52, %v6713_v17  ;;  %v4562_v17 = vunpack.c.h.bf16 %v4657_v11  ;;  %v5384_v52 = vld [vmem:[%s6689_s3 + $0xc0] sm:$0xff]   ;;  %v482_v49 = vadd.f32 %v5509_v16, %v444_v21  ;;  %v1246_v56 = vld [vmem:[#allocation2 + $0x169] sm:$0xff] }
  0x4d   : > { %4954 = vmatmul.mubr.bf16.vlgmr.msra.gmra.mxu1 %v5877_v20  ;;  %5082 = vmatpush3.bf16.msra.mxu0 %v5371_v60  ;;  %v5379_v60 = vld [vmem:[%s6689_s3 + $0x118] sm:$0xff]   ;;  %v1248_v24 = vld [vmem:[#allocation2 + $0x189] sm:$0xff] }
  0x4e   : > { %5034 = vmatpush3.bf16.msra.mxu1 %v5370_v51  ;;  %4957 = vmatprep.mubr.bf16.mxu1 %v5885_v32  ;;  %v5378_v51 = vld [vmem:[%s6689_s3 + $0xd8] sm:$0xff]   ;;  %v445_v59 = vmul.f32 %v4562_v17, %v5501_v8  ;;  %v5388_v12 = vld [vmem:[%s6689_s3 + $0x170] sm:$0xff]  }
  0x4f   : > { %5005 = vmatprep.mubr.bf16.mxu0 %v5887_v37  ;;  %5035 = vmatprep.subr.bf16.mxu1 %v5372_v31  ;;  %v5387_v8 = vld [vmem:[%s6689_s3 + $0x1b8] sm:$0xff]   ;;  %v5389_v17 = vld [vmem:[%s6689_s3 + $0x1b0] sm:$0xff]  }
  0x50   : > { %5083 = vmatprep.subr.bf16.mxu0 %v5373_v1  ;;  %v483_v15 = vadd.f32 %v5509_v16, %v445_v59  ;;  %v1611_v21 = vld [vmem:[#allocation2 + $0x12f] sm:$0xff] }
  0x51   : > { %5084 = vmatpush3.bf16.msra.mxu0 %v5373_v1  ;;  %v5382_v1 = vld [vmem:[%s6689_s3 + $0xc8] sm:$0xff]  }
  0x52   : > { %5036 = vmatpush3.bf16.msra.mxu1 %v5372_v31  ;;  %5085 = vmatprep.subr.bf16.mxu0 %v5375_v10  ;;  %v1241_v31 = vld [vmem:[#allocation2 + $0x111] sm:$0xff]  ;;  %v1980_v59 = vld [vmem:[#allocation2 + $0x128] sm:$0xff] }
  0x53   : > { %5037 = vmatprep.subr.bf16.mxu1 %v5374_v6 }
  0x54   : > { %5006 = vmatmul.mubr.bf16.gmra.mxu0 %v5911_v9 }
  0x55   : > { %4958 = vmatmul.mubr.bf16.gmra.mxu1 %v5909_v34  ;;  %5009 = vmatprep.mubr.bf16.mxu0 %v5919_v57 }
  0x56   : > { %4961 = vmatprep.mubr.bf16.mxu1 %v5917_v53  ;;  %5038 = vmatpush3.bf16.msra.mxu1 %v5374_v6  ;;  %v5975_v6 = vpack.c.bf16 %v1239_v13, %v1238_v23  ;;  %v1250_v13 = vld [vmem:[#allocation2 + $0x1a9] sm:$0xff] }
  0x57   : > { %5086 = vmatpush3.bf16.msra.mxu0 %v5375_v10  ;;  %5039 = vmatprep.subr.bf16.mxu1 %v5376_v4  ;;  %v5977_v10 = vpack.c.bf16 %v1241_v31, %v1240_v29  ;;  %v1251_v29 = vld [vmem:[#allocation2 + $0x1b1] sm:$0xff] }
  0x58   : > { %5087 = vmatprep.subr.bf16.mxu0 %v5377_v5  ;;  %v6018_v31 = vpack.c.bf16 %v1251_v29, %v1250_v13  ;;  %v5402_v13 = vld [vmem:[%s6689_s3 + $0x1f8] sm:$0xff]  }
  0x59   : > { %v5403_v29 = vld [vmem:[%s6689_s3 + $0x238] sm:$0xff]  }
  0x5a   : > { %5040 = vmatpush3.bf16.msra.mxu1 %v5376_v4  ;;  %v1243_v4 = vld [vmem:[#allocation2 + $0x131] sm:$0xff] }
  0x5b   : > { %5088 = vmatpush3.bf16.msra.mxu0 %v5377_v5  ;;  %5041 = vmatprep.subr.bf16.mxu1 %v5378_v51  ;;  %v1244_v5 = vld [vmem:[#allocation2 + $0x149] sm:$0xff] }
  0x5c   : > { %5089 = vmatprep.subr.bf16.mxu0 %v5379_v60  ;;  %5010 = vmatmul.mubr.bf16.gmra.mxu0 %v5943_v47  ;;  %v6002_v0 = vpack.c.bf16 %v1245_v45, %v1244_v5 }
  0x5d   : > { %4962 = vmatmul.mubr.bf16.gmra.mxu1 %v5941_v36  ;;  %5013 = vmatprep.mubr.bf16.mxu0 %v5951_v44 }
  0x5e   : > { %4965 = vmatprep.mubr.bf16.mxu1 %v5949_v39  ;;  %5042 = vmatpush3.bf16.msra.mxu1 %v5378_v51  ;;  %v514_v51 = vmax.f32 %v482_v49, 0.0  ;;  %v5400_v49 = vld [vmem:[%s6689_s3 + $0x140] sm:$0xff]  }
  0x5f   : > { %5090 = vmatpush3.bf16.msra.mxu0 %v5379_v60  ;;  %5043 = vmatprep.subr.bf16.mxu1 %v5380_v26  ;;  %v515_v60 = vmax.f32 %v483_v15, 0.0  ;;  %v5401_v15 = vld [vmem:[%s6689_s3 + $0x180] sm:$0xff]  }
  0x60   : > { %5091 = vmatprep.subr.bf16.mxu0 %v5381_v30  ;;  %547 = vst [vmem:[#allocation2 + $0x208] sm:$0xff] %v514_v51 }
  0x61   : > { %548 = vst [vmem:[#allocation2 + $0x210] sm:$0xff] %v515_v60  ;;  %v6004_v16 = vpack.c.bf16 %v515_v60, %v514_v51  ;;  %v1982_v51 = vld [vmem:[#allocation2 + $0x148] sm:$0xff]  ;;  %v1983_v60 = vld [vmem:[#allocation2 + $0x150] sm:$0xff] }
  0x62   : > { %5044 = vmatpush3.bf16.msra.mxu1 %v5380_v26  ;;  %v1249_v26 = vld [vmem:[#allocation2 + $0x191] sm:$0xff] }
  0x63   : > { %5092 = vmatpush3.bf16.msra.mxu0 %v5381_v30  ;;  %5045 = vmatprep.subr.bf16.mxu1 %v5382_v1  ;;  %v6010_v30 = vpack.c.bf16 %v1247_v48, %v1246_v56  ;;  %v6012_v23 = vpack.c.bf16 %v1249_v26, %v1248_v24  ;;  %v1614_v56 = vld [vmem:[#allocation2 + $0x167] sm:$0xff]  ;;  %v1615_v48 = vld [vmem:[#allocation2 + $0x16f] sm:$0xff] }
  0x64   : > { %5093 = vmatprep.subr.bf16.mxu0 %v5383_v50  ;;  %5014 = vmatmul.mubr.bf16.gmra.mxu0 %v5975_v6  ;;  %v1984_v24 = vld [vmem:[#allocation2 + $0x168] sm:$0xff]  ;;  %v1985_v26 = vld [vmem:[#allocation2 + $0x170] sm:$0xff] }
  0x65   : > { %4966 = vmatmul.mubr.bf16.gmra.mxu1 %v5973_v55  ;;  %5017 = vmatprep.mubr.bf16.mxu0 %v5977_v10 }
  0x66   : > { %4969 = vmatprep.mubr.bf16.mxu1 %v5805_v42  ;;  %5046 = vmatpush3.bf16.msra.mxu1 %v5382_v1  ;;  %v6000_v42 = vpack.c.bf16 %v1243_v4, %v1242_v54  ;;  %v1610_v54 = vld [vmem:[#allocation2 + $0x127] sm:$0xff]  ;;  %v1981_v4 = vld [vmem:[#allocation2 + $0x130] sm:$0xff] }
  0x67   : > { %5094 = vmatpush3.bf16.msra.mxu0 %v5383_v50  ;;  %5047 = vmatprep.subr.bf16.mxu1 %v5384_v52  ;;  %v1255_v50 = vld [vmem:[#allocation2 + $0x1f1] sm:$0xff]  ;;  %v6084_v5 = vpack.c.bf16 %v1611_v21, %v1610_v54  ;;  %v6086_v45 = vpack.c.bf16 %v1981_v4, %v1980_v59 }
  0x68   : > { %5095 = vmatprep.subr.bf16.mxu0 %v5385_v14  ;;  %v2716_v54 = vld [vmem:[#allocation2 + $0xef] sm:$0xff]  ;;  %v5410_v21 = vld [vmem:[%s6689_s3 + $0x1d8] sm:$0xff]  }
  0x69   : > { %v5411_v59 = vld [vmem:[%s6689_s3 + $0x218] sm:$0xff]  }
  0x6a   : > { %5048 = vmatpush3.bf16.msra.mxu1 %v5384_v52  ;;  %v1978_v52 = vld [vmem:[#allocation2 + $0x108] sm:$0xff] }
  0x6b   : > { %5096 = vmatpush3.bf16.msra.mxu0 %v5385_v14  ;;  %5129 = vmatprep.subr.bf16.mxu1 %v5386_v41  ;;  %v1979_v14 = vld [vmem:[#allocation2 + $0x110] sm:$0xff] }
  0x6c   : > { %5177 = vmatprep.subr.bf16.mxu0 %v5387_v8  ;;  %5018 = vmatmul.mubr.bf16.gmra.mxu0 %v6000_v42 }
  0x6d   : > { %4970 = vmatmul.mubr.bf16.gmra.mxu1 %v5811_v46  ;;  %5021 = vmatprep.mubr.bf16.mxu0 %v6002_v0  ;;  %v1252_v46 = vld [vmem:[#allocation2 + $0x1c9] sm:$0xff] }
  0x6e   : > { %4973 = vmatprep.mubr.bf16.mxu1 %v5817_v58  ;;  %v1253_v58 = vld [vmem:[#allocation2 + $0x1d1] sm:$0xff] }
  0x6f   : > { %v6020_v1 = vpack.c.bf16 %v1253_v58, %v1252_v46  ;;  %v6106_v58 = vpack.c.bf16 %v1983_v60, %v1982_v51  ;;  %v2729_v60 = vld [vmem:[#allocation2 + $0x1c7] sm:$0xff] }
  0x74   : > { %5022 = vmatmul.mubr.bf16.gmra.mxu0 %v6010_v30 }
  0x75   : > { %4974 = vmatmul.mubr.bf16.gmra.mxu1 %v5825_v27  ;;  %5025 = vmatprep.mubr.bf16.mxu0 %v6012_v23  ;;  %v1254_v27 = vld [vmem:[#allocation2 + $0x1e9] sm:$0xff] }
  0x76   : > { %4977 = vmatprep.mubr.bf16.mxu1 %v5831_v28  ;;  %v6026_v11 = vpack.c.bf16 %v1255_v50, %v1254_v27  ;;  %v6108_v27 = vpack.c.bf16 %v1615_v48, %v1614_v56  ;;  %v6110_v50 = vpack.c.bf16 %v1985_v26, %v1984_v24  ;;  %v2730_v56 = vld [vmem:[#allocation2 + $0x1cf] sm:$0xff] }
  0x7c   : > { %5026 = vmatmul.mubr.bf16.gmra.mxu0 %v6018_v31 }
  0x7d   : > { %4978 = vmatmul.mubr.bf16.gmra.mxu1 %v5837_v33  ;;  %5029 = vmatprep.mubr.bf16.mxu0 %v6020_v1 }
  0x7e   : > { %4981 = vmatprep.mubr.bf16.mxu1 %v5844_v38 }
  0x84   : > { %5030 = vmatmul.mubr.bf16.gmra.mxu0 %v6026_v11 }
  0x85   : > { %4982 = vmatmul.mubr.bf16.gmra.mxu1 %v5846_v43  ;;  %5097 = vmatprep.mubr.bf16.mxu0 %v5877_v20  ;;  %v5391_v20 = vld [vmem:[%s6689_s3 + $0x1a8] sm:$0xff]  }
  0x86   : > { %5049 = vmatprep.mubr.bf16.mxu1 %v5627_v40  ;;  %v5390_v40 = vld [vmem:[%s6689_s3 + $0x168] sm:$0xff]  }
  0x8c   : > { %5098 = vmatmul.mubr.bf16.vlgmr.msra.gmra.mxu0 %v5885_v32  ;;  %v5394_v32 = vld [vmem:[%s6689_s3 + $0x158] sm:$0xff]  }
  0x8d   : > { %5050 = vmatmul.mubr.bf16.vlgmr.msra.gmra.mxu1 %v5682_v25  ;;  %5178 = vmatpush3.bf16.msra.mxu0 %v5387_v8  ;;  %v5392_v25 = vld [vmem:[%s6689_s3 + $0x160] sm:$0xff]   ;;  %v1613_v8 = vld [vmem:[#allocation2 + $0x14f] sm:$0xff] }
  0x8e   : > { %5130 = vmatpush3.bf16.msra.mxu1 %v5386_v41  ;;  %5053 = vmatprep.mubr.bf16.mxu1 %v5710_v19  ;;  %v5393_v19 = vld [vmem:[%s6689_s3 + $0x1a0] sm:$0xff]  }
  0x8f   : > { %5101 = vmatprep.mubr.bf16.mxu0 %v5909_v34  ;;  %5131 = vmatprep.subr.bf16.mxu1 %v5388_v12  ;;  %v5395_v34 = vld [vmem:[%s6689_s3 + $0x198] sm:$0xff]   ;;  %v1612_v41 = vld [vmem:[#allocation2 + $0x147] sm:$0xff] }
  0x90   : > { %5179 = vmatprep.subr.bf16.mxu0 %v5389_v17  ;;  %v6104_v46 = vpack.c.bf16 %v1613_v8, %v1612_v41 }
  0x91   : > { %5180 = vmatpush3.bf16.msra.mxu0 %v5389_v17  ;;  %v1625_v17 = vld [vmem:[#allocation2 + $0x20f] sm:$0xff] }
  0x92   : > { %5132 = vmatpush3.bf16.msra.mxu1 %v5388_v12  ;;  %5181 = vmatprep.subr.bf16.mxu0 %v5391_v20  ;;  %v1624_v12 = vld [vmem:[#allocation2 + $0x207] sm:$0xff] }
  0x93   : > { %5133 = vmatprep.subr.bf16.mxu1 %v5390_v40 }
  0x94   : > { %5102 = vmatmul.mubr.bf16.gmra.mxu0 %v5917_v53  ;;  %v1608_v53 = vld [vmem:[#allocation2 + $0x107] sm:$0xff] }
  0x95   : > { %5054 = vmatmul.mubr.bf16.gmra.mxu1 %v5757_v62  ;;  %5105 = vmatprep.mubr.bf16.mxu0 %v5941_v36  ;;  %v5396_v62 = vld [vmem:[%s6689_s3 + $0x150] sm:$0xff]  }
  0x96   : > { %5057 = vmatprep.mubr.bf16.mxu1 %v5791_v3  ;;  %5134 = vmatpush3.bf16.msra.mxu1 %v5390_v40  ;;  %v5397_v3 = vld [vmem:[%s6689_s3 + $0x190] sm:$0xff]   ;;  %v2705_v40 = vld [vmem:[#allocation2 + $0x47] sm:$0xff] }
  0x97   : > { %5182 = vmatpush3.bf16.msra.mxu0 %v5391_v20  ;;  %5135 = vmatprep.subr.bf16.mxu1 %v5392_v25  ;;  %v1609_v36 = vld [vmem:[#allocation2 + $0x10f] sm:$0xff] }
  0x98   : > { %5183 = vmatprep.subr.bf16.mxu0 %v5393_v19  ;;  %v2706_v20 = vld [vmem:[#allocation2 + $0x4f] sm:$0xff] }
  0x9a   : > { %5136 = vmatpush3.bf16.msra.mxu1 %v5392_v25  ;;  %v6124_v25 = vpack.c.bf16 %v1625_v17, %v1624_v12  ;;  %v2732_v12 = vld [vmem:[#allocation2 + $0x1ef] sm:$0xff] }
  0x9b   : > { %5184 = vmatpush3.bf16.msra.mxu0 %v5393_v19  ;;  %5137 = vmatprep.subr.bf16.mxu1 %v5394_v32  ;;  %v5405_v19 = vld [vmem:[%s6689_s3 + $0x230] sm:$0xff]  }
  0x9c   : > { %5185 = vmatprep.subr.bf16.mxu0 %v5395_v34  ;;  %5106 = vmatmul.mubr.bf16.gmra.mxu0 %v5949_v39  ;;  %v6080_v39 = vpack.c.bf16 %v1609_v36, %v1608_v53  ;;  %v5407_v53 = vld [vmem:[%s6689_s3 + $0x228] sm:$0xff]  }
  0x9d   : > { %5058 = vmatmul.mubr.bf16.gmra.mxu1 %v5819_v61  ;;  %5109 = vmatprep.mubr.bf16.mxu0 %v5973_v55  ;;  %v5398_v61 = vld [vmem:[%s6689_s3 + $0x148] sm:$0xff]   ;;  %v6082_v55 = vpack.c.bf16 %v1979_v14, %v1978_v52  ;;  %v5409_v52 = vld [vmem:[%s6689_s3 + $0x220] sm:$0xff]  }
  0x9e   : > { %5061 = vmatprep.mubr.bf16.mxu1 %v5855_v22  ;;  %5138 = vmatpush3.bf16.msra.mxu1 %v5394_v32  ;;  %v5399_v22 = vld [vmem:[%s6689_s3 + $0x188] sm:$0xff]  }
  0x9f   : > { %5186 = vmatpush3.bf16.msra.mxu0 %v5395_v34  ;;  %5139 = vmatprep.subr.bf16.mxu1 %v5396_v62  ;;  %v2712_v32 = vld [vmem:[#allocation2 + $0xaf] sm:$0xff]  ;;  %v2713_v34 = vld [vmem:[#allocation2 + $0xc7] sm:$0xff] }
  0xa0   : > { %5187 = vmatprep.subr.bf16.mxu0 %v5397_v3  ;;  %v2715_v14 = vld [vmem:[#allocation2 + $0xe7] sm:$0xff] }
  0xa1   : > { %v2742_v4 = vpack.c.bf16 %v2716_v54, %v2715_v14 }
  0xa2   : > { %5140 = vmatpush3.bf16.msra.mxu1 %v5396_v62  ;;  %v2714_v62 = vld [vmem:[#allocation2 + $0xcf] sm:$0xff] }
  0xa3   : > { %5188 = vmatpush3.bf16.msra.mxu0 %v5397_v3  ;;  %5141 = vmatprep.subr.bf16.mxu1 %v5398_v61  ;;  %v5406_v3 = vld [vmem:[%s6689_s3 + $0x1e8] sm:$0xff]   ;;  %v2741_v36 = vpack.c.bf16 %v2714_v62, %v2713_v34  ;;  %v3076_v34 = vld [vmem:[#allocation2 + $0x50] sm:$0xff] }
  0xa4   : > { %5189 = vmatprep.subr.bf16.mxu0 %v5399_v22  ;;  %5110 = vmatmul.mubr.bf16.gmra.mxu0 %v6082_v55  ;;  %v3445_v62 = vld [vmem:[#allocation2 + $0x49] sm:$0xff] }
  0xa5   : > { %5062 = vmatmul.mubr.bf16.gmra.mxu1 %v6080_v39  ;;  %5113 = vmatprep.mubr.bf16.mxu0 %v6086_v45 }
  0xa6   : > { %5065 = vmatprep.mubr.bf16.mxu1 %v6084_v5  ;;  %5142 = vmatpush3.bf16.msra.mxu1 %v5398_v61  ;;  %v5414_v61 = vld [vmem:[%s6689_s3 + $0x1c8] sm:$0xff]  }
  0xa7   : > { %5190 = vmatpush3.bf16.msra.mxu0 %v5399_v22  ;;  %5143 = vmatprep.subr.bf16.mxu1 %v5400_v49  ;;  %v5415_v22 = vld [vmem:[%s6689_s3 + $0x208] sm:$0xff]  }
  0xa8   : > { %5191 = vmatprep.subr.bf16.mxu0 %v5401_v15 }
  0xaa   : > { %5144 = vmatpush3.bf16.msra.mxu1 %v5400_v49  ;;  %v2726_v49 = vld [vmem:[#allocation2 + $0x18f] sm:$0xff] }
  0xab   : > { %5192 = vmatpush3.bf16.msra.mxu0 %v5401_v15  ;;  %5225 = vmatprep.subr.bf16.mxu1 %v5402_v13 }
  0xac   : > { %5273 = vmatprep.subr.bf16.mxu0 %v5403_v29  ;;  %5114 = vmatmul.mubr.bf16.gmra.mxu0 %v6106_v58 }
  0xad   : > { %5066 = vmatmul.mubr.bf16.gmra.mxu1 %v6104_v46  ;;  %5117 = vmatprep.mubr.bf16.mxu0 %v6110_v50 }
  0xae   : > { %5069 = vmatprep.mubr.bf16.mxu1 %v6108_v27 }
  0xb4   : > { %5118 = vmatmul.mubr.bf16.gmra.mxu0 %v5831_v28  ;;  %v2708_v28 = vld [vmem:[#allocation2 + $0x6f] sm:$0xff] }
  0xb5   : > { %5070 = vmatmul.mubr.bf16.gmra.mxu1 %v5777_v35  ;;  %5121 = vmatprep.mubr.bf16.mxu0 %v5837_v33  ;;  %v2737_v35 = vpack.c.bf16 %v2706_v20, %v2705_v40  ;;  %v2709_v33 = vld [vmem:[#allocation2 + $0x87] sm:$0xff] }
  0xb6   : > { %5073 = vmatprep.mubr.bf16.mxu1 %v5793_v7  ;;  %v2707_v7 = vld [vmem:[#allocation2 + $0x67] sm:$0xff] }
  0xbc   : > { %5122 = vmatmul.mubr.bf16.gmra.mxu0 %v5844_v38  ;;  %v2710_v38 = vld [vmem:[#allocation2 + $0x8f] sm:$0xff] }
  0xbd   : > { %5074 = vmatmul.mubr.bf16.gmra.mxu1 %v5848_v2  ;;  %5125 = vmatprep.mubr.bf16.mxu0 %v5846_v43  ;;  %v2738_v2 = vpack.c.bf16 %v2708_v28, %v2707_v7  ;;  %v2739_v43 = vpack.c.bf16 %v2710_v38, %v2709_v33 }
  0xbe   : > { %5077 = vmatprep.mubr.bf16.mxu1 %v5857_v63  ;;  %v5404_v63 = vld [vmem:[%s6689_s3 + $0x1f0] sm:$0xff]  }
  0xc4   : > { %5126 = vmatmul.mubr.bf16.gmra.mxu0 %v6004_v16 }
  0xc5   : > { %5078 = vmatmul.mubr.bf16.gmra.mxu1 %v6124_v25  ;;  %5193 = vmatprep.mubr.bf16.mxu0 %v2737_v35 }
  0xc6   : > { %5145 = vmatprep.mubr.bf16.mxu1 %v5879_v18  ;;  %v2711_v18 = vld [vmem:[#allocation2 + $0xa7] sm:$0xff] }
  0xcc   : > { %5194 = vmatmul.mubr.bf16.vlgmr.msra.gmra.mxu0 %v2738_v2  ;;  %v2365_v2 = vld [vmem:[#allocation2 + $0x211] sm:$0xff] }
  0xcd   : > { %5146 = vmatmul.mubr.bf16.vlgmr.msra.gmra.mxu1 %v5887_v37  ;;  %5274 = vmatpush3.bf16.msra.mxu0 %v5403_v29  ;;  %v2740_v37 = vpack.c.bf16 %v2712_v32, %v2711_v18 }
  0xce   : > { %5226 = vmatpush3.bf16.msra.mxu1 %v5402_v13  ;;  %5149 = vmatprep.mubr.bf16.mxu1 %v5911_v9  ;;  %v5408_v9 = vld [vmem:[%s6689_s3 + $0x1e0] sm:$0xff]   ;;  %v2749_v13 = vpack.c.bf16 %v2730_v56, %v2729_v60 }
  0xcf   : > { %5197 = vmatprep.mubr.bf16.mxu0 %v2739_v43  ;;  %5227 = vmatprep.subr.bf16.mxu1 %v5404_v63  ;;  %v2735_v43 = vld [vmem:[#allocation2 + $0x227] sm:$0xff] }
  0xd0   : > { %5275 = vmatprep.subr.bf16.mxu0 %v5405_v19 }
  0xd1   : > { %5276 = vmatpush3.bf16.msra.mxu0 %v5405_v19  ;;  %v3075_v19 = vld [vmem:[#allocation2 + $0x48] sm:$0xff] }
  0xd2   : > { %5228 = vmatpush3.bf16.msra.mxu1 %v5404_v63  ;;  %5277 = vmatprep.subr.bf16.mxu0 %v5407_v53  ;;  %v2736_v63 = vld [vmem:[#allocation2 + $0x22f] sm:$0xff] }
  0xd3   : > { %5229 = vmatprep.subr.bf16.mxu1 %v5406_v3 }
  0xd4   : > { %5198 = vmatmul.mubr.bf16.gmra.mxu0 %v2740_v37 }
  0xd5   : > { %5150 = vmatmul.mubr.bf16.gmra.mxu1 %v5919_v57  ;;  %5201 = vmatprep.mubr.bf16.mxu0 %v2741_v36  ;;  %v5412_v57 = vld [vmem:[%s6689_s3 + $0x1d0] sm:$0xff]   ;;  %v2752_v36 = vpack.c.bf16 %v2736_v63, %v2735_v43 }
  0xd6   : > { %5153 = vmatprep.mubr.bf16.mxu1 %v5943_v47  ;;  %5230 = vmatpush3.bf16.msra.mxu1 %v5406_v3  ;;  %v5413_v47 = vld [vmem:[%s6689_s3 + $0x210] sm:$0xff]  }
  0xd7   : > { %5278 = vmatpush3.bf16.msra.mxu0 %v5407_v53  ;;  %5231 = vmatprep.subr.bf16.mxu1 %v5408_v9  ;;  %v3446_v3 = vld [vmem:[#allocation2 + $0x51] sm:$0xff]  ;;  %v3451_v43 = vld [vmem:[#allocation2 + $0xa9] sm:$0xff] }
  0xd8   : > { %5279 = vmatprep.subr.bf16.mxu0 %v5409_v52  ;;  %v3452_v63 = vld [vmem:[#allocation2 + $0xb1] sm:$0xff] }
  0xda   : > { %5232 = vmatpush3.bf16.msra.mxu1 %v5408_v9  ;;  %v3477_v9 = vpack.c.bf16 %v3446_v3, %v3445_v62  ;;  %v3084_v3 = vld [vmem:[#allocation2 + $0xd0] sm:$0xff] }
  0xdb   : > { %5280 = vmatpush3.bf16.msra.mxu0 %v5409_v52  ;;  %5233 = vmatprep.subr.bf16.mxu1 %v5410_v21 }
  0xdc   : > { %5281 = vmatprep.subr.bf16.mxu0 %v5411_v59  ;;  %5202 = vmatmul.mubr.bf16.gmra.mxu0 %v2742_v4  ;;  %v3447_v4 = vld [vmem:[#allocation2 + $0x69] sm:$0xff] }
  0xdd   : > { %5154 = vmatmul.mubr.bf16.gmra.mxu1 %v5951_v44  ;;  %5205 = vmatprep.mubr.bf16.mxu0 %v6080_v39  ;;  %v5416_v44 = vld [vmem:[%s6689_s3 + $0x1c0] sm:$0xff]  }
  0xde   : > { %5157 = vmatprep.mubr.bf16.mxu1 %v5975_v6  ;;  %5234 = vmatpush3.bf16.msra.mxu1 %v5410_v21  ;;  %v5417_v6 = vld [vmem:[%s6689_s3 + $0x200] sm:$0xff]   ;;  %v3077_v21 = vld [vmem:[#allocation2 + $0x68] sm:$0xff] }
  0xdf   : > { %5282 = vmatpush3.bf16.msra.mxu0 %v5411_v59  ;;  %5235 = vmatprep.subr.bf16.mxu1 %v5412_v57  ;;  %v2725_v39 = vld [vmem:[#allocation2 + $0x187] sm:$0xff]  ;;  %v3078_v59 = vld [vmem:[#allocation2 + $0x70] sm:$0xff] }
  0xe0   : > { %5283 = vmatprep.subr.bf16.mxu0 %v5413_v47  ;;  %v2747_v15 = vpack.c.bf16 %v2726_v49, %v2725_v39  ;;  %v3450_v39 = vld [vmem:[#allocation2 + $0x91] sm:$0xff] }
  0xe2   : > { %5236 = vmatpush3.bf16.msra.mxu1 %v5412_v57  ;;  %v3448_v57 = vld [vmem:[#allocation2 + $0x71] sm:$0xff] }
  0xe3   : > { %5284 = vmatpush3.bf16.msra.mxu0 %v5413_v47  ;;  %5237 = vmatprep.subr.bf16.mxu1 %v5414_v61  ;;  %v3079_v47 = vld [vmem:[#allocation2 + $0x88] sm:$0xff] }
  0xe4   : > { %5285 = vmatprep.subr.bf16.mxu0 %v5415_v22  ;;  %5206 = vmatmul.mubr.bf16.gmra.mxu0 %v6084_v5 }
  0xe5   : > { %5158 = vmatmul.mubr.bf16.gmra.mxu1 %v5977_v10  ;;  %5209 = vmatprep.mubr.bf16.mxu0 %v6104_v46  ;;  %v2727_v10 = vld [vmem:[#allocation2 + $0x1a7] sm:$0xff] }
  0xe6   : > { %5161 = vmatprep.mubr.bf16.mxu1 %v6000_v42  ;;  %5238 = vmatpush3.bf16.msra.mxu1 %v5414_v61  ;;  %v2728_v42 = vld [vmem:[#allocation2 + $0x1af] sm:$0xff] }
  0xe7   : > { %5286 = vmatpush3.bf16.msra.mxu0 %v5415_v22  ;;  %5239 = vmatprep.subr.bf16.mxu1 %v5416_v44  ;;  %v2748_v26 = vpack.c.bf16 %v2728_v42, %v2727_v10  ;;  %v3108_v10 = vpack.c.bf16 %v3078_v59, %v3077_v21  ;;  %v3478_v42 = vpack.c.bf16 %v3448_v57, %v3447_v4 }
  0xe8   : > { %5287 = vmatprep.subr.bf16.mxu0 %v5417_v6 }
  0xea   : > { %5240 = vmatpush3.bf16.msra.mxu1 %v5416_v44  ;;  %v3080_v44 = vld [vmem:[#allocation2 + $0x90] sm:$0xff] }
  0xeb   : > { %5288 = vmatpush3.bf16.msra.mxu0 %v5417_v6  ;;  %v3449_v6 = vld [vmem:[#allocation2 + $0x89] sm:$0xff]  ;;  %v3109_v60 = vpack.c.bf16 %v3080_v44, %v3079_v47  ;;  %v3480_v47 = vpack.c.bf16 %v3452_v63, %v3451_v43  ;;  %v3456_v43 = vld [vmem:[#allocation2 + $0xf1] sm:$0xff] }
  0xec   : > { %v6182_v41 = vpop.f32.mrf.mxu0  ;;  %v6184_v8 = vpop.f32.mrf.mxu1  ;;  %5210 = vmatmul.mubr.bf16.gmra.mxu0 %v6108_v27  ;;  %v2731_v27 = vld [vmem:[#allocation2 + $0x1e7] sm:$0xff]  ;;  %v3479_v56 = vpack.c.bf16 %v3450_v39, %v3449_v6 }
  0xed   : > { %5162 = vmatmul.mubr.bf16.gmra.mxu1 %v6002_v0  ;;  %5213 = vmatprep.mubr.bf16.mxu0 %v2747_v15  ;;  %v2750_v7 = vpack.c.bf16 %v2732_v12, %v2731_v27 }
  0xee   : > { %5165 = vmatprep.mubr.bf16.mxu1 %v6010_v30  ;;  %v6189_v5 = vpop.f32.mrf.mxu0  ;;  %v6191_v51 = vpop.f32.mrf.mxu1 }
  0xf0   : > { %v6193_v48 = vpop.f32.mrf.mxu0  ;;  %v6195_v24 = vpop.f32.mrf.mxu1 }
  0xf2   : > { %v6197_v0 = vpop.f32.mrf.mxu0  ;;  %v6199_v29 = vpop.f32.mrf.mxu1 }
  0xf4   : > { %v6201_v30 = vpop.f32.mrf.mxu0  ;;  %5214 = vmatmul.mubr.bf16.gmra.mxu0 %v2748_v26 }
  0xf5   : > { %v6203_v46 = vpop.f32.mrf.mxu1  ;;  %5166 = vmatmul.mubr.bf16.gmra.mxu1 %v6012_v23  ;;  %5217 = vmatprep.mubr.bf16.mxu0 %v2749_v13 }
  0xf6   : > { %5169 = vmatprep.mubr.bf16.mxu1 %v6018_v31  ;;  %v6207_v17 = vpop.f32.mrf.mxu0  ;;  %v2364_v31 = vld [vmem:[#allocation2 + $0x209] sm:$0xff] }
  0xf7   : > { %v6209_v40 = vpop.f32.mrf.mxu1  ;;  %v6234_v37 = vpack.c.bf16 %v2365_v2, %v2364_v31  ;;  %v3082_v31 = vld [vmem:[#allocation2 + $0xb0] sm:$0xff] }
  0xf8   : > { %v6211_v20 = vpop.f32.mrf.mxu0 }
  0xf9   : > { %v6213_v35 = vpop.f32.mrf.mxu1 }
  0xfa   : > { %v6215_v28 = vpop.f32.mrf.mxu0 }
  0xfb   : > { %v6217_v33 = vpop.f32.mrf.mxu1 }
  0xfc   : > { %v6219_v23 = vpop.f32.mrf.mxu0  ;;  %5218 = vmatmul.mubr.bf16.gmra.mxu0 %v2750_v7  ;;  %v3081_v7 = vld [vmem:[#allocation2 + $0xa8] sm:$0xff] }
  0xfd   : > { %v6221_v38 = vpop.f32.mrf.mxu1  ;;  %5170 = vmatmul.mubr.bf16.gmra.mxu1 %v6020_v1  ;;  %5221 = vmatprep.mubr.bf16.mxu0 %v6124_v25  ;;  %v3110_v57 = vpack.c.bf16 %v3082_v31, %v3081_v7  ;;  %v3455_v31 = vld [vmem:[#allocation2 + $0xe9] sm:$0xff] }
  0xfe   : > { %5173 = vmatprep.mubr.bf16.mxu1 %v6026_v11  ;;  %v6226_v18 = vpop.f32.mrf.mxu0  ;;  %v3107_v11 = vpack.c.bf16 %v3076_v34, %v3075_v19  ;;  %v3083_v19 = vld [vmem:[#allocation2 + $0xc8] sm:$0xff] }
  0xff   : > { %v6228_v32 = vpop.f32.mrf.mxu1  ;;  %v3111_v6 = vpack.c.bf16 %v3084_v3, %v3083_v19 }
 0x100   : > { %v6230_v53 = vpop.f32.mrf.mxu0 }
 0x101   : > { %v6232_v1 = vpop.f32.mrf.mxu1 }
 0x102   : > { %v6236_v25 = vpop.f32.mrf.mxu0 }
 0x103   : > { %v6238_v52 = vpop.f32.mrf.mxu1 }
 0x104   : > { %v6240_v14 = vpop.f32.mrf.mxu0  ;;  %5222 = vmatmul.mubr.bf16.gmra.mxu0 %v2752_v36  ;;  %v3453_v36 = vld [vmem:[#allocation2 + $0xc9] sm:$0xff] }
 0x105   : > { %v6242_v54 = vpop.f32.mrf.mxu1  ;;  %5174 = vmatmul.mubr.bf16.gmra.mxu1 %v6234_v37  ;;  %5289 = vmatprep.mubr.bf16.mxu0 %v3477_v9 }
 0x106   : > { %5241 = vmatprep.mubr.bf16.mxu1 %v3107_v11  ;;  %v6245_v61 = vpop.f32.mrf.mxu0  ;;  %v3454_v11 = vld [vmem:[#allocation2 + $0xd1] sm:$0xff] }
 0x107   : > { %v6247_v22 = vpop.f32.mrf.mxu1  ;;  %v3481_v39 = vpack.c.bf16 %v3454_v11, %v3453_v36 }
 0x108   : > { %v6249_v49 = vpop.f32.mrf.mxu0 }
 0x109   : > { %v6251_v15 = vpop.f32.mrf.mxu1 }
 0x10a   : > { %v6253_v26 = vpop.f32.mrf.mxu0 }
 0x10b   : > { %v6255_v13 = vpop.f32.mrf.mxu1 }
 0x10c   : > { %v5003_v12 = vpop.f32.mrf.mxu0  ;;  %5290 = vmatmul.mubr.bf16.vlgmr.msra.gmra.mxu0 %v3478_v42 }
 0x10d   : > { %v4955_v27 = vpop.f32.mrf.mxu1  ;;  %5242 = vmatmul.mubr.bf16.vlgmr.msra.gmra.mxu1 %v3108_v10  ;;  %5293 = vmatprep.mubr.bf16.mxu0 %v3479_v56 }
 0x10e   : > { %v1162_v2 = vadd.f32 %v4955_v27, %v6182_v41  ;;  %5245 = vmatprep.mubr.bf16.mxu1 %v3109_v60  ;;  %v1371_v62 = vpop.f32.mrf.mxu0 }
 0x10f   : > { %v1001_v34 = vpop.f32.mrf.mxu1 }
 0x110   : > { %v6258_v9 = vadd.f32 %v5003_v12, %v1162_v2  ;;  %v1160_v21 = vadd.f32 %v1001_v34, %v6189_v5  ;;  %v5004_v4 = vpop.f32.mrf.mxu0  ;;  %v3085_v5 = vld [vmem:[#allocation2 + $0xe8] sm:$0xff] }
 0x111   : > { %v4956_v59 = vpop.f32.mrf.mxu1  ;;  %v3457_v34 = vld [vmem:[#allocation2 + $0x109] sm:$0xff] }
 0x112   : > { %v6261_v44 = vadd.f32 %v1371_v62, %v1160_v21  ;;  %v1163_v41 = vadd.f32 %v4956_v59, %v6193_v48  ;;  %v1374_v42 = vpop.f32.mrf.mxu0  ;;  %v3086_v48 = vld [vmem:[#allocation2 + $0xf0] sm:$0xff]  ;;  %v3482_v59 = vpack.c.bf16 %v3456_v43, %v3455_v31 }
 0x113   : > { %v1004_v10 = vpop.f32.mrf.mxu1  ;;  %v3458_v62 = vld [vmem:[#allocation2 + $0x111] sm:$0xff]  ;;  %v3112_v21 = vpack.c.bf16 %v3086_v48, %v3085_v5 }
 0x114   : > { %v6264_v60 = vadd.f32 %v5004_v4, %v1163_v41  ;;  %v1161_v56 = vadd.f32 %v1004_v10, %v6197_v0  ;;  %v5007_v12 = vpop.f32.mrf.mxu0  ;;  %5294 = vmatmul.mubr.bf16.gmra.mxu0 %v3480_v47  ;;  %v3462_v48 = vld [vmem:[#allocation2 + $0x151] sm:$0xff] }
 0x115   : > { %v4959_v27 = vpop.f32.mrf.mxu1  ;;  %5246 = vmatmul.mubr.bf16.gmra.mxu1 %v3110_v57  ;;  %5297 = vmatprep.mubr.bf16.mxu0 %v3481_v39  ;;  %v3483_v57 = vpack.c.bf16 %v3458_v62, %v3457_v34 }
 0x116   : > { %v6267_v2 = vadd.f32 %v1374_v42, %v1161_v56  ;;  %v1166_v7 = vadd.f32 %v4959_v27, %v6201_v30  ;;  %5249 = vmatprep.mubr.bf16.mxu1 %v3111_v6  ;;  %v1387_v19 = vpop.f32.mrf.mxu0  ;;  %v3459_v27 = vld [vmem:[#allocation2 + $0x129] sm:$0xff] }
 0x117   : > { %v1017_v63 = vpop.f32.mrf.mxu1 }
 0x118   : > { %v6270_v3 = vadd.f32 %v5007_v12, %v1166_v7  ;;  %v1164_v0 = vadd.f32 %v1017_v63, %v6207_v17  ;;  %v5008_v11 = vpop.f32.mrf.mxu0  ;;  %v3461_v7 = vld [vmem:[#allocation2 + $0x149] sm:$0xff] }
 0x119   : > { %v4960_v36 = vpop.f32.mrf.mxu1  ;;  %v3485_v62 = vpack.c.bf16 %v3462_v48, %v3461_v7 }
 0x11a   : > { %v6273_v4 = vadd.f32 %v1387_v19, %v1164_v0  ;;  %v1167_v30 = vadd.f32 %v4960_v36, %v6211_v20  ;;  %v1390_v41 = vpop.f32.mrf.mxu0  ;;  %v3460_v20 = vld [vmem:[#allocation2 + $0x131] sm:$0xff] }
 0x11b   : > { %v1020_v47 = vpop.f32.mrf.mxu1  ;;  %v3484_v19 = vpack.c.bf16 %v3460_v20, %v3459_v27 }
 0x11c   : > { %v6276_v6 = vadd.f32 %v5008_v11, %v1167_v30  ;;  %v1165_v39 = vadd.f32 %v1020_v47, %v6215_v28  ;;  %v5011_v42 = vpop.f32.mrf.mxu0  ;;  %5298 = vmatmul.mubr.bf16.gmra.mxu0 %v3482_v59  ;;  %v3095_v47 = vld [vmem:[#allocation2 + $0x188] sm:$0xff] }
 0x11d   : > { %v4963_v10 = vpop.f32.mrf.mxu1  ;;  %5250 = vmatmul.mubr.bf16.gmra.mxu1 %v3112_v21  ;;  %5301 = vmatprep.mubr.bf16.mxu0 %v3483_v57  ;;  %v3464_v57 = vld [vmem:[#allocation2 + $0x171] sm:$0xff] }
 0x11e   : > { %v6279_v17 = vadd.f32 %v1390_v41, %v1165_v39  ;;  %v1170_v56 = vadd.f32 %v4963_v10, %v6219_v23  ;;  %5253 = vmatprep.mubr.bf16.mxu1 %v6082_v55  ;;  %v1403_v5 = vpop.f32.mrf.mxu0  ;;  %v3096_v10 = vld [vmem:[#allocation2 + $0x190] sm:$0xff] }
 0x11f   : > { %v1033_v12 = vpop.f32.mrf.mxu1 }
 0x120   : > { %v6283_v31 = vadd.f32 %v5011_v42, %v1170_v56  ;;  %v1168_v28 = vadd.f32 %v1033_v12, %v6226_v18  ;;  %v5012_v63 = vpop.f32.mrf.mxu0  ;;  %v3465_v42 = vld [vmem:[#allocation2 + $0x189] sm:$0xff] }
 0x121   : > { %v4964_v43 = vpop.f32.mrf.mxu1 }
 0x122   : > { %v6286_v34 = vadd.f32 %v1403_v5, %v1168_v28  ;;  %v1171_v23 = vadd.f32 %v4964_v43, %v6230_v53  ;;  %v1406_v0 = vpop.f32.mrf.mxu0  ;;  %v3463_v53 = vld [vmem:[#allocation2 + $0x169] sm:$0xff] }
 0x123   : > { %v1036_v55 = vpop.f32.mrf.mxu1  ;;  %v3486_v12 = vpack.c.bf16 %v3464_v57, %v3463_v53  ;;  %v3100_v53 = vld [vmem:[#allocation2 + $0x1d0] sm:$0xff] }
 0x124   : > { %v6289_v36 = vadd.f32 %v5012_v63, %v1171_v23  ;;  %v1169_v11 = vadd.f32 %v1036_v55, %v6236_v25  ;;  %v5015_v59 = vpop.f32.mrf.mxu0  ;;  %5302 = vmatmul.mubr.bf16.gmra.mxu0 %v3484_v19  ;;  %v3466_v25 = vld [vmem:[#allocation2 + $0x191] sm:$0xff] }
 0x125   : > { %v4967_v21 = vpop.f32.mrf.mxu1  ;;  %5254 = vmatmul.mubr.bf16.gmra.mxu1 %v6086_v45  ;;  %5305 = vmatprep.mubr.bf16.mxu0 %v3485_v62  ;;  %v3487_v7 = vpack.c.bf16 %v3466_v25, %v3465_v42  ;;  %v3098_v62 = vld [vmem:[#allocation2 + $0x1b0] sm:$0xff] }
 0x126   : > { %v6293_v18 = vadd.f32 %v1406_v0, %v1169_v11  ;;  %v1174_v30 = vadd.f32 %v4967_v21, %v6240_v14  ;;  %5257 = vmatprep.mubr.bf16.mxu1 %v6106_v58  ;;  %v1419_v39 = vpop.f32.mrf.mxu0  ;;  %v3117_v14 = vpack.c.bf16 %v3096_v10, %v3095_v47  ;;  %v3468_v11 = vld [vmem:[#allocation2 + $0x1b1] sm:$0xff]  ;;  %v3099_v21 = vld [vmem:[#allocation2 + $0x1c8] sm:$0xff] }
 0x127   : > { %v1049_v41 = vpop.f32.mrf.mxu1  ;;  %v3470_v57 = vld [vmem:[#allocation2 + $0x1d1] sm:$0xff] }
 0x128   : > { %v6297_v56 = vadd.f32 %v5015_v59, %v1174_v30  ;;  %v1172_v45 = vadd.f32 %v1049_v41, %v6245_v61  ;;  %v5016_v20 = vpop.f32.mrf.mxu0  ;;  %v3097_v61 = vld [vmem:[#allocation2 + $0x1a8] sm:$0xff] }
 0x129   : > { %v4968_v27 = vpop.f32.mrf.mxu1  ;;  %v3118_v10 = vpack.c.bf16 %v3098_v62, %v3097_v61 }
 0x12a   : > { %v6300_v5 = vadd.f32 %v1419_v39, %v1172_v45  ;;  %v1175_v58 = vadd.f32 %v4968_v27, %v6249_v49  ;;  %v1422_v28 = vpop.f32.mrf.mxu0  ;;  %v3467_v49 = vld [vmem:[#allocation2 + $0x1a9] sm:$0xff]  ;;  %v3119_v45 = vpack.c.bf16 %v3100_v53, %v3099_v21 }
 0x12b   : > { %v1052_v48 = vpop.f32.mrf.mxu1  ;;  %v3488_v42 = vpack.c.bf16 %v3468_v11, %v3467_v49 }
 0x12c   : > { %v6303_v43 = vadd.f32 %v5016_v20, %v1175_v58  ;;  %v1173_v63 = vadd.f32 %v1052_v48, %v6253_v26  ;;  %v5019_v23 = vpop.f32.mrf.mxu0  ;;  %5306 = vmatmul.mubr.bf16.gmra.mxu0 %v3486_v12  ;;  %v3469_v26 = vld [vmem:[#allocation2 + $0x1c9] sm:$0xff] }
 0x12d   : > { %v4971_v19 = vpop.f32.mrf.mxu1  ;;  %5258 = vmatmul.mubr.bf16.gmra.mxu1 %v6110_v50  ;;  %5309 = vmatprep.mubr.bf16.mxu0 %v3487_v7  ;;  %v3489_v27 = vpack.c.bf16 %v3470_v57, %v3469_v26 }
 0x12e   : > { %v6307_v55 = vadd.f32 %v1422_v28, %v1173_v63  ;;  %v1178_v0 = vadd.f32 %v4971_v19, %v6184_v8  ;;  %5261 = vmatprep.mubr.bf16.mxu1 %v3117_v14  ;;  %v1435_v30 = vpop.f32.mrf.mxu0  ;;  %v3471_v19 = vld [vmem:[#allocation2 + $0x1e9] sm:$0xff] }
 0x12f   : > { %v1065_v59 = vpop.f32.mrf.mxu1 }
 0x130   : > { %v6310_v47 = vadd.f32 %v5019_v23, %v1178_v0  ;;  %v1176_v50 = vadd.f32 %v1065_v59, %v6191_v51  ;;  %v5020_v39 = vpop.f32.mrf.mxu0  ;;  %v3101_v51 = vld [vmem:[#allocation2 + $0x1e8] sm:$0xff]  ;;  %v3472_v23 = vld [vmem:[#allocation2 + $0x1f1] sm:$0xff] }
 0x131   : > { %v4972_v41 = vpop.f32.mrf.mxu1  ;;  %v3490_v59 = vpack.c.bf16 %v3472_v23, %v3471_v19 }
 0x132   : > { %v6313_v25 = vadd.f32 %v1435_v30, %v1176_v50  ;;  %v1179_v8 = vadd.f32 %v4972_v41, %v6195_v24  ;;  %v1438_v12 = vpop.f32.mrf.mxu0  ;;  %v3102_v24 = vld [vmem:[#allocation2 + $0x1f0] sm:$0xff] }
 0x133   : > { %v1068_v20 = vpop.f32.mrf.mxu1  ;;  %v3120_v21 = vpack.c.bf16 %v3102_v24, %v3101_v51 }
 0x134   : > { %v6316_v58 = vadd.f32 %v5020_v39, %v1179_v8  ;;  %v1177_v14 = vadd.f32 %v1068_v20, %v6199_v29  ;;  %v5023_v48 = vpop.f32.mrf.mxu0  ;;  %5310 = vmatmul.mubr.bf16.gmra.mxu0 %v3488_v42  ;;  %v3475_v42 = vld [vmem:[#allocation2 + $0x229] sm:$0xff] }
 0x135   : > { %v4975_v7 = vpop.f32.mrf.mxu1  ;;  %5262 = vmatmul.mubr.bf16.gmra.mxu1 %v3118_v10  ;;  %5313 = vmatprep.mubr.bf16.mxu0 %v3489_v27 }
 0x136   : > { %v6319_v28 = vadd.f32 %v1438_v12, %v1177_v14  ;;  %v1182_v63 = vadd.f32 %v4975_v7, %v6203_v46  ;;  %5265 = vmatprep.mubr.bf16.mxu1 %v3119_v45  ;;  %v1451_v62 = vpop.f32.mrf.mxu0  ;;  %v5418_v14 = vld [vmem:[#allocation2] sm:$0xff] }
 0x137   : > { %v1081_v61 = vpop.f32.mrf.mxu1  ;;  %v3122_v7 = vpack.c.bf16 %v5418_v14, %v5418_v14 }
 0x138   : > { %v6322_v0 = vadd.f32 %v5023_v48, %v1182_v63  ;;  %v1180_v29 = vadd.f32 %v1081_v61, %v6209_v40  ;;  %v5024_v11 = vpop.f32.mrf.mxu0 }
 0x139   : > { %v4976_v49 = vpop.f32.mrf.mxu1 }
 0x13a   : > { %v6325_v30 = vadd.f32 %v1451_v62, %v1180_v29  ;;  %v1183_v53 = vadd.f32 %v4976_v49, %v6213_v35  ;;  %v1454_v26 = vpop.f32.mrf.mxu0  ;;  %v3476_v35 = vld [vmem:[#allocation2 + $0x231] sm:$0xff] }
 0x13b   : > { %v1084_v46 = vpop.f32.mrf.mxu1  ;;  %v3492_v48 = vpack.c.bf16 %v3476_v35, %v3475_v42 }
 0x13c   : > { %v6328_v57 = vadd.f32 %v5024_v11, %v1183_v53  ;;  %v1181_v50 = vadd.f32 %v1084_v46, %v6217_v33  ;;  %v5027_v39 = vpop.f32.mrf.mxu0  ;;  %5314 = vmatmul.mubr.bf16.gmra.mxu0 %v3490_v59 }
 0x13d   : > { %v4979_v41 = vpop.f32.mrf.mxu1  ;;  %5266 = vmatmul.mubr.bf16.gmra.mxu1 %v3120_v21  ;;  %5317 = vmatprep.mubr.bf16.mxu0 %v6234_v37 }
 0x13e   : > { %v6331_v10 = vadd.f32 %v1454_v26, %v1181_v50  ;;  %v1186_v40 = vadd.f32 %v4979_v41, %v6221_v38  ;;  %5269 = vmatprep.mubr.bf16.mxu1 %v6004_v16  ;;  %v1467_v45 = vpop.f32.mrf.mxu0 }
 0x13f   : > { %v1097_v8 = vpop.f32.mrf.mxu1 }
 0x140   : > { %v6336_v27 = vadd.f32 %v5027_v39, %v1186_v40  ;;  %v1184_v33 = vadd.f32 %v1097_v8, %v6228_v32  ;;  %v5028_v12 = vpop.f32.mrf.mxu0 }
 0x141   : > { %v4980_v20 = vpop.f32.mrf.mxu1 }
 0x142   : > { %v6339_v51 = vadd.f32 %v1467_v45, %v1184_v33  ;;  %v1187_v38 = vadd.f32 %v4980_v20, %v6232_v1  ;;  %v1470_v63 = vpop.f32.mrf.mxu0 }
 0x143   : > { %v1100_v16 = vpop.f32.mrf.mxu1 }
 0x144   : > { %v6342_v37 = vadd.f32 %v5028_v12, %v1187_v38  ;;  %v1185_v24 = vadd.f32 %v1100_v16, %v6238_v52  ;;  %v5031_v23 = vpop.f32.mrf.mxu0  ;;  %5318 = vmatmul.mubr.bf16.gmra.mxu0 %v3492_v48 }
 0x145   : > { %v4983_v19 = vpop.f32.mrf.mxu1  ;;  %5270 = vmatmul.mubr.bf16.gmra.mxu1 %v3122_v7 }
 0x146   : > { %v6345_v32 = vadd.f32 %v1470_v63, %v1185_v24  ;;  %v1190_v61 = vadd.f32 %v4983_v19, %v6242_v54  ;;  %v1483_v29 = vpop.f32.mrf.mxu0 }
 0x147   : > { %v1113_v62 = vpop.f32.mrf.mxu1 }
 0x148   : > { %v6348_v49 = vadd.f32 %v5031_v23, %v1190_v61  ;;  %v1188_v1 = vadd.f32 %v1113_v62, %v6247_v22  ;;  %v5032_v21 = vpop.f32.mrf.mxu0 }
 0x149   : > { %v4984_v11 = vpop.f32.mrf.mxu1 }
 0x14a   : > { %v6351_v59 = vadd.f32 %v1483_v29, %v1188_v1  ;;  %v1191_v52 = vadd.f32 %v4984_v11, %v6251_v15  ;;  %v1486_v46 = vpop.f32.mrf.mxu0 }
 0x14b   : > { %v1116_v53 = vpop.f32.mrf.mxu1 }
 0x14c   : > { %v6354_v26 = vadd.f32 %v5032_v21, %v1191_v52  ;;  %v1189_v50 = vadd.f32 %v1116_v53, %v6255_v13  ;;  %v5099_v54 = vpop.f32.mrf.mxu0 }
 0x14d   : > { %v5051_v41 = vpop.f32.mrf.mxu1 }
 0x14e   : > { %v6357_v39 = vadd.f32 %v1486_v46, %v1189_v50  ;;  %v1902_v40 = vadd.f32 %v5051_v41, %v6258_v9  ;;  %v2111_v22 = vpop.f32.mrf.mxu0 }
 0x14f   : > { %v1741_v42 = vpop.f32.mrf.mxu1 }
 0x150   : > { %v6360_v35 = vadd.f32 %v5099_v54, %v1902_v40  ;;  %v1900_v8 = vadd.f32 %v1741_v42, %v6261_v44  ;;  %v5100_v15 = vpop.f32.mrf.mxu0 }
 0x151   : > { %v5052_v45 = vpop.f32.mrf.mxu1 }
 0x152   : > { %v6363_v33 = vadd.f32 %v2111_v22, %v1900_v8  ;;  %v1903_v20 = vadd.f32 %v5052_v45, %v6264_v60  ;;  %v2114_v13 = vpop.f32.mrf.mxu0 }
 0x153   : > { %v1744_v12 = vpop.f32.mrf.mxu1 }
 0x154   : > { %v6366_v14 = vadd.f32 %v5100_v15, %v1903_v20  ;;  %v1901_v7 = vadd.f32 %v1744_v12, %v6267_v2  ;;  %v5103_v9 = vpop.f32.mrf.mxu0 }
 0x155   : > { %v5055_v48 = vpop.f32.mrf.mxu1 }
 0x156   : > { %v6369_v38 = vadd.f32 %v2114_v13, %v1901_v7  ;;  %v1906_v16 = vadd.f32 %v5055_v48, %v6270_v3  ;;  %v2127_v44 = vpop.f32.mrf.mxu0 }
 0x157   : > { %v1757_v63 = vpop.f32.mrf.mxu1 }
 0x158   : > { %v6372_v24 = vadd.f32 %v5103_v9, %v1906_v16  ;;  %v1904_v19 = vadd.f32 %v1757_v63, %v6273_v4  ;;  %v5104_v60 = vpop.f32.mrf.mxu0 }
 0x159   : > { %v5056_v23 = vpop.f32.mrf.mxu1 }
 0x15a   : > { %v6375_v61 = vadd.f32 %v2127_v44, %v1904_v19  ;;  %v1907_v62 = vadd.f32 %v5056_v23, %v6276_v6  ;;  %v2130_v2 = vpop.f32.mrf.mxu0 }
 0x15b   : > { %v1760_v29 = vpop.f32.mrf.mxu1 }
 0x15c   : > { %v6378_v1 = vadd.f32 %v5104_v60, %v1907_v62  ;;  %v1905_v11 = vadd.f32 %v1760_v29, %v6279_v17  ;;  %v5107_v3 = vpop.f32.mrf.mxu0 }
 0x15d   : > { %v5059_v21 = vpop.f32.mrf.mxu1 }
 0x15e   : > { %v6381_v52 = vadd.f32 %v2130_v2, %v1905_v11  ;;  %v1910_v53 = vadd.f32 %v5059_v21, %v6283_v31  ;;  %v2143_v4 = vpop.f32.mrf.mxu0 }
 0x15f   : > { %v1773_v46 = vpop.f32.mrf.mxu1 }
 0x160   : > { %v6384_v50 = vadd.f32 %v5107_v3, %v1910_v53  ;;  %v1908_v41 = vadd.f32 %v1773_v46, %v6286_v34  ;;  %v5108_v6 = vpop.f32.mrf.mxu0 }
 0x161   : > { %v5060_v54 = vpop.f32.mrf.mxu1 }
 0x162   : > { %v6387_v40 = vadd.f32 %v2143_v4, %v1908_v41  ;;  %v1911_v42 = vadd.f32 %v5060_v54, %v6289_v36  ;;  %v2146_v17 = vpop.f32.mrf.mxu0 }
 0x163   : > { %v1776_v22 = vpop.f32.mrf.mxu1 }
 0x164   : > { %v6390_v8 = vadd.f32 %v5108_v6, %v1911_v42  ;;  %v1909_v45 = vadd.f32 %v1776_v22, %v6293_v18  ;;  %v5111_v31 = vpop.f32.mrf.mxu0 }
 0x165   : > { %v5063_v15 = vpop.f32.mrf.mxu1 }
 0x166   : > { %v6393_v20 = vadd.f32 %v2146_v17, %v1909_v45  ;;  %v1914_v12 = vadd.f32 %v5063_v15, %v6297_v56  ;;  %v2159_v34 = vpop.f32.mrf.mxu0 }
 0x167   : > { %v1789_v13 = vpop.f32.mrf.mxu1 }
 0x168   : > { %v6396_v7 = vadd.f32 %v5111_v31, %v1914_v12  ;;  %v1912_v48 = vadd.f32 %v1789_v13, %v6300_v5  ;;  %v5112_v36 = vpop.f32.mrf.mxu0 }
 0x169   : > { %v5064_v9 = vpop.f32.mrf.mxu1 }
 0x16a   : > { %v6399_v16 = vadd.f32 %v2159_v34, %v1912_v48  ;;  %v1915_v63 = vadd.f32 %v5064_v9, %v6303_v43  ;;  %v2162_v18 = vpop.f32.mrf.mxu0 }
 0x16b   : > { %v1792_v44 = vpop.f32.mrf.mxu1 }
 0x16c   : > { %v6402_v19 = vadd.f32 %v5112_v36, %v1915_v63  ;;  %v1913_v23 = vadd.f32 %v1792_v44, %v6307_v55  ;;  %v5115_v56 = vpop.f32.mrf.mxu0 }
 0x16d   : > { %v5067_v60 = vpop.f32.mrf.mxu1 }
 0x16e   : > { %v6405_v62 = vadd.f32 %v2162_v18, %v1913_v23  ;;  %v1918_v29 = vadd.f32 %v5067_v60, %v6310_v47  ;;  %v2175_v5 = vpop.f32.mrf.mxu0 }
 0x16f   : > { %v1805_v2 = vpop.f32.mrf.mxu1 }
 0x170   : > { %v6408_v11 = vadd.f32 %v5115_v56, %v1918_v29  ;;  %v1916_v21 = vadd.f32 %v1805_v2, %v6313_v25  ;;  %v5116_v43 = vpop.f32.mrf.mxu0 }
 0x171   : > { %v5068_v3 = vpop.f32.mrf.mxu1 }
 0x172   : > { %v6411_v53 = vadd.f32 %v2175_v5, %v1916_v21  ;;  %v1919_v46 = vadd.f32 %v5068_v3, %v6316_v58  ;;  %v2178_v55 = vpop.f32.mrf.mxu0 }
 0x173   : > { %v1808_v4 = vpop.f32.mrf.mxu1 }
 0x174   : > { %v6414_v41 = vadd.f32 %v5116_v43, %v1919_v46  ;;  %v1917_v54 = vadd.f32 %v1808_v4, %v6319_v28  ;;  %v5119_v47 = vpop.f32.mrf.mxu0 }
 0x175   : > { %v5071_v6 = vpop.f32.mrf.mxu1 }
 0x176   : > { %v6417_v42 = vadd.f32 %v2178_v55, %v1917_v54  ;;  %v1922_v22 = vadd.f32 %v5071_v6, %v6322_v0  ;;  %v2191_v25 = vpop.f32.mrf.mxu0 }
 0x177   : > { %v1821_v17 = vpop.f32.mrf.mxu1 }
 0x178   : > { %v6420_v45 = vadd.f32 %v5119_v47, %v1922_v22  ;;  %v1920_v15 = vadd.f32 %v1821_v17, %v6325_v30  ;;  %v5120_v58 = vpop.f32.mrf.mxu0 }
 0x179   : > { %v5072_v31 = vpop.f32.mrf.mxu1 }
 0x17a   : > { %v6423_v12 = vadd.f32 %v2191_v25, %v1920_v15  ;;  %v1923_v13 = vadd.f32 %v5072_v31, %v6328_v57  ;;  %v2194_v28 = vpop.f32.mrf.mxu0 }
 0x17b   : > { %v1824_v34 = vpop.f32.mrf.mxu1 }
 0x17c   : > { %6719 = vst [vmem:[#allocation4_spill] sm:$0xff] %v6423_v12  ;;  %v6426_v48 = vadd.f32 %v5120_v58, %v1923_v13  ;;  %v1921_v9 = vadd.f32 %v1824_v34, %v6331_v10  ;;  %v5123_v0 = vpop.f32.mrf.mxu0 }
 0x17d   : > { %v5075_v36 = vpop.f32.mrf.mxu1 }
 0x17e   : > { %6720 = vst [vmem:[#allocation5_spill] sm:$0xff] %v6426_v48  ;;  %v6429_v63 = vadd.f32 %v2194_v28, %v1921_v9  ;;  %v1926_v44 = vadd.f32 %v5075_v36, %v6336_v27  ;;  %v2207_v30 = vpop.f32.mrf.mxu0 }
 0x17f   : > { %v1837_v18 = vpop.f32.mrf.mxu1 }
 0x180   : > { %6721 = vst [vmem:[#allocation6_spill] sm:$0xff] %v6429_v63  ;;  %v6432_v23 = vadd.f32 %v5123_v0, %v1926_v44  ;;  %v1924_v60 = vadd.f32 %v1837_v18, %v6339_v51  ;;  %v5124_v57 = vpop.f32.mrf.mxu0 }
 0x181   : > { %v5076_v56 = vpop.f32.mrf.mxu1 }
 0x182   : > { %v6435_v29 = vadd.f32 %v2207_v30, %v1924_v60  ;;  %v1927_v2 = vadd.f32 %v5076_v56, %v6342_v37  ;;  %v2210_v10 = vpop.f32.mrf.mxu0 }
 0x183   : > { %v1840_v5 = vpop.f32.mrf.mxu1 }
 0x184   : > { %6722 = vst [vmem:[#allocation7_spill] sm:$0xff] %v6435_v29  ;;  %v6438_v21 = vadd.f32 %v5124_v57, %v1927_v2  ;;  %v1925_v3 = vadd.f32 %v1840_v5, %v6345_v32  ;;  %v5127_v27 = vpop.f32.mrf.mxu0 }
 0x185   : > { %v5079_v43 = vpop.f32.mrf.mxu1 }
 0x186   : > { %6723 = vst [vmem:[#allocation8_spill] sm:$0xff] %v6438_v21  ;;  %v6441_v46 = vadd.f32 %v2210_v10, %v1925_v3  ;;  %v1930_v4 = vadd.f32 %v5079_v43, %v6348_v49  ;;  %v2223_v51 = vpop.f32.mrf.mxu0 }
 0x187   : > { %v1853_v55 = vpop.f32.mrf.mxu1 }
 0x188   : > { %6724 = vst [vmem:[#allocation9_spill] sm:$0xff] %v6441_v46  ;;  %v6444_v54 = vadd.f32 %v5127_v27, %v1930_v4  ;;  %v1928_v6 = vadd.f32 %v1853_v55, %v6351_v59  ;;  %v5128_v37 = vpop.f32.mrf.mxu0 }
 0x189   : > { %v5080_v47 = vpop.f32.mrf.mxu1 }
 0x18a   : > { %v6447_v22 = vadd.f32 %v2223_v51, %v1928_v6  ;;  %v1931_v17 = vadd.f32 %v5080_v47, %v6354_v26  ;;  %v2226_v32 = vpop.f32.mrf.mxu0 }
 0x18b   : > { %v1856_v25 = vpop.f32.mrf.mxu1 }
 0x18c   : > { %6725 = vst [vmem:[#allocation10_spill] sm:$0xff] %v6447_v22  ;;  %v6450_v15 = vadd.f32 %v5128_v37, %v1931_v17  ;;  %v1929_v31 = vadd.f32 %v1856_v25, %v6357_v39  ;;  %v5195_v49 = vpop.f32.mrf.mxu0 }
 0x18d   : > { %v5147_v58 = vpop.f32.mrf.mxu1 }
 0x18e   : > { %6726 = vst [vmem:[#allocation11_spill] sm:$0xff] %v6450_v15  ;;  %v6453_v13 = vadd.f32 %v2226_v32, %v1929_v31  ;;  %v2642_v34 = vadd.f32 %v5147_v58, %v6360_v35  ;;  %v2852_v59 = vpop.f32.mrf.mxu0 }
 0x18f   : > { %v2481_v28 = vpop.f32.mrf.mxu1 }
 0x190   : > { %6727 = vst [vmem:[#allocation12_spill] sm:$0xff] %v6453_v13  ;;  %v6456_v9 = vadd.f32 %v5195_v49, %v2642_v34  ;;  %v2640_v36 = vadd.f32 %v2481_v28, %v6363_v33  ;;  %v6461_v26 = vpop.f32.mrf.mxu0 }
 0x191   : > { %v6459_v0 = vpop.f32.mrf.mxu1 }
 0x192   : > { %v6463_v44 = vadd.f32 %v2852_v59, %v2640_v36  ;;  %v6467_v39 = vpop.f32.mrf.mxu0 }
 0x193   : > { %v6465_v18 = vpop.f32.mrf.mxu1 }
 0x194   : > { %v5199_v60 = vpop.f32.mrf.mxu0 }
 0x195   : > { %v5151_v30 = vpop.f32.mrf.mxu1 }
 0x196   : > { %v2646_v35 = vadd.f32 %v5151_v30, %v6372_v24  ;;  %v6472_v57 = vpop.f32.mrf.mxu0 }
 0x197   : > { %v6470_v56 = vpop.f32.mrf.mxu1 }
 0x198   : > { %v6474_v2 = vadd.f32 %v5199_v60, %v2646_v35  ;;  %v6478_v5 = vpop.f32.mrf.mxu0 }
 0x199   : > { %v6476_v33 = vpop.f32.mrf.mxu1 }
 0x19a   : > { %v6482_v3 = vpop.f32.mrf.mxu0 }
 0x19b   : > { %v6480_v10 = vpop.f32.mrf.mxu1 }
 0x19c   : > { %v5203_v27 = vpop.f32.mrf.mxu0 }
 0x19d   : > { %v5155_v43 = vpop.f32.mrf.mxu1 }
 0x19e   : > { %v2650_v4 = vadd.f32 %v5155_v43, %v6384_v50  ;;  %v6487_v24 = vpop.f32.mrf.mxu0 }
 0x19f   : > { %v6485_v55 = vpop.f32.mrf.mxu1 }
 0x1a0   : > { %v6489_v51 = vadd.f32 %v5203_v27, %v2650_v4  ;;  %v6493_v47 = vpop.f32.mrf.mxu0 }
 0x1a1   : > { %v6491_v6 = vpop.f32.mrf.mxu1 }
 0x1a2   : > { %v6497_v17 = vpop.f32.mrf.mxu0 }
 0x1a3   : > { %v6495_v37 = vpop.f32.mrf.mxu1 }
 0x1a4   : > { %v5207_v32 = vpop.f32.mrf.mxu0 }
 0x1a5   : > { %v5159_v25 = vpop.f32.mrf.mxu1 }
 0x1a6   : > { %v2654_v31 = vadd.f32 %v5159_v25, %v6396_v7  ;;  %v6502_v50 = vpop.f32.mrf.mxu0 }
 0x1a7   : > { %v6500_v58 = vpop.f32.mrf.mxu1 }
 0x1a8   : > { %v6504_v49 = vadd.f32 %v5207_v32, %v2654_v31  ;;  %v6508_v28 = vpop.f32.mrf.mxu0 }
 0x1a9   : > { %v6506_v34 = vpop.f32.mrf.mxu1 }
 0x1aa   : > { %v6512_v36 = vpop.f32.mrf.mxu0 }
 0x1ab   : > { %v6510_v59 = vpop.f32.mrf.mxu1 }
 0x1ac   : > { %v5211_v60 = vpop.f32.mrf.mxu0 }
 0x1ad   : > { %v5163_v30 = vpop.f32.mrf.mxu1 }
 0x1ae   : > { %v2658_v35 = vadd.f32 %v5163_v30, %v6408_v11  ;;  %v6517_v7 = vpop.f32.mrf.mxu0 }
 0x1af   : > { %v6515_v43 = vpop.f32.mrf.mxu1 }
 0x1b0   : > { %v6519_v27 = vadd.f32 %v5211_v60, %v2658_v35  ;;  %v6523_v25 = vpop.f32.mrf.mxu0 }
 0x1b1   : > { %v6521_v4 = vpop.f32.mrf.mxu1 }
 0x1b2   : > { %v6527_v31 = vpop.f32.mrf.mxu0 }
 0x1b3   : > { %v6525_v32 = vpop.f32.mrf.mxu1  ;;  %6728 = vst [vmem:[#allocation13_spill] sm:$0xff] %v6527_v31 }
 0x1b4   : > { %v5215_v15 = vpop.f32.mrf.mxu0 }
 0x1b5   : > { %v5167_v13 = vpop.f32.mrf.mxu1 }
 0x1b6   : > { %v2662_v22 = vadd.f32 %v5167_v13, %v6420_v45  ;;  %v6532_v11 = vpop.f32.mrf.mxu0 }
 0x1b7   : > { %v6530_v46 = vpop.f32.mrf.mxu1  ;;  %6729 = vst [vmem:[#allocation14_spill] sm:$0xff] %v6532_v11 }
 0x1b8   : > { %v6534_v30 = vadd.f32 %v5215_v15, %v2662_v22  ;;  %v6538_v35 = vpop.f32.mrf.mxu0 }
 0x1b9   : > { %v6536_v60 = vpop.f32.mrf.mxu1  ;;  %6732 = vst [vmem:[#allocation17_spill] sm:$0xff] %v6538_v35 }
 0x1ba   : > { %6730 = vst [vmem:[#allocation15_spill] sm:$0xff] %v6534_v30  ;;  %6731 = vst [vmem:[#allocation16_spill] sm:$0xff] %v6536_v60  ;;  %v6542_v29 = vpop.f32.mrf.mxu0 }
 0x1bb   : > { %v6540_v21 = vpop.f32.mrf.mxu1  ;;  %6734 = vst [vmem:[#allocation19_spill] sm:$0xff] %v6542_v29 }
 0x1bc   : > { %6733 = vst [vmem:[#allocation18_spill] sm:$0xff] %v6540_v21  ;;  %v5219_v48 = vpop.f32.mrf.mxu0 }
 0x1bd   : > { %v5171_v63 = vpop.f32.mrf.mxu1 }
 0x1be   : > { %v2666_v12 = vadd.f32 %v5171_v63, %v6432_v23  ;;  %v6547_v45 = vpop.f32.mrf.mxu0 }
 0x1bf   : > { %v6545_v31 = vpop.f32.mrf.mxu1  ;;  %6735 = vst [vmem:[#allocation20_spill] sm:$0xff] %v6547_v45 }
 0x1c0   : > { %v6549_v13 = vadd.f32 %v5219_v48, %v2666_v12  ;;  %v6553_v15 = vpop.f32.mrf.mxu0 }
 0x1c1   : > { %v6551_v22 = vpop.f32.mrf.mxu1  ;;  %6738 = vst [vmem:[#allocation23_spill] sm:$0xff] %v6553_v15 }
 0x1c2   : > { %6736 = vst [vmem:[#allocation21_spill] sm:$0xff] %v6549_v13  ;;  %6737 = vst [vmem:[#allocation22_spill] sm:$0xff] %v6551_v22  ;;  %v6557_v35 = vpop.f32.mrf.mxu0 }
 0x1c3   : > { %v6555_v30 = vpop.f32.mrf.mxu1  ;;  %6740 = vst [vmem:[#allocation25_spill] sm:$0xff] %v6557_v35  ;;  %v2643_v35 = vadd.f32 %v6459_v0, %v6366_v14  ;;  %v2644_v14 = vadd.f32 %v6470_v56, %v6375_v61 }
 0x1c4   : > { %6739 = vst [vmem:[#allocation24_spill] sm:$0xff] %v6555_v30  ;;  %v5223_v29 = vpop.f32.mrf.mxu0 }
 0x1c5   : > { %v5175_v21 = vpop.f32.mrf.mxu1  ;;  %v3015_v56 = vadd.f32 %v6472_v57, %v2644_v14 }
 0x1c6   : > { %v2670_v11 = vadd.f32 %v5175_v21, %v6444_v54  ;;  %v6562_v63 = vpop.f32.mrf.mxu0  ;;  %v2641_v21 = vadd.f32 %v6465_v18, %v6369_v38  ;;  %v2647_v38 = vadd.f32 %v6476_v33, %v6378_v1 }
 0x1c7   : > { %v6560_v60 = vpop.f32.mrf.mxu1  ;;  %6742 = vst [vmem:[#allocation27_spill] sm:$0xff] %v6562_v63 }
 0x1c8   : > { %6741 = vst [vmem:[#allocation26_spill] sm:$0xff] %v6560_v60  ;;  %v6564_v23 = vadd.f32 %v5223_v29, %v2670_v11  ;;  %v6568_v48 = vpop.f32.mrf.mxu0  ;;  %v3014_v29 = vadd.f32 %v6461_v26, %v2643_v35  ;;  %v3018_v33 = vadd.f32 %v6478_v5, %v2647_v38 }
 0x1c9   : > { %v6566_v12 = vpop.f32.mrf.mxu1  ;;  %6745 = vst [vmem:[#allocation30_spill] sm:$0xff] %v6568_v48 }
 0x1ca   : > { %6743 = vst [vmem:[#allocation28_spill] sm:$0xff] %v6564_v23  ;;  %6744 = vst [vmem:[#allocation29_spill] sm:$0xff] %v6566_v12  ;;  %v6572_v15 = vpop.f32.mrf.mxu0 }
 0x1cb   : > { %v6570_v13 = vpop.f32.mrf.mxu1  ;;  %6747 = vst [vmem:[#allocation32_spill] sm:$0xff] %v6572_v15  ;;  %v3012_v15 = vadd.f32 %v6467_v39, %v2641_v21 }
 0x1cc   : > { %6746 = vst [vmem:[#allocation31_spill] sm:$0xff] %v6570_v13  ;;  %v5291_v45 = vpop.f32.mrf.mxu0 }
 0x1cd   : > { %v5243_v30 = vpop.f32.mrf.mxu1 }
 0x1ce   : > { %v3592_v63 = vpop.f32.mrf.mxu0  ;;  %v3383_v11 = vadd.f32 %v5243_v30, %v6456_v9  ;;  %v2645_v9 = vadd.f32 %v6480_v10, %v6381_v52 }
 0x1cf   : > { %v3222_v54 = vpop.f32.mrf.mxu1 }
 0x1d0   : > { %v3381_v23 = vadd.f32 %v3222_v54, %v6463_v44  ;;  %v5292_v13 = vpop.f32.mrf.mxu0  ;;  %v3753_v60 = vadd.f32 %v5291_v45, %v3383_v11 }
 0x1d1   : > { %v5244_v48 = vpop.f32.mrf.mxu1 }
 0x1d2   : > { %v3384_v12 = vadd.f32 %v5244_v48, %v3014_v29  ;;  %v3595_v18 = vpop.f32.mrf.mxu0  ;;  %v3751_v26 = vadd.f32 %v3592_v63, %v3381_v23  ;;  %v3016_v23 = vadd.f32 %v6482_v3, %v2645_v9  ;;  %v4047_v21 = vmul.f32 %v3753_v60, %v3753_v60 }
 0x1d3   : > { %v3225_v0 = vpop.f32.mrf.mxu1  ;;  %v2651_v29 = vadd.f32 %v6491_v6, %v6390_v8 }
 0x1d4   : > { %v3754_v35 = vadd.f32 %v5292_v13, %v3384_v12  ;;  %v3382_v22 = vadd.f32 %v3225_v0, %v3012_v15  ;;  %v5295_v44 = vpop.f32.mrf.mxu0  ;;  %v4045_v10 = vmul.f32 %v3751_v26, %v3751_v26  ;;  %v2648_v12 = vadd.f32 %v6485_v55, %v6387_v40 }
 0x1d5   : > { %v5247_v61 = vpop.f32.mrf.mxu1 }
 0x1d6   : > { %v4571_v39 = vpack.c.bf16 %v3754_v35, %v3753_v60  ;;  %v3752_v1 = vadd.f32 %v3595_v18, %v3382_v22  ;;  %v3387_v30 = vadd.f32 %v5247_v61, %v6474_v2  ;;  %v3608_v52 = vpop.f32.mrf.mxu0  ;;  %v4048_v11 = vmul.f32 %v3754_v35, %v3754_v35 }
 0x1d7   : > { %v3238_v45 = vpop.f32.mrf.mxu1  ;;  %v3019_v9 = vadd.f32 %v6487_v24, %v2648_v12  ;;  %v2655_v12 = vadd.f32 %v6506_v34, %v6402_v19  ;;  %v2653_v19 = vadd.f32 %v6510_v59, %v6405_v62 }
 0x1d8   : > { %4658 = vst [vmem:[%s6593_s9 + $0x8] sm:$0xff] %v4571_v39   ;;  %v4566_v13 = vpack.c.bf16 %v3752_v1, %v3751_v26  ;;  %v4007_v15 = vadd.f32 %v3752_v1, %v3751_v26  ;;  %v4046_v63 = vmul.f32 %v3752_v1, %v3752_v1  ;;  %v3385_v22 = vadd.f32 %v3238_v45, %v3015_v56  ;;  %v5296_v57 = vpop.f32.mrf.mxu0 }
 0x1d9   : > { %v5248_v48 = vpop.f32.mrf.mxu1  ;;  %v3757_v14 = vadd.f32 %v5295_v44, %v3387_v30  ;;  %v3024_v59 = vadd.f32 %v6512_v36, %v2653_v19 }
 0x1da   : > { %4567 = vst [vmem:[%s6593_s9] sm:$0xff] %v4566_v13   ;;  %v4008_v5 = vadd.f32 %v4007_v15, %v3753_v60  ;;  %v4077_v54 = vadd.f32 %v4046_v63, %v4045_v10  ;;  %v3388_v2 = vadd.f32 %v5248_v48, %v3018_v33  ;;  %v3755_v38 = vadd.f32 %v3608_v52, %v3385_v22  ;;  %v3611_v18 = vpop.f32.mrf.mxu0 }
 0x1db   : > { %v3241_v0 = vpop.f32.mrf.mxu1  ;;  %v2649_v60 = vadd.f32 %v6495_v37, %v6393_v20 }
 0x1dc   : > { %v4078_v3 = vadd.f32 %v4077_v54, %v4047_v21  ;;  %v4009_v26 = vadd.f32 %v4008_v5, %v3754_v35  ;;  %v3758_v40 = vadd.f32 %v5296_v57, %v3388_v2  ;;  %v3386_v55 = vadd.f32 %v3241_v0, %v3016_v23  ;;  %v5299_v39 = vpop.f32.mrf.mxu0 }
 0x1dd   : > { %v5251_v61 = vpop.f32.mrf.mxu1  ;;  %v4049_v56 = vmul.f32 %v3755_v38, %v3755_v38  ;;  %v3022_v35 = vadd.f32 %v6493_v47, %v2651_v29  ;;  %v3020_v63 = vadd.f32 %v6497_v17, %v2649_v60  ;;  %v2652_v23 = vadd.f32 %v6500_v58, %v6399_v16 }
 0x1de   : > { %v4010_v1 = vadd.f32 %v4009_v26, %v3755_v38  ;;  %v4079_v8 = vadd.f32 %v4078_v3, %v4048_v11  ;;  %v4581_v6 = vpack.c.bf16 %v3758_v40, %v3757_v14  ;;  %v3756_v44 = vadd.f32 %v3611_v18, %v3386_v55  ;;  %v3624_v30 = vpop.f32.mrf.mxu0 }
 0x1df   : > { %v3254_v33 = vpop.f32.mrf.mxu1  ;;  %v3391_v52 = vadd.f32 %v5251_v61, %v6489_v51  ;;  %v4051_v47 = vmul.f32 %v3757_v14, %v3757_v14  ;;  %v4052_v11 = vmul.f32 %v3758_v40, %v3758_v40  ;;  %v3023_v58 = vadd.f32 %v6502_v50, %v2652_v23 }
 0x1e0   : > { %v4080_v45 = vadd.f32 %v4079_v8, %v4049_v56  ;;  %4660 = vst [vmem:[%s6593_s9 + $0x18] sm:$0xff] %v4581_v6   ;;  %v3389_v24 = vadd.f32 %v3254_v33, %v3019_v9  ;;  %v4576_v10 = vpack.c.bf16 %v3756_v44, %v3755_v38  ;;  %v4011_v13 = vadd.f32 %v4010_v1, %v3756_v44  ;;  %v5300_v15 = vpop.f32.mrf.mxu0 }
 0x1e1   : > { %v4050_v20 = vmul.f32 %v3756_v44, %v3756_v44  ;;  %v5252_v37 = vpop.f32.mrf.mxu1  ;;  %v3761_v54 = vadd.f32 %v5299_v39, %v3391_v52  ;;  %v3026_v18 = vadd.f32 %v6508_v28, %v2655_v12  ;;  %v2656_v28 = vadd.f32 %v6515_v43, %v6411_v53 }
 0x1e2   : > { %v3392_v22 = vadd.f32 %v5252_v37, %v3022_v35  ;;  %4659 = vst [vmem:[%s6593_s9 + $0x10] sm:$0xff] %v4576_v10   ;;  %v4012_v48 = vadd.f32 %v4011_v13, %v3757_v14  ;;  %v3759_v51 = vadd.f32 %v3624_v30, %v3389_v24  ;;  %v3627_v5 = vpop.f32.mrf.mxu0  ;;  %v2659_v6 = vadd.f32 %v6521_v4, %v6414_v41 }
 0x1e3   : > { %v4081_v57 = vadd.f32 %v4080_v45, %v4050_v20  ;;  %v3257_v21 = vpop.f32.mrf.mxu1  ;;  %v4055_v33 = vmul.f32 %v3761_v54, %v3761_v54  ;;  %v3027_v43 = vadd.f32 %v6517_v7, %v2656_v28  ;;  %v2657_v41 = vadd.f32 %v6525_v32, %v6417_v42  ;;  %v6748_v32 = vld [vmem:[#allocation13_spill] sm:$0xff] }
 0x1e4   : > { %v3762_v2 = vadd.f32 %v5300_v15, %v3392_v22  ;;  %v3390_v29 = vadd.f32 %v3257_v21, %v3020_v63  ;;  %v4013_v38 = vadd.f32 %v4012_v48, %v3758_v40  ;;  %v5303_v16 = vpop.f32.mrf.mxu0  ;;  %v4053_v26 = vmul.f32 %v3759_v51, %v3759_v51 }
 0x1e5   : > { %v4082_v17 = vadd.f32 %v4081_v57, %v4051_v47  ;;  %v5255_v0 = vpop.f32.mrf.mxu1  ;;  %v3030_v23 = vadd.f32 %v6523_v25, %v2659_v6  ;;  %v6755_v6 = vld [vmem:[#allocation17_spill] sm:$0xff] }
 0x1e6   : > { %v4591_v34 = vpack.c.bf16 %v3762_v2, %v3761_v54  ;;  %v3760_v14 = vadd.f32 %v3627_v5, %v3390_v29  ;;  %v4014_v3 = vadd.f32 %v4013_v38, %v3759_v51  ;;  %v3640_v60 = vpop.f32.mrf.mxu0  ;;  %v3395_v39 = vadd.f32 %v5255_v0, %v6504_v49  ;;  %v6750_v38 = vld [vmem:[#allocation5_spill] sm:$0xff]  ;;  %v6751_v0 = vld [vmem:[#allocation16_spill] sm:$0xff] }
 0x1e7   : > { %v4083_v55 = vadd.f32 %v4082_v17, %v4052_v11  ;;  %v3270_v9 = vpop.f32.mrf.mxu1  ;;  %v4056_v20 = vmul.f32 %v3762_v2, %v3762_v2  ;;  %v3028_v11 = vadd.f32 %v6748_v32, %v2657_v41  ;;  %v6749_v17 = vld [vmem:[#allocation4_spill] sm:$0xff] }
 0x1e8   : > { %4662 = vst [vmem:[%s6593_s9 + $0x28] sm:$0xff] %v4591_v34   ;;  %v4586_v61 = vpack.c.bf16 %v3760_v14, %v3759_v51  ;;  %v4054_v40 = vmul.f32 %v3760_v14, %v3760_v14  ;;  %v3393_v1 = vadd.f32 %v3270_v9, %v3023_v58  ;;  %v4015_v56 = vadd.f32 %v4014_v3, %v3760_v14  ;;  %v5304_v62 = vpop.f32.mrf.mxu0 }
 0x1e9   : > { %v4084_v50 = vadd.f32 %v4083_v55, %v4053_v26  ;;  %v5256_v8 = vpop.f32.mrf.mxu1  ;;  %v3765_v24 = vadd.f32 %v5303_v16, %v3395_v39  ;;  %v2660_v25 = vadd.f32 %v6530_v46, %v6749_v17  ;;  %v2663_v16 = vadd.f32 %v6751_v0, %v6750_v38  ;;  %v6762_v0 = vld [vmem:[#allocation9_spill] sm:$0xff] }
 0x1ea   : > { %4661 = vst [vmem:[%s6593_s9 + $0x20] sm:$0xff] %v4586_v61   ;;  %v3396_v44 = vadd.f32 %v5256_v8, %v3026_v18  ;;  %v4016_v30 = vadd.f32 %v4015_v56, %v3761_v54  ;;  %v3763_v45 = vadd.f32 %v3640_v60, %v3393_v1  ;;  %v3643_v52 = vpop.f32.mrf.mxu0  ;;  %v6752_v1 = vld [vmem:[#allocation14_spill] sm:$0xff] }
 0x1eb   : > { %v4085_v35 = vadd.f32 %v4084_v50, %v4054_v40  ;;  %v3273_v49 = vpop.f32.mrf.mxu1  ;;  %v4059_v19 = vmul.f32 %v3765_v24, %v3765_v24  ;;  %v3031_v50 = vadd.f32 %v6752_v1, %v2660_v25  ;;  %v6753_v56 = vld [vmem:[#allocation6_spill] sm:$0xff]  ;;  %v6761_v25 = vld [vmem:[#allocation20_spill] sm:$0xff] }
 0x1ec   : > { %v3766_v10 = vadd.f32 %v5304_v62, %v3396_v44  ;;  %v3394_v13 = vadd.f32 %v3273_v49, %v3024_v59  ;;  %v4017_v37 = vadd.f32 %v4016_v30, %v3762_v2  ;;  %v5307_v53 = vpop.f32.mrf.mxu0  ;;  %v4057_v22 = vmul.f32 %v3763_v45, %v3763_v45  ;;  %v6754_v8 = vld [vmem:[#allocation18_spill] sm:$0xff] }
 0x1ed   : > { %v4086_v36 = vadd.f32 %v4085_v35, %v4055_v33  ;;  %v5259_v15 = vpop.f32.mrf.mxu1  ;;  %v2661_v62 = vadd.f32 %v6754_v8, %v6753_v56  ;;  %v3034_v44 = vadd.f32 %v6755_v6, %v2663_v16  ;;  %v6763_v16 = vld [vmem:[#allocation24_spill] sm:$0xff]  ;;  %v6768_v6 = vld [vmem:[#allocation26_spill] sm:$0xff] }
 0x1ee   : > { %v4601_v4 = vpack.c.bf16 %v3766_v10, %v3765_v24  ;;  %v3764_v63 = vadd.f32 %v3643_v52, %v3394_v13  ;;  %v4018_v12 = vadd.f32 %v4017_v37, %v3763_v45  ;;  %v3656_v57 = vpop.f32.mrf.mxu0  ;;  %v3399_v5 = vadd.f32 %v5259_v15, %v6519_v27 }
 0x1ef   : > { %v4087_v47 = vadd.f32 %v4086_v36, %v4056_v20  ;;  %v3286_v48 = vpop.f32.mrf.mxu1  ;;  %v4060_v60 = vmul.f32 %v3766_v10, %v3766_v10 }
 0x1f0   : > { %4664 = vst [vmem:[%s6593_s9 + $0x38] sm:$0xff] %v4601_v4   ;;  %v4596_v51 = vpack.c.bf16 %v3764_v63, %v3763_v45  ;;  %v4058_v21 = vmul.f32 %v3764_v63, %v3764_v63  ;;  %v3397_v54 = vadd.f32 %v3286_v48, %v3027_v43  ;;  %v4019_v2 = vadd.f32 %v4018_v12, %v3764_v63  ;;  %v5308_v42 = vpop.f32.mrf.mxu0  ;;  %v6757_v43 = vld [vmem:[#allocation19_spill] sm:$0xff]  ;;  %v6760_v12 = vld [vmem:[#allocation22_spill] sm:$0xff] }
 0x1f1   : > { %v4088_v7 = vadd.f32 %v4087_v47, %v4057_v22  ;;  %v5260_v29 = vpop.f32.mrf.mxu1  ;;  %v3769_v26 = vadd.f32 %v5307_v53, %v3399_v5  ;;  %v3032_v41 = vadd.f32 %v6757_v43, %v2661_v62  ;;  %v6758_v4 = vld [vmem:[#allocation7_spill] sm:$0xff]  ;;  %v6766_v62 = vld [vmem:[#allocation25_spill] sm:$0xff] }
 0x1f2   : > { %4663 = vst [vmem:[%s6593_s9 + $0x30] sm:$0xff] %v4596_v51   ;;  %v3400_v58 = vadd.f32 %v5260_v29, %v3030_v23  ;;  %v4020_v34 = vadd.f32 %v4019_v2, %v3765_v24  ;;  %v3767_v18 = vadd.f32 %v3656_v57, %v3397_v54  ;;  %v3659_v3 = vpop.f32.mrf.mxu0  ;;  %v2664_v63 = vadd.f32 %v6545_v31, %v6758_v4  ;;  %v6759_v23 = vld [vmem:[#allocation8_spill] sm:$0xff] }
 0x1f3   : > { %v4089_v14 = vadd.f32 %v4088_v7, %v4058_v21  ;;  %v3289_v27 = vpop.f32.mrf.mxu1  ;;  %v2667_v22 = vadd.f32 %v6760_v12, %v6759_v23  ;;  %v4063_v48 = vmul.f32 %v3769_v26, %v3769_v26  ;;  %v6771_v23 = vld [vmem:[#allocation27_spill] sm:$0xff] }
 0x1f4   : > { %v3770_v55 = vadd.f32 %v5308_v42, %v3400_v58  ;;  %v3398_v9 = vadd.f32 %v3289_v27, %v3028_v11  ;;  %v4021_v40 = vadd.f32 %v4020_v34, %v3766_v10  ;;  %v5311_v46 = vpop.f32.mrf.mxu0  ;;  %v4061_v30 = vmul.f32 %v3767_v18, %v3767_v18  ;;  %v6756_v10 = vld [vmem:[#allocation15_spill] sm:$0xff] }
 0x1f5   : > { %v4090_v61 = vadd.f32 %v4089_v14, %v4059_v19  ;;  %v5263_v39 = vpop.f32.mrf.mxu1  ;;  %v3035_v38 = vadd.f32 %v6761_v25, %v2664_v63  ;;  %v2665_v58 = vadd.f32 %v6763_v16, %v6762_v0  ;;  %v6764_v14 = vld [vmem:[#allocation23_spill] sm:$0xff] }
 0x1f6   : > { %v4611_v59 = vpack.c.bf16 %v3770_v55, %v3769_v26  ;;  %v3768_v28 = vadd.f32 %v3659_v3, %v3398_v9  ;;  %v4022_v33 = vadd.f32 %v4021_v40, %v3767_v18  ;;  %v3672_v49 = vpop.f32.mrf.mxu0  ;;  %v3403_v13 = vadd.f32 %v5263_v39, %v6756_v10  ;;  %v6765_v40 = vld [vmem:[#allocation21_spill] sm:$0xff] }
 0x1f7   : > { %v4091_v35 = vadd.f32 %v4090_v61, %v4060_v60  ;;  %v3302_v45 = vpop.f32.mrf.mxu1  ;;  %v4064_v42 = vmul.f32 %v3770_v55, %v3770_v55 }
 0x1f8   : > { %4666 = vst [vmem:[%s6593_s9 + $0x48] sm:$0xff] %v4611_v59   ;;  %v4606_v52 = vpack.c.bf16 %v3768_v28, %v3767_v18  ;;  %v4062_v24 = vmul.f32 %v3768_v28, %v3768_v28  ;;  %v3401_v20 = vadd.f32 %v3302_v45, %v3031_v50  ;;  %v4023_v37 = vadd.f32 %v4022_v33, %v3768_v28  ;;  %v5312_v53 = vpop.f32.mrf.mxu0  ;;  %v6767_v28 = vld [vmem:[#allocation10_spill] sm:$0xff]  ;;  %v6769_v33 = vld [vmem:[#allocation11_spill] sm:$0xff] }
 0x1f9   : > { %v4092_v36 = vadd.f32 %v4091_v35, %v4061_v30  ;;  %v5264_v15 = vpop.f32.mrf.mxu1  ;;  %v3773_v7 = vadd.f32 %v5311_v46, %v3403_v13  ;;  %v3038_v18 = vadd.f32 %v6764_v14, %v2667_v22  ;;  %v3036_v59 = vadd.f32 %v6766_v62, %v2665_v58  ;;  %v6770_v30 = vld [vmem:[#allocation29_spill] sm:$0xff]  ;;  %v6772_v22 = vld [vmem:[#allocation12_spill] sm:$0xff] }
 0x1fa   : > { %4665 = vst [vmem:[%s6593_s9 + $0x40] sm:$0xff] %v4606_v52   ;;  %v3404_v47 = vadd.f32 %v5264_v15, %v3034_v44  ;;  %v4024_v57 = vadd.f32 %v4023_v37, %v3769_v26  ;;  %v3771_v21 = vadd.f32 %v3672_v49, %v3401_v20  ;;  %v3675_v54 = vpop.f32.mrf.mxu0  ;;  %v2668_v44 = vadd.f32 %v6768_v6, %v6767_v28 }
 0x1fb   : > { %v4093_v51 = vadd.f32 %v4092_v36, %v4062_v24  ;;  %v3305_v5 = vpop.f32.mrf.mxu1  ;;  %v2671_v35 = vadd.f32 %v6770_v30, %v6769_v33  ;;  %v4067_v49 = vmul.f32 %v3773_v7, %v3773_v7 }
 0x1fc   : > { %v3774_v2 = vadd.f32 %v5312_v53, %v3404_v47  ;;  %v3402_v29 = vadd.f32 %v3305_v5, %v3032_v41  ;;  %v4025_v11 = vadd.f32 %v4024_v57, %v3770_v55  ;;  %v5315_v31 = vpop.f32.mrf.mxu0  ;;  %v4065_v3 = vmul.f32 %v3771_v21, %v3771_v21  ;;  %v6773_v47 = vld [vmem:[#allocation31_spill] sm:$0xff] }
 0x1fd   : > { %v4094_v32 = vadd.f32 %v4093_v51, %v4063_v48  ;;  %v5267_v17 = vpop.f32.mrf.mxu1  ;;  %v3039_v12 = vadd.f32 %v6771_v23, %v2668_v44  ;;  %v2669_v48 = vadd.f32 %v6773_v47, %v6772_v22 }
 0x1fe   : > { %v4621_v19 = vpack.c.bf16 %v3774_v2, %v3773_v7  ;;  %v3772_v34 = vadd.f32 %v3675_v54, %v3402_v29  ;;  %v4026_v27 = vadd.f32 %v4025_v11, %v3771_v21  ;;  %v3688_v60 = vpop.f32.mrf.mxu0  ;;  %v3407_v39 = vadd.f32 %v5267_v17, %v6765_v40  ;;  %v6775_v17 = vld [vmem:[#allocation28_spill] sm:$0xff] }
 0x1ff   : > { %v4095_v26 = vadd.f32 %v4094_v32, %v4064_v42  ;;  %v3318_v9 = vpop.f32.mrf.mxu1  ;;  %v4068_v53 = vmul.f32 %v3774_v2, %v3774_v2 }
 0x200   : > { %4668 = vst [vmem:[%s6593_s9 + $0x58] sm:$0xff] %v4621_v19   ;;  %v4616_v61 = vpack.c.bf16 %v3772_v34, %v3771_v21  ;;  %v4066_v55 = vmul.f32 %v3772_v34, %v3772_v34  ;;  %v3405_v46 = vadd.f32 %v3318_v9, %v3035_v38  ;;  %v4027_v50 = vadd.f32 %v4026_v27, %v3772_v34  ;;  %v5316_v8 = vpop.f32.mrf.mxu0  ;;  %v6774_v21 = vld [vmem:[#allocation30_spill] sm:$0xff]  ;;  %v6776_v19 = vld [vmem:[#allocation32_spill] sm:$0xff] }
 0x201   : > { %v4096_v1 = vadd.f32 %v4095_v26, %v4065_v3  ;;  %v5268_v56 = vpop.f32.mrf.mxu1  ;;  %v3777_v36 = vadd.f32 %v5315_v31, %v3407_v39  ;;  %v3042_v5 = vadd.f32 %v6774_v21, %v2671_v35  ;;  %v3040_v34 = vadd.f32 %v6776_v19, %v2669_v48 }
 0x202   : > { %4667 = vst [vmem:[%s6593_s9 + $0x50] sm:$0xff] %v4616_v61   ;;  %v3408_v45 = vadd.f32 %v5268_v56, %v3038_v18  ;;  %v4028_v52 = vadd.f32 %v4027_v50, %v3773_v7  ;;  %v3775_v10 = vadd.f32 %v3688_v60, %v3405_v46  ;;  %v3691_v20 = vpop.f32.mrf.mxu0 }
 0x203   : > { %v4097_v24 = vadd.f32 %v4096_v1, %v4066_v55  ;;  %v3321_v13 = vpop.f32.mrf.mxu1  ;;  %v4071_v18 = vmul.f32 %v3777_v36, %v3777_v36 }
 0x204   : > { %v3778_v37 = vadd.f32 %v5316_v8, %v3408_v45  ;;  %v3406_v15 = vadd.f32 %v3321_v13, %v3036_v59  ;;  %v4029_v41 = vadd.f32 %v4028_v52, %v3774_v2  ;;  %v5319_v63 = vpop.f32.mrf.mxu0  ;;  %v4069_v7 = vmul.f32 %v3775_v10, %v3775_v10 }
 0x205   : > { %v4098_v43 = vadd.f32 %v4097_v24, %v4067_v49  ;;  %v5271_v4 = vpop.f32.mrf.mxu1 }
 0x206   : > { %v4631_v57 = vpack.c.bf16 %v3778_v37, %v3777_v36  ;;  %v3776_v51 = vadd.f32 %v3691_v20, %v3406_v15  ;;  %v4030_v54 = vadd.f32 %v4029_v41, %v3775_v10  ;;  %v3704_v32 = vpop.f32.mrf.mxu0  ;;  %v3411_v31 = vadd.f32 %v5271_v4, %v6775_v17 }
 0x207   : > { %v4099_v29 = vadd.f32 %v4098_v43, %v4068_v53  ;;  %v3334_v42 = vpop.f32.mrf.mxu1  ;;  %v4072_v40 = vmul.f32 %v3778_v37, %v3778_v37 }
 0x208   : > { %4670 = vst [vmem:[%s6593_s9 + $0x68] sm:$0xff] %v4631_v57   ;;  %v4626_v11 = vpack.c.bf16 %v3776_v51, %v3775_v10  ;;  %v4070_v2 = vmul.f32 %v3776_v51, %v3776_v51  ;;  %v3409_v25 = vadd.f32 %v3334_v42, %v3039_v12  ;;  %v4031_v0 = vadd.f32 %v4030_v54, %v3776_v51  ;;  %v5320_v58 = vpop.f32.mrf.mxu0 }
 0x209   : > { %v4100_v38 = vadd.f32 %v4099_v29, %v4069_v7  ;;  %v5272_v16 = vpop.f32.mrf.mxu1  ;;  %v3781_v60 = vadd.f32 %v5319_v63, %v3411_v31 }
 0x20a   : > { %4669 = vst [vmem:[%s6593_s9 + $0x60] sm:$0xff] %v4626_v11   ;;  %v3412_v14 = vadd.f32 %v5272_v16, %v3042_v5  ;;  %v4032_v27 = vadd.f32 %v4031_v0, %v3777_v36  ;;  %v3779_v26 = vadd.f32 %v3704_v32, %v3409_v25  ;;  %v3707_v1 = vpop.f32.mrf.mxu0 }
 0x20b   : > { %v4101_v3 = vadd.f32 %v4100_v38, %v4070_v2  ;;  %v3337_v9 = vpop.f32.mrf.mxu1  ;;  %v4075_v30 = vmul.f32 %v3781_v60, %v3781_v60 }
 0x20c   : > { %v3782_v61 = vadd.f32 %v5320_v58, %v3412_v14  ;;  %v3410_v55 = vadd.f32 %v3337_v9, %v3040_v34  ;;  %v4033_v46 = vadd.f32 %v4032_v27, %v3778_v37  ;;  %v4073_v62 = vmul.f32 %v3779_v26, %v3779_v26 }
 0x20d   : > { %v4102_v39 = vadd.f32 %v4101_v3, %v4071_v18 }
 0x20e   : > { %v4641_v50 = vpack.c.bf16 %v3782_v61, %v3781_v60  ;;  %v3780_v56 = vadd.f32 %v3707_v1, %v3410_v55  ;;  %v4034_v8 = vadd.f32 %v4033_v46, %v3779_v26  ;;  %v4076_v49 = vmul.f32 %v3782_v61, %v3782_v61 }
 0x20f   : > { %v4103_v59 = vadd.f32 %v4102_v39, %v4072_v40 }
 0x210   : > { %4672 = vst [vmem:[%s6593_s9 + $0x78] sm:$0xff] %v4641_v50   ;;  %v4636_v28 = vpack.c.bf16 %v3780_v56, %v3779_v26  ;;  %v4074_v6 = vmul.f32 %v3780_v56, %v3780_v56  ;;  %v4035_v33 = vadd.f32 %v4034_v8, %v3780_v56 }
 0x211   : > { %v4104_v44 = vadd.f32 %v4103_v59, %v4073_v62 }
 0x212   : > { %4671 = vst [vmem:[%s6593_s9 + $0x70] sm:$0xff] %v4636_v28   ;;  %v4036_v35 = vadd.f32 %v4035_v33, %v3781_v60 }
 0x213   : > { %v4105_v45 = vadd.f32 %v4104_v44, %v4074_v6 }
 0x214   : > { %v4037_v52 = vadd.f32 %v4036_v35, %v3782_v61 }
 0x215   : > { %v4106_v24 = vadd.f32 %v4105_v45, %v4075_v30 }
 0x216   : > { %v4038_v10 = vrot.slane %v4037_v52, 4 }
 0x217   : > { %v4107_v13 = vadd.f32 %v4106_v24, %v4076_v49 }
 0x218   : > { %v4039_v20 = vadd.f32 %v4038_v10, %v4037_v52 }
 0x219   : > { %v4108_v36 = vrot.slane %v4107_v13, 4 }
 0x21a   : > { %v4040_v37 = vrot.slane %v4039_v20, 2 }
 0x21b   : > { %v4109_v15 = vadd.f32 %v4108_v36, %v4107_v13 }
 0x21c   : > { %v4041_v53 = vadd.f32 %v4040_v37, %v4039_v20 }
 0x21d   : > { %v4110_v43 = vrot.slane %v4109_v15, 2 }
 0x21e   : > { %v4042_v41 = vrot.slane %v4041_v53, 1 }
 0x21f   : > { %v4111_v4 = vadd.f32 %v4110_v43, %v4109_v15 }
 0x220   : > { %v4043_v63 = vadd.f32 %v4042_v41, %v4041_v53 }
 0x221   : > { %v4112_v23 = vrot.slane %v4111_v4, 1 }
 0x222   : > { %4044 = vst [vmem:[%s265_s11] sm:$0x1] %v4043_v63 }
 0x223   : > { %v4113_v12 = vadd.f32 %v4112_v23, %v4111_v4 }
 0x225   : > { %4114 = vst [vmem:[%s268_s14] sm:$0x1] %v4113_v12 }
 0x226 PF: > { %s17_s21 = sadd.s32 1, %s5425_s21  }
 0x227   : > { %p14_p4 = scmp.ge.s32.totalorder %s17_s21, 4  }
 0x229   :  { %16 = sbr.rel (!%p14_p4) target bundleno = 1 (0x1), region = 100 }

</bundles_post_ra>
